<compile_context>
chip_gen: v7x
topology: tpu7x:2x2x1
jax: 0.10.0
libtpu: 0.0.40
codegen_flags: <defaults>
</compile_context>

<pallas_src>
import numpy as np

import jax
import jax.numpy as jnp
from jax import lax
from jax.experimental import pallas as pl
from jax.experimental.pallas import tpu as pltpu


def _round_up(x, m):
    return (x + m - 1) // m * m


_CENTER = 4  # tap index of (kh=1, kw=1) in a 3x3 kernel


# ----------------------------------------------------------------------------
# Trace-time (numpy) construction of the gather matrices used for in-kernel
# im2col.  All of this depends only on static shapes.
# ----------------------------------------------------------------------------
def _conv_gather_mats(n, hin, win, k, stride, pad):
    """Per-tap 0/1 gather matrices for an im2col'd conv.

    Returns (s2d, taps, oh, ow, mo_pad): s2d is float32 of shape
    (len(taps) * mo_pad, n*hin*win); rows [i*mo_pad, i*mo_pad+mo) hold the
    gather matrix of valid tap taps[i] (tap index = kh*k + kw).
    """
    oh = (hin + 2 * pad - k) // stride + 1
    ow = (win + 2 * pad - k) // stride + 1
    mo, mi = n * oh * ow, n * hin * win
    mo_pad = _round_up(mo, 8)
    mats, taps = [], []
    for kh in range(k):
        for kw in range(k):
            s = np.zeros((mo_pad, mi), np.float32)
            valid = False
            for b in range(n):
                for r in range(oh):
                    for c in range(ow):
                        ih = r * stride + kh - pad
                        iw = c * stride + kw - pad
                        if 0 <= ih < hin and 0 <= iw < win:
                            s[(b * oh + r) * ow + c,
                              (b * hin + ih) * win + iw] = 1.0
                            valid = True
            if valid:
                mats.append(s)
                taps.append(kh * k + kw)
    return np.concatenate(mats, axis=0), taps, oh, ow, mo_pad


def _downsample_select(n, hin, win, stride):
    """Row-selection matrix of the 1x1/stride downsample conv (None if identity)."""
    oh = (hin - 1) // stride + 1
    ow = (win - 1) // stride + 1
    mo, mi = n * oh * ow, n * hin * win
    s = np.zeros((mo, mi), np.float32)
    for b in range(n):
        for r in range(oh):
            for c in range(ow):
                s[(b * oh + r) * ow + c,
                  (b * hin + r * stride) * win + c * stride] = 1.0
    if mo == mi and np.array_equal(s, np.eye(mo, dtype=np.float32)):
        return None
    return s


# ----------------------------------------------------------------------------
# Pallas kernels
# ----------------------------------------------------------------------------
def _stem_kernel(p_ref, w_ref, b_ref, o_ref):
    acc = jnp.dot(p_ref[...], w_ref[...], preferred_element_type=jnp.float32)
    o_ref[...] = jnp.maximum(acc + b_ref[...], 0.0).astype(o_ref.dtype)


def _conv_taps(inp, s_ref, w_ref, taps, mo, mo_pad, cin, cout):
    """sum_t (S_t @ inp) @ W[tap t]  — in-kernel im2col as gather matmuls."""
    acc = jnp.zeros((mo, cout), jnp.float32)
    for idx, t in enumerate(taps):
        g = jnp.dot(s_ref[idx * mo_pad:idx * mo_pad + mo, :], inp,
                    preferred_element_type=jnp.float32)
        acc = acc + jnp.dot(g.astype(jnp.bfloat16),
                            w_ref[t * cin:(t + 1) * cin, :],
                            preferred_element_type=jnp.float32)
    return acc


def _make_block_kernel(*, taps1, taps2, mo, mo_pad, cin, cmid, cout,
                       has_down, has_sd):
    """Fused downsample basic block: conv1 -> ReLU -> conv2 -> +shortcut -> ReLU."""

    def kernel(*refs):
        it = iter(refs)
        x_ref = next(it)
        s1_ref = next(it) if taps1 is not None else None
        w1_ref, b1_ref = next(it), next(it)
        s2_ref = next(it) if taps2 is not None else None
        w2_ref, b2_ref = next(it), next(it)
        sd_ref = next(it) if has_sd else None
        wd_ref = next(it) if has_down else None
        bd_ref = next(it) if has_down else None
        o_ref = next(it)

        x = x_ref[...]
        if taps1 is None:                       # 1x1 input -> center tap only
            acc = jnp.dot(x, w1_ref[...], preferred_element_type=jnp.float32)
        else:
            acc = _conv_taps(x, s1_ref, w1_ref, taps1, mo, mo_pad, cin, cmid)
        h = jnp.maximum(acc + b1_ref[...], 0.0).astype(jnp.bfloat16)

        if taps2 is None:
            acc2 = jnp.dot(h, w2_ref[...], preferred_element_type=jnp.float32)
        else:
            acc2 = _conv_taps(h, s2_ref, w2_ref, taps2, mo, mo_pad, cmid, cout)
        acc2 = acc2 + b2_ref[...]

        if has_down:
            xs = x
            if has_sd:
                xs = jnp.dot(sd_ref[...], x,
                             preferred_element_type=jnp.float32).astype(jnp.bfloat16)
            sc = jnp.dot(xs, wd_ref[...],
                         preferred_element_type=jnp.float32) + bd_ref[...]
        else:
            sc = x.astype(jnp.float32)
        o_ref[...] = jnp.maximum(acc2 + sc, 0.0).astype(o_ref.dtype)

    return kernel


def _make_chain_kernel(*, taps, mo, mo_pad, c):
    """One identity basic block per sequential grid step.  The running
    activation lives in the revisited output VMEM block; the next step's
    weights are prefetched by the BlockSpec pipeline."""

    def kernel(*refs):
        if taps is None:
            x_ref, w1_ref, b1_ref, w2_ref, b2_ref, o_ref = refs
            s_ref = None
        else:
            x_ref, s_ref, w1_ref, b1_ref, w2_ref, b2_ref, o_ref = refs
        step = pl.program_id(0)

        @pl.when(step == 0)
        def _():
            o_ref[...] = x_ref[...]

        x = o_ref[...]

        def conv(inp, w_ref):
            if taps is None:                    # 1x1 spatial -> center tap only
                return jnp.dot(inp, w_ref[...],
                               preferred_element_type=jnp.float32)
            return _conv_taps(inp, s_ref, w_ref, taps, mo, mo_pad, c, c)

        h = jnp.maximum(conv(x, w1_ref) + b1_ref[...], 0.0).astype(jnp.bfloat16)
        y = conv(h, w2_ref) + b2_ref[...] + x.astype(jnp.float32)
        o_ref[...] = jnp.maximum(y, 0.0).astype(o_ref.dtype)

    return kernel


# ----------------------------------------------------------------------------
# Wrappers (pallas_call construction)
# ----------------------------------------------------------------------------
def _fused_block(act, n, h, w, blk):
    """One downsample basic block as a single pallas_call."""
    cin = act.shape[1]
    cmid = blk['w1'].shape[1]
    cout = blk['w2'].shape[1]
    stride = blk['stride']
    assert blk['w1'].shape[0] == 9 * cin and blk['w2'].shape[0] == 9 * cmid

    s1np, taps1, oh, ow, mo_pad = _conv_gather_mats(n, h, w, 3, stride, 1)
    s2np, taps2, _, _, _ = _conv_gather_mats(n, oh, ow, 3, 1, 1)
    mo = n * oh * ow
    c1_center = taps1 == [_CENTER]
    c2_center = taps2 == [_CENTER]
    if c1_center:
        assert mo == act.shape[0]
    sdnp = _downsample_select(n, h, w, stride)
    has_sd = sdnp is not None

    args, specs = [], []

    def add(a, spec):
        args.append(a)
        specs.append(spec)

    add(act, pl.BlockSpec(act.shape, lambda i: (0, 0)))
    if c1_center:
        add(blk['w1'], pl.BlockSpec((cin, cmid), lambda i: (_CENTER, 0)))
    else:
        s1 = jnp.asarray(s1np, jnp.bfloat16)
        add(s1, pl.BlockSpec(s1.shape, lambda i: (0, 0)))
        add(blk['w1'], pl.BlockSpec(blk['w1'].shape, lambda i: (0, 0)))
    add(blk['b1'], pl.BlockSpec(blk['b1'].shape, lambda i: (0, 0)))
    if c2_center:
        add(blk['w2'], pl.BlockSpec((cmid, cout), lambda i: (_CENTER, 0)))
    else:
        s2 = jnp.asarray(s2np, jnp.bfloat16)
        add(s2, pl.BlockSpec(s2.shape, lambda i: (0, 0)))
        add(blk['w2'], pl.BlockSpec(blk['w2'].shape, lambda i: (0, 0)))
    add(blk['b2'], pl.BlockSpec(blk['b2'].shape, lambda i: (0, 0)))
    if has_sd:
        sd = jnp.asarray(sdnp, jnp.bfloat16)
        add(sd, pl.BlockSpec(sd.shape, lambda i: (0, 0)))
    add(blk['wd'], pl.BlockSpec(blk['wd'].shape, lambda i: (0, 0)))
    add(blk['bd'], pl.BlockSpec(blk['bd'].shape, lambda i: (0, 0)))

    kernel = _make_block_kernel(
        taps1=None if c1_center else tuple(taps1),
        taps2=None if c2_center else tuple(taps2),
        mo=mo, mo_pad=mo_pad, cin=cin, cmid=cmid, cout=cout,
        has_down=True, has_sd=has_sd)

    out = pl.pallas_call(
        kernel,
        out_shape=jax.ShapeDtypeStruct((mo, cout), jnp.bfloat16),
        grid=(1,),
        in_specs=specs,
        out_specs=pl.BlockSpec((mo, cout), lambda i: (0, 0)),
    )(*args)
    return out, oh, ow


def _chain_blocks(act, n, h, w, tail):
    """Run a stage's identity blocks as one pallas_call with a sequential
    'block index' grid axis (cross-block weight DMA pipelining)."""
    nblk = tail['w1s'].shape[0]
    c = tail['w1s'].shape[2]
    mo = act.shape[0]
    assert tail['w1s'].shape[1] == 9 * c

    snp, taps, oh, ow, mo_pad = _conv_gather_mats(n, h, w, 3, 1, 1)
    assert (oh, ow) == (h, w) and n * oh * ow == mo
    center = taps == [_CENTER]

    args = [act]
    specs = [pl.BlockSpec((mo, c), lambda i: (0, 0))]
    if not center:
        s = jnp.asarray(snp, jnp.bfloat16)
        args.append(s)
        specs.append(pl.BlockSpec(s.shape, lambda i: (0, 0)))
        w_spec = pl.BlockSpec((None, 9 * c, c), lambda i: (i, 0, 0))
    else:
        # only the center tap of the stored 3x3 weights is ever DMA'd
        w_spec = pl.BlockSpec((None, c, c), lambda i: (i, _CENTER, 0))
    b_spec = pl.BlockSpec((None, 1, c), lambda i: (i, 0, 0))
    args += [tail['w1s'], tail['b1s'], tail['w2s'], tail['b2s']]
    specs += [w_spec, b_spec, w_spec, b_spec]

    kernel = _make_chain_kernel(taps=None if center else tuple(taps),
                                mo=mo, mo_pad=mo_pad, c=c)
    return pl.pallas_call(
        kernel,
        out_shape=jax.ShapeDtypeStruct((mo, c), jnp.bfloat16),
        grid=(nblk,),
        in_specs=specs,
        out_specs=pl.BlockSpec((mo, c), lambda i: (0, 0)),
        compiler_params=pltpu.CompilerParams(
            dimension_semantics=("arbitrary",)),
    )(*args)


# ----------------------------------------------------------------------------
# Parameters (pre-padded, pre-cast at init; BN folded as identity)
# ----------------------------------------------------------------------------
def _conv_w(key, k, cin, cout, cin_p, cout_p):
    std = (2.0 / (k * k * cin)) ** 0.5
    wv = jax.random.normal(key, (k, k, cin, cout), jnp.float32) * std
    wp = jnp.zeros((k, k, cin_p, cout_p), jnp.float32)
    wp = wp.at[:, :, :cin, :cout].set(wv)
    return wp.reshape(k * k * cin_p, cout_p).astype(jnp.bfloat16)


def init_params(key, n_actions):
    keys = iter(jax.random.split(key, 64))
    p = {}

    # stem: 7x7/2 conv 4 -> 64; K = 7*7*4 = 196 padded to 256 at init.
    std = (2.0 / (7 * 7 * 4)) ** 0.5
    ws = jax.random.normal(next(keys), (7, 7, 4, 64), jnp.float32) * std
    stem_w = jnp.zeros((256, 128), jnp.float32).at[:196, :64].set(
        ws.reshape(196, 64))
    p['stem_w'] = stem_w.astype(jnp.bfloat16)
    p['stem_b'] = jnp.zeros((1, 128), jnp.float32)

    stages = []
    cfg = [(3, 64, 64), (4, 64, 128), (6, 128, 256), (3, 256, 512)]
    for si, (nblocks, cin, cout) in enumerate(cfg):
        cin_p, cout_p = _round_up(cin, 128), _round_up(cout, 128)
        stage = {}
        ntail = nblocks
        if si > 0:                          # first block of stage downsamples
            stage['block0'] = {
                'w1': _conv_w(next(keys), 3, cin, cout, cin_p, cout_p),
                'b1': jnp.zeros((1, cout_p), jnp.float32),
                'w2': _conv_w(next(keys), 3, cout, cout, cout_p, cout_p),
                'b2': jnp.zeros((1, cout_p), jnp.float32),
                'wd': _conv_w(next(keys), 1, cin, cout, cin_p, cout_p),
                'bd': jnp.zeros((1, cout_p), jnp.float32),
                'stride': 2,
            }
            ntail -= 1
        stage['tail'] = {
            'w1s': jnp.stack([_conv_w(next(keys), 3, cout, cout, cout_p, cout_p)
                              for _ in range(ntail)]),
            'b1s': jnp.zeros((ntail, 1, cout_p), jnp.float32),
            'w2s': jnp.stack([_conv_w(next(keys), 3, cout, cout, cout_p, cout_p)
                              for _ in range(ntail)]),
            'b2s': jnp.zeros((ntail, 1, cout_p), jnp.float32),
        }
        stages.append(stage)
    p['stages'] = stages

    ka, kc = jax.random.split(next(keys))
    p['actor_w'] = jax.random.normal(ka, (512, n_actions), jnp.float32) * 512 ** -0.5
    p['actor_b'] = jnp.zeros((n_actions,), jnp.float32)
    p['critic_w'] = jax.random.normal(kc, (512, 1), jnp.float32) * 512 ** -0.5
    p['critic_b'] = jnp.zeros((1,), jnp.float32)
    return p


# ----------------------------------------------------------------------------
# Forward pass
# ----------------------------------------------------------------------------
def resnet34_features(params, x):
    """x: (N, H, W, 4) bf16 NHWC -> (N, 512) f32 pooled features."""
    n, h, w, cin = x.shape

    # stem: 7x7/2 conv via wrapper im2col + one Pallas matmul.
    oh, ow = (h + 6 - 7) // 2 + 1, (w + 6 - 7) // 2 + 1
    xp = jnp.pad(x, ((0, 0), (3, 3), (3, 3), (0, 0)))
    cols = [xp[:, i:i + 2 * oh:2, j:j + 2 * ow:2, :]
            for i in range(7) for j in range(7)]
    patches = jnp.concatenate(cols, axis=-1).reshape(n * oh * ow, 49 * cin)
    kp, cpo = params['stem_w'].shape
    patches = jnp.pad(patches, ((0, 0), (0, kp - patches.shape[1])))
    y = pl.pallas_call(
        _stem_kernel,
        out_shape=jax.ShapeDtypeStruct((n * oh * ow, cpo), jnp.bfloat16),
        grid=(1,),
        in_specs=[pl.BlockSpec(patches.shape, lambda i: (0, 0)),
                  pl.BlockSpec((kp, cpo), lambda i: (0, 0)),
                  pl.BlockSpec((1, cpo), lambda i: (0, 0))],
        out_specs=pl.BlockSpec((n * oh * ow, cpo), lambda i: (0, 0)),
    )(patches, params['stem_w'], params['stem_b'])

    # 3x3/2 maxpool, pad 1 (XLA).  TODO(synk): fold into the stem epilogue.
    y = y.reshape(n, oh, ow, -1)
    y = lax.reduce_window(y, jnp.array(-jnp.inf, y.dtype), lax.max,
                          (1, 3, 3, 1), (1, 2, 2, 1),
                          [(0, 0), (1, 1), (1, 1), (0, 0)])
    _, h, w, c = y.shape
    act = y.reshape(n * h * w, c)

    # residual stages
    for stage in params['stages']:
        if 'block0' in stage:
            act, h, w = _fused_block(act, n, h, w, stage['block0'])
        act = _chain_blocks(act, n, h, w, stage['tail'])

    # global average pool -> (N, 512) in f32
    feats = act.reshape(n, h * w, act.shape[-1]).astype(jnp.float32).mean(axis=1)
    return feats[:, :512]


def actor_critic_forward(params, x_nchw):
    x = jnp.transpose(x_nchw, (0, 2, 3, 1)).astype(jnp.bfloat16)
    feats = jnp.maximum(resnet34_features(params, x), 0.0)   # F.relu(net(x))
    logits = feats @ params['actor_w'] + params['actor_b']
    value = feats @ params['critic_w'] + params['critic_b']
    return logits, value


if __name__ == "__main__":
    n_actions = 4  # Breakout action space
    key = jax.random.PRNGKey(0)
    pkey, xkey = jax.random.split(key)
    params = init_params(pkey, n_actions)
    x = jax.random.normal(xkey, (2, 4, 16, 16), jnp.float32)   # NCHW, as PyTorch

    fwd = jax.jit(lambda inp: actor_critic_forward(params, inp))
    logits, value = fwd(x)
    jax.block_until_ready((logits, value))

    assert logits.shape == (2, n_actions), logits.shape
    assert value.shape == (2, 1), value.shape
    assert bool(jnp.all(jnp.isfinite(logits))) and bool(jnp.all(jnp.isfinite(value)))
    print("KERNEL_OK")
</pallas_src>

<mosaic_0001>
module attributes {stable_mosaic.version = 11 : i64} {
  func.func @_stem_kernel(%arg0: i32, %arg1: memref<128x256xbf16, #tpu.memory_space<vmem>>, %arg2: memref<256x128xbf16, #tpu.memory_space<vmem>>, %arg3: memref<1x128xf32, #tpu.memory_space<vmem>>, %arg4: memref<128x128xbf16, #tpu.memory_space<vmem>>) attributes {dimension_semantics = [#tpu.dimension_semantics<arbitrary>], iteration_bounds = array<i64: 1>, scalar_prefetch = 0 : i64, scratch_operands = 0 : i64, tpu.core_type = #tpu.core_type<tc>, window_params = [{pipeline_mode = #tpu.pipeline_mode<synchronous>, transform_indices = @transform_0, window_bounds = array<i64: 128, 256>}, {pipeline_mode = #tpu.pipeline_mode<synchronous>, transform_indices = @transform_1, window_bounds = array<i64: 256, 128>}, {pipeline_mode = #tpu.pipeline_mode<synchronous>, transform_indices = @transform_2, window_bounds = array<i64: 1, 128>}, {pipeline_mode = #tpu.pipeline_mode<synchronous>, transform_indices = @transform_3, window_bounds = array<i64: 128, 128>}]} {
    %c0 = arith.constant 0 : index
    %c0_0 = arith.constant 0 : index
    %0 = vector.load %arg1[%c0, %c0_0] : memref<128x256xbf16, #tpu.memory_space<vmem>>, vector<128x256xbf16>
    %c0_1 = arith.constant 0 : index
    %c0_2 = arith.constant 0 : index
    %1 = vector.load %arg2[%c0_1, %c0_2] : memref<256x128xbf16, #tpu.memory_space<vmem>>, vector<256x128xbf16>
    %cst = arith.constant dense<0.000000e+00> : vector<128x128xf32>
    %2 = tpu.matmul %0, %1, %cst {dimension_numbers = #tpu.dot_dimension_numbers<[1], [0], [0], [1], [0, 0, 1, 1], [], []>} : vector<128x256xbf16>, vector<256x128xbf16>, vector<128x128xf32> -> vector<128x128xf32>
    %c0_3 = arith.constant 0 : index
    %c0_4 = arith.constant 0 : index
    %3 = vector.load %arg3[%c0_3, %c0_4] : memref<1x128xf32, #tpu.memory_space<vmem>>, vector<1x128xf32>
    %4 = vector.broadcast %3 : vector<1x128xf32> to vector<128x128xf32>
    %5 = arith.addf %2, %4 : vector<128x128xf32>
    %cst_5 = arith.constant 0.000000e+00 : f32
    %6 = vector.broadcast %cst_5 : f32 to vector<128x128xf32>
    %7 = arith.maximumf %5, %6 : vector<128x128xf32>
    %8 = arith.truncf %7 : vector<128x128xf32> to vector<128x128xbf16>
    %c0_6 = arith.constant 0 : index
    %c0_7 = arith.constant 0 : index
    %9 = vector.load %arg4[%c0_6, %c0_7] : memref<128x128xbf16, #tpu.memory_space<vmem>>, vector<128x128xbf16>
    tpu.vector_store %arg4[%c0_6, %c0_7], %8 {strides = array<i32>} : memref<128x128xbf16, #tpu.memory_space<vmem>>, vector<128x128xbf16>,
    return
  }
  func.func @transform_0(%arg0: i32) -> (i32, i32) {
    %c0_i32 = arith.constant 0 : i32
    %c0_i32_0 = arith.constant 0 : i32
    %c0_i32_1 = arith.constant 0 : i32
    return %c0_i32, %c0_i32_0 : i32, i32
  }
  func.func @transform_1(%arg0: i32) -> (i32, i32) {
    %c0_i32 = arith.constant 0 : i32
    %c0_i32_0 = arith.constant 0 : i32
    %c0_i32_1 = arith.constant 0 : i32
    return %c0_i32, %c0_i32_0 : i32, i32
  }
  func.func @transform_2(%arg0: i32) -> (i32, i32) {
    %c0_i32 = arith.constant 0 : i32
    %c0_i32_0 = arith.constant 0 : i32
    %c0_i32_1 = arith.constant 0 : i32
    return %c0_i32, %c0_i32_0 : i32, i32
  }
  func.func @transform_3(%arg0: i32) -> (i32, i32) {
    %c0_i32 = arith.constant 0 : i32
    %c0_i32_0 = arith.constant 0 : i32
    %c0_i32_1 = arith.constant 0 : i32
    return %c0_i32, %c0_i32_0 : i32, i32
  }
}

module attributes {stable_mosaic.version = 11 : i64} {
  func.func @kernel(%arg0: i32, %arg1: memref<32x128xbf16, #tpu.memory_space<vmem>>, %arg2: memref<288x32xbf16, #tpu.memory_space<vmem>>, %arg3: memref<1x1152x128xbf16, #tpu.memory_space<vmem>>, %arg4: memref<1x1x128xf32, #tpu.memory_space<vmem>>, %arg5: memref<1x1152x128xbf16, #tpu.memory_space<vmem>>, %arg6: memref<1x1x128xf32, #tpu.memory_space<vmem>>, %arg7: memref<32x128xbf16, #tpu.memory_space<vmem>>) attributes {dimension_semantics = [#tpu.dimension_semantics<arbitrary>], iteration_bounds = array<i64: 3>, scalar_prefetch = 0 : i64, scratch_operands = 0 : i64, tpu.core_type = #tpu.core_type<tc>, window_params = [{pipeline_mode = #tpu.pipeline_mode<synchronous>, transform_indices = @transform_0, window_bounds = array<i64: 32, 128>}, {pipeline_mode = #tpu.pipeline_mode<synchronous>, transform_indices = @transform_1, window_bounds = array<i64: 288, 32>}, {transform_indices = @transform_2, window_bounds = array<i64: 1, 1152, 128>}, {transform_indices = @transform_3, window_bounds = array<i64: 1, 1, 128>}, {transform_indices = @transform_4, window_bounds = array<i64: 1, 1152, 128>}, {transform_indices = @transform_5, window_bounds = array<i64: 1, 1, 128>}, {pipeline_mode = #tpu.pipeline_mode<synchronous>, transform_indices = @transform_6, window_bounds = array<i64: 32, 128>}]} {
    %c0_i32 = arith.constant 0 : i32
    %0 = arith.cmpi eq, %arg0, %c0_i32 : i32
    %1 = arith.extui %0 : i1 to i32
    %c0_i32_0 = arith.constant 0 : i32
    %2 = arith.cmpi ne, %1, %c0_i32_0 : i32
    scf.if %2 {
      %c0_125 = arith.constant 0 : index
      %c0_126 = arith.constant 0 : index
      %149 = vector.load %arg1[%c0_125, %c0_126] : memref<32x128xbf16, #tpu.memory_space<vmem>>, vector<32x128xbf16>
      %c0_127 = arith.constant 0 : index
      %c0_128 = arith.constant 0 : index
      %150 = vector.load %arg7[%c0_127, %c0_128] : memref<32x128xbf16, #tpu.memory_space<vmem>>, vector<32x128xbf16>
      tpu.vector_store %arg7[%c0_127, %c0_128], %149 {strides = array<i32>} : memref<32x128xbf16, #tpu.memory_space<vmem>>, vector<32x128xbf16>,
    } else {
    }
    %c0 = arith.constant 0 : index
    %c0_1 = arith.constant 0 : index
    %3 = vector.load %arg7[%c0, %c0_1] : memref<32x128xbf16, #tpu.memory_space<vmem>>, vector<32x128xbf16>
    %cst = arith.constant 0.000000e+00 : f32
    %4 = vector.broadcast %cst : f32 to vector<32x128xf32>
    %c0_2 = arith.constant 0 : index
    %c0_3 = arith.constant 0 : index
    %5 = vector.load %arg2[%c0_2, %c0_3] : memref<288x32xbf16, #tpu.memory_space<vmem>>, vector<32x32xbf16>
    %cst_4 = arith.constant dense<0.000000e+00> : vector<32x128xf32>
    %6 = tpu.matmul %5, %3, %cst_4 {dimension_numbers = #tpu.dot_dimension_numbers<[1], [0], [0], [1], [0, 0, 1, 1], [], []>} : vector<32x32xbf16>, vector<32x128xbf16>, vector<32x128xf32> -> vector<32x128xf32>
    %7 = arith.truncf %6 : vector<32x128xf32> to vector<32x128xbf16>
    %c0_5 = arith.constant 0 : index
    %c0_6 = arith.constant 0 : index
    %c0_7 = arith.constant 0 : index
    %8 = vector.load %arg3[%c0_5, %c0_6, %c0_7] : memref<1x1152x128xbf16, #tpu.memory_space<vmem>>, vector<1x128x128xbf16>
    %9 = vector.shape_cast %8 : vector<1x128x128xbf16> to vector<128x128xbf16>
    %cst_8 = arith.constant dense<0.000000e+00> : vector<32x128xf32>
    %10 = tpu.matmul %7, %9, %cst_8 {dimension_numbers = #tpu.dot_dimension_numbers<[1], [0], [0], [1], [0, 0, 1, 1], [], []>} : vector<32x128xbf16>, vector<128x128xbf16>, vector<32x128xf32> -> vector<32x128xf32>
    %11 = arith.addf %4, %10 : vector<32x128xf32>
    %c32 = arith.constant 32 : index
    %c0_9 = arith.constant 0 : index
    %12 = vector.load %arg2[%c32, %c0_9] : memref<288x32xbf16, #tpu.memory_space<vmem>>, vector<32x32xbf16>
    %cst_10 = arith.constant dense<0.000000e+00> : vector<32x128xf32>
    %13 = tpu.matmul %12, %3, %cst_10 {dimension_numbers = #tpu.dot_dimension_numbers<[1], [0], [0], [1], [0, 0, 1, 1], [], []>} : vector<32x32xbf16>, vector<32x128xbf16>, vector<32x128xf32> -> vector<32x128xf32>
    %14 = arith.truncf %13 : vector<32x128xf32> to vector<32x128xbf16>
    %c0_11 = arith.constant 0 : index
    %c128 = arith.constant 128 : index
    %c0_12 = arith.constant 0 : index
    %15 = vector.load %arg3[%c0_11, %c128, %c0_12] : memref<1x1152x128xbf16, #tpu.memory_space<vmem>>, vector<1x128x128xbf16>
    %16 = vector.shape_cast %15 : vector<1x128x128xbf16> to vector<128x128xbf16>
    %cst_13 = arith.constant dense<0.000000e+00> : vector<32x128xf32>
    %17 = tpu.matmul %14, %16, %cst_13 {dimension_numbers = #tpu.dot_dimension_numbers<[1], [0], [0], [1], [0, 0, 1, 1], [], []>} : vector<32x128xbf16>, vector<128x128xbf16>, vector<32x128xf32> -> vector<32x128xf32>
    %18 = arith.addf %11, %17 : vector<32x128xf32>
    %c64 = arith.constant 64 : index
    %c0_14 = arith.constant 0 : index
    %19 = vector.load %arg2[%c64, %c0_14] : memref<288x32xbf16, #tpu.memory_space<vmem>>, vector<32x32xbf16>
    %cst_15 = arith.constant dense<0.000000e+00> : vector<32x128xf32>
    %20 = tpu.matmul %19, %3, %cst_15 {dimension_numbers = #tpu.dot_dimension_numbers<[1], [0], [0], [1], [0, 0, 1, 1], [], []>} : vector<32x32xbf16>, vector<32x128xbf16>, vector<32x128xf32> -> vector<32x128xf32>
    %21 = arith.truncf %20 : vector<32x128xf32> to vector<32x128xbf16>
    %c0_16 = arith.constant 0 : index
    %c256 = arith.constant 256 : index
    %c0_17 = arith.constant 0 : index
    %22 = vector.load %arg3[%c0_16, %c256, %c0_17] : memref<1x1152x128xbf16, #tpu.memory_space<vmem>>, vector<1x128x128xbf16>
    %23 = vector.shape_cast %22 : vector<1x128x128xbf16> to vector<128x128xbf16>
    %cst_18 = arith.constant dense<0.000000e+00> : vector<32x128xf32>
    %24 = tpu.matmul %21, %23, %cst_18 {dimension_numbers = #tpu.dot_dimension_numbers<[1], [0], [0], [1], [0, 0, 1, 1], [], []>} : vector<32x128xbf16>, vector<128x128xbf16>, vector<32x128xf32> -> vector<32x128xf32>
    %25 = arith.addf %18, %24 : vector<32x128xf32>
    %c96 = arith.constant 96 : index
    %c0_19 = arith.constant 0 : index
    %26 = vector.load %arg2[%c96, %c0_19] : memref<288x32xbf16, #tpu.memory_space<vmem>>, vector<32x32xbf16>
    %cst_20 = arith.constant dense<0.000000e+00> : vector<32x128xf32>
    %27 = tpu.matmul %26, %3, %cst_20 {dimension_numbers = #tpu.dot_dimension_numbers<[1], [0], [0], [1], [0, 0, 1, 1], [], []>} : vector<32x32xbf16>, vector<32x128xbf16>, vector<32x128xf32> -> vector<32x128xf32>
    %28 = arith.truncf %27 : vector<32x128xf32> to vector<32x128xbf16>
    %c0_21 = arith.constant 0 : index
    %c384 = arith.constant 384 : index
    %c0_22 = arith.constant 0 : index
    %29 = vector.load %arg3[%c0_21, %c384, %c0_22] : memref<1x1152x128xbf16, #tpu.memory_space<vmem>>, vector<1x128x128xbf16>
    %30 = vector.shape_cast %29 : vector<1x128x128xbf16> to vector<128x128xbf16>
    %cst_23 = arith.constant dense<0.000000e+00> : vector<32x128xf32>
    %31 = tpu.matmul %28, %30, %cst_23 {dimension_numbers = #tpu.dot_dimension_numbers<[1], [0], [0], [1], [0, 0, 1, 1], [], []>} : vector<32x128xbf16>, vector<128x128xbf16>, vector<32x128xf32> -> vector<32x128xf32>
    %32 = arith.addf %25, %31 : vector<32x128xf32>
    %c128_24 = arith.constant 128 : index
    %c0_25 = arith.constant 0 : index
    %33 = vector.load %arg2[%c128_24, %c0_25] : memref<288x32xbf16, #tpu.memory_space<vmem>>, vector<32x32xbf16>
    %cst_26 = arith.constant dense<0.000000e+00> : vector<32x128xf32>
    %34 = tpu.matmul %33, %3, %cst_26 {dimension_numbers = #tpu.dot_dimension_numbers<[1], [0], [0], [1], [0, 0, 1, 1], [], []>} : vector<32x32xbf16>, vector<32x128xbf16>, vector<32x128xf32> -> vector<32x128xf32>
    %35 = arith.truncf %34 : vector<32x128xf32> to vector<32x128xbf16>
    %c0_27 = arith.constant 0 : index
    %c512 = arith.constant 512 : index
    %c0_28 = arith.constant 0 : index
    %36 = vector.load %arg3[%c0_27, %c512, %c0_28] : memref<1x1152x128xbf16, #tpu.memory_space<vmem>>, vector<1x128x128xbf16>
    %37 = vector.shape_cast %36 : vector<1x128x128xbf16> to vector<128x128xbf16>
    %cst_29 = arith.constant dense<0.000000e+00> : vector<32x128xf32>
    %38 = tpu.matmul %35, %37, %cst_29 {dimension_numbers = #tpu.dot_dimension_numbers<[1], [0], [0], [1], [0, 0, 1, 1], [], []>} : vector<32x128xbf16>, vector<128x128xbf16>, vector<32x128xf32> -> vector<32x128xf32>
    %39 = arith.addf %32, %38 : vector<32x128xf32>
    %c160 = arith.constant 160 : index
    %c0_30 = arith.constant 0 : index
    %40 = vector.load %arg2[%c160, %c0_30] : memref<288x32xbf16, #tpu.memory_space<vmem>>, vector<32x32xbf16>
    %cst_31 = arith.constant dense<0.000000e+00> : vector<32x128xf32>
    %41 = tpu.matmul %40, %3, %cst_31 {dimension_numbers = #tpu.dot_dimension_numbers<[1], [0], [0], [1], [0, 0, 1, 1], [], []>} : vector<32x32xbf16>, vector<32x128xbf16>, vector<32x128xf32> -> vector<32x128xf32>
    %42 = arith.truncf %41 : vector<32x128xf32> to vector<32x128xbf16>
    %c0_32 = arith.constant 0 : index
    %c640 = arith.constant 640 : index
    %c0_33 = arith.constant 0 : index
    %43 = vector.load %arg3[%c0_32, %c640, %c0_33] : memref<1x1152x128xbf16, #tpu.memory_space<vmem>>, vector<1x128x128xbf16>
    %44 = vector.shape_cast %43 : vector<1x128x128xbf16> to vector<128x128xbf16>
    %cst_34 = arith.constant dense<0.000000e+00> : vector<32x128xf32>
    %45 = tpu.matmul %42, %44, %cst_34 {dimension_numbers = #tpu.dot_dimension_numbers<[1], [0], [0], [1], [0, 0, 1, 1], [], []>} : vector<32x128xbf16>, vector<128x128xbf16>, vector<32x128xf32> -> vector<32x128xf32>
    %46 = arith.addf %39, %45 : vector<32x128xf32>
    %c192 = arith.constant 192 : index
    %c0_35 = arith.constant 0 : index
    %47 = vector.load %arg2[%c192, %c0_35] : memref<288x32xbf16, #tpu.memory_space<vmem>>, vector<32x32xbf16>
    %cst_36 = arith.constant dense<0.000000e+00> : vector<32x128xf32>
    %48 = tpu.matmul %47, %3, %cst_36 {dimension_numbers = #tpu.dot_dimension_numbers<[1], [0], [0], [1], [0, 0, 1, 1], [], []>} : vector<32x32xbf16>, vector<32x128xbf16>, vector<32x128xf32> -> vector<32x128xf32>
    %49 = arith.truncf %48 : vector<32x128xf32> to vector<32x128xbf16>
    %c0_37 = arith.constant 0 : index
    %c768 = arith.constant 768 : index
    %c0_38 = arith.constant 0 : index
    %50 = vector.load %arg3[%c0_37, %c768, %c0_38] : memref<1x1152x128xbf16, #tpu.memory_space<vmem>>, vector<1x128x128xbf16>
    %51 = vector.shape_cast %50 : vector<1x128x128xbf16> to vector<128x128xbf16>
    %cst_39 = arith.constant dense<0.000000e+00> : vector<32x128xf32>
    %52 = tpu.matmul %49, %51, %cst_39 {dimension_numbers = #tpu.dot_dimension_numbers<[1], [0], [0], [1], [0, 0, 1, 1], [], []>} : vector<32x128xbf16>, vector<128x128xbf16>, vector<32x128xf32> -> vector<32x128xf32>
    %53 = arith.addf %46, %52 : vector<32x128xf32>
    %c224 = arith.constant 224 : index
    %c0_40 = arith.constant 0 : index
    %54 = vector.load %arg2[%c224, %c0_40] : memref<288x32xbf16, #tpu.memory_space<vmem>>, vector<32x32xbf16>
    %cst_41 = arith.constant dense<0.000000e+00> : vector<32x128xf32>
    %55 = tpu.matmul %54, %3, %cst_41 {dimension_numbers = #tpu.dot_dimension_numbers<[1], [0], [0], [1], [0, 0, 1, 1], [], []>} : vector<32x32xbf16>, vector<32x128xbf16>, vector<32x128xf32> -> vector<32x128xf32>
    %56 = arith.truncf %55 : vector<32x128xf32> to vector<32x128xbf16>
    %c0_42 = arith.constant 0 : index
    %c896 = arith.constant 896 : index
    %c0_43 = arith.constant 0 : index
    %57 = vector.load %arg3[%c0_42, %c896, %c0_43] : memref<1x1152x128xbf16, #tpu.memory_space<vmem>>, vector<1x128x128xbf16>
    %58 = vector.shape_cast %57 : vector<1x128x128xbf16> to vector<128x128xbf16>
    %cst_44 = arith.constant dense<0.000000e+00> : vector<32x128xf32>
    %59 = tpu.matmul %56, %58, %cst_44 {dimension_numbers = #tpu.dot_dimension_numbers<[1], [0], [0], [1], [0, 0, 1, 1], [], []>} : vector<32x128xbf16>, vector<128x128xbf16>, vector<32x128xf32> -> vector<32x128xf32>
    %60 = arith.addf %53, %59 : vector<32x128xf32>
    %c256_45 = arith.constant 256 : index
    %c0_46 = arith.constant 0 : index
    %61 = vector.load %arg2[%c256_45, %c0_46] : memref<288x32xbf16, #tpu.memory_space<vmem>>, vector<32x32xbf16>
    %cst_47 = arith.constant dense<0.000000e+00> : vector<32x128xf32>
    %62 = tpu.matmul %61, %3, %cst_47 {dimension_numbers = #tpu.dot_dimension_numbers<[1], [0], [0], [1], [0, 0, 1, 1], [], []>} : vector<32x32xbf16>, vector<32x128xbf16>, vector<32x128xf32> -> vector<32x128xf32>
    %63 = arith.truncf %62 : vector<32x128xf32> to vector<32x128xbf16>
    %c0_48 = arith.constant 0 : index
    %c1024 = arith.constant 1024 : index
    %c0_49 = arith.constant 0 : index
    %64 = vector.load %arg3[%c0_48, %c1024, %c0_49] : memref<1x1152x128xbf16, #tpu.memory_space<vmem>>, vector<1x128x128xbf16>
    %65 = vector.shape_cast %64 : vector<1x128x128xbf16> to vector<128x128xbf16>
    %cst_50 = arith.constant dense<0.000000e+00> : vector<32x128xf32>
    %66 = tpu.matmul %63, %65, %cst_50 {dimension_numbers = #tpu.dot_dimension_numbers<[1], [0], [0], [1], [0, 0, 1, 1], [], []>} : vector<32x128xbf16>, vector<128x128xbf16>, vector<32x128xf32> -> vector<32x128xf32>
    %67 = arith.addf %60, %66 : vector<32x128xf32>
    %c0_51 = arith.constant 0 : index
    %c0_52 = arith.constant 0 : index
    %c0_53 = arith.constant 0 : index
    %68 = vector.load %arg4[%c0_51, %c0_52, %c0_53] : memref<1x1x128xf32, #tpu.memory_space<vmem>>, vector<1x1x128xf32>
    %69 = vector.shape_cast %68 : vector<1x1x128xf32> to vector<1x128xf32>
    %70 = vector.broadcast %69 : vector<1x128xf32> to vector<32x128xf32>
    %71 = arith.addf %67, %70 : vector<32x128xf32>
    %cst_54 = arith.constant 0.000000e+00 : f32
    %72 = vector.broadcast %cst_54 : f32 to vector<32x128xf32>
    %73 = arith.maximumf %71, %72 : vector<32x128xf32>
    %74 = arith.truncf %73 : vector<32x128xf32> to vector<32x128xbf16>
    %cst_55 = arith.constant 0.000000e+00 : f32
    %75 = vector.broadcast %cst_55 : f32 to vector<32x128xf32>
    %c0_56 = arith.constant 0 : index
    %c0_57 = arith.constant 0 : index
    %76 = vector.load %arg2[%c0_56, %c0_57] : memref<288x32xbf16, #tpu.memory_space<vmem>>, vector<32x32xbf16>
    %cst_58 = arith.constant dense<0.000000e+00> : vector<32x128xf32>
    %77 = tpu.matmul %76, %74, %cst_58 {dimension_numbers = #tpu.dot_dimension_numbers<[1], [0], [0], [1], [0, 0, 1, 1], [], []>} : vector<32x32xbf16>, vector<32x128xbf16>, vector<32x128xf32> -> vector<32x128xf32>
    %78 = arith.truncf %77 : vector<32x128xf32> to vector<32x128xbf16>
    %c0_59 = arith.constant 0 : index
    %c0_60 = arith.constant 0 : index
    %c0_61 = arith.constant 0 : index
    %79 = vector.load %arg5[%c0_59, %c0_60, %c0_61] : memref<1x1152x128xbf16, #tpu.memory_space<vmem>>, vector<1x128x128xbf16>
    %80 = vector.shape_cast %79 : vector<1x128x128xbf16> to vector<128x128xbf16>
    %cst_62 = arith.constant dense<0.000000e+00> : vector<32x128xf32>
    %81 = tpu.matmul %78, %80, %cst_62 {dimension_numbers = #tpu.dot_dimension_numbers<[1], [0], [0], [1], [0, 0, 1, 1], [], []>} : vector<32x128xbf16>, vector<128x128xbf16>, vector<32x128xf32> -> vector<32x128xf32>
    %82 = arith.addf %75, %81 : vector<32x128xf32>
    %c32_63 = arith.constant 32 : index
    %c0_64 = arith.constant 0 : index
    %83 = vector.load %arg2[%c32_63, %c0_64] : memref<288x32xbf16, #tpu.memory_space<vmem>>, vector<32x32xbf16>
    %cst_65 = arith.constant dense<0.000000e+00> : vector<32x128xf32>
    %84 = tpu.matmul %83, %74, %cst_65 {dimension_numbers = #tpu.dot_dimension_numbers<[1], [0], [0], [1], [0, 0, 1, 1], [], []>} : vector<32x32xbf16>, vector<32x128xbf16>, vector<32x128xf32> -> vector<32x128xf32>
    %85 = arith.truncf %84 : vector<32x128xf32> to vector<32x128xbf16>
    %c0_66 = arith.constant 0 : index
    %c128_67 = arith.constant 128 : index
    %c0_68 = arith.constant 0 : index
    %86 = vector.load %arg5[%c0_66, %c128_67, %c0_68] : memref<1x1152x128xbf16, #tpu.memory_space<vmem>>, vector<1x128x128xbf16>
    %87 = vector.shape_cast %86 : vector<1x128x128xbf16> to vector<128x128xbf16>
    %cst_69 = arith.constant dense<0.000000e+00> : vector<32x128xf32>
    %88 = tpu.matmul %85, %87, %cst_69 {dimension_numbers = #tpu.dot_dimension_numbers<[1], [0], [0], [1], [0, 0, 1, 1], [], []>} : vector<32x128xbf16>, vector<128x128xbf16>, vector<32x128xf32> -> vector<32x128xf32>
    %89 = arith.addf %82, %88 : vector<32x128xf32>
    %c64_70 = arith.constant 64 : index
    %c0_71 = arith.constant 0 : index
    %90 = vector.load %arg2[%c64_70, %c0_71] : memref<288x32xbf16, #tpu.memory_space<vmem>>, vector<32x32xbf16>
    %cst_72 = arith.constant dense<0.000000e+00> : vector<32x128xf32>
    %91 = tpu.matmul %90, %74, %cst_72 {dimension_numbers = #tpu.dot_dimension_numbers<[1], [0], [0], [1], [0, 0, 1, 1], [], []>} : vector<32x32xbf16>, vector<32x128xbf16>, vector<32x128xf32> -> vector<32x128xf32>
    %92 = arith.truncf %91 : vector<32x128xf32> to vector<32x128xbf16>
    %c0_73 = arith.constant 0 : index
    %c256_74 = arith.constant 256 : index
    %c0_75 = arith.constant 0 : index
    %93 = vector.load %arg5[%c0_73, %c256_74, %c0_75] : memref<1x1152x128xbf16, #tpu.memory_space<vmem>>, vector<1x128x128xbf16>
    %94 = vector.shape_cast %93 : vector<1x128x128xbf16> to vector<128x128xbf16>
    %cst_76 = arith.constant dense<0.000000e+00> : vector<32x128xf32>
    %95 = tpu.matmul %92, %94, %cst_76 {dimension_numbers = #tpu.dot_dimension_numbers<[1], [0], [0], [1], [0, 0, 1, 1], [], []>} : vector<32x128xbf16>, vector<128x128xbf16>, vector<32x128xf32> -> vector<32x128xf32>
    %96 = arith.addf %89, %95 : vector<32x128xf32>
    %c96_77 = arith.constant 96 : index
    %c0_78 = arith.constant 0 : index
    %97 = vector.load %arg2[%c96_77, %c0_78] : memref<288x32xbf16, #tpu.memory_space<vmem>>, vector<32x32xbf16>
    %cst_79 = arith.constant dense<0.000000e+00> : vector<32x128xf32>
    %98 = tpu.matmul %97, %74, %cst_79 {dimension_numbers = #tpu.dot_dimension_numbers<[1], [0], [0], [1], [0, 0, 1, 1], [], []>} : vector<32x32xbf16>, vector<32x128xbf16>, vector<32x128xf32> -> vector<32x128xf32>
    %99 = arith.truncf %98 : vector<32x128xf32> to vector<32x128xbf16>
    %c0_80 = arith.constant 0 : index
    %c384_81 = arith.constant 384 : index
    %c0_82 = arith.constant 0 : index
    %100 = vector.load %arg5[%c0_80, %c384_81, %c0_82] : memref<1x1152x128xbf16, #tpu.memory_space<vmem>>, vector<1x128x128xbf16>
    %101 = vector.shape_cast %100 : vector<1x128x128xbf16> to vector<128x128xbf16>
    %cst_83 = arith.constant dense<0.000000e+00> : vector<32x128xf32>
    %102 = tpu.matmul %99, %101, %cst_83 {dimension_numbers = #tpu.dot_dimension_numbers<[1], [0], [0], [1], [0, 0, 1, 1], [], []>} : vector<32x128xbf16>, vector<128x128xbf16>, vector<32x128xf32> -> vector<32x128xf32>
    %103 = arith.addf %96, %102 : vector<32x128xf32>
    %c128_84 = arith.constant 128 : index
    %c0_85 = arith.constant 0 : index
    %104 = vector.load %arg2[%c128_84, %c0_85] : memref<288x32xbf16, #tpu.memory_space<vmem>>, vector<32x32xbf16>
    %cst_86 = arith.constant dense<0.000000e+00> : vector<32x128xf32>
    %105 = tpu.matmul %104, %74, %cst_86 {dimension_numbers = #tpu.dot_dimension_numbers<[1], [0], [0], [1], [0, 0, 1, 1], [], []>} : vector<32x32xbf16>, vector<32x128xbf16>, vector<32x128xf32> -> vector<32x128xf32>
    %106 = arith.truncf %105 : vector<32x128xf32> to vector<32x128xbf16>
    %c0_87 = arith.constant 0 : index
    %c512_88 = arith.constant 512 : index
    %c0_89 = arith.constant 0 : index
    %107 = vector.load %arg5[%c0_87, %c512_88, %c0_89] : memref<1x1152x128xbf16, #tpu.memory_space<vmem>>, vector<1x128x128xbf16>
    %108 = vector.shape_cast %107 : vector<1x128x128xbf16> to vector<128x128xbf16>
    %cst_90 = arith.constant dense<0.000000e+00> : vector<32x128xf32>
    %109 = tpu.matmul %106, %108, %cst_90 {dimension_numbers = #tpu.dot_dimension_numbers<[1], [0], [0], [1], [0, 0, 1, 1], [], []>} : vector<32x128xbf16>, vector<128x128xbf16>, vector<32x128xf32> -> vector<32x128xf32>
    %110 = arith.addf %103, %109 : vector<32x128xf32>
    %c160_91 = arith.constant 160 : index
    %c0_92 = arith.constant 0 : index
    %111 = vector.load %arg2[%c160_91, %c0_92] : memref<288x32xbf16, #tpu.memory_space<vmem>>, vector<32x32xbf16>
    %cst_93 = arith.constant dense<0.000000e+00> : vector<32x128xf32>
    %112 = tpu.matmul %111, %74, %cst_93 {dimension_numbers = #tpu.dot_dimension_numbers<[1], [0], [0], [1], [0, 0, 1, 1], [], []>} : vector<32x32xbf16>, vector<32x128xbf16>, vector<32x128xf32> -> vector<32x128xf32>
    %113 = arith.truncf %112 : vector<32x128xf32> to vector<32x128xbf16>
    %c0_94 = arith.constant 0 : index
    %c640_95 = arith.constant 640 : index
    %c0_96 = arith.constant 0 : index
    %114 = vector.load %arg5[%c0_94, %c640_95, %c0_96] : memref<1x1152x128xbf16, #tpu.memory_space<vmem>>, vector<1x128x128xbf16>
    %115 = vector.shape_cast %114 : vector<1x128x128xbf16> to vector<128x128xbf16>
    %cst_97 = arith.constant dense<0.000000e+00> : vector<32x128xf32>
    %116 = tpu.matmul %113, %115, %cst_97 {dimension_numbers = #tpu.dot_dimension_numbers<[1], [0], [0], [1], [0, 0, 1, 1], [], []>} : vector<32x128xbf16>, vector<128x128xbf16>, vector<32x128xf32> -> vector<32x128xf32>
    %117 = arith.addf %110, %116 : vector<32x128xf32>
    %c192_98 = arith.constant 192 : index
    %c0_99 = arith.constant 0 : index
    %118 = vector.load %arg2[%c192_98, %c0_99] : memref<288x32xbf16, #tpu.memory_space<vmem>>, vector<32x32xbf16>
    %cst_100 = arith.constant dense<0.000000e+00> : vector<32x128xf32>
    %119 = tpu.matmul %118, %74, %cst_100 {dimension_numbers = #tpu.dot_dimension_numbers<[1], [0], [0], [1], [0, 0, 1, 1], [], []>} : vector<32x32xbf16>, vector<32x128xbf16>, vector<32x128xf32> -> vector<32x128xf32>
    %120 = arith.truncf %119 : vector<32x128xf32> to vector<32x128xbf16>
    %c0_101 = arith.constant 0 : index
    %c768_102 = arith.constant 768 : index
    %c0_103 = arith.constant 0 : index
    %121 = vector.load %arg5[%c0_101, %c768_102, %c0_103] : memref<1x1152x128xbf16, #tpu.memory_space<vmem>>, vector<1x128x128xbf16>
    %122 = vector.shape_cast %121 : vector<1x128x128xbf16> to vector<128x128xbf16>
    %cst_104 = arith.constant dense<0.000000e+00> : vector<32x128xf32>
    %123 = tpu.matmul %120, %122, %cst_104 {dimension_numbers = #tpu.dot_dimension_numbers<[1], [0], [0], [1], [0, 0, 1, 1], [], []>} : vector<32x128xbf16>, vector<128x128xbf16>, vector<32x128xf32> -> vector<32x128xf32>
    %124 = arith.addf %117, %123 : vector<32x128xf32>
    %c224_105 = arith.constant 224 : index
    %c0_106 = arith.constant 0 : index
    %125 = vector.load %arg2[%c224_105, %c0_106] : memref<288x32xbf16, #tpu.memory_space<vmem>>, vector<32x32xbf16>
    %cst_107 = arith.constant dense<0.000000e+00> : vector<32x128xf32>
    %126 = tpu.matmul %125, %74, %cst_107 {dimension_numbers = #tpu.dot_dimension_numbers<[1], [0], [0], [1], [0, 0, 1, 1], [], []>} : vector<32x32xbf16>, vector<32x128xbf16>, vector<32x128xf32> -> vector<32x128xf32>
    %127 = arith.truncf %126 : vector<32x128xf32> to vector<32x128xbf16>
    %c0_108 = arith.constant 0 : index
    %c896_109 = arith.constant 896 : index
    %c0_110 = arith.constant 0 : index
    %128 = vector.load %arg5[%c0_108, %c896_109, %c0_110] : memref<1x1152x128xbf16, #tpu.memory_space<vmem>>, vector<1x128x128xbf16>
    %129 = vector.shape_cast %128 : vector<1x128x128xbf16> to vector<128x128xbf16>
    %cst_111 = arith.constant dense<0.000000e+00> : vector<32x128xf32>
    %130 = tpu.matmul %127, %129, %cst_111 {dimension_numbers = #tpu.dot_dimension_numbers<[1], [0], [0], [1], [0, 0, 1, 1], [], []>} : vector<32x128xbf16>, vector<128x128xbf16>, vector<32x128xf32> -> vector<32x128xf32>
    %131 = arith.addf %124, %130 : vector<32x128xf32>
    %c256_112 = arith.constant 256 : index
    %c0_113 = arith.constant 0 : index
    %132 = vector.load %arg2[%c256_112, %c0_113] : memref<288x32xbf16, #tpu.memory_space<vmem>>, vector<32x32xbf16>
    %cst_114 = arith.constant dense<0.000000e+00> : vector<32x128xf32>
    %133 = tpu.matmul %132, %74, %cst_114 {dimension_numbers = #tpu.dot_dimension_numbers<[1], [0], [0], [1], [0, 0, 1, 1], [], []>} : vector<32x32xbf16>, vector<32x128xbf16>, vector<32x128xf32> -> vector<32x128xf32>
    %134 = arith.truncf %133 : vector<32x128xf32> to vector<32x128xbf16>
    %c0_115 = arith.constant 0 : index
    %c1024_116 = arith.constant 1024 : index
    %c0_117 = arith.constant 0 : index
    %135 = vector.load %arg5[%c0_115, %c1024_116, %c0_117] : memref<1x1152x128xbf16, #tpu.memory_space<vmem>>, vector<1x128x128xbf16>
    %136 = vector.shape_cast %135 : vector<1x128x128xbf16> to vector<128x128xbf16>
    %cst_118 = arith.constant dense<0.000000e+00> : vector<32x128xf32>
    %137 = tpu.matmul %134, %136, %cst_118 {dimension_numbers = #tpu.dot_dimension_numbers<[1], [0], [0], [1], [0, 0, 1, 1], [], []>} : vector<32x128xbf16>, vector<128x128xbf16>, vector<32x128xf32> -> vector<32x128xf32>
    %138 = arith.addf %131, %137 : vector<32x128xf32>
    %c0_119 = arith.constant 0 : index
    %c0_120 = arith.constant 0 : index
    %c0_121 = arith.constant 0 : index
    %139 = vector.load %arg6[%c0_119, %c0_120, %c0_121] : memref<1x1x128xf32, #tpu.memory_space<vmem>>, vector<1x1x128xf32>
    %140 = vector.shape_cast %139 : vector<1x1x128xf32> to vector<1x128xf32>
    %141 = vector.broadcast %140 : vector<1x128xf32> to vector<32x128xf32>
    %142 = arith.addf %138, %141 : vector<32x128xf32>
    %143 = arith.extf %3 : vector<32x128xbf16> to vector<32x128xf32>
    %144 = arith.addf %142, %143 : vector<32x128xf32>
    %cst_122 = arith.constant 0.000000e+00 : f32
    %145 = vector.broadcast %cst_122 : f32 to vector<32x128xf32>
    %146 = arith.maximumf %144, %145 : vector<32x128xf32>
    %147 = arith.truncf %146 : vector<32x128xf32> to vector<32x128xbf16>
    %c0_123 = arith.constant 0 : index
    %c0_124 = arith.constant 0 : index
    %148 = vector.load %arg7[%c0_123, %c0_124] : memref<32x128xbf16, #tpu.memory_space<vmem>>, vector<32x128xbf16>
    tpu.vector_store %arg7[%c0_123, %c0_124], %147 {strides = array<i32>} : memref<32x128xbf16, #tpu.memory_space<vmem>>, vector<32x128xbf16>,
    return
  }
  func.func @transform_0(%arg0: i32) -> (i32, i32) {
    %c0_i32 = arith.constant 0 : i32
    %c0_i32_0 = arith.constant 0 : i32
    %c0_i32_1 = arith.constant 0 : i32
    return %c0_i32, %c0_i32_0 : i32, i32
  }
  func.func @transform_1(%arg0: i32) -> (i32, i32) {
    %c0_i32 = arith.constant 0 : i32
    %c0_i32_0 = arith.constant 0 : i32
    %c0_i32_1 = arith.constant 0 : i32
    return %c0_i32, %c0_i32_0 : i32, i32
  }
  func.func @transform_2(%arg0: i32) -> (i32, i32, i32) {
    %c0_i32 = arith.constant 0 : i32
    %c0_i32_0 = arith.constant 0 : i32
    %c0_i32_1 = arith.constant 0 : i32
    return %arg0, %c0_i32, %c0_i32_0 : i32, i32, i32
  }
  func.func @transform_3(%arg0: i32) -> (i32, i32, i32) {
    %c0_i32 = arith.constant 0 : i32
    %c0_i32_0 = arith.constant 0 : i32
    %c0_i32_1 = arith.constant 0 : i32
    return %arg0, %c0_i32, %c0_i32_0 : i32, i32, i32
  }
  func.func @transform_4(%arg0: i32) -> (i32, i32, i32) {
    %c0_i32 = arith.constant 0 : i32
    %c0_i32_0 = arith.constant 0 : i32
    %c0_i32_1 = arith.constant 0 : i32
    return %arg0, %c0_i32, %c0_i32_0 : i32, i32, i32
  }
  func.func @transform_5(%arg0: i32) -> (i32, i32, i32) {
    %c0_i32 = arith.constant 0 : i32
    %c0_i32_0 = arith.constant 0 : i32
    %c0_i32_1 = arith.constant 0 : i32
    return %arg0, %c0_i32, %c0_i32_0 : i32, i32, i32
  }
  func.func @transform_6(%arg0: i32) -> (i32, i32) {
    %c0_i32 = arith.constant 0 : i32
    %c0_i32_0 = arith.constant 0 : i32
    %c0_i32_1 = arith.constant 0 : i32
    return %c0_i32, %c0_i32_0 : i32, i32
  }
}

module attributes {stable_mosaic.version = 11 : i64} {
  func.func @kernel(%arg0: i32, %arg1: memref<32x128xbf16, #tpu.memory_space<vmem>>, %arg2: memref<72x32xbf16, #tpu.memory_space<vmem>>, %arg3: memref<1152x128xbf16, #tpu.memory_space<vmem>>, %arg4: memref<1x128xf32, #tpu.memory_space<vmem>>, %arg5: memref<72x8xbf16, #tpu.memory_space<vmem>>, %arg6: memref<1152x128xbf16, #tpu.memory_space<vmem>>, %arg7: memref<1x128xf32, #tpu.memory_space<vmem>>, %arg8: memref<8x32xbf16, #tpu.memory_space<vmem>>, %arg9: memref<128x128xbf16, #tpu.memory_space<vmem>>, %arg10: memref<1x128xf32, #tpu.memory_space<vmem>>, %arg11: memref<8x128xbf16, #tpu.memory_space<vmem>>) attributes {dimension_semantics = [#tpu.dimension_semantics<arbitrary>], iteration_bounds = array<i64: 1>, scalar_prefetch = 0 : i64, scratch_operands = 0 : i64, tpu.core_type = #tpu.core_type<tc>, window_params = [{pipeline_mode = #tpu.pipeline_mode<synchronous>, transform_indices = @transform_0, window_bounds = array<i64: 32, 128>}, {pipeline_mode = #tpu.pipeline_mode<synchronous>, transform_indices = @transform_1, window_bounds = array<i64: 72, 32>}, {pipeline_mode = #tpu.pipeline_mode<synchronous>, transform_indices = @transform_2, window_bounds = array<i64: 1152, 128>}, {pipeline_mode = #tpu.pipeline_mode<synchronous>, transform_indices = @transform_3, window_bounds = array<i64: 1, 128>}, {pipeline_mode = #tpu.pipeline_mode<synchronous>, transform_indices = @transform_4, window_bounds = array<i64: 72, 8>}, {pipeline_mode = #tpu.pipeline_mode<synchronous>, transform_indices = @transform_5, window_bounds = array<i64: 1152, 128>}, {pipeline_mode = #tpu.pipeline_mode<synchronous>, transform_indices = @transform_6, window_bounds = array<i64: 1, 128>}, {pipeline_mode = #tpu.pipeline_mode<synchronous>, transform_indices = @transform_7, window_bounds = array<i64: 8, 32>}, {pipeline_mode = #tpu.pipeline_mode<synchronous>, transform_indices = @transform_8, window_bounds = array<i64: 128, 128>}, {pipeline_mode = #tpu.pipeline_mode<synchronous>, transform_indices = @transform_9, window_bounds = array<i64: 1, 128>}, {pipeline_mode = #tpu.pipeline_mode<synchronous>, transform_indices = @transform_10, window_bounds = array<i64: 8, 128>}]} {
    %c0 = arith.constant 0 : index
    %c0_0 = arith.constant 0 : index
    %0 = vector.load %arg1[%c0, %c0_0] : memref<32x128xbf16, #tpu.memory_space<vmem>>, vector<32x128xbf16>
    %cst = arith.constant 0.000000e+00 : f32
    %1 = vector.broadcast %cst : f32 to vector<8x128xf32>
    %c0_1 = arith.constant 0 : index
    %c0_2 = arith.constant 0 : index
    %2 = vector.load %arg2[%c0_1, %c0_2] : memref<72x32xbf16, #tpu.memory_space<vmem>>, vector<8x32xbf16>
    %cst_3 = arith.constant dense<0.000000e+00> : vector<8x128xf32>
    %3 = tpu.matmul %2, %0, %cst_3 {dimension_numbers = #tpu.dot_dimension_numbers<[1], [0], [0], [1], [0, 0, 1, 1], [], []>} : vector<8x32xbf16>, vector<32x128xbf16>, vector<8x128xf32> -> vector<8x128xf32>
    %4 = arith.truncf %3 : vector<8x128xf32> to vector<8x128xbf16>
    %c0_4 = arith.constant 0 : index
    %c0_5 = arith.constant 0 : index
    %5 = vector.load %arg3[%c0_4, %c0_5] : memref<1152x128xbf16, #tpu.memory_space<vmem>>, vector<128x128xbf16>
    %cst_6 = arith.constant dense<0.000000e+00> : vector<8x128xf32>
    %6 = tpu.matmul %4, %5, %cst_6 {dimension_numbers = #tpu.dot_dimension_numbers<[1], [0], [0], [1], [0, 0, 1, 1], [], []>} : vector<8x128xbf16>, vector<128x128xbf16>, vector<8x128xf32> -> vector<8x128xf32>
    %7 = arith.addf %1, %6 : vector<8x128xf32>
    %c8 = arith.constant 8 : index
    %c0_7 = arith.constant 0 : index
    %8 = vector.load %arg2[%c8, %c0_7] : memref<72x32xbf16, #tpu.memory_space<vmem>>, vector<8x32xbf16>
    %cst_8 = arith.constant dense<0.000000e+00> : vector<8x128xf32>
    %9 = tpu.matmul %8, %0, %cst_8 {dimension_numbers = #tpu.dot_dimension_numbers<[1], [0], [0], [1], [0, 0, 1, 1], [], []>} : vector<8x32xbf16>, vector<32x128xbf16>, vector<8x128xf32> -> vector<8x128xf32>
    %10 = arith.truncf %9 : vector<8x128xf32> to vector<8x128xbf16>
    %c128 = arith.constant 128 : index
    %c0_9 = arith.constant 0 : index
    %11 = vector.load %arg3[%c128, %c0_9] : memref<1152x128xbf16, #tpu.memory_space<vmem>>, vector<128x128xbf16>
    %cst_10 = arith.constant dense<0.000000e+00> : vector<8x128xf32>
    %12 = tpu.matmul %10, %11, %cst_10 {dimension_numbers = #tpu.dot_dimension_numbers<[1], [0], [0], [1], [0, 0, 1, 1], [], []>} : vector<8x128xbf16>, vector<128x128xbf16>, vector<8x128xf32> -> vector<8x128xf32>
    %13 = arith.addf %7, %12 : vector<8x128xf32>
    %c16 = arith.constant 16 : index
    %c0_11 = arith.constant 0 : index
    %14 = vector.load %arg2[%c16, %c0_11] : memref<72x32xbf16, #tpu.memory_space<vmem>>, vector<8x32xbf16>
    %cst_12 = arith.constant dense<0.000000e+00> : vector<8x128xf32>
    %15 = tpu.matmul %14, %0, %cst_12 {dimension_numbers = #tpu.dot_dimension_numbers<[1], [0], [0], [1], [0, 0, 1, 1], [], []>} : vector<8x32xbf16>, vector<32x128xbf16>, vector<8x128xf32> -> vector<8x128xf32>
    %16 = arith.truncf %15 : vector<8x128xf32> to vector<8x128xbf16>
    %c256 = arith.constant 256 : index
    %c0_13 = arith.constant 0 : index
    %17 = vector.load %arg3[%c256, %c0_13] : memref<1152x128xbf16, #tpu.memory_space<vmem>>, vector<128x128xbf16>
    %cst_14 = arith.constant dense<0.000000e+00> : vector<8x128xf32>
    %18 = tpu.matmul %16, %17, %cst_14 {dimension_numbers = #tpu.dot_dimension_numbers<[1], [0], [0], [1], [0, 0, 1, 1], [], []>} : vector<8x128xbf16>, vector<128x128xbf16>, vector<8x128xf32> -> vector<8x128xf32>
    %19 = arith.addf %13, %18 : vector<8x128xf32>
    %c24 = arith.constant 24 : index
    %c0_15 = arith.constant 0 : index
    %20 = vector.load %arg2[%c24, %c0_15] : memref<72x32xbf16, #tpu.memory_space<vmem>>, vector<8x32xbf16>
    %cst_16 = arith.constant dense<0.000000e+00> : vector<8x128xf32>
    %21 = tpu.matmul %20, %0, %cst_16 {dimension_numbers = #tpu.dot_dimension_numbers<[1], [0], [0], [1], [0, 0, 1, 1], [], []>} : vector<8x32xbf16>, vector<32x128xbf16>, vector<8x128xf32> -> vector<8x128xf32>
    %22 = arith.truncf %21 : vector<8x128xf32> to vector<8x128xbf16>
    %c384 = arith.constant 384 : index
    %c0_17 = arith.constant 0 : index
    %23 = vector.load %arg3[%c384, %c0_17] : memref<1152x128xbf16, #tpu.memory_space<vmem>>, vector<128x128xbf16>
    %cst_18 = arith.constant dense<0.000000e+00> : vector<8x128xf32>
    %24 = tpu.matmul %22, %23, %cst_18 {dimension_numbers = #tpu.dot_dimension_numbers<[1], [0], [0], [1], [0, 0, 1, 1], [], []>} : vector<8x128xbf16>, vector<128x128xbf16>, vector<8x128xf32> -> vector<8x128xf32>
    %25 = arith.addf %19, %24 : vector<8x128xf32>
    %c32 = arith.constant 32 : index
    %c0_19 = arith.constant 0 : index
    %26 = vector.load %arg2[%c32, %c0_19] : memref<72x32xbf16, #tpu.memory_space<vmem>>, vector<8x32xbf16>
    %cst_20 = arith.constant dense<0.000000e+00> : vector<8x128xf32>
    %27 = tpu.matmul %26, %0, %cst_20 {dimension_numbers = #tpu.dot_dimension_numbers<[1], [0], [0], [1], [0, 0, 1, 1], [], []>} : vector<8x32xbf16>, vector<32x128xbf16>, vector<8x128xf32> -> vector<8x128xf32>
    %28 = arith.truncf %27 : vector<8x128xf32> to vector<8x128xbf16>
    %c512 = arith.constant 512 : index
    %c0_21 = arith.constant 0 : index
    %29 = vector.load %arg3[%c512, %c0_21] : memref<1152x128xbf16, #tpu.memory_space<vmem>>, vector<128x128xbf16>
    %cst_22 = arith.constant dense<0.000000e+00> : vector<8x128xf32>
    %30 = tpu.matmul %28, %29, %cst_22 {dimension_numbers = #tpu.dot_dimension_numbers<[1], [0], [0], [1], [0, 0, 1, 1], [], []>} : vector<8x128xbf16>, vector<128x128xbf16>, vector<8x128xf32> -> vector<8x128xf32>
    %31 = arith.addf %25, %30 : vector<8x128xf32>
    %c40 = arith.constant 40 : index
    %c0_23 = arith.constant 0 : index
    %32 = vector.load %arg2[%c40, %c0_23] : memref<72x32xbf16, #tpu.memory_space<vmem>>, vector<8x32xbf16>
    %cst_24 = arith.constant dense<0.000000e+00> : vector<8x128xf32>
    %33 = tpu.matmul %32, %0, %cst_24 {dimension_numbers = #tpu.dot_dimension_numbers<[1], [0], [0], [1], [0, 0, 1, 1], [], []>} : vector<8x32xbf16>, vector<32x128xbf16>, vector<8x128xf32> -> vector<8x128xf32>
    %34 = arith.truncf %33 : vector<8x128xf32> to vector<8x128xbf16>
    %c640 = arith.constant 640 : index
    %c0_25 = arith.constant 0 : index
    %35 = vector.load %arg3[%c640, %c0_25] : memref<1152x128xbf16, #tpu.memory_space<vmem>>, vector<128x128xbf16>
    %cst_26 = arith.constant dense<0.000000e+00> : vector<8x128xf32>
    %36 = tpu.matmul %34, %35, %cst_26 {dimension_numbers = #tpu.dot_dimension_numbers<[1], [0], [0], [1], [0, 0, 1, 1], [], []>} : vector<8x128xbf16>, vector<128x128xbf16>, vector<8x128xf32> -> vector<8x128xf32>
    %37 = arith.addf %31, %36 : vector<8x128xf32>
    %c48 = arith.constant 48 : index
    %c0_27 = arith.constant 0 : index
    %38 = vector.load %arg2[%c48, %c0_27] : memref<72x32xbf16, #tpu.memory_space<vmem>>, vector<8x32xbf16>
    %cst_28 = arith.constant dense<0.000000e+00> : vector<8x128xf32>
    %39 = tpu.matmul %38, %0, %cst_28 {dimension_numbers = #tpu.dot_dimension_numbers<[1], [0], [0], [1], [0, 0, 1, 1], [], []>} : vector<8x32xbf16>, vector<32x128xbf16>, vector<8x128xf32> -> vector<8x128xf32>
    %40 = arith.truncf %39 : vector<8x128xf32> to vector<8x128xbf16>
    %c768 = arith.constant 768 : index
    %c0_29 = arith.constant 0 : index
    %41 = vector.load %arg3[%c768, %c0_29] : memref<1152x128xbf16, #tpu.memory_space<vmem>>, vector<128x128xbf16>
    %cst_30 = arith.constant dense<0.000000e+00> : vector<8x128xf32>
    %42 = tpu.matmul %40, %41, %cst_30 {dimension_numbers = #tpu.dot_dimension_numbers<[1], [0], [0], [1], [0, 0, 1, 1], [], []>} : vector<8x128xbf16>, vector<128x128xbf16>, vector<8x128xf32> -> vector<8x128xf32>
    %43 = arith.addf %37, %42 : vector<8x128xf32>
    %c56 = arith.constant 56 : index
    %c0_31 = arith.constant 0 : index
    %44 = vector.load %arg2[%c56, %c0_31] : memref<72x32xbf16, #tpu.memory_space<vmem>>, vector<8x32xbf16>
    %cst_32 = arith.constant dense<0.000000e+00> : vector<8x128xf32>
    %45 = tpu.matmul %44, %0, %cst_32 {dimension_numbers = #tpu.dot_dimension_numbers<[1], [0], [0], [1], [0, 0, 1, 1], [], []>} : vector<8x32xbf16>, vector<32x128xbf16>, vector<8x128xf32> -> vector<8x128xf32>
    %46 = arith.truncf %45 : vector<8x128xf32> to vector<8x128xbf16>
    %c896 = arith.constant 896 : index
    %c0_33 = arith.constant 0 : index
    %47 = vector.load %arg3[%c896, %c0_33] : memref<1152x128xbf16, #tpu.memory_space<vmem>>, vector<128x128xbf16>
    %cst_34 = arith.constant dense<0.000000e+00> : vector<8x128xf32>
    %48 = tpu.matmul %46, %47, %cst_34 {dimension_numbers = #tpu.dot_dimension_numbers<[1], [0], [0], [1], [0, 0, 1, 1], [], []>} : vector<8x128xbf16>, vector<128x128xbf16>, vector<8x128xf32> -> vector<8x128xf32>
    %49 = arith.addf %43, %48 : vector<8x128xf32>
    %c64 = arith.constant 64 : index
    %c0_35 = arith.constant 0 : index
    %50 = vector.load %arg2[%c64, %c0_35] : memref<72x32xbf16, #tpu.memory_space<vmem>>, vector<8x32xbf16>
    %cst_36 = arith.constant dense<0.000000e+00> : vector<8x128xf32>
    %51 = tpu.matmul %50, %0, %cst_36 {dimension_numbers = #tpu.dot_dimension_numbers<[1], [0], [0], [1], [0, 0, 1, 1], [], []>} : vector<8x32xbf16>, vector<32x128xbf16>, vector<8x128xf32> -> vector<8x128xf32>
    %52 = arith.truncf %51 : vector<8x128xf32> to vector<8x128xbf16>
    %c1024 = arith.constant 1024 : index
    %c0_37 = arith.constant 0 : index
    %53 = vector.load %arg3[%c1024, %c0_37] : memref<1152x128xbf16, #tpu.memory_space<vmem>>, vector<128x128xbf16>
    %cst_38 = arith.constant dense<0.000000e+00> : vector<8x128xf32>
    %54 = tpu.matmul %52, %53, %cst_38 {dimension_numbers = #tpu.dot_dimension_numbers<[1], [0], [0], [1], [0, 0, 1, 1], [], []>} : vector<8x128xbf16>, vector<128x128xbf16>, vector<8x128xf32> -> vector<8x128xf32>
    %55 = arith.addf %49, %54 : vector<8x128xf32>
    %c0_39 = arith.constant 0 : index
    %c0_40 = arith.constant 0 : index
    %56 = vector.load %arg4[%c0_39, %c0_40] : memref<1x128xf32, #tpu.memory_space<vmem>>, vector<1x128xf32>
    %57 = vector.broadcast %56 : vector<1x128xf32> to vector<8x128xf32>
    %58 = arith.addf %55, %57 : vector<8x128xf32>
    %cst_41 = arith.constant 0.000000e+00 : f32
    %59 = vector.broadcast %cst_41 : f32 to vector<8x128xf32>
    %60 = arith.maximumf %58, %59 : vector<8x128xf32>
    %61 = arith.truncf %60 : vector<8x128xf32> to vector<8x128xbf16>
    %cst_42 = arith.constant 0.000000e+00 : f32
    %62 = vector.broadcast %cst_42 : f32 to vector<8x128xf32>
    %c0_43 = arith.constant 0 : index
    %c0_44 = arith.constant 0 : index
    %63 = vector.load %arg5[%c0_43, %c0_44] : memref<72x8xbf16, #tpu.memory_space<vmem>>, vector<8x8xbf16>
    %cst_45 = arith.constant dense<0.000000e+00> : vector<8x128xf32>
    %64 = tpu.matmul %63, %61, %cst_45 {dimension_numbers = #tpu.dot_dimension_numbers<[1], [0], [0], [1], [0, 0, 1, 1], [], []>} : vector<8x8xbf16>, vector<8x128xbf16>, vector<8x128xf32> -> vector<8x128xf32>
    %65 = arith.truncf %64 : vector<8x128xf32> to vector<8x128xbf16>
    %c0_46 = arith.constant 0 : index
    %c0_47 = arith.constant 0 : index
    %66 = vector.load %arg6[%c0_46, %c0_47] : memref<1152x128xbf16, #tpu.memory_space<vmem>>, vector<128x128xbf16>
    %cst_48 = arith.constant dense<0.000000e+00> : vector<8x128xf32>
    %67 = tpu.matmul %65, %66, %cst_48 {dimension_numbers = #tpu.dot_dimension_numbers<[1], [0], [0], [1], [0, 0, 1, 1], [], []>} : vector<8x128xbf16>, vector<128x128xbf16>, vector<8x128xf32> -> vector<8x128xf32>
    %68 = arith.addf %62, %67 : vector<8x128xf32>
    %c8_49 = arith.constant 8 : index
    %c0_50 = arith.constant 0 : index
    %69 = vector.load %arg5[%c8_49, %c0_50] : memref<72x8xbf16, #tpu.memory_space<vmem>>, vector<8x8xbf16>
    %cst_51 = arith.constant dense<0.000000e+00> : vector<8x128xf32>
    %70 = tpu.matmul %69, %61, %cst_51 {dimension_numbers = #tpu.dot_dimension_numbers<[1], [0], [0], [1], [0, 0, 1, 1], [], []>} : vector<8x8xbf16>, vector<8x128xbf16>, vector<8x128xf32> -> vector<8x128xf32>
    %71 = arith.truncf %70 : vector<8x128xf32> to vector<8x128xbf16>
    %c128_52 = arith.constant 128 : index
    %c0_53 = arith.constant 0 : index
    %72 = vector.load %arg6[%c128_52, %c0_53] : memref<1152x128xbf16, #tpu.memory_space<vmem>>, vector<128x128xbf16>
    %cst_54 = arith.constant dense<0.000000e+00> : vector<8x128xf32>
    %73 = tpu.matmul %71, %72, %cst_54 {dimension_numbers = #tpu.dot_dimension_numbers<[1], [0], [0], [1], [0, 0, 1, 1], [], []>} : vector<8x128xbf16>, vector<128x128xbf16>, vector<8x128xf32> -> vector<8x128xf32>
    %74 = arith.addf %68, %73 : vector<8x128xf32>
    %c16_55 = arith.constant 16 : index
    %c0_56 = arith.constant 0 : index
    %75 = vector.load %arg5[%c16_55, %c0_56] : memref<72x8xbf16, #tpu.memory_space<vmem>>, vector<8x8xbf16>
    %cst_57 = arith.constant dense<0.000000e+00> : vector<8x128xf32>
    %76 = tpu.matmul %75, %61, %cst_57 {dimension_numbers = #tpu.dot_dimension_numbers<[1], [0], [0], [1], [0, 0, 1, 1], [], []>} : vector<8x8xbf16>, vector<8x128xbf16>, vector<8x128xf32> -> vector<8x128xf32>
    %77 = arith.truncf %76 : vector<8x128xf32> to vector<8x128xbf16>
    %c256_58 = arith.constant 256 : index
    %c0_59 = arith.constant 0 : index
    %78 = vector.load %arg6[%c256_58, %c0_59] : memref<1152x128xbf16, #tpu.memory_space<vmem>>, vector<128x128xbf16>
    %cst_60 = arith.constant dense<0.000000e+00> : vector<8x128xf32>
    %79 = tpu.matmul %77, %78, %cst_60 {dimension_numbers = #tpu.dot_dimension_numbers<[1], [0], [0], [1], [0, 0, 1, 1], [], []>} : vector<8x128xbf16>, vector<128x128xbf16>, vector<8x128xf32> -> vector<8x128xf32>
    %80 = arith.addf %74, %79 : vector<8x128xf32>
    %c24_61 = arith.constant 24 : index
    %c0_62 = arith.constant 0 : index
    %81 = vector.load %arg5[%c24_61, %c0_62] : memref<72x8xbf16, #tpu.memory_space<vmem>>, vector<8x8xbf16>
    %cst_63 = arith.constant dense<0.000000e+00> : vector<8x128xf32>
    %82 = tpu.matmul %81, %61, %cst_63 {dimension_numbers = #tpu.dot_dimension_numbers<[1], [0], [0], [1], [0, 0, 1, 1], [], []>} : vector<8x8xbf16>, vector<8x128xbf16>, vector<8x128xf32> -> vector<8x128xf32>
    %83 = arith.truncf %82 : vector<8x128xf32> to vector<8x128xbf16>
    %c384_64 = arith.constant 384 : index
    %c0_65 = arith.constant 0 : index
    %84 = vector.load %arg6[%c384_64, %c0_65] : memref<1152x128xbf16, #tpu.memory_space<vmem>>, vector<128x128xbf16>
    %cst_66 = arith.constant dense<0.000000e+00> : vector<8x128xf32>
    %85 = tpu.matmul %83, %84, %cst_66 {dimension_numbers = #tpu.dot_dimension_numbers<[1], [0], [0], [1], [0, 0, 1, 1], [], []>} : vector<8x128xbf16>, vector<128x128xbf16>, vector<8x128xf32> -> vector<8x128xf32>
    %86 = arith.addf %80, %85 : vector<8x128xf32>
    %c32_67 = arith.constant 32 : index
    %c0_68 = arith.constant 0 : index
    %87 = vector.load %arg5[%c32_67, %c0_68] : memref<72x8xbf16, #tpu.memory_space<vmem>>, vector<8x8xbf16>
    %cst_69 = arith.constant dense<0.000000e+00> : vector<8x128xf32>
    %88 = tpu.matmul %87, %61, %cst_69 {dimension_numbers = #tpu.dot_dimension_numbers<[1], [0], [0], [1], [0, 0, 1, 1], [], []>} : vector<8x8xbf16>, vector<8x128xbf16>, vector<8x128xf32> -> vector<8x128xf32>
    %89 = arith.truncf %88 : vector<8x128xf32> to vector<8x128xbf16>
    %c512_70 = arith.constant 512 : index
    %c0_71 = arith.constant 0 : index
    %90 = vector.load %arg6[%c512_70, %c0_71] : memref<1152x128xbf16, #tpu.memory_space<vmem>>, vector<128x128xbf16>
    %cst_72 = arith.constant dense<0.000000e+00> : vector<8x128xf32>
    %91 = tpu.matmul %89, %90, %cst_72 {dimension_numbers = #tpu.dot_dimension_numbers<[1], [0], [0], [1], [0, 0, 1, 1], [], []>} : vector<8x128xbf16>, vector<128x128xbf16>, vector<8x128xf32> -> vector<8x128xf32>
    %92 = arith.addf %86, %91 : vector<8x128xf32>
    %c40_73 = arith.constant 40 : index
    %c0_74 = arith.constant 0 : index
    %93 = vector.load %arg5[%c40_73, %c0_74] : memref<72x8xbf16, #tpu.memory_space<vmem>>, vector<8x8xbf16>
    %cst_75 = arith.constant dense<0.000000e+00> : vector<8x128xf32>
    %94 = tpu.matmul %93, %61, %cst_75 {dimension_numbers = #tpu.dot_dimension_numbers<[1], [0], [0], [1], [0, 0, 1, 1], [], []>} : vector<8x8xbf16>, vector<8x128xbf16>, vector<8x128xf32> -> vector<8x128xf32>
    %95 = arith.truncf %94 : vector<8x128xf32> to vector<8x128xbf16>
    %c640_76 = arith.constant 640 : index
    %c0_77 = arith.constant 0 : index
    %96 = vector.load %arg6[%c640_76, %c0_77] : memref<1152x128xbf16, #tpu.memory_space<vmem>>, vector<128x128xbf16>
    %cst_78 = arith.constant dense<0.000000e+00> : vector<8x128xf32>
    %97 = tpu.matmul %95, %96, %cst_78 {dimension_numbers = #tpu.dot_dimension_numbers<[1], [0], [0], [1], [0, 0, 1, 1], [], []>} : vector<8x128xbf16>, vector<128x128xbf16>, vector<8x128xf32> -> vector<8x128xf32>
    %98 = arith.addf %92, %97 : vector<8x128xf32>
    %c48_79 = arith.constant 48 : index
    %c0_80 = arith.constant 0 : index
    %99 = vector.load %arg5[%c48_79, %c0_80] : memref<72x8xbf16, #tpu.memory_space<vmem>>, vector<8x8xbf16>
    %cst_81 = arith.constant dense<0.000000e+00> : vector<8x128xf32>
    %100 = tpu.matmul %99, %61, %cst_81 {dimension_numbers = #tpu.dot_dimension_numbers<[1], [0], [0], [1], [0, 0, 1, 1], [], []>} : vector<8x8xbf16>, vector<8x128xbf16>, vector<8x128xf32> -> vector<8x128xf32>
    %101 = arith.truncf %100 : vector<8x128xf32> to vector<8x128xbf16>
    %c768_82 = arith.constant 768 : index
    %c0_83 = arith.constant 0 : index
    %102 = vector.load %arg6[%c768_82, %c0_83] : memref<1152x128xbf16, #tpu.memory_space<vmem>>, vector<128x128xbf16>
    %cst_84 = arith.constant dense<0.000000e+00> : vector<8x128xf32>
    %103 = tpu.matmul %101, %102, %cst_84 {dimension_numbers = #tpu.dot_dimension_numbers<[1], [0], [0], [1], [0, 0, 1, 1], [], []>} : vector<8x128xbf16>, vector<128x128xbf16>, vector<8x128xf32> -> vector<8x128xf32>
    %104 = arith.addf %98, %103 : vector<8x128xf32>
    %c56_85 = arith.constant 56 : index
    %c0_86 = arith.constant 0 : index
    %105 = vector.load %arg5[%c56_85, %c0_86] : memref<72x8xbf16, #tpu.memory_space<vmem>>, vector<8x8xbf16>
    %cst_87 = arith.constant dense<0.000000e+00> : vector<8x128xf32>
    %106 = tpu.matmul %105, %61, %cst_87 {dimension_numbers = #tpu.dot_dimension_numbers<[1], [0], [0], [1], [0, 0, 1, 1], [], []>} : vector<8x8xbf16>, vector<8x128xbf16>, vector<8x128xf32> -> vector<8x128xf32>
    %107 = arith.truncf %106 : vector<8x128xf32> to vector<8x128xbf16>
    %c896_88 = arith.constant 896 : index
    %c0_89 = arith.constant 0 : index
    %108 = vector.load %arg6[%c896_88, %c0_89] : memref<1152x128xbf16, #tpu.memory_space<vmem>>, vector<128x128xbf16>
    %cst_90 = arith.constant dense<0.000000e+00> : vector<8x128xf32>
    %109 = tpu.matmul %107, %108, %cst_90 {dimension_numbers = #tpu.dot_dimension_numbers<[1], [0], [0], [1], [0, 0, 1, 1], [], []>} : vector<8x128xbf16>, vector<128x128xbf16>, vector<8x128xf32> -> vector<8x128xf32>
    %110 = arith.addf %104, %109 : vector<8x128xf32>
    %c64_91 = arith.constant 64 : index
    %c0_92 = arith.constant 0 : index
    %111 = vector.load %arg5[%c64_91, %c0_92] : memref<72x8xbf16, #tpu.memory_space<vmem>>, vector<8x8xbf16>
    %cst_93 = arith.constant dense<0.000000e+00> : vector<8x128xf32>
    %112 = tpu.matmul %111, %61, %cst_93 {dimension_numbers = #tpu.dot_dimension_numbers<[1], [0], [0], [1], [0, 0, 1, 1], [], []>} : vector<8x8xbf16>, vector<8x128xbf16>, vector<8x128xf32> -> vector<8x128xf32>
    %113 = arith.truncf %112 : vector<8x128xf32> to vector<8x128xbf16>
    %c1024_94 = arith.constant 1024 : index
    %c0_95 = arith.constant 0 : index
    %114 = vector.load %arg6[%c1024_94, %c0_95] : memref<1152x128xbf16, #tpu.memory_space<vmem>>, vector<128x128xbf16>
    %cst_96 = arith.constant dense<0.000000e+00> : vector<8x128xf32>
    %115 = tpu.matmul %113, %114, %cst_96 {dimension_numbers = #tpu.dot_dimension_numbers<[1], [0], [0], [1], [0, 0, 1, 1], [], []>} : vector<8x128xbf16>, vector<128x128xbf16>, vector<8x128xf32> -> vector<8x128xf32>
    %116 = arith.addf %110, %115 : vector<8x128xf32>
    %c0_97 = arith.constant 0 : index
    %c0_98 = arith.constant 0 : index
    %117 = vector.load %arg7[%c0_97, %c0_98] : memref<1x128xf32, #tpu.memory_space<vmem>>, vector<1x128xf32>
    %118 = vector.broadcast %117 : vector<1x128xf32> to vector<8x128xf32>
    %119 = arith.addf %116, %118 : vector<8x128xf32>
    %c0_99 = arith.constant 0 : index
    %c0_100 = arith.constant 0 : index
    %120 = vector.load %arg8[%c0_99, %c0_100] : memref<8x32xbf16, #tpu.memory_space<vmem>>, vector<8x32xbf16>
    %cst_101 = arith.constant dense<0.000000e+00> : vector<8x128xf32>
    %121 = tpu.matmul %120, %0, %cst_101 {dimension_numbers = #tpu.dot_dimension_numbers<[1], [0], [0], [1], [0, 0, 1, 1], [], []>} : vector<8x32xbf16>, vector<32x128xbf16>, vector<8x128xf32> -> vector<8x128xf32>
    %122 = arith.truncf %121 : vector<8x128xf32> to vector<8x128xbf16>
    %c0_102 = arith.constant 0 : index
    %c0_103 = arith.constant 0 : index
    %123 = vector.load %arg9[%c0_102, %c0_103] : memref<128x128xbf16, #tpu.memory_space<vmem>>, vector<128x128xbf16>
    %cst_104 = arith.constant dense<0.000000e+00> : vector<8x128xf32>
    %124 = tpu.matmul %122, %123, %cst_104 {dimension_numbers = #tpu.dot_dimension_numbers<[1], [0], [0], [1], [0, 0, 1, 1], [], []>} : vector<8x128xbf16>, vector<128x128xbf16>, vector<8x128xf32> -> vector<8x128xf32>
    %c0_105 = arith.constant 0 : index
    %c0_106 = arith.constant 0 : index
    %125 = vector.load %arg10[%c0_105, %c0_106] : memref<1x128xf32, #tpu.memory_space<vmem>>, vector<1x128xf32>
    %126 = vector.broadcast %125 : vector<1x128xf32> to vector<8x128xf32>
    %127 = arith.addf %124, %126 : vector<8x128xf32>
    %128 = arith.addf %119, %127 : vector<8x128xf32>
    %cst_107 = arith.constant 0.000000e+00 : f32
    %129 = vector.broadcast %cst_107 : f32 to vector<8x128xf32>
    %130 = arith.maximumf %128, %129 : vector<8x128xf32>
    %131 = arith.truncf %130 : vector<8x128xf32> to vector<8x128xbf16>
    %c0_108 = arith.constant 0 : index
    %c0_109 = arith.constant 0 : index
    %132 = vector.load %arg11[%c0_108, %c0_109] : memref<8x128xbf16, #tpu.memory_space<vmem>>, vector<8x128xbf16>
    tpu.vector_store %arg11[%c0_108, %c0_109], %131 {strides = array<i32>} : memref<8x128xbf16, #tpu.memory_space<vmem>>, vector<8x128xbf16>,
    return
  }
  func.func @transform_0(%arg0: i32) -> (i32, i32) {
    %c0_i32 = arith.constant 0 : i32
    %c0_i32_0 = arith.constant 0 : i32
    %c0_i32_1 = arith.constant 0 : i32
    return %c0_i32, %c0_i32_0 : i32, i32
  }
  func.func @transform_1(%arg0: i32) -> (i32, i32) {
    %c0_i32 = arith.constant 0 : i32
    %c0_i32_0 = arith.constant 0 : i32
    %c0_i32_1 = arith.constant 0 : i32
    return %c0_i32, %c0_i32_0 : i32, i32
  }
  func.func @transform_2(%arg0: i32) -> (i32, i32) {
    %c0_i32 = arith.constant 0 : i32
    %c0_i32_0 = arith.constant 0 : i32
    %c0_i32_1 = arith.constant 0 : i32
    return %c0_i32, %c0_i32_0 : i32, i32
  }
  func.func @transform_3(%arg0: i32) -> (i32, i32) {
    %c0_i32 = arith.constant 0 : i32
    %c0_i32_0 = arith.constant 0 : i32
    %c0_i32_1 = arith.constant 0 : i32
    return %c0_i32, %c0_i32_0 : i32, i32
  }
  func.func @transform_4(%arg0: i32) -> (i32, i32) {
    %c0_i32 = arith.constant 0 : i32
    %c0_i32_0 = arith.constant 0 : i32
    %c0_i32_1 = arith.constant 0 : i32
    return %c0_i32, %c0_i32_0 : i32, i32
  }
  func.func @transform_5(%arg0: i32) -> (i32, i32) {
    %c0_i32 = arith.constant 0 : i32
    %c0_i32_0 = arith.constant 0 : i32
    %c0_i32_1 = arith.constant 0 : i32
    return %c0_i32, %c0_i32_0 : i32, i32
  }
  func.func @transform_6(%arg0: i32) -> (i32, i32) {
    %c0_i32 = arith.constant 0 : i32
    %c0_i32_0 = arith.constant 0 : i32
    %c0_i32_1 = arith.constant 0 : i32
    return %c0_i32, %c0_i32_0 : i32, i32
  }
  func.func @transform_7(%arg0: i32) -> (i32, i32) {
    %c0_i32 = arith.constant 0 : i32
    %c0_i32_0 = arith.constant 0 : i32
    %c0_i32_1 = arith.constant 0 : i32
    return %c0_i32, %c0_i32_0 : i32, i32
  }
  func.func @transform_8(%arg0: i32) -> (i32, i32) {
    %c0_i32 = arith.constant 0 : i32
    %c0_i32_0 = arith.constant 0 : i32
    %c0_i32_1 = arith.constant 0 : i32
    return %c0_i32, %c0_i32_0 : i32, i32
  }
  func.func @transform_9(%arg0: i32) -> (i32, i32) {
    %c0_i32 = arith.constant 0 : i32
    %c0_i32_0 = arith.constant 0 : i32
    %c0_i32_1 = arith.constant 0 : i32
    return %c0_i32, %c0_i32_0 : i32, i32
  }
  func.func @transform_10(%arg0: i32) -> (i32, i32) {
    %c0_i32 = arith.constant 0 : i32
    %c0_i32_0 = arith.constant 0 : i32
    %c0_i32_1 = arith.constant 0 : i32
    return %c0_i32, %c0_i32_0 : i32, i32
  }
}

module attributes {stable_mosaic.version = 11 : i64} {
  func.func @kernel(%arg0: i32, %arg1: memref<8x128xbf16, #tpu.memory_space<vmem>>, %arg2: memref<72x8xbf16, #tpu.memory_space<vmem>>, %arg3: memref<1x1152x128xbf16, #tpu.memory_space<vmem>>, %arg4: memref<1x1x128xf32, #tpu.memory_space<vmem>>, %arg5: memref<1x1152x128xbf16, #tpu.memory_space<vmem>>, %arg6: memref<1x1x128xf32, #tpu.memory_space<vmem>>, %arg7: memref<8x128xbf16, #tpu.memory_space<vmem>>) attributes {dimension_semantics = [#tpu.dimension_semantics<arbitrary>], iteration_bounds = array<i64: 3>, scalar_prefetch = 0 : i64, scratch_operands = 0 : i64, tpu.core_type = #tpu.core_type<tc>, window_params = [{pipeline_mode = #tpu.pipeline_mode<synchronous>, transform_indices = @transform_0, window_bounds = array<i64: 8, 128>}, {pipeline_mode = #tpu.pipeline_mode<synchronous>, transform_indices = @transform_1, window_bounds = array<i64: 72, 8>}, {transform_indices = @transform_2, window_bounds = array<i64: 1, 1152, 128>}, {transform_indices = @transform_3, window_bounds = array<i64: 1, 1, 128>}, {transform_indices = @transform_4, window_bounds = array<i64: 1, 1152, 128>}, {transform_indices = @transform_5, window_bounds = array<i64: 1, 1, 128>}, {pipeline_mode = #tpu.pipeline_mode<synchronous>, transform_indices = @transform_6, window_bounds = array<i64: 8, 128>}]} {
    %c0_i32 = arith.constant 0 : i32
    %0 = arith.cmpi eq, %arg0, %c0_i32 : i32
    %1 = arith.extui %0 : i1 to i32
    %c0_i32_0 = arith.constant 0 : i32
    %2 = arith.cmpi ne, %1, %c0_i32_0 : i32
    scf.if %2 {
      %c0_123 = arith.constant 0 : index
      %c0_124 = arith.constant 0 : index
      %149 = vector.load %arg1[%c0_123, %c0_124] : memref<8x128xbf16, #tpu.memory_space<vmem>>, vector<8x128xbf16>
      %c0_125 = arith.constant 0 : index
      %c0_126 = arith.constant 0 : index
      %150 = vector.load %arg7[%c0_125, %c0_126] : memref<8x128xbf16, #tpu.memory_space<vmem>>, vector<8x128xbf16>
      tpu.vector_store %arg7[%c0_125, %c0_126], %149 {strides = array<i32>} : memref<8x128xbf16, #tpu.memory_space<vmem>>, vector<8x128xbf16>,
    } else {
    }
    %c0 = arith.constant 0 : index
    %c0_1 = arith.constant 0 : index
    %3 = vector.load %arg7[%c0, %c0_1] : memref<8x128xbf16, #tpu.memory_space<vmem>>, vector<8x128xbf16>
    %cst = arith.constant 0.000000e+00 : f32
    %4 = vector.broadcast %cst : f32 to vector<8x128xf32>
    %c0_2 = arith.constant 0 : index
    %c0_3 = arith.constant 0 : index
    %5 = vector.load %arg2[%c0_2, %c0_3] : memref<72x8xbf16, #tpu.memory_space<vmem>>, vector<8x8xbf16>
    %cst_4 = arith.constant dense<0.000000e+00> : vector<8x128xf32>
    %6 = tpu.matmul %5, %3, %cst_4 {dimension_numbers = #tpu.dot_dimension_numbers<[1], [0], [0], [1], [0, 0, 1, 1], [], []>} : vector<8x8xbf16>, vector<8x128xbf16>, vector<8x128xf32> -> vector<8x128xf32>
    %7 = arith.truncf %6 : vector<8x128xf32> to vector<8x128xbf16>
    %c0_5 = arith.constant 0 : index
    %c0_6 = arith.constant 0 : index
    %c0_7 = arith.constant 0 : index
    %8 = vector.load %arg3[%c0_5, %c0_6, %c0_7] : memref<1x1152x128xbf16, #tpu.memory_space<vmem>>, vector<1x128x128xbf16>
    %9 = vector.shape_cast %8 : vector<1x128x128xbf16> to vector<128x128xbf16>
    %cst_8 = arith.constant dense<0.000000e+00> : vector<8x128xf32>
    %10 = tpu.matmul %7, %9, %cst_8 {dimension_numbers = #tpu.dot_dimension_numbers<[1], [0], [0], [1], [0, 0, 1, 1], [], []>} : vector<8x128xbf16>, vector<128x128xbf16>, vector<8x128xf32> -> vector<8x128xf32>
    %11 = arith.addf %4, %10 : vector<8x128xf32>
    %c8 = arith.constant 8 : index
    %c0_9 = arith.constant 0 : index
    %12 = vector.load %arg2[%c8, %c0_9] : memref<72x8xbf16, #tpu.memory_space<vmem>>, vector<8x8xbf16>
    %cst_10 = arith.constant dense<0.000000e+00> : vector<8x128xf32>
    %13 = tpu.matmul %12, %3, %cst_10 {dimension_numbers = #tpu.dot_dimension_numbers<[1], [0], [0], [1], [0, 0, 1, 1], [], []>} : vector<8x8xbf16>, vector<8x128xbf16>, vector<8x128xf32> -> vector<8x128xf32>
    %14 = arith.truncf %13 : vector<8x128xf32> to vector<8x128xbf16>
    %c0_11 = arith.constant 0 : index
    %c128 = arith.constant 128 : index
    %c0_12 = arith.constant 0 : index
    %15 = vector.load %arg3[%c0_11, %c128, %c0_12] : memref<1x1152x128xbf16, #tpu.memory_space<vmem>>, vector<1x128x128xbf16>
    %16 = vector.shape_cast %15 : vector<1x128x128xbf16> to vector<128x128xbf16>
    %cst_13 = arith.constant dense<0.000000e+00> : vector<8x128xf32>
    %17 = tpu.matmul %14, %16, %cst_13 {dimension_numbers = #tpu.dot_dimension_numbers<[1], [0], [0], [1], [0, 0, 1, 1], [], []>} : vector<8x128xbf16>, vector<128x128xbf16>, vector<8x128xf32> -> vector<8x128xf32>
    %18 = arith.addf %11, %17 : vector<8x128xf32>
    %c16 = arith.constant 16 : index
    %c0_14 = arith.constant 0 : index
    %19 = vector.load %arg2[%c16, %c0_14] : memref<72x8xbf16, #tpu.memory_space<vmem>>, vector<8x8xbf16>
    %cst_15 = arith.constant dense<0.000000e+00> : vector<8x128xf32>
    %20 = tpu.matmul %19, %3, %cst_15 {dimension_numbers = #tpu.dot_dimension_numbers<[1], [0], [0], [1], [0, 0, 1, 1], [], []>} : vector<8x8xbf16>, vector<8x128xbf16>, vector<8x128xf32> -> vector<8x128xf32>
    %21 = arith.truncf %20 : vector<8x128xf32> to vector<8x128xbf16>
    %c0_16 = arith.constant 0 : index
    %c256 = arith.constant 256 : index
    %c0_17 = arith.constant 0 : index
    %22 = vector.load %arg3[%c0_16, %c256, %c0_17] : memref<1x1152x128xbf16, #tpu.memory_space<vmem>>, vector<1x128x128xbf16>
    %23 = vector.shape_cast %22 : vector<1x128x128xbf16> to vector<128x128xbf16>
    %cst_18 = arith.constant dense<0.000000e+00> : vector<8x128xf32>
    %24 = tpu.matmul %21, %23, %cst_18 {dimension_numbers = #tpu.dot_dimension_numbers<[1], [0], [0], [1], [0, 0, 1, 1], [], []>} : vector<8x128xbf16>, vector<128x128xbf16>, vector<8x128xf32> -> vector<8x128xf32>
    %25 = arith.addf %18, %24 : vector<8x128xf32>
    %c24 = arith.constant 24 : index
    %c0_19 = arith.constant 0 : index
    %26 = vector.load %arg2[%c24, %c0_19] : memref<72x8xbf16, #tpu.memory_space<vmem>>, vector<8x8xbf16>
    %cst_20 = arith.constant dense<0.000000e+00> : vector<8x128xf32>
    %27 = tpu.matmul %26, %3, %cst_20 {dimension_numbers = #tpu.dot_dimension_numbers<[1], [0], [0], [1], [0, 0, 1, 1], [], []>} : vector<8x8xbf16>, vector<8x128xbf16>, vector<8x128xf32> -> vector<8x128xf32>
    %28 = arith.truncf %27 : vector<8x128xf32> to vector<8x128xbf16>
    %c0_21 = arith.constant 0 : index
    %c384 = arith.constant 384 : index
    %c0_22 = arith.constant 0 : index
    %29 = vector.load %arg3[%c0_21, %c384, %c0_22] : memref<1x1152x128xbf16, #tpu.memory_space<vmem>>, vector<1x128x128xbf16>
    %30 = vector.shape_cast %29 : vector<1x128x128xbf16> to vector<128x128xbf16>
    %cst_23 = arith.constant dense<0.000000e+00> : vector<8x128xf32>
    %31 = tpu.matmul %28, %30, %cst_23 {dimension_numbers = #tpu.dot_dimension_numbers<[1], [0], [0], [1], [0, 0, 1, 1], [], []>} : vector<8x128xbf16>, vector<128x128xbf16>, vector<8x128xf32> -> vector<8x128xf32>
    %32 = arith.addf %25, %31 : vector<8x128xf32>
    %c32 = arith.constant 32 : index
    %c0_24 = arith.constant 0 : index
    %33 = vector.load %arg2[%c32, %c0_24] : memref<72x8xbf16, #tpu.memory_space<vmem>>, vector<8x8xbf16>
    %cst_25 = arith.constant dense<0.000000e+00> : vector<8x128xf32>
    %34 = tpu.matmul %33, %3, %cst_25 {dimension_numbers = #tpu.dot_dimension_numbers<[1], [0], [0], [1], [0, 0, 1, 1], [], []>} : vector<8x8xbf16>, vector<8x128xbf16>, vector<8x128xf32> -> vector<8x128xf32>
    %35 = arith.truncf %34 : vector<8x128xf32> to vector<8x128xbf16>
    %c0_26 = arith.constant 0 : index
    %c512 = arith.constant 512 : index
    %c0_27 = arith.constant 0 : index
    %36 = vector.load %arg3[%c0_26, %c512, %c0_27] : memref<1x1152x128xbf16, #tpu.memory_space<vmem>>, vector<1x128x128xbf16>
    %37 = vector.shape_cast %36 : vector<1x128x128xbf16> to vector<128x128xbf16>
    %cst_28 = arith.constant dense<0.000000e+00> : vector<8x128xf32>
    %38 = tpu.matmul %35, %37, %cst_28 {dimension_numbers = #tpu.dot_dimension_numbers<[1], [0], [0], [1], [0, 0, 1, 1], [], []>} : vector<8x128xbf16>, vector<128x128xbf16>, vector<8x128xf32> -> vector<8x128xf32>
    %39 = arith.addf %32, %38 : vector<8x128xf32>
    %c40 = arith.constant 40 : index
    %c0_29 = arith.constant 0 : index
    %40 = vector.load %arg2[%c40, %c0_29] : memref<72x8xbf16, #tpu.memory_space<vmem>>, vector<8x8xbf16>
    %cst_30 = arith.constant dense<0.000000e+00> : vector<8x128xf32>
    %41 = tpu.matmul %40, %3, %cst_30 {dimension_numbers = #tpu.dot_dimension_numbers<[1], [0], [0], [1], [0, 0, 1, 1], [], []>} : vector<8x8xbf16>, vector<8x128xbf16>, vector<8x128xf32> -> vector<8x128xf32>
    %42 = arith.truncf %41 : vector<8x128xf32> to vector<8x128xbf16>
    %c0_31 = arith.constant 0 : index
    %c640 = arith.constant 640 : index
    %c0_32 = arith.constant 0 : index
    %43 = vector.load %arg3[%c0_31, %c640, %c0_32] : memref<1x1152x128xbf16, #tpu.memory_space<vmem>>, vector<1x128x128xbf16>
    %44 = vector.shape_cast %43 : vector<1x128x128xbf16> to vector<128x128xbf16>
    %cst_33 = arith.constant dense<0.000000e+00> : vector<8x128xf32>
    %45 = tpu.matmul %42, %44, %cst_33 {dimension_numbers = #tpu.dot_dimension_numbers<[1], [0], [0], [1], [0, 0, 1, 1], [], []>} : vector<8x128xbf16>, vector<128x128xbf16>, vector<8x128xf32> -> vector<8x128xf32>
    %46 = arith.addf %39, %45 : vector<8x128xf32>
    %c48 = arith.constant 48 : index
    %c0_34 = arith.constant 0 : index
    %47 = vector.load %arg2[%c48, %c0_34] : memref<72x8xbf16, #tpu.memory_space<vmem>>, vector<8x8xbf16>
    %cst_35 = arith.constant dense<0.000000e+00> : vector<8x128xf32>
    %48 = tpu.matmul %47, %3, %cst_35 {dimension_numbers = #tpu.dot_dimension_numbers<[1], [0], [0], [1], [0, 0, 1, 1], [], []>} : vector<8x8xbf16>, vector<8x128xbf16>, vector<8x128xf32> -> vector<8x128xf32>
    %49 = arith.truncf %48 : vector<8x128xf32> to vector<8x128xbf16>
    %c0_36 = arith.constant 0 : index
    %c768 = arith.constant 768 : index
    %c0_37 = arith.constant 0 : index
    %50 = vector.load %arg3[%c0_36, %c768, %c0_37] : memref<1x1152x128xbf16, #tpu.memory_space<vmem>>, vector<1x128x128xbf16>
    %51 = vector.shape_cast %50 : vector<1x128x128xbf16> to vector<128x128xbf16>
    %cst_38 = arith.constant dense<0.000000e+00> : vector<8x128xf32>
    %52 = tpu.matmul %49, %51, %cst_38 {dimension_numbers = #tpu.dot_dimension_numbers<[1], [0], [0], [1], [0, 0, 1, 1], [], []>} : vector<8x128xbf16>, vector<128x128xbf16>, vector<8x128xf32> -> vector<8x128xf32>
    %53 = arith.addf %46, %52 : vector<8x128xf32>
    %c56 = arith.constant 56 : index
    %c0_39 = arith.constant 0 : index
    %54 = vector.load %arg2[%c56, %c0_39] : memref<72x8xbf16, #tpu.memory_space<vmem>>, vector<8x8xbf16>
    %cst_40 = arith.constant dense<0.000000e+00> : vector<8x128xf32>
    %55 = tpu.matmul %54, %3, %cst_40 {dimension_numbers = #tpu.dot_dimension_numbers<[1], [0], [0], [1], [0, 0, 1, 1], [], []>} : vector<8x8xbf16>, vector<8x128xbf16>, vector<8x128xf32> -> vector<8x128xf32>
    %56 = arith.truncf %55 : vector<8x128xf32> to vector<8x128xbf16>
    %c0_41 = arith.constant 0 : index
    %c896 = arith.constant 896 : index
    %c0_42 = arith.constant 0 : index
    %57 = vector.load %arg3[%c0_41, %c896, %c0_42] : memref<1x1152x128xbf16, #tpu.memory_space<vmem>>, vector<1x128x128xbf16>
    %58 = vector.shape_cast %57 : vector<1x128x128xbf16> to vector<128x128xbf16>
    %cst_43 = arith.constant dense<0.000000e+00> : vector<8x128xf32>
    %59 = tpu.matmul %56, %58, %cst_43 {dimension_numbers = #tpu.dot_dimension_numbers<[1], [0], [0], [1], [0, 0, 1, 1], [], []>} : vector<8x128xbf16>, vector<128x128xbf16>, vector<8x128xf32> -> vector<8x128xf32>
    %60 = arith.addf %53, %59 : vector<8x128xf32>
    %c64 = arith.constant 64 : index
    %c0_44 = arith.constant 0 : index
    %61 = vector.load %arg2[%c64, %c0_44] : memref<72x8xbf16, #tpu.memory_space<vmem>>, vector<8x8xbf16>
    %cst_45 = arith.constant dense<0.000000e+00> : vector<8x128xf32>
    %62 = tpu.matmul %61, %3, %cst_45 {dimension_numbers = #tpu.dot_dimension_numbers<[1], [0], [0], [1], [0, 0, 1, 1], [], []>} : vector<8x8xbf16>, vector<8x128xbf16>, vector<8x128xf32> -> vector<8x128xf32>
    %63 = arith.truncf %62 : vector<8x128xf32> to vector<8x128xbf16>
    %c0_46 = arith.constant 0 : index
    %c1024 = arith.constant 1024 : index
    %c0_47 = arith.constant 0 : index
    %64 = vector.load %arg3[%c0_46, %c1024, %c0_47] : memref<1x1152x128xbf16, #tpu.memory_space<vmem>>, vector<1x128x128xbf16>
    %65 = vector.shape_cast %64 : vector<1x128x128xbf16> to vector<128x128xbf16>
    %cst_48 = arith.constant dense<0.000000e+00> : vector<8x128xf32>
    %66 = tpu.matmul %63, %65, %cst_48 {dimension_numbers = #tpu.dot_dimension_numbers<[1], [0], [0], [1], [0, 0, 1, 1], [], []>} : vector<8x128xbf16>, vector<128x128xbf16>, vector<8x128xf32> -> vector<8x128xf32>
    %67 = arith.addf %60, %66 : vector<8x128xf32>
    %c0_49 = arith.constant 0 : index
    %c0_50 = arith.constant 0 : index
    %c0_51 = arith.constant 0 : index
    %68 = vector.load %arg4[%c0_49, %c0_50, %c0_51] : memref<1x1x128xf32, #tpu.memory_space<vmem>>, vector<1x1x128xf32>
    %69 = vector.shape_cast %68 : vector<1x1x128xf32> to vector<1x128xf32>
    %70 = vector.broadcast %69 : vector<1x128xf32> to vector<8x128xf32>
    %71 = arith.addf %67, %70 : vector<8x128xf32>
    %cst_52 = arith.constant 0.000000e+00 : f32
    %72 = vector.broadcast %cst_52 : f32 to vector<8x128xf32>
    %73 = arith.maximumf %71, %72 : vector<8x128xf32>
    %74 = arith.truncf %73 : vector<8x128xf32> to vector<8x128xbf16>
    %cst_53 = arith.constant 0.000000e+00 : f32
    %75 = vector.broadcast %cst_53 : f32 to vector<8x128xf32>
    %c0_54 = arith.constant 0 : index
    %c0_55 = arith.constant 0 : index
    %76 = vector.load %arg2[%c0_54, %c0_55] : memref<72x8xbf16, #tpu.memory_space<vmem>>, vector<8x8xbf16>
    %cst_56 = arith.constant dense<0.000000e+00> : vector<8x128xf32>
    %77 = tpu.matmul %76, %74, %cst_56 {dimension_numbers = #tpu.dot_dimension_numbers<[1], [0], [0], [1], [0, 0, 1, 1], [], []>} : vector<8x8xbf16>, vector<8x128xbf16>, vector<8x128xf32> -> vector<8x128xf32>
    %78 = arith.truncf %77 : vector<8x128xf32> to vector<8x128xbf16>
    %c0_57 = arith.constant 0 : index
    %c0_58 = arith.constant 0 : index
    %c0_59 = arith.constant 0 : index
    %79 = vector.load %arg5[%c0_57, %c0_58, %c0_59] : memref<1x1152x128xbf16, #tpu.memory_space<vmem>>, vector<1x128x128xbf16>
    %80 = vector.shape_cast %79 : vector<1x128x128xbf16> to vector<128x128xbf16>
    %cst_60 = arith.constant dense<0.000000e+00> : vector<8x128xf32>
    %81 = tpu.matmul %78, %80, %cst_60 {dimension_numbers = #tpu.dot_dimension_numbers<[1], [0], [0], [1], [0, 0, 1, 1], [], []>} : vector<8x128xbf16>, vector<128x128xbf16>, vector<8x128xf32> -> vector<8x128xf32>
    %82 = arith.addf %75, %81 : vector<8x128xf32>
    %c8_61 = arith.constant 8 : index
    %c0_62 = arith.constant 0 : index
    %83 = vector.load %arg2[%c8_61, %c0_62] : memref<72x8xbf16, #tpu.memory_space<vmem>>, vector<8x8xbf16>
    %cst_63 = arith.constant dense<0.000000e+00> : vector<8x128xf32>
    %84 = tpu.matmul %83, %74, %cst_63 {dimension_numbers = #tpu.dot_dimension_numbers<[1], [0], [0], [1], [0, 0, 1, 1], [], []>} : vector<8x8xbf16>, vector<8x128xbf16>, vector<8x128xf32> -> vector<8x128xf32>
    %85 = arith.truncf %84 : vector<8x128xf32> to vector<8x128xbf16>
    %c0_64 = arith.constant 0 : index
    %c128_65 = arith.constant 128 : index
    %c0_66 = arith.constant 0 : index
    %86 = vector.load %arg5[%c0_64, %c128_65, %c0_66] : memref<1x1152x128xbf16, #tpu.memory_space<vmem>>, vector<1x128x128xbf16>
    %87 = vector.shape_cast %86 : vector<1x128x128xbf16> to vector<128x128xbf16>
    %cst_67 = arith.constant dense<0.000000e+00> : vector<8x128xf32>
    %88 = tpu.matmul %85, %87, %cst_67 {dimension_numbers = #tpu.dot_dimension_numbers<[1], [0], [0], [1], [0, 0, 1, 1], [], []>} : vector<8x128xbf16>, vector<128x128xbf16>, vector<8x128xf32> -> vector<8x128xf32>
    %89 = arith.addf %82, %88 : vector<8x128xf32>
    %c16_68 = arith.constant 16 : index
    %c0_69 = arith.constant 0 : index
    %90 = vector.load %arg2[%c16_68, %c0_69] : memref<72x8xbf16, #tpu.memory_space<vmem>>, vector<8x8xbf16>
    %cst_70 = arith.constant dense<0.000000e+00> : vector<8x128xf32>
    %91 = tpu.matmul %90, %74, %cst_70 {dimension_numbers = #tpu.dot_dimension_numbers<[1], [0], [0], [1], [0, 0, 1, 1], [], []>} : vector<8x8xbf16>, vector<8x128xbf16>, vector<8x128xf32> -> vector<8x128xf32>
    %92 = arith.truncf %91 : vector<8x128xf32> to vector<8x128xbf16>
    %c0_71 = arith.constant 0 : index
    %c256_72 = arith.constant 256 : index
    %c0_73 = arith.constant 0 : index
    %93 = vector.load %arg5[%c0_71, %c256_72, %c0_73] : memref<1x1152x128xbf16, #tpu.memory_space<vmem>>, vector<1x128x128xbf16>
    %94 = vector.shape_cast %93 : vector<1x128x128xbf16> to vector<128x128xbf16>
    %cst_74 = arith.constant dense<0.000000e+00> : vector<8x128xf32>
    %95 = tpu.matmul %92, %94, %cst_74 {dimension_numbers = #tpu.dot_dimension_numbers<[1], [0], [0], [1], [0, 0, 1, 1], [], []>} : vector<8x128xbf16>, vector<128x128xbf16>, vector<8x128xf32> -> vector<8x128xf32>
    %96 = arith.addf %89, %95 : vector<8x128xf32>
    %c24_75 = arith.constant 24 : index
    %c0_76 = arith.constant 0 : index
    %97 = vector.load %arg2[%c24_75, %c0_76] : memref<72x8xbf16, #tpu.memory_space<vmem>>, vector<8x8xbf16>
    %cst_77 = arith.constant dense<0.000000e+00> : vector<8x128xf32>
    %98 = tpu.matmul %97, %74, %cst_77 {dimension_numbers = #tpu.dot_dimension_numbers<[1], [0], [0], [1], [0, 0, 1, 1], [], []>} : vector<8x8xbf16>, vector<8x128xbf16>, vector<8x128xf32> -> vector<8x128xf32>
    %99 = arith.truncf %98 : vector<8x128xf32> to vector<8x128xbf16>
    %c0_78 = arith.constant 0 : index
    %c384_79 = arith.constant 384 : index
    %c0_80 = arith.constant 0 : index
    %100 = vector.load %arg5[%c0_78, %c384_79, %c0_80] : memref<1x1152x128xbf16, #tpu.memory_space<vmem>>, vector<1x128x128xbf16>
    %101 = vector.shape_cast %100 : vector<1x128x128xbf16> to vector<128x128xbf16>
    %cst_81 = arith.constant dense<0.000000e+00> : vector<8x128xf32>
    %102 = tpu.matmul %99, %101, %cst_81 {dimension_numbers = #tpu.dot_dimension_numbers<[1], [0], [0], [1], [0, 0, 1, 1], [], []>} : vector<8x128xbf16>, vector<128x128xbf16>, vector<8x128xf32> -> vector<8x128xf32>
    %103 = arith.addf %96, %102 : vector<8x128xf32>
    %c32_82 = arith.constant 32 : index
    %c0_83 = arith.constant 0 : index
    %104 = vector.load %arg2[%c32_82, %c0_83] : memref<72x8xbf16, #tpu.memory_space<vmem>>, vector<8x8xbf16>
    %cst_84 = arith.constant dense<0.000000e+00> : vector<8x128xf32>
    %105 = tpu.matmul %104, %74, %cst_84 {dimension_numbers = #tpu.dot_dimension_numbers<[1], [0], [0], [1], [0, 0, 1, 1], [], []>} : vector<8x8xbf16>, vector<8x128xbf16>, vector<8x128xf32> -> vector<8x128xf32>
    %106 = arith.truncf %105 : vector<8x128xf32> to vector<8x128xbf16>
    %c0_85 = arith.constant 0 : index
    %c512_86 = arith.constant 512 : index
    %c0_87 = arith.constant 0 : index
    %107 = vector.load %arg5[%c0_85, %c512_86, %c0_87] : memref<1x1152x128xbf16, #tpu.memory_space<vmem>>, vector<1x128x128xbf16>
    %108 = vector.shape_cast %107 : vector<1x128x128xbf16> to vector<128x128xbf16>
    %cst_88 = arith.constant dense<0.000000e+00> : vector<8x128xf32>
    %109 = tpu.matmul %106, %108, %cst_88 {dimension_numbers = #tpu.dot_dimension_numbers<[1], [0], [0], [1], [0, 0, 1, 1], [], []>} : vector<8x128xbf16>, vector<128x128xbf16>, vector<8x128xf32> -> vector<8x128xf32>
    %110 = arith.addf %103, %109 : vector<8x128xf32>
    %c40_89 = arith.constant 40 : index
    %c0_90 = arith.constant 0 : index
    %111 = vector.load %arg2[%c40_89, %c0_90] : memref<72x8xbf16, #tpu.memory_space<vmem>>, vector<8x8xbf16>
    %cst_91 = arith.constant dense<0.000000e+00> : vector<8x128xf32>
    %112 = tpu.matmul %111, %74, %cst_91 {dimension_numbers = #tpu.dot_dimension_numbers<[1], [0], [0], [1], [0, 0, 1, 1], [], []>} : vector<8x8xbf16>, vector<8x128xbf16>, vector<8x128xf32> -> vector<8x128xf32>
    %113 = arith.truncf %112 : vector<8x128xf32> to vector<8x128xbf16>
    %c0_92 = arith.constant 0 : index
    %c640_93 = arith.constant 640 : index
    %c0_94 = arith.constant 0 : index
    %114 = vector.load %arg5[%c0_92, %c640_93, %c0_94] : memref<1x1152x128xbf16, #tpu.memory_space<vmem>>, vector<1x128x128xbf16>
    %115 = vector.shape_cast %114 : vector<1x128x128xbf16> to vector<128x128xbf16>
    %cst_95 = arith.constant dense<0.000000e+00> : vector<8x128xf32>
    %116 = tpu.matmul %113, %115, %cst_95 {dimension_numbers = #tpu.dot_dimension_numbers<[1], [0], [0], [1], [0, 0, 1, 1], [], []>} : vector<8x128xbf16>, vector<128x128xbf16>, vector<8x128xf32> -> vector<8x128xf32>
    %117 = arith.addf %110, %116 : vector<8x128xf32>
    %c48_96 = arith.constant 48 : index
    %c0_97 = arith.constant 0 : index
    %118 = vector.load %arg2[%c48_96, %c0_97] : memref<72x8xbf16, #tpu.memory_space<vmem>>, vector<8x8xbf16>
    %cst_98 = arith.constant dense<0.000000e+00> : vector<8x128xf32>
    %119 = tpu.matmul %118, %74, %cst_98 {dimension_numbers = #tpu.dot_dimension_numbers<[1], [0], [0], [1], [0, 0, 1, 1], [], []>} : vector<8x8xbf16>, vector<8x128xbf16>, vector<8x128xf32> -> vector<8x128xf32>
    %120 = arith.truncf %119 : vector<8x128xf32> to vector<8x128xbf16>
    %c0_99 = arith.constant 0 : index
    %c768_100 = arith.constant 768 : index
    %c0_101 = arith.constant 0 : index
    %121 = vector.load %arg5[%c0_99, %c768_100, %c0_101] : memref<1x1152x128xbf16, #tpu.memory_space<vmem>>, vector<1x128x128xbf16>
    %122 = vector.shape_cast %121 : vector<1x128x128xbf16> to vector<128x128xbf16>
    %cst_102 = arith.constant dense<0.000000e+00> : vector<8x128xf32>
    %123 = tpu.matmul %120, %122, %cst_102 {dimension_numbers = #tpu.dot_dimension_numbers<[1], [0], [0], [1], [0, 0, 1, 1], [], []>} : vector<8x128xbf16>, vector<128x128xbf16>, vector<8x128xf32> -> vector<8x128xf32>
    %124 = arith.addf %117, %123 : vector<8x128xf32>
    %c56_103 = arith.constant 56 : index
    %c0_104 = arith.constant 0 : index
    %125 = vector.load %arg2[%c56_103, %c0_104] : memref<72x8xbf16, #tpu.memory_space<vmem>>, vector<8x8xbf16>
    %cst_105 = arith.constant dense<0.000000e+00> : vector<8x128xf32>
    %126 = tpu.matmul %125, %74, %cst_105 {dimension_numbers = #tpu.dot_dimension_numbers<[1], [0], [0], [1], [0, 0, 1, 1], [], []>} : vector<8x8xbf16>, vector<8x128xbf16>, vector<8x128xf32> -> vector<8x128xf32>
    %127 = arith.truncf %126 : vector<8x128xf32> to vector<8x128xbf16>
    %c0_106 = arith.constant 0 : index
    %c896_107 = arith.constant 896 : index
    %c0_108 = arith.constant 0 : index
    %128 = vector.load %arg5[%c0_106, %c896_107, %c0_108] : memref<1x1152x128xbf16, #tpu.memory_space<vmem>>, vector<1x128x128xbf16>
    %129 = vector.shape_cast %128 : vector<1x128x128xbf16> to vector<128x128xbf16>
    %cst_109 = arith.constant dense<0.000000e+00> : vector<8x128xf32>
    %130 = tpu.matmul %127, %129, %cst_109 {dimension_numbers = #tpu.dot_dimension_numbers<[1], [0], [0], [1], [0, 0, 1, 1], [], []>} : vector<8x128xbf16>, vector<128x128xbf16>, vector<8x128xf32> -> vector<8x128xf32>
    %131 = arith.addf %124, %130 : vector<8x128xf32>
    %c64_110 = arith.constant 64 : index
    %c0_111 = arith.constant 0 : index
    %132 = vector.load %arg2[%c64_110, %c0_111] : memref<72x8xbf16, #tpu.memory_space<vmem>>, vector<8x8xbf16>
    %cst_112 = arith.constant dense<0.000000e+00> : vector<8x128xf32>
    %133 = tpu.matmul %132, %74, %cst_112 {dimension_numbers = #tpu.dot_dimension_numbers<[1], [0], [0], [1], [0, 0, 1, 1], [], []>} : vector<8x8xbf16>, vector<8x128xbf16>, vector<8x128xf32> -> vector<8x128xf32>
    %134 = arith.truncf %133 : vector<8x128xf32> to vector<8x128xbf16>
    %c0_113 = arith.constant 0 : index
    %c1024_114 = arith.constant 1024 : index
    %c0_115 = arith.constant 0 : index
    %135 = vector.load %arg5[%c0_113, %c1024_114, %c0_115] : memref<1x1152x128xbf16, #tpu.memory_space<vmem>>, vector<1x128x128xbf16>
    %136 = vector.shape_cast %135 : vector<1x128x128xbf16> to vector<128x128xbf16>
    %cst_116 = arith.constant dense<0.000000e+00> : vector<8x128xf32>
    %137 = tpu.matmul %134, %136, %cst_116 {dimension_numbers = #tpu.dot_dimension_numbers<[1], [0], [0], [1], [0, 0, 1, 1], [], []>} : vector<8x128xbf16>, vector<128x128xbf16>, vector<8x128xf32> -> vector<8x128xf32>
    %138 = arith.addf %131, %137 : vector<8x128xf32>
    %c0_117 = arith.constant 0 : index
    %c0_118 = arith.constant 0 : index
    %c0_119 = arith.constant 0 : index
    %139 = vector.load %arg6[%c0_117, %c0_118, %c0_119] : memref<1x1x128xf32, #tpu.memory_space<vmem>>, vector<1x1x128xf32>
    %140 = vector.shape_cast %139 : vector<1x1x128xf32> to vector<1x128xf32>
    %141 = vector.broadcast %140 : vector<1x128xf32> to vector<8x128xf32>
    %142 = arith.addf %138, %141 : vector<8x128xf32>
    %143 = arith.extf %3 : vector<8x128xbf16> to vector<8x128xf32>
    %144 = arith.addf %142, %143 : vector<8x128xf32>
    %cst_120 = arith.constant 0.000000e+00 : f32
    %145 = vector.broadcast %cst_120 : f32 to vector<8x128xf32>
    %146 = arith.maximumf %144, %145 : vector<8x128xf32>
    %147 = arith.truncf %146 : vector<8x128xf32> to vector<8x128xbf16>
    %c0_121 = arith.constant 0 : index
    %c0_122 = arith.constant 0 : index
    %148 = vector.load %arg7[%c0_121, %c0_122] : memref<8x128xbf16, #tpu.memory_space<vmem>>, vector<8x128xbf16>
    tpu.vector_store %arg7[%c0_121, %c0_122], %147 {strides = array<i32>} : memref<8x128xbf16, #tpu.memory_space<vmem>>, vector<8x128xbf16>,
    return
  }
  func.func @transform_0(%arg0: i32) -> (i32, i32) {
    %c0_i32 = arith.constant 0 : i32
    %c0_i32_0 = arith.constant 0 : i32
    %c0_i32_1 = arith.constant 0 : i32
    return %c0_i32, %c0_i32_0 : i32, i32
  }
  func.func @transform_1(%arg0: i32) -> (i32, i32) {
    %c0_i32 = arith.constant 0 : i32
    %c0_i32_0 = arith.constant 0 : i32
    %c0_i32_1 = arith.constant 0 : i32
    return %c0_i32, %c0_i32_0 : i32, i32
  }
  func.func @transform_2(%arg0: i32) -> (i32, i32, i32) {
    %c0_i32 = arith.constant 0 : i32
    %c0_i32_0 = arith.constant 0 : i32
    %c0_i32_1 = arith.constant 0 : i32
    return %arg0, %c0_i32, %c0_i32_0 : i32, i32, i32
  }
  func.func @transform_3(%arg0: i32) -> (i32, i32, i32) {
    %c0_i32 = arith.constant 0 : i32
    %c0_i32_0 = arith.constant 0 : i32
    %c0_i32_1 = arith.constant 0 : i32
    return %arg0, %c0_i32, %c0_i32_0 : i32, i32, i32
  }
  func.func @transform_4(%arg0: i32) -> (i32, i32, i32) {
    %c0_i32 = arith.constant 0 : i32
    %c0_i32_0 = arith.constant 0 : i32
    %c0_i32_1 = arith.constant 0 : i32
    return %arg0, %c0_i32, %c0_i32_0 : i32, i32, i32
  }
  func.func @transform_5(%arg0: i32) -> (i32, i32, i32) {
    %c0_i32 = arith.constant 0 : i32
    %c0_i32_0 = arith.constant 0 : i32
    %c0_i32_1 = arith.constant 0 : i32
    return %arg0, %c0_i32, %c0_i32_0 : i32, i32, i32
  }
  func.func @transform_6(%arg0: i32) -> (i32, i32) {
    %c0_i32 = arith.constant 0 : i32
    %c0_i32_0 = arith.constant 0 : i32
    %c0_i32_1 = arith.constant 0 : i32
    return %c0_i32, %c0_i32_0 : i32, i32
  }
}

module attributes {stable_mosaic.version = 11 : i64} {
  func.func @kernel(%arg0: i32, %arg1: memref<8x128xbf16, #tpu.memory_space<vmem>>, %arg2: memref<32x8xbf16, #tpu.memory_space<vmem>>, %arg3: memref<1152x256xbf16, #tpu.memory_space<vmem>>, %arg4: memref<1x256xf32, #tpu.memory_space<vmem>>, %arg5: memref<256x256xbf16, #tpu.memory_space<vmem>>, %arg6: memref<1x256xf32, #tpu.memory_space<vmem>>, %arg7: memref<2x8xbf16, #tpu.memory_space<vmem>>, %arg8: memref<128x256xbf16, #tpu.memory_space<vmem>>, %arg9: memref<1x256xf32, #tpu.memory_space<vmem>>, %arg10: memref<2x256xbf16, #tpu.memory_space<vmem>>) attributes {dimension_semantics = [#tpu.dimension_semantics<arbitrary>], iteration_bounds = array<i64: 1>, scalar_prefetch = 0 : i64, scratch_operands = 0 : i64, tpu.core_type = #tpu.core_type<tc>, window_params = [{pipeline_mode = #tpu.pipeline_mode<synchronous>, transform_indices = @transform_0, window_bounds = array<i64: 8, 128>}, {pipeline_mode = #tpu.pipeline_mode<synchronous>, transform_indices = @transform_1, window_bounds = array<i64: 32, 8>}, {pipeline_mode = #tpu.pipeline_mode<synchronous>, transform_indices = @transform_2, window_bounds = array<i64: 1152, 256>}, {pipeline_mode = #tpu.pipeline_mode<synchronous>, transform_indices = @transform_3, window_bounds = array<i64: 1, 256>}, {transform_indices = @transform_4, window_bounds = array<i64: 256, 256>}, {pipeline_mode = #tpu.pipeline_mode<synchronous>, transform_indices = @transform_5, window_bounds = array<i64: 1, 256>}, {pipeline_mode = #tpu.pipeline_mode<synchronous>, transform_indices = @transform_6, window_bounds = array<i64: 2, 8>}, {pipeline_mode = #tpu.pipeline_mode<synchronous>, transform_indices = @transform_7, window_bounds = array<i64: 128, 256>}, {pipeline_mode = #tpu.pipeline_mode<synchronous>, transform_indices = @transform_8, window_bounds = array<i64: 1, 256>}, {pipeline_mode = #tpu.pipeline_mode<synchronous>, transform_indices = @transform_9, window_bounds = array<i64: 2, 256>}]} {
    %c0 = arith.constant 0 : index
    %c0_0 = arith.constant 0 : index
    %0 = vector.load %arg1[%c0, %c0_0] : memref<8x128xbf16, #tpu.memory_space<vmem>>, vector<8x128xbf16>
    %cst = arith.constant 0.000000e+00 : f32
    %1 = vector.broadcast %cst : f32 to vector<2x256xf32>
    %c0_1 = arith.constant 0 : index
    %c0_2 = arith.constant 0 : index
    %2 = vector.load %arg2[%c0_1, %c0_2] : memref<32x8xbf16, #tpu.memory_space<vmem>>, vector<2x8xbf16>
    %cst_3 = arith.constant dense<0.000000e+00> : vector<2x128xf32>
    %3 = tpu.matmul %2, %0, %cst_3 {dimension_numbers = #tpu.dot_dimension_numbers<[1], [0], [0], [1], [0, 0, 1, 1], [], []>} : vector<2x8xbf16>, vector<8x128xbf16>, vector<2x128xf32> -> vector<2x128xf32>
    %4 = arith.truncf %3 : vector<2x128xf32> to vector<2x128xbf16>
    %c512 = arith.constant 512 : index
    %c0_4 = arith.constant 0 : index
    %5 = vector.load %arg3[%c512, %c0_4] : memref<1152x256xbf16, #tpu.memory_space<vmem>>, vector<128x256xbf16>
    %cst_5 = arith.constant dense<0.000000e+00> : vector<2x256xf32>
    %6 = tpu.matmul %4, %5, %cst_5 {dimension_numbers = #tpu.dot_dimension_numbers<[1], [0], [0], [1], [0, 0, 1, 1], [], []>} : vector<2x128xbf16>, vector<128x256xbf16>, vector<2x256xf32> -> vector<2x256xf32>
    %7 = arith.addf %1, %6 : vector<2x256xf32>
    %c8 = arith.constant 8 : index
    %c0_6 = arith.constant 0 : index
    %8 = vector.load %arg2[%c8, %c0_6] : memref<32x8xbf16, #tpu.memory_space<vmem>>, vector<2x8xbf16>
    %cst_7 = arith.constant dense<0.000000e+00> : vector<2x128xf32>
    %9 = tpu.matmul %8, %0, %cst_7 {dimension_numbers = #tpu.dot_dimension_numbers<[1], [0], [0], [1], [0, 0, 1, 1], [], []>} : vector<2x8xbf16>, vector<8x128xbf16>, vector<2x128xf32> -> vector<2x128xf32>
    %10 = arith.truncf %9 : vector<2x128xf32> to vector<2x128xbf16>
    %c640 = arith.constant 640 : index
    %c0_8 = arith.constant 0 : index
    %11 = vector.load %arg3[%c640, %c0_8] : memref<1152x256xbf16, #tpu.memory_space<vmem>>, vector<128x256xbf16>
    %cst_9 = arith.constant dense<0.000000e+00> : vector<2x256xf32>
    %12 = tpu.matmul %10, %11, %cst_9 {dimension_numbers = #tpu.dot_dimension_numbers<[1], [0], [0], [1], [0, 0, 1, 1], [], []>} : vector<2x128xbf16>, vector<128x256xbf16>, vector<2x256xf32> -> vector<2x256xf32>
    %13 = arith.addf %7, %12 : vector<2x256xf32>
    %c16 = arith.constant 16 : index
    %c0_10 = arith.constant 0 : index
    %14 = vector.load %arg2[%c16, %c0_10] : memref<32x8xbf16, #tpu.memory_space<vmem>>, vector<2x8xbf16>
    %cst_11 = arith.constant dense<0.000000e+00> : vector<2x128xf32>
    %15 = tpu.matmul %14, %0, %cst_11 {dimension_numbers = #tpu.dot_dimension_numbers<[1], [0], [0], [1], [0, 0, 1, 1], [], []>} : vector<2x8xbf16>, vector<8x128xbf16>, vector<2x128xf32> -> vector<2x128xf32>
    %16 = arith.truncf %15 : vector<2x128xf32> to vector<2x128xbf16>
    %c896 = arith.constant 896 : index
    %c0_12 = arith.constant 0 : index
    %17 = vector.load %arg3[%c896, %c0_12] : memref<1152x256xbf16, #tpu.memory_space<vmem>>, vector<128x256xbf16>
    %cst_13 = arith.constant dense<0.000000e+00> : vector<2x256xf32>
    %18 = tpu.matmul %16, %17, %cst_13 {dimension_numbers = #tpu.dot_dimension_numbers<[1], [0], [0], [1], [0, 0, 1, 1], [], []>} : vector<2x128xbf16>, vector<128x256xbf16>, vector<2x256xf32> -> vector<2x256xf32>
    %19 = arith.addf %13, %18 : vector<2x256xf32>
    %c24 = arith.constant 24 : index
    %c0_14 = arith.constant 0 : index
    %20 = vector.load %arg2[%c24, %c0_14] : memref<32x8xbf16, #tpu.memory_space<vmem>>, vector<2x8xbf16>
    %cst_15 = arith.constant dense<0.000000e+00> : vector<2x128xf32>
    %21 = tpu.matmul %20, %0, %cst_15 {dimension_numbers = #tpu.dot_dimension_numbers<[1], [0], [0], [1], [0, 0, 1, 1], [], []>} : vector<2x8xbf16>, vector<8x128xbf16>, vector<2x128xf32> -> vector<2x128xf32>
    %22 = arith.truncf %21 : vector<2x128xf32> to vector<2x128xbf16>
    %c1024 = arith.constant 1024 : index
    %c0_16 = arith.constant 0 : index
    %23 = vector.load %arg3[%c1024, %c0_16] : memref<1152x256xbf16, #tpu.memory_space<vmem>>, vector<128x256xbf16>
    %cst_17 = arith.constant dense<0.000000e+00> : vector<2x256xf32>
    %24 = tpu.matmul %22, %23, %cst_17 {dimension_numbers = #tpu.dot_dimension_numbers<[1], [0], [0], [1], [0, 0, 1, 1], [], []>} : vector<2x128xbf16>, vector<128x256xbf16>, vector<2x256xf32> -> vector<2x256xf32>
    %25 = arith.addf %19, %24 : vector<2x256xf32>
    %c0_18 = arith.constant 0 : index
    %c0_19 = arith.constant 0 : index
    %26 = vector.load %arg4[%c0_18, %c0_19] : memref<1x256xf32, #tpu.memory_space<vmem>>, vector<1x256xf32>
    %27 = vector.broadcast %26 : vector<1x256xf32> to vector<2x256xf32>
    %28 = arith.addf %25, %27 : vector<2x256xf32>
    %cst_20 = arith.constant 0.000000e+00 : f32
    %29 = vector.broadcast %cst_20 : f32 to vector<2x256xf32>
    %30 = arith.maximumf %28, %29 : vector<2x256xf32>
    %31 = arith.truncf %30 : vector<2x256xf32> to vector<2x256xbf16>
    %c0_21 = arith.constant 0 : index
    %c0_22 = arith.constant 0 : index
    %32 = vector.load %arg5[%c0_21, %c0_22] : memref<256x256xbf16, #tpu.memory_space<vmem>>, vector<256x256xbf16>
    %cst_23 = arith.constant dense<0.000000e+00> : vector<2x256xf32>
    %33 = tpu.matmul %31, %32, %cst_23 {dimension_numbers = #tpu.dot_dimension_numbers<[1], [0], [0], [1], [0, 0, 1, 1], [], []>} : vector<2x256xbf16>, vector<256x256xbf16>, vector<2x256xf32> -> vector<2x256xf32>
    %c0_24 = arith.constant 0 : index
    %c0_25 = arith.constant 0 : index
    %34 = vector.load %arg6[%c0_24, %c0_25] : memref<1x256xf32, #tpu.memory_space<vmem>>, vector<1x256xf32>
    %35 = vector.broadcast %34 : vector<1x256xf32> to vector<2x256xf32>
    %36 = arith.addf %33, %35 : vector<2x256xf32>
    %c0_26 = arith.constant 0 : index
    %c0_27 = arith.constant 0 : index
    %37 = vector.load %arg7[%c0_26, %c0_27] : memref<2x8xbf16, #tpu.memory_space<vmem>>, vector<2x8xbf16>
    %cst_28 = arith.constant dense<0.000000e+00> : vector<2x128xf32>
    %38 = tpu.matmul %37, %0, %cst_28 {dimension_numbers = #tpu.dot_dimension_numbers<[1], [0], [0], [1], [0, 0, 1, 1], [], []>} : vector<2x8xbf16>, vector<8x128xbf16>, vector<2x128xf32> -> vector<2x128xf32>
    %39 = arith.truncf %38 : vector<2x128xf32> to vector<2x128xbf16>
    %c0_29 = arith.constant 0 : index
    %c0_30 = arith.constant 0 : index
    %40 = vector.load %arg8[%c0_29, %c0_30] : memref<128x256xbf16, #tpu.memory_space<vmem>>, vector<128x256xbf16>
    %cst_31 = arith.constant dense<0.000000e+00> : vector<2x256xf32>
    %41 = tpu.matmul %39, %40, %cst_31 {dimension_numbers = #tpu.dot_dimension_numbers<[1], [0], [0], [1], [0, 0, 1, 1], [], []>} : vector<2x128xbf16>, vector<128x256xbf16>, vector<2x256xf32> -> vector<2x256xf32>
    %c0_32 = arith.constant 0 : index
    %c0_33 = arith.constant 0 : index
    %42 = vector.load %arg9[%c0_32, %c0_33] : memref<1x256xf32, #tpu.memory_space<vmem>>, vector<1x256xf32>
    %43 = vector.broadcast %42 : vector<1x256xf32> to vector<2x256xf32>
    %44 = arith.addf %41, %43 : vector<2x256xf32>
    %45 = arith.addf %36, %44 : vector<2x256xf32>
    %cst_34 = arith.constant 0.000000e+00 : f32
    %46 = vector.broadcast %cst_34 : f32 to vector<2x256xf32>
    %47 = arith.maximumf %45, %46 : vector<2x256xf32>
    %48 = arith.truncf %47 : vector<2x256xf32> to vector<2x256xbf16>
    %c0_35 = arith.constant 0 : index
    %c0_36 = arith.constant 0 : index
    %49 = vector.load %arg10[%c0_35, %c0_36] : memref<2x256xbf16, #tpu.memory_space<vmem>>, vector<2x256xbf16>
    tpu.vector_store %arg10[%c0_35, %c0_36], %48 {strides = array<i32>} : memref<2x256xbf16, #tpu.memory_space<vmem>>, vector<2x256xbf16>,
    return
  }
  func.func @transform_0(%arg0: i32) -> (i32, i32) {
    %c0_i32 = arith.constant 0 : i32
    %c0_i32_0 = arith.constant 0 : i32
    %c0_i32_1 = arith.constant 0 : i32
    return %c0_i32, %c0_i32_0 : i32, i32
  }
  func.func @transform_1(%arg0: i32) -> (i32, i32) {
    %c0_i32 = arith.constant 0 : i32
    %c0_i32_0 = arith.constant 0 : i32
    %c0_i32_1 = arith.constant 0 : i32
    return %c0_i32, %c0_i32_0 : i32, i32
  }
  func.func @transform_2(%arg0: i32) -> (i32, i32) {
    %c0_i32 = arith.constant 0 : i32
    %c0_i32_0 = arith.constant 0 : i32
    %c0_i32_1 = arith.constant 0 : i32
    return %c0_i32, %c0_i32_0 : i32, i32
  }
  func.func @transform_3(%arg0: i32) -> (i32, i32) {
    %c0_i32 = arith.constant 0 : i32
    %c0_i32_0 = arith.constant 0 : i32
    %c0_i32_1 = arith.constant 0 : i32
    return %c0_i32, %c0_i32_0 : i32, i32
  }
  func.func @transform_4(%arg0: i32) -> (i32, i32) {
    %c4_i32 = arith.constant 4 : i32
    %c0_i32 = arith.constant 0 : i32
    %c0_i32_0 = arith.constant 0 : i32
    return %c4_i32, %c0_i32 : i32, i32
  }
  func.func @transform_5(%arg0: i32) -> (i32, i32) {
    %c0_i32 = arith.constant 0 : i32
    %c0_i32_0 = arith.constant 0 : i32
    %c0_i32_1 = arith.constant 0 : i32
    return %c0_i32, %c0_i32_0 : i32, i32
  }
  func.func @transform_6(%arg0: i32) -> (i32, i32) {
    %c0_i32 = arith.constant 0 : i32
    %c0_i32_0 = arith.constant 0 : i32
    %c0_i32_1 = arith.constant 0 : i32
    return %c0_i32, %c0_i32_0 : i32, i32
  }
  func.func @transform_7(%arg0: i32) -> (i32, i32) {
    %c0_i32 = arith.constant 0 : i32
    %c0_i32_0 = arith.constant 0 : i32
    %c0_i32_1 = arith.constant 0 : i32
    return %c0_i32, %c0_i32_0 : i32, i32
  }
  func.func @transform_8(%arg0: i32) -> (i32, i32) {
    %c0_i32 = arith.constant 0 : i32
    %c0_i32_0 = arith.constant 0 : i32
    %c0_i32_1 = arith.constant 0 : i32
    return %c0_i32, %c0_i32_0 : i32, i32
  }
  func.func @transform_9(%arg0: i32) -> (i32, i32) {
    %c0_i32 = arith.constant 0 : i32
    %c0_i32_0 = arith.constant 0 : i32
    %c0_i32_1 = arith.constant 0 : i32
    return %c0_i32, %c0_i32_0 : i32, i32
  }
}

module attributes {stable_mosaic.version = 11 : i64} {
  func.func @kernel(%arg0: i32, %arg1: memref<2x256xbf16, #tpu.memory_space<vmem>>, %arg2: memref<1x256x256xbf16, #tpu.memory_space<vmem>>, %arg3: memref<1x1x256xf32, #tpu.memory_space<vmem>>, %arg4: memref<1x256x256xbf16, #tpu.memory_space<vmem>>, %arg5: memref<1x1x256xf32, #tpu.memory_space<vmem>>, %arg6: memref<2x256xbf16, #tpu.memory_space<vmem>>) attributes {dimension_semantics = [#tpu.dimension_semantics<arbitrary>], iteration_bounds = array<i64: 5>, scalar_prefetch = 0 : i64, scratch_operands = 0 : i64, tpu.core_type = #tpu.core_type<tc>, window_params = [{pipeline_mode = #tpu.pipeline_mode<synchronous>, transform_indices = @transform_0, window_bounds = array<i64: 2, 256>}, {transform_indices = @transform_1, window_bounds = array<i64: 1, 256, 256>}, {transform_indices = @transform_2, window_bounds = array<i64: 1, 1, 256>}, {transform_indices = @transform_3, window_bounds = array<i64: 1, 256, 256>}, {transform_indices = @transform_4, window_bounds = array<i64: 1, 1, 256>}, {pipeline_mode = #tpu.pipeline_mode<synchronous>, transform_indices = @transform_5, window_bounds = array<i64: 2, 256>}]} {
    %c0_i32 = arith.constant 0 : i32
    %0 = arith.cmpi eq, %arg0, %c0_i32 : i32
    %1 = arith.extui %0 : i1 to i32
    %c0_i32_0 = arith.constant 0 : i32
    %2 = arith.cmpi ne, %1, %c0_i32_0 : i32
    scf.if %2 {
      %c0_19 = arith.constant 0 : index
      %c0_20 = arith.constant 0 : index
      %27 = vector.load %arg1[%c0_19, %c0_20] : memref<2x256xbf16, #tpu.memory_space<vmem>>, vector<2x256xbf16>
      %c0_21 = arith.constant 0 : index
      %c0_22 = arith.constant 0 : index
      %28 = vector.load %arg6[%c0_21, %c0_22] : memref<2x256xbf16, #tpu.memory_space<vmem>>, vector<2x256xbf16>
      tpu.vector_store %arg6[%c0_21, %c0_22], %27 {strides = array<i32>} : memref<2x256xbf16, #tpu.memory_space<vmem>>, vector<2x256xbf16>,
    } else {
    }
    %c0 = arith.constant 0 : index
    %c0_1 = arith.constant 0 : index
    %3 = vector.load %arg6[%c0, %c0_1] : memref<2x256xbf16, #tpu.memory_space<vmem>>, vector<2x256xbf16>
    %c0_2 = arith.constant 0 : index
    %c0_3 = arith.constant 0 : index
    %c0_4 = arith.constant 0 : index
    %4 = vector.load %arg2[%c0_2, %c0_3, %c0_4] : memref<1x256x256xbf16, #tpu.memory_space<vmem>>, vector<1x256x256xbf16>
    %5 = vector.shape_cast %4 : vector<1x256x256xbf16> to vector<256x256xbf16>
    %cst = arith.constant dense<0.000000e+00> : vector<2x256xf32>
    %6 = tpu.matmul %3, %5, %cst {dimension_numbers = #tpu.dot_dimension_numbers<[1], [0], [0], [1], [0, 0, 1, 1], [], []>} : vector<2x256xbf16>, vector<256x256xbf16>, vector<2x256xf32> -> vector<2x256xf32>
    %c0_5 = arith.constant 0 : index
    %c0_6 = arith.constant 0 : index
    %c0_7 = arith.constant 0 : index
    %7 = vector.load %arg3[%c0_5, %c0_6, %c0_7] : memref<1x1x256xf32, #tpu.memory_space<vmem>>, vector<1x1x256xf32>
    %8 = vector.shape_cast %7 : vector<1x1x256xf32> to vector<1x256xf32>
    %9 = vector.broadcast %8 : vector<1x256xf32> to vector<2x256xf32>
    %10 = arith.addf %6, %9 : vector<2x256xf32>
    %cst_8 = arith.constant 0.000000e+00 : f32
    %11 = vector.broadcast %cst_8 : f32 to vector<2x256xf32>
    %12 = arith.maximumf %10, %11 : vector<2x256xf32>
    %13 = arith.truncf %12 : vector<2x256xf32> to vector<2x256xbf16>
    %c0_9 = arith.constant 0 : index
    %c0_10 = arith.constant 0 : index
    %c0_11 = arith.constant 0 : index
    %14 = vector.load %arg4[%c0_9, %c0_10, %c0_11] : memref<1x256x256xbf16, #tpu.memory_space<vmem>>, vector<1x256x256xbf16>
    %15 = vector.shape_cast %14 : vector<1x256x256xbf16> to vector<256x256xbf16>
    %cst_12 = arith.constant dense<0.000000e+00> : vector<2x256xf32>
    %16 = tpu.matmul %13, %15, %cst_12 {dimension_numbers = #tpu.dot_dimension_numbers<[1], [0], [0], [1], [0, 0, 1, 1], [], []>} : vector<2x256xbf16>, vector<256x256xbf16>, vector<2x256xf32> -> vector<2x256xf32>
    %c0_13 = arith.constant 0 : index
    %c0_14 = arith.constant 0 : index
    %c0_15 = arith.constant 0 : index
    %17 = vector.load %arg5[%c0_13, %c0_14, %c0_15] : memref<1x1x256xf32, #tpu.memory_space<vmem>>, vector<1x1x256xf32>
    %18 = vector.shape_cast %17 : vector<1x1x256xf32> to vector<1x256xf32>
    %19 = vector.broadcast %18 : vector<1x256xf32> to vector<2x256xf32>
    %20 = arith.addf %16, %19 : vector<2x256xf32>
    %21 = arith.extf %3 : vector<2x256xbf16> to vector<2x256xf32>
    %22 = arith.addf %20, %21 : vector<2x256xf32>
    %cst_16 = arith.constant 0.000000e+00 : f32
    %23 = vector.broadcast %cst_16 : f32 to vector<2x256xf32>
    %24 = arith.maximumf %22, %23 : vector<2x256xf32>
    %25 = arith.truncf %24 : vector<2x256xf32> to vector<2x256xbf16>
    %c0_17 = arith.constant 0 : index
    %c0_18 = arith.constant 0 : index
    %26 = vector.load %arg6[%c0_17, %c0_18] : memref<2x256xbf16, #tpu.memory_space<vmem>>, vector<2x256xbf16>
    tpu.vector_store %arg6[%c0_17, %c0_18], %25 {strides = array<i32>} : memref<2x256xbf16, #tpu.memory_space<vmem>>, vector<2x256xbf16>,
    return
  }
  func.func @transform_0(%arg0: i32) -> (i32, i32) {
    %c0_i32 = arith.constant 0 : i32
    %c0_i32_0 = arith.constant 0 : i32
    %c0_i32_1 = arith.constant 0 : i32
    return %c0_i32, %c0_i32_0 : i32, i32
  }
  func.func @transform_1(%arg0: i32) -> (i32, i32, i32) {
    %c4_i32 = arith.constant 4 : i32
    %c0_i32 = arith.constant 0 : i32
    %c0_i32_0 = arith.constant 0 : i32
    return %arg0, %c4_i32, %c0_i32 : i32, i32, i32
  }
  func.func @transform_2(%arg0: i32) -> (i32, i32, i32) {
    %c0_i32 = arith.constant 0 : i32
    %c0_i32_0 = arith.constant 0 : i32
    %c0_i32_1 = arith.constant 0 : i32
    return %arg0, %c0_i32, %c0_i32_0 : i32, i32, i32
  }
  func.func @transform_3(%arg0: i32) -> (i32, i32, i32) {
    %c4_i32 = arith.constant 4 : i32
    %c0_i32 = arith.constant 0 : i32
    %c0_i32_0 = arith.constant 0 : i32
    return %arg0, %c4_i32, %c0_i32 : i32, i32, i32
  }
  func.func @transform_4(%arg0: i32) -> (i32, i32, i32) {
    %c0_i32 = arith.constant 0 : i32
    %c0_i32_0 = arith.constant 0 : i32
    %c0_i32_1 = arith.constant 0 : i32
    return %arg0, %c0_i32, %c0_i32_0 : i32, i32, i32
  }
  func.func @transform_5(%arg0: i32) -> (i32, i32) {
    %c0_i32 = arith.constant 0 : i32
    %c0_i32_0 = arith.constant 0 : i32
    %c0_i32_1 = arith.constant 0 : i32
    return %c0_i32, %c0_i32_0 : i32, i32
  }
}

module attributes {stable_mosaic.version = 11 : i64} {
  func.func @kernel(%arg0: i32, %arg1: memref<2x256xbf16, #tpu.memory_space<vmem>>, %arg2: memref<256x512xbf16, #tpu.memory_space<vmem>>, %arg3: memref<1x512xf32, #tpu.memory_space<vmem>>, %arg4: memref<512x512xbf16, #tpu.memory_space<vmem>>, %arg5: memref<1x512xf32, #tpu.memory_space<vmem>>, %arg6: memref<256x512xbf16, #tpu.memory_space<vmem>>, %arg7: memref<1x512xf32, #tpu.memory_space<vmem>>, %arg8: memref<2x512xbf16, #tpu.memory_space<vmem>>) attributes {dimension_semantics = [#tpu.dimension_semantics<arbitrary>], iteration_bounds = array<i64: 1>, scalar_prefetch = 0 : i64, scratch_operands = 0 : i64, tpu.core_type = #tpu.core_type<tc>, window_params = [{pipeline_mode = #tpu.pipeline_mode<synchronous>, transform_indices = @transform_0, window_bounds = array<i64: 2, 256>}, {transform_indices = @transform_1, window_bounds = array<i64: 256, 512>}, {pipeline_mode = #tpu.pipeline_mode<synchronous>, transform_indices = @transform_2, window_bounds = array<i64: 1, 512>}, {transform_indices = @transform_3, window_bounds = array<i64: 512, 512>}, {pipeline_mode = #tpu.pipeline_mode<synchronous>, transform_indices = @transform_4, window_bounds = array<i64: 1, 512>}, {pipeline_mode = #tpu.pipeline_mode<synchronous>, transform_indices = @transform_5, window_bounds = array<i64: 256, 512>}, {pipeline_mode = #tpu.pipeline_mode<synchronous>, transform_indices = @transform_6, window_bounds = array<i64: 1, 512>}, {pipeline_mode = #tpu.pipeline_mode<synchronous>, transform_indices = @transform_7, window_bounds = array<i64: 2, 512>}]} {
    %c0 = arith.constant 0 : index
    %c0_0 = arith.constant 0 : index
    %0 = vector.load %arg1[%c0, %c0_0] : memref<2x256xbf16, #tpu.memory_space<vmem>>, vector<2x256xbf16>
    %c0_1 = arith.constant 0 : index
    %c0_2 = arith.constant 0 : index
    %1 = vector.load %arg2[%c0_1, %c0_2] : memref<256x512xbf16, #tpu.memory_space<vmem>>, vector<256x512xbf16>
    %cst = arith.constant dense<0.000000e+00> : vector<2x512xf32>
    %2 = tpu.matmul %0, %1, %cst {dimension_numbers = #tpu.dot_dimension_numbers<[1], [0], [0], [1], [0, 0, 1, 1], [], []>} : vector<2x256xbf16>, vector<256x512xbf16>, vector<2x512xf32> -> vector<2x512xf32>
    %c0_3 = arith.constant 0 : index
    %c0_4 = arith.constant 0 : index
    %3 = vector.load %arg3[%c0_3, %c0_4] : memref<1x512xf32, #tpu.memory_space<vmem>>, vector<1x512xf32>
    %4 = vector.broadcast %3 : vector<1x512xf32> to vector<2x512xf32>
    %5 = arith.addf %2, %4 : vector<2x512xf32>
    %cst_5 = arith.constant 0.000000e+00 : f32
    %6 = vector.broadcast %cst_5 : f32 to vector<2x512xf32>
    %7 = arith.maximumf %5, %6 : vector<2x512xf32>
    %8 = arith.truncf %7 : vector<2x512xf32> to vector<2x512xbf16>
    %c0_6 = arith.constant 0 : index
    %c0_7 = arith.constant 0 : index
    %9 = vector.load %arg4[%c0_6, %c0_7] : memref<512x512xbf16, #tpu.memory_space<vmem>>, vector<512x512xbf16>
    %cst_8 = arith.constant dense<0.000000e+00> : vector<2x512xf32>
    %10 = tpu.matmul %8, %9, %cst_8 {dimension_numbers = #tpu.dot_dimension_numbers<[1], [0], [0], [1], [0, 0, 1, 1], [], []>} : vector<2x512xbf16>, vector<512x512xbf16>, vector<2x512xf32> -> vector<2x512xf32>
    %c0_9 = arith.constant 0 : index
    %c0_10 = arith.constant 0 : index
    %11 = vector.load %arg5[%c0_9, %c0_10] : memref<1x512xf32, #tpu.memory_space<vmem>>, vector<1x512xf32>
    %12 = vector.broadcast %11 : vector<1x512xf32> to vector<2x512xf32>
    %13 = arith.addf %10, %12 : vector<2x512xf32>
    %c0_11 = arith.constant 0 : index
    %c0_12 = arith.constant 0 : index
    %14 = vector.load %arg6[%c0_11, %c0_12] : memref<256x512xbf16, #tpu.memory_space<vmem>>, vector<256x512xbf16>
    %cst_13 = arith.constant dense<0.000000e+00> : vector<2x512xf32>
    %15 = tpu.matmul %0, %14, %cst_13 {dimension_numbers = #tpu.dot_dimension_numbers<[1], [0], [0], [1], [0, 0, 1, 1], [], []>} : vector<2x256xbf16>, vector<256x512xbf16>, vector<2x512xf32> -> vector<2x512xf32>
    %c0_14 = arith.constant 0 : index
    %c0_15 = arith.constant 0 : index
    %16 = vector.load %arg7[%c0_14, %c0_15] : memref<1x512xf32, #tpu.memory_space<vmem>>, vector<1x512xf32>
    %17 = vector.broadcast %16 : vector<1x512xf32> to vector<2x512xf32>
    %18 = arith.addf %15, %17 : vector<2x512xf32>
    %19 = arith.addf %13, %18 : vector<2x512xf32>
    %cst_16 = arith.constant 0.000000e+00 : f32
    %20 = vector.broadcast %cst_16 : f32 to vector<2x512xf32>
    %21 = arith.maximumf %19, %20 : vector<2x512xf32>
    %22 = arith.truncf %21 : vector<2x512xf32> to vector<2x512xbf16>
    %c0_17 = arith.constant 0 : index
    %c0_18 = arith.constant 0 : index
    %23 = vector.load %arg8[%c0_17, %c0_18] : memref<2x512xbf16, #tpu.memory_space<vmem>>, vector<2x512xbf16>
    tpu.vector_store %arg8[%c0_17, %c0_18], %22 {strides = array<i32>} : memref<2x512xbf16, #tpu.memory_space<vmem>>, vector<2x512xbf16>,
    return
  }
  func.func @transform_0(%arg0: i32) -> (i32, i32) {
    %c0_i32 = arith.constant 0 : i32
    %c0_i32_0 = arith.constant 0 : i32
    %c0_i32_1 = arith.constant 0 : i32
    return %c0_i32, %c0_i32_0 : i32, i32
  }
  func.func @transform_1(%arg0: i32) -> (i32, i32) {
    %c4_i32 = arith.constant 4 : i32
    %c0_i32 = arith.constant 0 : i32
    %c0_i32_0 = arith.constant 0 : i32
    return %c4_i32, %c0_i32 : i32, i32
  }
  func.func @transform_2(%arg0: i32) -> (i32, i32) {
    %c0_i32 = arith.constant 0 : i32
    %c0_i32_0 = arith.constant 0 : i32
    %c0_i32_1 = arith.constant 0 : i32
    return %c0_i32, %c0_i32_0 : i32, i32
  }
  func.func @transform_3(%arg0: i32) -> (i32, i32) {
    %c4_i32 = arith.constant 4 : i32
    %c0_i32 = arith.constant 0 : i32
    %c0_i32_0 = arith.constant 0 : i32
    return %c4_i32, %c0_i32 : i32, i32
  }
  func.func @transform_4(%arg0: i32) -> (i32, i32) {
    %c0_i32 = arith.constant 0 : i32
    %c0_i32_0 = arith.constant 0 : i32
    %c0_i32_1 = arith.constant 0 : i32
    return %c0_i32, %c0_i32_0 : i32, i32
  }
  func.func @transform_5(%arg0: i32) -> (i32, i32) {
    %c0_i32 = arith.constant 0 : i32
    %c0_i32_0 = arith.constant 0 : i32
    %c0_i32_1 = arith.constant 0 : i32
    return %c0_i32, %c0_i32_0 : i32, i32
  }
  func.func @transform_6(%arg0: i32) -> (i32, i32) {
    %c0_i32 = arith.constant 0 : i32
    %c0_i32_0 = arith.constant 0 : i32
    %c0_i32_1 = arith.constant 0 : i32
    return %c0_i32, %c0_i32_0 : i32, i32
  }
  func.func @transform_7(%arg0: i32) -> (i32, i32) {
    %c0_i32 = arith.constant 0 : i32
    %c0_i32_0 = arith.constant 0 : i32
    %c0_i32_1 = arith.constant 0 : i32
    return %c0_i32, %c0_i32_0 : i32, i32
  }
}

module attributes {stable_mosaic.version = 11 : i64} {
  func.func @kernel(%arg0: i32, %arg1: memref<2x512xbf16, #tpu.memory_space<vmem>>, %arg2: memref<1x512x512xbf16, #tpu.memory_space<vmem>>, %arg3: memref<1x1x512xf32, #tpu.memory_space<vmem>>, %arg4: memref<1x512x512xbf16, #tpu.memory_space<vmem>>, %arg5: memref<1x1x512xf32, #tpu.memory_space<vmem>>, %arg6: memref<2x512xbf16, #tpu.memory_space<vmem>>) attributes {dimension_semantics = [#tpu.dimension_semantics<arbitrary>], iteration_bounds = array<i64: 2>, scalar_prefetch = 0 : i64, scratch_operands = 0 : i64, tpu.core_type = #tpu.core_type<tc>, window_params = [{pipeline_mode = #tpu.pipeline_mode<synchronous>, transform_indices = @transform_0, window_bounds = array<i64: 2, 512>}, {transform_indices = @transform_1, window_bounds = array<i64: 1, 512, 512>}, {transform_indices = @transform_2, window_bounds = array<i64: 1, 1, 512>}, {transform_indices = @transform_3, window_bounds = array<i64: 1, 512, 512>}, {transform_indices = @transform_4, window_bounds = array<i64: 1, 1, 512>}, {pipeline_mode = #tpu.pipeline_mode<synchronous>, transform_indices = @transform_5, window_bounds = array<i64: 2, 512>}]} {
    %c0_i32 = arith.constant 0 : i32
    %0 = arith.cmpi eq, %arg0, %c0_i32 : i32
    %1 = arith.extui %0 : i1 to i32
    %c0_i32_0 = arith.constant 0 : i32
    %2 = arith.cmpi ne, %1, %c0_i32_0 : i32
    scf.if %2 {
      %c0_19 = arith.constant 0 : index
      %c0_20 = arith.constant 0 : index
      %27 = vector.load %arg1[%c0_19, %c0_20] : memref<2x512xbf16, #tpu.memory_space<vmem>>, vector<2x512xbf16>
      %c0_21 = arith.constant 0 : index
      %c0_22 = arith.constant 0 : index
      %28 = vector.load %arg6[%c0_21, %c0_22] : memref<2x512xbf16, #tpu.memory_space<vmem>>, vector<2x512xbf16>
      tpu.vector_store %arg6[%c0_21, %c0_22], %27 {strides = array<i32>} : memref<2x512xbf16, #tpu.memory_space<vmem>>, vector<2x512xbf16>,
    } else {
    }
    %c0 = arith.constant 0 : index
    %c0_1 = arith.constant 0 : index
    %3 = vector.load %arg6[%c0, %c0_1] : memref<2x512xbf16, #tpu.memory_space<vmem>>, vector<2x512xbf16>
    %c0_2 = arith.constant 0 : index
    %c0_3 = arith.constant 0 : index
    %c0_4 = arith.constant 0 : index
    %4 = vector.load %arg2[%c0_2, %c0_3, %c0_4] : memref<1x512x512xbf16, #tpu.memory_space<vmem>>, vector<1x512x512xbf16>
    %5 = vector.shape_cast %4 : vector<1x512x512xbf16> to vector<512x512xbf16>
    %cst = arith.constant dense<0.000000e+00> : vector<2x512xf32>
    %6 = tpu.matmul %3, %5, %cst {dimension_numbers = #tpu.dot_dimension_numbers<[1], [0], [0], [1], [0, 0, 1, 1], [], []>} : vector<2x512xbf16>, vector<512x512xbf16>, vector<2x512xf32> -> vector<2x512xf32>
    %c0_5 = arith.constant 0 : index
    %c0_6 = arith.constant 0 : index
    %c0_7 = arith.constant 0 : index
    %7 = vector.load %arg3[%c0_5, %c0_6, %c0_7] : memref<1x1x512xf32, #tpu.memory_space<vmem>>, vector<1x1x512xf32>
    %8 = vector.shape_cast %7 : vector<1x1x512xf32> to vector<1x512xf32>
    %9 = vector.broadcast %8 : vector<1x512xf32> to vector<2x512xf32>
    %10 = arith.addf %6, %9 : vector<2x512xf32>
    %cst_8 = arith.constant 0.000000e+00 : f32
    %11 = vector.broadcast %cst_8 : f32 to vector<2x512xf32>
    %12 = arith.maximumf %10, %11 : vector<2x512xf32>
    %13 = arith.truncf %12 : vector<2x512xf32> to vector<2x512xbf16>
    %c0_9 = arith.constant 0 : index
    %c0_10 = arith.constant 0 : index
    %c0_11 = arith.constant 0 : index
    %14 = vector.load %arg4[%c0_9, %c0_10, %c0_11] : memref<1x512x512xbf16, #tpu.memory_space<vmem>>, vector<1x512x512xbf16>
    %15 = vector.shape_cast %14 : vector<1x512x512xbf16> to vector<512x512xbf16>
    %cst_12 = arith.constant dense<0.000000e+00> : vector<2x512xf32>
    %16 = tpu.matmul %13, %15, %cst_12 {dimension_numbers = #tpu.dot_dimension_numbers<[1], [0], [0], [1], [0, 0, 1, 1], [], []>} : vector<2x512xbf16>, vector<512x512xbf16>, vector<2x512xf32> -> vector<2x512xf32>
    %c0_13 = arith.constant 0 : index
    %c0_14 = arith.constant 0 : index
    %c0_15 = arith.constant 0 : index
    %17 = vector.load %arg5[%c0_13, %c0_14, %c0_15] : memref<1x1x512xf32, #tpu.memory_space<vmem>>, vector<1x1x512xf32>
    %18 = vector.shape_cast %17 : vector<1x1x512xf32> to vector<1x512xf32>
    %19 = vector.broadcast %18 : vector<1x512xf32> to vector<2x512xf32>
    %20 = arith.addf %16, %19 : vector<2x512xf32>
    %21 = arith.extf %3 : vector<2x512xbf16> to vector<2x512xf32>
    %22 = arith.addf %20, %21 : vector<2x512xf32>
    %cst_16 = arith.constant 0.000000e+00 : f32
    %23 = vector.broadcast %cst_16 : f32 to vector<2x512xf32>
    %24 = arith.maximumf %22, %23 : vector<2x512xf32>
    %25 = arith.truncf %24 : vector<2x512xf32> to vector<2x512xbf16>
    %c0_17 = arith.constant 0 : index
    %c0_18 = arith.constant 0 : index
    %26 = vector.load %arg6[%c0_17, %c0_18] : memref<2x512xbf16, #tpu.memory_space<vmem>>, vector<2x512xbf16>
    tpu.vector_store %arg6[%c0_17, %c0_18], %25 {strides = array<i32>} : memref<2x512xbf16, #tpu.memory_space<vmem>>, vector<2x512xbf16>,
    return
  }
  func.func @transform_0(%arg0: i32) -> (i32, i32) {
    %c0_i32 = arith.constant 0 : i32
    %c0_i32_0 = arith.constant 0 : i32
    %c0_i32_1 = arith.constant 0 : i32
    return %c0_i32, %c0_i32_0 : i32, i32
  }
  func.func @transform_1(%arg0: i32) -> (i32, i32, i32) {
    %c4_i32 = arith.constant 4 : i32
    %c0_i32 = arith.constant 0 : i32
    %c0_i32_0 = arith.constant 0 : i32
    return %arg0, %c4_i32, %c0_i32 : i32, i32, i32
  }
  func.func @transform_2(%arg0: i32) -> (i32, i32, i32) {
    %c0_i32 = arith.constant 0 : i32
    %c0_i32_0 = arith.constant 0 : i32
    %c0_i32_1 = arith.constant 0 : i32
    return %arg0, %c0_i32, %c0_i32_0 : i32, i32, i32
  }
  func.func @transform_3(%arg0: i32) -> (i32, i32, i32) {
    %c4_i32 = arith.constant 4 : i32
    %c0_i32 = arith.constant 0 : i32
    %c0_i32_0 = arith.constant 0 : i32
    return %arg0, %c4_i32, %c0_i32 : i32, i32, i32
  }
  func.func @transform_4(%arg0: i32) -> (i32, i32, i32) {
    %c0_i32 = arith.constant 0 : i32
    %c0_i32_0 = arith.constant 0 : i32
    %c0_i32_1 = arith.constant 0 : i32
    return %arg0, %c0_i32, %c0_i32_0 : i32, i32, i32
  }
  func.func @transform_5(%arg0: i32) -> (i32, i32) {
    %c0_i32 = arith.constant 0 : i32
    %c0_i32_0 = arith.constant 0 : i32
    %c0_i32_1 = arith.constant 0 : i32
    return %c0_i32, %c0_i32_0 : i32, i32
  }
}

</mosaic_0001>

<bundles_post_ra>
// kernel: _lambda_.8
= control target key start
LH: loop header
LB: loop body
LE: loop exit
PB: predicated region body
PF: predicated region fallthrough
CT: control target
= control target key end

     0   :  { %s836_s1 = inlined_call_operand.vmem [shape: bf16[256,128], index: 1, kind: input, shape index: {}]   ;;  %s837_s0 = inlined_call_operand.vmem [shape: bf16[128,256], index: 0, kind: input, shape index: {}]   ;;  %s838_s2 = inlined_call_operand.vmem [shape: f32[1,128], index: 2, kind: input, shape index: {}]   ;;  %s839_s3 = inlined_call_operand.vmem [shape: bf16[128,128], index: 3, kind: output, shape index: {}]  }
   0x1   :  { %v635_v0 = vld [vmem:[%s836_s1 + $0x40] sm:$0xff]   ;;  %v637_v2 = vld [vmem:[%s836_s1 + $0x48] sm:$0xff]   ;;  %v639_v4 = vld [vmem:[%s836_s1 + $0x50] sm:$0xff]  }
   0x2   :  { %v636_v1 = vld [vmem:[%s836_s1] sm:$0xff]   ;;  %555 = vmatprep.subr.bf16.mxu0 %v635_v0  ;;  %619 = vmatprep.subr.bf16.mxu1 %v635_v0  ;;  %v638_v3 = vld [vmem:[%s836_s1 + $0x8] sm:$0xff]   ;;  %v640_v5 = vld [vmem:[%s836_s1 + $0x10] sm:$0xff]  }
   0x3   :  { %556 = vmatpush3.bf16.msra.mxu0 %v636_v1  ;;  %627 = vmatpush3.bf16.msra.mxu1 %v636_v1  ;;  %v641_v6 = vld [vmem:[%s836_s1 + $0x58] sm:$0xff]   ;;  %v643_v8 = vld [vmem:[%s836_s1 + $0x60] sm:$0xff]   ;;  %v645_v10 = vld [vmem:[%s836_s1 + $0x68] sm:$0xff]  }
   0x4   :  { %557 = vmatprep.subr.bf16.mxu0 %v637_v2  ;;  %620 = vmatprep.subr.bf16.mxu1 %v637_v2  ;;  %v642_v7 = vld [vmem:[%s836_s1 + $0x18] sm:$0xff]   ;;  %v644_v9 = vld [vmem:[%s836_s1 + $0x20] sm:$0xff]   ;;  %v646_v13 = vld [vmem:[%s836_s1 + $0x28] sm:$0xff]  }
   0x5   :  { %v653_v11 = vld [vmem:[%s837_s0 + $0x4] ss:$8 sps:$4 sm:$0xff]   ;;  %v647_v14 = vld [vmem:[%s836_s1 + $0x70] sm:$0xff]   ;;  %v649_v16 = vld [vmem:[%s836_s1 + $0x78] sm:$0xff]  }
   0x6   :  { %v656_v12 = vld [vmem:[%s837_s0 + $0x44] ss:$8 sps:$4 sm:$0xff]   ;;  %278 = vmatprep.mubr.bf16.mxu0 %v653_v11  ;;  %v648_v15 = vld [vmem:[%s836_s1 + $0x30] sm:$0xff]   ;;  %v650_v17 = vld [vmem:[%s836_s1 + $0x38] sm:$0xff]  }
   0x7   :  { %558 = vmatpush3.bf16.msra.mxu0 %v638_v3  ;;  %628 = vmatpush3.bf16.msra.mxu1 %v638_v3  ;;  %v651_v18 = vld [vmem:[%s837_s0] ss:$8 sps:$4 sm:$0xff]   ;;  %v657_v20 = vld [vmem:[%s837_s0 + $0x14] ss:$8 sps:$4 sm:$0xff]   ;;  %v661_v22 = vld [vmem:[%s837_s0 + $0x10] ss:$8 sps:$4 sm:$0xff]  }
   0x8   :  { %559 = vmatprep.subr.bf16.mxu0 %v639_v4  ;;  %621 = vmatprep.subr.bf16.mxu1 %v639_v4  ;;  %v654_v19 = vld [vmem:[%s837_s0 + $0x40] ss:$8 sps:$4 sm:$0xff]   ;;  %v659_v21 = vld [vmem:[%s837_s0 + $0x54] ss:$8 sps:$4 sm:$0xff]   ;;  %v662_v23 = vld [vmem:[%s837_s0 + $0x50] ss:$8 sps:$4 sm:$0xff]  }
   0x9   :  { %310 = vmatprep.mubr.bf16.mxu1 %v656_v12  ;;  %v663_v24 = vld [vmem:[%s837_s0 + $0x24] ss:$8 sps:$4 sm:$0xff]   ;;  %v667_v26 = vld [vmem:[%s837_s0 + $0x20] ss:$8 sps:$4 sm:$0xff]   ;;  %v669_v28 = vld [vmem:[%s837_s0 + $0x34] ss:$8 sps:$4 sm:$0xff]  }
   0xa   :  { %v665_v25 = vld [vmem:[%s837_s0 + $0x64] ss:$8 sps:$4 sm:$0xff]   ;;  %v668_v27 = vld [vmem:[%s837_s0 + $0x60] ss:$8 sps:$4 sm:$0xff]   ;;  %v671_v29 = vld [vmem:[%s837_s0 + $0x74] ss:$8 sps:$4 sm:$0xff]  }
   0xb   :  { %560 = vmatpush3.bf16.msra.mxu0 %v640_v5  ;;  %629 = vmatpush3.bf16.msra.mxu1 %v640_v5  ;;  %v673_v30 = vld [vmem:[%s837_s0 + $0x30] ss:$8 sps:$4 sm:$0xff]   ;;  %v794_v34 = vld [vmem:[%s838_s2] ss:$0 sm:$0xff] }
   0xc   :  { %561 = vmatprep.subr.bf16.mxu0 %v641_v6  ;;  %622 = vmatprep.subr.bf16.mxu1 %v641_v6  ;;  %v674_v31 = vld [vmem:[%s837_s0 + $0x70] ss:$8 sps:$4 sm:$0xff]  }
   0xf   :  { %562 = vmatpush3.bf16.msra.mxu0 %v642_v7  ;;  %630 = vmatpush3.bf16.msra.mxu1 %v642_v7 }
  0x10   :  { %563 = vmatprep.subr.bf16.mxu0 %v643_v8  ;;  %623 = vmatprep.subr.bf16.mxu1 %v643_v8 }
  0x13   :  { %564 = vmatpush3.bf16.msra.mxu0 %v644_v9  ;;  %631 = vmatpush3.bf16.msra.mxu1 %v644_v9 }
  0x14   :  { %565 = vmatprep.subr.bf16.mxu0 %v645_v10  ;;  %624 = vmatprep.subr.bf16.mxu1 %v645_v10 }
  0x17   :  { %566 = vmatpush3.bf16.msra.mxu0 %v646_v13  ;;  %632 = vmatpush3.bf16.msra.mxu1 %v646_v13 }
  0x18   :  { %567 = vmatprep.subr.bf16.mxu0 %v647_v14  ;;  %625 = vmatprep.subr.bf16.mxu1 %v647_v14 }
  0x1b   :  { %568 = vmatpush3.bf16.msra.mxu0 %v648_v15  ;;  %633 = vmatpush3.bf16.msra.mxu1 %v648_v15 }
  0x1c   :  { %569 = vmatprep.subr.bf16.mxu0 %v649_v16  ;;  %626 = vmatprep.subr.bf16.mxu1 %v649_v16 }
  0x1f   :  { %570 = vmatpush3.bf16.msra.mxu0 %v650_v17  ;;  %634 = vmatpush3.bf16.msra.mxu1 %v650_v17 }
  0x22   :  { %279 = vmatmul.mubr.bf16.vlgmr.msra.gmra.mrb[0].mxu0 %v651_v18  ;;  %311 = vmatmul.mubr.bf16.vlgmr.msra.gmra.mrb[0].mxu1 %v654_v19 }
  0x23   :  { %286 = vmatprep.mubr.bf16.mxu0 %v657_v20  ;;  %318 = vmatprep.mubr.bf16.mxu1 %v659_v21 }
  0x2a   :  { %287 = vmatmul.mubr.bf16.gmra.mrb[4].mxu0 %v661_v22  ;;  %319 = vmatmul.mubr.bf16.gmra.mrb[4].mxu1 %v662_v23 }
  0x2b   :  { %294 = vmatprep.mubr.bf16.mxu0 %v663_v24  ;;  %326 = vmatprep.mubr.bf16.mxu1 %v665_v25 }
  0x32   :  { %295 = vmatmul.mubr.bf16.gmra.mrb[8].mxu0 %v667_v26  ;;  %327 = vmatmul.mubr.bf16.gmra.mrb[8].mxu1 %v668_v27 }
  0x33   :  { %302 = vmatprep.mubr.bf16.mxu0 %v669_v28  ;;  %334 = vmatprep.mubr.bf16.mxu1 %v671_v29 }
  0x3a   :  { %303 = vmatmul.mubr.bf16.gmra.mrb[12].mxu0 %v673_v30  ;;  %335 = vmatmul.mubr.bf16.gmra.mrb[12].mxu1 %v674_v31 }
  0xf5   :  { %v571_v32 = vpop.f32.mrb[0].mxu0  ;;  %v595_v33 = vpop.f32.mrb[0].mxu1 }
  0xf6   :  { %v572_v35 = vpop.f32.mrb[1].mxu0  ;;  %v596_v36 = vpop.f32.mrb[1].mxu1 }
  0xf7   :  { %v573_v37 = vadd.f32 %v572_v35, %v571_v32  ;;  %v597_v38 = vadd.f32 %v596_v36, %v595_v33  ;;  %v574_v39 = vpop.f32.mrb[2].mxu0  ;;  %v598_v40 = vpop.f32.mrb[2].mxu1 }
  0xf8   :  { %v575_v41 = vpop.f32.mrb[3].mxu0  ;;  %v599_v42 = vpop.f32.mrb[3].mxu1 }
  0xf9   :  { %v281_v43 = vadd.f32 %v573_v37, %v794_v34  ;;  %v313_v44 = vadd.f32 %v597_v38, %v794_v34  ;;  %v576_v45 = vadd.f32 %v575_v41, %v574_v39  ;;  %v600_v46 = vadd.f32 %v599_v42, %v598_v40 }
  0xfb   :  { %v284_v47 = vadd.f32 %v576_v45, %v794_v34  ;;  %v316_v48 = vadd.f32 %v600_v46, %v794_v34  ;;  %v343_v49 = vmax.f32 %v281_v43, 0.0  ;;  %v351_v50 = vmax.f32 %v313_v44, 0.0 }
  0xfd   :  { %v344_v51 = vmax.f32 %v284_v47, 0.0  ;;  %v352_v52 = vmax.f32 %v316_v48, 0.0  ;;  %v577_v53 = vpop.f32.mrb[4].mxu0  ;;  %v601_v54 = vpop.f32.mrb[4].mxu1 }
  0xfe   :  { %v578_v55 = vpop.f32.mrb[5].mxu0  ;;  %v602_v56 = vpop.f32.mrb[5].mxu1 }
  0xff   :  { %v511_v57 = vpack.c.bf16 %v344_v51, %v343_v49  ;;  %v531_v58 = vpack.c.bf16 %v352_v52, %v351_v50  ;;  %v579_v59 = vadd.f32 %v578_v55, %v577_v53  ;;  %v603_v60 = vadd.f32 %v602_v56, %v601_v54  ;;  %v580_v61 = vpop.f32.mrb[6].mxu0  ;;  %v604_v62 = vpop.f32.mrb[6].mxu1 }
 0x100   :  { %v581_v63 = vpop.f32.mrb[7].mxu0  ;;  %v605_v0 = vpop.f32.mrb[7].mxu1 }
 0x101   :  { %512 = vst [vmem:[%s839_s3] sm:$0xff] %v511_v57   ;;  %551 = vst [vmem:[%s839_s3 + $0x20] sm:$0xff] %v531_v58   ;;  %v289_v1 = vadd.f32 %v579_v59, %v794_v34  ;;  %v321_v2 = vadd.f32 %v603_v60, %v794_v34  ;;  %v582_v3 = vadd.f32 %v581_v63, %v580_v61 }
 0x102   :  { %v606_v4 = vadd.f32 %v605_v0, %v604_v62 }
 0x103   :  { %v292_v5 = vadd.f32 %v582_v3, %v794_v34  ;;  %v345_v7 = vmax.f32 %v289_v1, 0.0  ;;  %v353_v8 = vmax.f32 %v321_v2, 0.0 }
 0x104   :  { %v324_v6 = vadd.f32 %v606_v4, %v794_v34 }
 0x105   :  { %v346_v9 = vmax.f32 %v292_v5, 0.0  ;;  %v583_v11 = vpop.f32.mrb[8].mxu0  ;;  %v607_v12 = vpop.f32.mrb[8].mxu1 }
 0x106   :  { %v354_v10 = vmax.f32 %v324_v6, 0.0  ;;  %v584_v13 = vpop.f32.mrb[9].mxu0  ;;  %v608_v14 = vpop.f32.mrb[9].mxu1 }
 0x107   :  { %v516_v15 = vpack.c.bf16 %v346_v9, %v345_v7  ;;  %v585_v17 = vadd.f32 %v584_v13, %v583_v11  ;;  %v609_v18 = vadd.f32 %v608_v14, %v607_v12  ;;  %v586_v19 = vpop.f32.mrb[10].mxu0  ;;  %v610_v20 = vpop.f32.mrb[10].mxu1 }
 0x108   :  { %v536_v16 = vpack.c.bf16 %v354_v10, %v353_v8  ;;  %v587_v21 = vpop.f32.mrb[11].mxu0  ;;  %v611_v22 = vpop.f32.mrb[11].mxu1 }
 0x109   :  { %548 = vst [vmem:[%s839_s3 + $0x8] sm:$0xff] %v516_v15   ;;  %v297_v23 = vadd.f32 %v585_v17, %v794_v34  ;;  %v329_v24 = vadd.f32 %v609_v18, %v794_v34  ;;  %v588_v25 = vadd.f32 %v587_v21, %v586_v19  ;;  %v612_v26 = vadd.f32 %v611_v22, %v610_v20 }
 0x10a   :  { %552 = vst [vmem:[%s839_s3 + $0x28] sm:$0xff] %v536_v16  }
 0x10b   :  { %v300_v27 = vadd.f32 %v588_v25, %v794_v34  ;;  %v332_v28 = vadd.f32 %v612_v26, %v794_v34  ;;  %v347_v29 = vmax.f32 %v297_v23, 0.0  ;;  %v355_v30 = vmax.f32 %v329_v24, 0.0 }
 0x10d   :  { %v348_v31 = vmax.f32 %v300_v27, 0.0  ;;  %v356_v32 = vmax.f32 %v332_v28, 0.0  ;;  %v589_v33 = vpop.f32.mrb[12].mxu0  ;;  %v613_v35 = vpop.f32.mrb[12].mxu1 }
 0x10e   :  { %v590_v36 = vpop.f32.mrb[13].mxu0  ;;  %v614_v37 = vpop.f32.mrb[13].mxu1 }
 0x10f   :  { %v521_v38 = vpack.c.bf16 %v348_v31, %v347_v29  ;;  %v541_v39 = vpack.c.bf16 %v356_v32, %v355_v30  ;;  %v591_v40 = vadd.f32 %v590_v36, %v589_v33  ;;  %v615_v41 = vadd.f32 %v614_v37, %v613_v35  ;;  %v592_v42 = vpop.f32.mrb[14].mxu0  ;;  %v616_v43 = vpop.f32.mrb[14].mxu1 }
 0x110   :  { %v593_v44 = vpop.f32.mrb[15].mxu0  ;;  %v617_v45 = vpop.f32.mrb[15].mxu1 }
 0x111   :  { %549 = vst [vmem:[%s839_s3 + $0x10] sm:$0xff] %v521_v38   ;;  %553 = vst [vmem:[%s839_s3 + $0x30] sm:$0xff] %v541_v39   ;;  %v305_v46 = vadd.f32 %v591_v40, %v794_v34  ;;  %v337_v47 = vadd.f32 %v615_v41, %v794_v34  ;;  %v594_v48 = vadd.f32 %v593_v44, %v592_v42 }
 0x112   :  { %v618_v49 = vadd.f32 %v617_v45, %v616_v43 }
 0x113   :  { %v308_v50 = vadd.f32 %v594_v48, %v794_v34  ;;  %v349_v52 = vmax.f32 %v305_v46, 0.0  ;;  %v357_v53 = vmax.f32 %v337_v47, 0.0 }
 0x114   :  { %v340_v51 = vadd.f32 %v618_v49, %v794_v34 }
 0x115   :  { %v350_v54 = vmax.f32 %v308_v50, 0.0 }
 0x116   :  { %v358_v55 = vmax.f32 %v340_v51, 0.0 }
 0x117   :  { %v526_v56 = vpack.c.bf16 %v350_v54, %v349_v52 }
 0x118   :  { %v546_v57 = vpack.c.bf16 %v358_v55, %v357_v53 }
 0x119   :  { %550 = vst [vmem:[%s839_s3 + $0x18] sm:$0xff] %v526_v56  }
 0x11a   :  { %554 = vst [vmem:[%s839_s3 + $0x38] sm:$0xff] %v546_v57  }

// kernel: _lambda_.10
= control target key start
LH: loop header
LB: loop body
LE: loop exit
PB: predicated region body
PF: predicated region fallthrough
CT: control target
= control target key end

     0   :  { %v4041_v0 = vmov 0.0   ;;  %vm4042_vm0 = vmmov 0   ;;  %vm53_vm1 = vcmask 261120   ;;  %vm1416_vm2 = vcmask 1043456   ;;  %s4975_s0 = inlined_call_operand.vmem [shape: bf16[32,128], index: 0, kind: input, shape index: {}]   ;;  %s4976_s1 = inlined_call_operand.vmem [shape: bf16[72,32], index: 1, kind: input, shape index: {}]   ;;  %s4977_s2 = inlined_call_operand.vmem [shape: bf16[1152,128], index: 2, kind: input, shape index: {}]   ;;  %s4978_s5 = inlined_call_operand.vmem [shape: bf16[1152,128], index: 5, kind: input, shape index: {}]   ;;  %s4979_s3 = inlined_call_operand.vmem [shape: f32[1,128], index: 3, kind: input, shape index: {}, may-alias: {3,6,9}]   ;;  %s4980_s4 = inlined_call_operand.vmem [shape: bf16[72,8], index: 4, kind: input, shape index: {}]   ;;  %s4981_s7 = inlined_call_operand.vmem [shape: bf16[8,32], index: 7, kind: input, shape index: {}]   ;;  %s4982_s8 = inlined_call_operand.vmem [shape: bf16[128,128], index: 8, kind: input, shape index: {}]   ;;  %s4983_s6 = inlined_call_operand.vmem [shape: f32[1,128], index: 6, kind: input, shape index: {}, may-alias: {3,6,9}]   ;;  %s4984_s9 = inlined_call_operand.vmem [shape: f32[1,128], index: 9, kind: input, shape index: {}, may-alias: {3,6,9}]   ;;  %s4985_s10 = inlined_call_operand.vmem [shape: bf16[8,128], index: 10, kind: output, shape index: {}]  }
   0x1   :  { %3339 = vmatprep.subr.bf16.mxu1 %v4041_v0  ;;  %v4102_v1 = vld [vmem:[%s4975_s0] sm:$0xff]   ;;  %3343 = vmatprep.mubr.msk.bf16.mxu1 %vm4042_vm0, %v4041_v0  ;;  %v4113_v2 = vld [vmem:[%s4975_s0 + $0x8] sm:$0xff]   ;;  %v3889_v8 = vld [vmem:[%s4977_s2 + $0x50] sm:$0xff]   ;;  %vm1412_vm3 = vcmask 64512  }
   0x2   :  { %3331 = vmatprep.subr.bf16.mxu0 %v4041_v0  ;;  %3335 = vmatprep.mubr.msk.bf16.mxu0 %vm4042_vm0, %v4041_v0  ;;  %v114_v3 = vld [vmem:[%s4976_s1 + $0x4] sm:$0xf]  ;;  %v40_v4 = vld [vmem:[%s4976_s1] sm:$0xf]  ;;  %v3888_v6 = vld [vmem:[%s4977_s2 + $0x48] sm:$0xff]  }
   0x3   :  { %3340 = vmatpush3.bf16.msra.mxu1 %v4102_v1  ;;  %3332 = vmatpush3.bf16.msra.mxu0 %v4102_v1  ;;  %v3887_v5 = vld [vmem:[%s4977_s2 + $0x40] sm:$0xff]   ;;  %v351_v7 = vld [vmem:[%s4976_s1 + $0x8] sm:$0xf]  ;;  %v3890_v9 = vld [vmem:[%s4977_s2 + $0x58] sm:$0xff]  }
   0x4   :  { %3341 = vmatprep.subr.bf16.mxu1 %v4041_v0  ;;  %3333 = vmatprep.subr.bf16.mxu0 %v4041_v0  ;;  %v501_v10 = vld [vmem:[%s4976_s1 + $0xc] sm:$0xf]  ;;  %v3891_v11 = vld [vmem:[%s4977_s2 + $0x60] sm:$0xff]   ;;  %v3893_v13 = vld [vmem:[%s4977_s2 + $0x70] sm:$0xff]  }
   0x5   :  { %v3892_v12 = vld [vmem:[%s4977_s2 + $0x68] sm:$0xff]   ;;  %v3894_v14 = vld [vmem:[%s4977_s2 + $0x78] sm:$0xff]   ;;  %v801_v15 = vld [vmem:[%s4976_s1 + $0x14] sm:$0xf] }
   0x6   :  { %v3895_v17 = vld [vmem:[%s4977_s2] sm:$0xff]   ;;  %v3896_v26 = vld [vmem:[%s4977_s2 + $0x8] sm:$0xff]   ;;  %v3897_v27 = vld [vmem:[%s4977_s2 + $0x10] sm:$0xff]  }
   0x7   :  { %3342 = vmatpush3.bf16.msra.mxu1 %v4113_v2  ;;  %3334 = vmatpush3.bf16.msra.mxu0 %v4113_v2  ;;  %v3898_v32 = vld [vmem:[%s4977_s2 + $0x18] sm:$0xff]   ;;  %v3899_v33 = vld [vmem:[%s4977_s2 + $0x20] sm:$0xff]   ;;  %v3900_v38 = vld [vmem:[%s4977_s2 + $0x28] sm:$0xff]  }
   0x8   :  { %3387 = vmatprep.subr.bf16.mxu0 %v4041_v0  ;;  %3347 = vmatprep.subr.bf16.mxu1 %v4041_v0  ;;  %v3901_v39 = vld [vmem:[%s4977_s2 + $0x30] sm:$0xff]   ;;  %v3902_v40 = vld [vmem:[%s4977_s2 + $0x38] sm:$0xff]   ;;  %v3903_v42 = vld [vmem:[%s4977_s2 + $0x80] sm:$0xff]  }
   0x9   :  { %v3904_v43 = vld [vmem:[%s4977_s2 + $0x88] sm:$0xff]   ;;  %v3905_v44 = vld [vmem:[%s4977_s2 + $0x90] sm:$0xff]   ;;  %v3906_v45 = vld [vmem:[%s4977_s2 + $0x98] sm:$0xff]  }
   0xa   :  { %3344 = vmatmul.mubr.msk.bf16.vlgmr.msra.gmra.mrb[0].mxu1 %vm53_vm1, %v114_v3  ;;  %3336 = vmatmul.mubr.msk.bf16.vlgmr.msra.gmra.mrb[0].mxu0 %vm53_vm1, %v40_v4  ;;  %v3907_v46 = vld [vmem:[%s4977_s2 + $0xa0] sm:$0xff]   ;;  %v3908_v47 = vld [vmem:[%s4977_s2 + $0xa8] sm:$0xff]   ;;  %v3909_v48 = vld [vmem:[%s4977_s2 + $0xb0] sm:$0xff]  }
   0xb   :  { %3388 = vmatpush3.bf16.msra.mxu0 %v4102_v1  ;;  %3391 = vmatprep.mubr.msk.bf16.mxu0 %vm4042_vm0, %v4041_v0  ;;  %v3910_v49 = vld [vmem:[%s4977_s2 + $0xb8] sm:$0xff]   ;;  %v3911_v51 = vld [vmem:[%s4977_s2 + $0xc0] sm:$0xff]   ;;  %v3912_v52 = vld [vmem:[%s4977_s2 + $0xc8] sm:$0xff]  }
   0xc   :  { %3389 = vmatprep.subr.bf16.mxu0 %v4041_v0  ;;  %3348 = vmatpush3.bf16.msra.mxu1 %v3887_v5  ;;  %v3913_v53 = vld [vmem:[%s4977_s2 + $0xd0] sm:$0xff]   ;;  %v3914_v54 = vld [vmem:[%s4977_s2 + $0xd8] sm:$0xff]   ;;  %v3915_v55 = vld [vmem:[%s4977_s2 + $0xe0] sm:$0xff]  }
   0xd   :  { %3349 = vmatprep.subr.bf16.mxu1 %v4041_v0  ;;  %3363 = vmatprep.mubr.msk.bf16.mxu1 %vm4042_vm0, %v4041_v0  ;;  %v3916_v56 = vld [vmem:[%s4977_s2 + $0xe8] sm:$0xff]   ;;  %v3917_v57 = vld [vmem:[%s4977_s2 + $0xf0] sm:$0xff]   ;;  %v3918_v58 = vld [vmem:[%s4977_s2 + $0xf8] sm:$0xff]  }
   0xe   :  { %v651_v60 = vld [vmem:[%s4976_s1 + $0x10] sm:$0xf]  ;;  %v3919_v61 = vld [vmem:[%s4977_s2 + $0x100] sm:$0xff]   ;;  %v3920_v62 = vld [vmem:[%s4977_s2 + $0x108] sm:$0xff]  }
   0xf   :  { %3390 = vmatpush3.bf16.msra.mxu0 %v4113_v2  ;;  %v3921_v63 = vld [vmem:[%s4977_s2 + $0x110] sm:$0xff]   ;;  %v3922_v3 = vld [vmem:[%s4977_s2 + $0x118] sm:$0xff]   ;;  %v3923_v4 = vld [vmem:[%s4977_s2 + $0x120] sm:$0xff]  }
  0x10   :  { %3415 = vmatprep.subr.bf16.mxu0 %v4041_v0  ;;  %3350 = vmatpush3.bf16.msra.mxu1 %v3888_v6  ;;  %v3924_v5 = vld [vmem:[%s4977_s2 + $0x128] sm:$0xff]   ;;  %v3925_v6 = vld [vmem:[%s4977_s2 + $0x130] sm:$0xff]  }
  0x11   :  { %3351 = vmatprep.subr.bf16.mxu1 %v4041_v0 }
  0x12   :  { %3392 = vmatmul.mubr.msk.bf16.vlgmr.msra.gmra.mrb[4].mxu0 %vm53_vm1, %v351_v7  ;;  %v3926_v7 = vld [vmem:[%s4977_s2 + $0x138] sm:$0xff]  }
  0x13   :  { %3416 = vmatpush3.bf16.msra.mxu0 %v4102_v1  ;;  %3419 = vmatprep.mubr.msk.bf16.mxu0 %vm4042_vm0, %v4041_v0 }
  0x14   :  { %3417 = vmatprep.subr.bf16.mxu0 %v4041_v0  ;;  %3352 = vmatpush3.bf16.msra.mxu1 %v3889_v8 }
  0x15   :  { %3353 = vmatprep.subr.bf16.mxu1 %v4041_v0 }
  0x17   :  { %3418 = vmatpush3.bf16.msra.mxu0 %v4113_v2 }
  0x18   :  { %3354 = vmatpush3.bf16.msra.mxu1 %v3890_v9  ;;  %3471 = vmatprep.subr.bf16.mxu0 %v4041_v0 }
  0x19   :  { %3355 = vmatprep.subr.bf16.mxu1 %v4041_v0 }
  0x1a   :  { %3420 = vmatmul.mubr.msk.bf16.vlgmr.msra.gmra.mrb[8].mxu0 %vm53_vm1, %v501_v10 }
  0x1b   :  { %3472 = vmatpush3.bf16.msra.mxu0 %v4102_v1  ;;  %3475 = vmatprep.mubr.msk.bf16.mxu0 %vm4042_vm0, %v4041_v0 }
  0x1c   :  { %3356 = vmatpush3.bf16.msra.mxu1 %v3891_v11  ;;  %3473 = vmatprep.subr.bf16.mxu0 %v4041_v0 }
  0x1d   :  { %3357 = vmatprep.subr.bf16.mxu1 %v4041_v0 }
  0x1f   :  { %3474 = vmatpush3.bf16.msra.mxu0 %v4113_v2 }
  0x20   :  { %3358 = vmatpush3.bf16.msra.mxu1 %v3892_v12  ;;  %3527 = vmatprep.subr.bf16.mxu0 %v4041_v0 }
  0x21   :  { %3359 = vmatprep.subr.bf16.mxu1 %v4041_v0 }
  0x22   :  { %3476 = vmatmul.mubr.msk.bf16.vlgmr.msra.gmra.mrb[12].mxu0 %vm53_vm1, %v801_v15 }
  0x23   :  { %3528 = vmatpush3.bf16.msra.mxu0 %v4102_v1  ;;  %3531 = vmatprep.mubr.msk.bf16.mxu0 %vm4042_vm0, %v4041_v0 }
  0x24   :  { %3360 = vmatpush3.bf16.msra.mxu1 %v3893_v13  ;;  %3529 = vmatprep.subr.bf16.mxu0 %v4041_v0 }
  0x25   :  { %3361 = vmatprep.subr.bf16.mxu1 %v4041_v0 }
  0x27   :  { %3530 = vmatpush3.bf16.msra.mxu0 %v4113_v2 }
  0x28   :  { %3362 = vmatpush3.bf16.msra.mxu1 %v3894_v14  ;;  %3583 = vmatprep.subr.bf16.mxu0 %v4041_v0 }
  0x29   :  { %3367 = vmatprep.subr.bf16.mxu1 %v4041_v0 }
  0xdd   :  { %v152_v16 = vpop.f32.mrb[0].mxu1  ;;  %v91_v18 = vpop.f32.mrb[0].mxu0 }
  0xde   :  { %v158_v19 = vpack.c.bf16 %v152_v16, %v152_v16  ;;  %v3345_v20 = vpop.f32.mrb[1].mxu1  ;;  %v3337_v21 = vpop.f32.mrb[1].mxu0  ;;  %v97_v41 = vpack.c.bf16 %v91_v18, %v91_v18  ;;  %v1101_v16 = vld [vmem:[%s4976_s1 + $0x1c] sm:$0xf] }
  0xdf   :  { %v155_v22 = vpop.f32.mrb[2].mxu1  ;;  %v94_v23 = vpop.f32.mrb[2].mxu0  ;;  %3532 = vmatmul.mubr.msk.bf16.vlgmr.msra.gmra.mrb[16].mxu0 %vm53_vm1, %v1101_v16  ;;  %v3946_v16 = vld [vmem:[%s4977_s2 + $0x1d8] sm:$0xff]  }
  0xe0   :  { %v3346_v24 = vpop.f32.mrb[3].mxu1  ;;  %3364 = vmatmul.mubr.bf16.vlgmr.msra.gmra.mrb[4].mxu1 %v158_v19  ;;  %v3338_v25 = vpop.f32.mrb[3].mxu0  ;;  %3585 = vmatprep.mubr.msk.bf16.mxu0 %vm4042_vm0, %v4041_v0 }
  0xe1   :  { %3368 = vmatpush3.bf16.msra.mxu1 %v3895_v17  ;;  %3383 = vmatprep.mubr.msk.bf16.mxu1 %vm4042_vm0, %v4041_v0 }
  0xe2   :  { %3369 = vmatprep.subr.bf16.mxu1 %v4041_v0 }
  0xe5   :  { %3370 = vmatpush3.bf16.msra.mxu1 %v3896_v26  ;;  %v389_v28 = vpop.f32.mrb[4].mxu0 }
  0xe6   :  { %3371 = vmatprep.subr.bf16.mxu1 %v4041_v0  ;;  %v3393_v29 = vpop.f32.mrb[5].mxu0  ;;  %v395_v50 = vpack.c.bf16 %v389_v28, %v389_v28 }
  0xe7   :  { %v392_v30 = vpop.f32.mrb[6].mxu0 }
  0xe8   :  { %v3394_v31 = vpop.f32.mrb[7].mxu0 }
  0xe9   :  { %3372 = vmatpush3.bf16.msra.mxu1 %v3897_v27 }
  0xea   :  { %3373 = vmatprep.subr.bf16.mxu1 %v4041_v0 }
  0xed   :  { %3374 = vmatpush3.bf16.msra.mxu1 %v3898_v32  ;;  %v4220_v34 = vpop.f32.mrb[8].mxu0 }
  0xee   :  { %3375 = vmatprep.subr.bf16.mxu1 %v4041_v0  ;;  %v3421_v35 = vpop.f32.mrb[9].mxu0  ;;  %v545_v59 = vpack.c.bf16 %v4220_v34, %v4220_v34 }
  0xef   :  { %v542_v36 = vpop.f32.mrb[10].mxu0 }
  0xf0   :  { %v3422_v37 = vpop.f32.mrb[11].mxu0 }
  0xf1   :  { %3376 = vmatpush3.bf16.msra.mxu1 %v3899_v33  ;;  %v3927_v33 = vld [vmem:[%s4977_s2 + $0x140] sm:$0xff]  }
  0xf2   :  { %3377 = vmatprep.subr.bf16.mxu1 %v4041_v0 }
  0xf5   :  { %3378 = vmatpush3.bf16.msra.mxu1 %v3900_v38  ;;  %v839_v12 = vpop.f32.mrb[12].mxu0  ;;  %v3928_v38 = vld [vmem:[%s4977_s2 + $0x148] sm:$0xff]  }
  0xf6   :  { %3379 = vmatprep.subr.bf16.mxu1 %v4041_v0  ;;  %v3477_v13 = vpop.f32.mrb[13].mxu0 }
  0xf7   :  { %v842_v14 = vpop.f32.mrb[14].mxu0 }
  0xf8   :  { %v3478_v15 = vpop.f32.mrb[15].mxu0  ;;  %v3944_v14 = vld [vmem:[%s4977_s2 + $0x1c8] sm:$0xff]  }
  0xf9   :  { %3380 = vmatpush3.bf16.msra.mxu1 %v3901_v39  ;;  %v3929_v39 = vld [vmem:[%s4977_s2 + $0x150] sm:$0xff]  }
  0xfa   :  { %3381 = vmatprep.subr.bf16.mxu1 %v4041_v0  ;;  %v3945_v15 = vld [vmem:[%s4977_s2 + $0x1d0] sm:$0xff]  }
  0xfd   :  { %3382 = vmatpush3.bf16.msra.mxu1 %v3902_v40  ;;  %v3930_v40 = vld [vmem:[%s4977_s2 + $0x158] sm:$0xff]  }
  0xfe   :  { %3395 = vmatprep.subr.bf16.mxu1 %v4041_v0 }
 0x100   :  { %3384 = vmatmul.mubr.bf16.vlgmr.msra.gmra.mrb[8].mxu1 %v97_v41  ;;  %v3931_v41 = vld [vmem:[%s4977_s2 + $0x160] sm:$0xff]  }
 0x101   :  { %3396 = vmatpush3.bf16.msra.mxu1 %v3903_v42  ;;  %3411 = vmatprep.mubr.msk.bf16.mxu1 %vm4042_vm0, %v4041_v0  ;;  %v3932_v42 = vld [vmem:[%s4977_s2 + $0x168] sm:$0xff]  }
 0x102   :  { %3397 = vmatprep.subr.bf16.mxu1 %v4041_v0 }
 0x105   :  { %3398 = vmatpush3.bf16.msra.mxu1 %v3904_v43  ;;  %v3933_v43 = vld [vmem:[%s4977_s2 + $0x170] sm:$0xff]  }
 0x106   :  { %3399 = vmatprep.subr.bf16.mxu1 %v4041_v0 }
 0x109   :  { %3400 = vmatpush3.bf16.msra.mxu1 %v3905_v44  ;;  %v3934_v44 = vld [vmem:[%s4977_s2 + $0x178] sm:$0xff]  }
 0x10a   :  { %3401 = vmatprep.subr.bf16.mxu1 %v4041_v0 }
 0x10d   :  { %3402 = vmatpush3.bf16.msra.mxu1 %v3906_v45  ;;  %v845_v45 = vpack.c.bf16 %v839_v12, %v839_v12 }
 0x10e   :  { %3403 = vmatprep.subr.bf16.mxu1 %v4041_v0 }
 0x111   :  { %3404 = vmatpush3.bf16.msra.mxu1 %v3907_v46  ;;  %v951_v46 = vld [vmem:[%s4976_s1 + $0x18] sm:$0xf] }
 0x112   :  { %3405 = vmatprep.subr.bf16.mxu1 %v4041_v0 }
 0x115   :  { %3406 = vmatpush3.bf16.msra.mxu1 %v3908_v47  ;;  %v3935_v47 = vld [vmem:[%s4977_s2 + $0x180] sm:$0xff]  }
 0x116   :  { %3407 = vmatprep.subr.bf16.mxu1 %v4041_v0 }
 0x119   :  { %3408 = vmatpush3.bf16.msra.mxu1 %v3909_v48  ;;  %v3936_v48 = vld [vmem:[%s4977_s2 + $0x188] sm:$0xff]  }
 0x11a   :  { %3409 = vmatprep.subr.bf16.mxu1 %v4041_v0 }
 0x11d   :  { %3410 = vmatpush3.bf16.msra.mxu1 %v3910_v49  ;;  %v3937_v49 = vld [vmem:[%s4977_s2 + $0x190] sm:$0xff]  }
 0x11e   :  { %3423 = vmatprep.subr.bf16.mxu1 %v4041_v0 }
 0x120   :  { %3412 = vmatmul.mubr.bf16.vlgmr.msra.gmra.mrb[12].mxu1 %v395_v50  ;;  %v3938_v50 = vld [vmem:[%s4977_s2 + $0x198] sm:$0xff]  }
 0x121   :  { %3424 = vmatpush3.bf16.msra.mxu1 %v3911_v51  ;;  %3439 = vmatprep.mubr.msk.bf16.mxu1 %vm4042_vm0, %v4041_v0  ;;  %v3939_v51 = vld [vmem:[%s4977_s2 + $0x1a0] sm:$0xff]  }
 0x122   :  { %3425 = vmatprep.subr.bf16.mxu1 %v4041_v0 }
 0x125   :  { %3426 = vmatpush3.bf16.msra.mxu1 %v3912_v52  ;;  %v3940_v52 = vld [vmem:[%s4977_s2 + $0x1a8] sm:$0xff]  }
 0x126   :  { %3427 = vmatprep.subr.bf16.mxu1 %v4041_v0 }
 0x129   :  { %3428 = vmatpush3.bf16.msra.mxu1 %v3913_v53  ;;  %v3941_v53 = vld [vmem:[%s4977_s2 + $0x1b0] sm:$0xff]  }
 0x12a   :  { %3429 = vmatprep.subr.bf16.mxu1 %v4041_v0 }
 0x12d   :  { %3430 = vmatpush3.bf16.msra.mxu1 %v3914_v54  ;;  %v3942_v54 = vld [vmem:[%s4977_s2 + $0x1b8] sm:$0xff]  }
 0x12e   :  { %3431 = vmatprep.subr.bf16.mxu1 %v4041_v0 }
 0x131   :  { %3432 = vmatpush3.bf16.msra.mxu1 %v3915_v55 }
 0x132   :  { %3433 = vmatprep.subr.bf16.mxu1 %v4041_v0 }
 0x135   :  { %3434 = vmatpush3.bf16.msra.mxu1 %v3916_v56 }
 0x136   :  { %3435 = vmatprep.subr.bf16.mxu1 %v4041_v0 }
 0x139   :  { %3436 = vmatpush3.bf16.msra.mxu1 %v3917_v57 }
 0x13a   :  { %3437 = vmatprep.subr.bf16.mxu1 %v4041_v0 }
 0x13d   :  { %3438 = vmatpush3.bf16.msra.mxu1 %v3918_v58 }
 0x13e   :  { %3443 = vmatprep.subr.bf16.mxu1 %v4041_v0 }
 0x140   :  { %3440 = vmatmul.mubr.bf16.vlgmr.msra.gmra.mrb[16].mxu1 %v545_v59 }
 0x141   :  { %3444 = vmatpush3.bf16.msra.mxu1 %v4102_v1  ;;  %3447 = vmatprep.mubr.msk.bf16.mxu1 %vm4042_vm0, %v4041_v0 }
 0x142   :  { %3445 = vmatprep.subr.bf16.mxu1 %v4041_v0 }
 0x145   :  { %3446 = vmatpush3.bf16.msra.mxu1 %v4113_v2 }
 0x146   :  { %3451 = vmatprep.subr.bf16.mxu1 %v4041_v0 }
 0x148   :  { %3448 = vmatmul.mubr.msk.bf16.vlgmr.msra.gmra.mrb[20].mxu1 %vm53_vm1, %v651_v60 }
 0x149   :  { %3467 = vmatprep.mubr.msk.bf16.mxu1 %vm4042_vm0, %v4041_v0  ;;  %3452 = vmatpush3.bf16.msra.mxu1 %v3919_v61 }
 0x14a   :  { %3453 = vmatprep.subr.bf16.mxu1 %v4041_v0 }
 0x14d   :  { %3454 = vmatpush3.bf16.msra.mxu1 %v3920_v62 }
 0x14e   :  { %3455 = vmatprep.subr.bf16.mxu1 %v4041_v0 }
 0x151   :  { %3456 = vmatpush3.bf16.msra.mxu1 %v3921_v63 }
 0x152   :  { %3457 = vmatprep.subr.bf16.mxu1 %v4041_v0 }
 0x155   :  { %3458 = vmatpush3.bf16.msra.mxu1 %v3922_v3 }
 0x156   :  { %3459 = vmatprep.subr.bf16.mxu1 %v4041_v0 }
 0x159   :  { %3460 = vmatpush3.bf16.msra.mxu1 %v3923_v4 }
 0x15a   :  { %3461 = vmatprep.subr.bf16.mxu1 %v4041_v0 }
 0x15d   :  { %3462 = vmatpush3.bf16.msra.mxu1 %v3924_v5 }
 0x15e   :  { %3463 = vmatprep.subr.bf16.mxu1 %v4041_v0 }
 0x161   :  { %3464 = vmatpush3.bf16.msra.mxu1 %v3925_v6 }
 0x162   :  { %3465 = vmatprep.subr.bf16.mxu1 %v4041_v0 }
 0x165   :  { %3466 = vmatpush3.bf16.msra.mxu1 %v3926_v7 }
 0x166   :  { %3479 = vmatprep.subr.bf16.mxu1 %v4041_v0 }
 0x1b2   :  { %v1139_v55 = vpop.f32.mrb[16].mxu0 }
 0x1b3   :  { %v257_v8 = vpop.f32.mrb[4].mxu1  ;;  %v3533_v56 = vpop.f32.mrb[17].mxu0 }
 0x1b4   :  { %v3365_v9 = vpop.f32.mrb[5].mxu1  ;;  %v1142_v57 = vpop.f32.mrb[18].mxu0  ;;  %v1477_v56 = vld [vmem:[%s4980_s4 + $0x4] sm:$0xf] }
 0x1b5   :  { %v260_v10 = vpop.f32.mrb[6].mxu1  ;;  %v3534_v58 = vpop.f32.mrb[19].mxu0  ;;  %v3943_v9 = vld [vmem:[%s4977_s2 + $0x1c0] sm:$0xff]   ;;  %v1864_v57 = vld [vmem:[%s4980_s4 + $0xc] sm:$0xf] }
 0x1b6   :  { %v3366_v11 = vpop.f32.mrb[7].mxu1  ;;  %v3959_v58 = vld [vmem:[%s4978_s5 + $0x40] sm:$0xff]  }
 0x1d3   :  { %v345_v17 = vpop.f32.mrb[8].mxu1 }
 0x1d4   :  { %v346_v18 = vadd.f32 %v345_v17, %v257_v8  ;;  %v3385_v19 = vpop.f32.mrb[9].mxu1  ;;  %v3947_v17 = vld [vmem:[%s4977_s2 + $0x1e0] sm:$0xff]  }
 0x1d5   :  { %v348_v20 = vpop.f32.mrb[10].mxu1  ;;  %v3949_v19 = vld [vmem:[%s4977_s2 + $0x1f0] sm:$0xff]  }
 0x1d6   :  { %v3386_v21 = vpop.f32.mrb[11].mxu1  ;;  %v3950_v20 = vld [vmem:[%s4977_s2 + $0x1f8] sm:$0xff]  }
 0x1d7   :  { %v1145_v21 = vpack.c.bf16 %v1139_v55, %v1139_v55  ;;  %v1714_v55 = vld [vmem:[%s4980_s4 + $0x8] sm:$0xf] }
 0x1f3   :  { %v494_v22 = vpop.f32.mrb[12].mxu1 }
 0x1f4   :  { %v500_v23 = vadd.f32 %v494_v22, %v346_v18  ;;  %v3413_v24 = vpop.f32.mrb[13].mxu1  ;;  %v3948_v18 = vld [vmem:[%s4977_s2 + $0x1e8] sm:$0xff]   ;;  %v1251_v22 = vld [vmem:[%s4976_s1 + $0x20] sm:$0xf] }
 0x1f5   :  { %v497_v25 = vpop.f32.mrb[14].mxu1  ;;  %v3954_v24 = vld [vmem:[%s4977_s2 + $0x218] sm:$0xff]  }
 0x1f6   :  { %v3414_v26 = vpop.f32.mrb[15].mxu1  ;;  %v3955_v25 = vld [vmem:[%s4977_s2 + $0x220] sm:$0xff]  }
 0x1f7   :  { %v3956_v26 = vld [vmem:[%s4977_s2 + $0x228] sm:$0xff]  }
 0x213   :  { %v644_v27 = vpop.f32.mrb[16].mxu1 }
 0x214   :  { %v4356_v28 = vadd.f32 %v644_v27, %v500_v23  ;;  %v3441_v29 = vpop.f32.mrb[17].mxu1  ;;  %v3953_v23 = vld [vmem:[%s4977_s2 + $0x210] sm:$0xff]  }
 0x215   :  { %v647_v30 = vpop.f32.mrb[18].mxu1  ;;  %v3957_v27 = vld [vmem:[%s4977_s2 + $0x230] sm:$0xff]  }
 0x216   :  { %v3442_v31 = vpop.f32.mrb[19].mxu1 }
 0x21b   :  { %v689_v32 = vpop.f32.mrb[20].mxu1 }
 0x21c   :  { %v695_v34 = vpack.c.bf16 %v689_v32, %v689_v32  ;;  %v3449_v35 = vpop.f32.mrb[21].mxu1 }
 0x21d   :  { %v692_v36 = vpop.f32.mrb[22].mxu1 }
 0x21e   :  { %v3450_v37 = vpop.f32.mrb[23].mxu1  ;;  %3468 = vmatmul.mubr.bf16.vlgmr.msra.gmra.mrb[24].mxu1 %v695_v34 }
 0x21f   :  { %3480 = vmatpush3.bf16.msra.mxu1 %v3927_v33  ;;  %3495 = vmatprep.mubr.msk.bf16.mxu1 %vm4042_vm0, %v4041_v0 }
 0x220   :  { %3481 = vmatprep.subr.bf16.mxu1 %v4041_v0 }
 0x223   :  { %3482 = vmatpush3.bf16.msra.mxu1 %v3928_v38 }
 0x224   :  { %3483 = vmatprep.subr.bf16.mxu1 %v4041_v0 }
 0x227   :  { %3484 = vmatpush3.bf16.msra.mxu1 %v3929_v39 }
 0x228   :  { %3485 = vmatprep.subr.bf16.mxu1 %v4041_v0 }
 0x22b   :  { %3486 = vmatpush3.bf16.msra.mxu1 %v3930_v40 }
 0x22c   :  { %3487 = vmatprep.subr.bf16.mxu1 %v4041_v0 }
 0x22f   :  { %3488 = vmatpush3.bf16.msra.mxu1 %v3931_v41 }
 0x230   :  { %3489 = vmatprep.subr.bf16.mxu1 %v4041_v0 }
 0x233   :  { %3490 = vmatpush3.bf16.msra.mxu1 %v3932_v42 }
 0x234   :  { %3491 = vmatprep.subr.bf16.mxu1 %v4041_v0 }
 0x237   :  { %3492 = vmatpush3.bf16.msra.mxu1 %v3933_v43 }
 0x238   :  { %3493 = vmatprep.subr.bf16.mxu1 %v4041_v0 }
 0x23b   :  { %3494 = vmatpush3.bf16.msra.mxu1 %v3934_v44 }
 0x23c   :  { %3499 = vmatprep.subr.bf16.mxu1 %v4041_v0 }
 0x23e   :  { %3496 = vmatmul.mubr.bf16.vlgmr.msra.gmra.mrb[28].mxu1 %v845_v45  ;;  %v3019_v45 = vld [vmem:[%s4979_s3] ss:$0 sm:$0xff] }
 0x23f   :  { %3500 = vmatpush3.bf16.msra.mxu1 %v4102_v1  ;;  %3503 = vmatprep.mubr.msk.bf16.mxu1 %vm4042_vm0, %v4041_v0 }
 0x240   :  { %3501 = vmatprep.subr.bf16.mxu1 %v4041_v0 }
 0x243   :  { %3502 = vmatpush3.bf16.msra.mxu1 %v4113_v2 }
 0x244   :  { %3507 = vmatprep.subr.bf16.mxu1 %v4041_v0 }
 0x246   :  { %3504 = vmatmul.mubr.msk.bf16.vlgmr.msra.gmra.mrb[32].mxu1 %vm53_vm1, %v951_v46 }
 0x247   :  { %3523 = vmatprep.mubr.msk.bf16.mxu1 %vm4042_vm0, %v4041_v0  ;;  %3508 = vmatpush3.bf16.msra.mxu1 %v3935_v47 }
 0x248   :  { %3509 = vmatprep.subr.bf16.mxu1 %v4041_v0 }
 0x24b   :  { %3510 = vmatpush3.bf16.msra.mxu1 %v3936_v48 }
 0x24c   :  { %3511 = vmatprep.subr.bf16.mxu1 %v4041_v0 }
 0x24f   :  { %3512 = vmatpush3.bf16.msra.mxu1 %v3937_v49 }
 0x250   :  { %3513 = vmatprep.subr.bf16.mxu1 %v4041_v0 }
 0x253   :  { %3514 = vmatpush3.bf16.msra.mxu1 %v3938_v50 }
 0x254   :  { %3515 = vmatprep.subr.bf16.mxu1 %v4041_v0 }
 0x257   :  { %3516 = vmatpush3.bf16.msra.mxu1 %v3939_v51 }
 0x258   :  { %3517 = vmatprep.subr.bf16.mxu1 %v4041_v0 }
 0x25b   :  { %3518 = vmatpush3.bf16.msra.mxu1 %v3940_v52 }
 0x25c   :  { %3519 = vmatprep.subr.bf16.mxu1 %v4041_v0 }
 0x25f   :  { %3520 = vmatpush3.bf16.msra.mxu1 %v3941_v53 }
 0x260   :  { %3521 = vmatprep.subr.bf16.mxu1 %v4041_v0 }
 0x263   :  { %3522 = vmatpush3.bf16.msra.mxu1 %v3942_v54  ;;  %v1411_v54 = vld [vmem:[%s4980_s4] sm:$0xf] }
 0x264   :  { %3535 = vmatprep.subr.bf16.mxu1 %v4041_v0 }
 0x2f1   :  { %v794_v59 = vpop.f32.mrb[24].mxu1 }
 0x2f2   :  { %v800_v60 = vadd.f32 %v794_v59, %v4356_v28  ;;  %v3469_v61 = vpop.f32.mrb[25].mxu1  ;;  %v3958_v28 = vld [vmem:[%s4977_s2 + $0x238] sm:$0xff]   ;;  %v3960_v59 = vld [vmem:[%s4978_s5 + $0x48] sm:$0xff]  }
 0x2f3   :  { %v797_v62 = vpop.f32.mrb[26].mxu1  ;;  %v3961_v61 = vld [vmem:[%s4978_s5 + $0x50] sm:$0xff]  }
 0x2f4   :  { %v3470_v63 = vpop.f32.mrb[27].mxu1  ;;  %v3962_v62 = vld [vmem:[%s4978_s5 + $0x58] sm:$0xff]  }
 0x2f5   :  { %v2164_v63 = vld [vmem:[%s4980_s4 + $0x14] sm:$0xf] }
 0x311   :  { %v944_v3 = vpop.f32.mrb[28].mxu1 }
 0x312   :  { %v4437_v4 = vadd.f32 %v944_v3, %v800_v60  ;;  %v3497_v5 = vpop.f32.mrb[29].mxu1  ;;  %v2014_v60 = vld [vmem:[%s4980_s4 + $0x10] sm:$0xf]  ;;  %v3963_v3 = vld [vmem:[%s4978_s5 + $0x60] sm:$0xff]  }
 0x313   :  { %v947_v6 = vpop.f32.mrb[30].mxu1  ;;  %v2314_v5 = vld [vmem:[%s4980_s4 + $0x18] sm:$0xf] }
 0x314   :  { %v3498_v7 = vpop.f32.mrb[31].mxu1  ;;  %v2464_v6 = vld [vmem:[%s4980_s4 + $0x1c] sm:$0xf] }
 0x315   :  { %v3965_v7 = vld [vmem:[%s4978_s5 + $0x70] sm:$0xff]  }
 0x319   :  { %v989_v8 = vpop.f32.mrb[32].mxu1 }
 0x31a   :  { %v995_v10 = vpack.c.bf16 %v989_v8, %v989_v8  ;;  %v3505_v11 = vpop.f32.mrb[33].mxu1  ;;  %v3966_v8 = vld [vmem:[%s4978_s5 + $0x78] sm:$0xff]  }
 0x31b   :  { %v992_v12 = vpop.f32.mrb[34].mxu1  ;;  %v4040_v11 = vld [vmem:[%s4975_s0 + $0x8] sm:$0xff]  }
 0x31c   :  { %v3506_v13 = vpop.f32.mrb[35].mxu1  ;;  %3524 = vmatmul.mubr.bf16.vlgmr.msra.gmra.mrb[36].mxu1 %v995_v10  ;;  %v4039_v10 = vld [vmem:[%s4975_s0] sm:$0xff]  }
 0x31d   :  { %3536 = vmatpush3.bf16.msra.mxu1 %v3943_v9  ;;  %3551 = vmatprep.mubr.msk.bf16.mxu1 %vm4042_vm0, %v4041_v0  ;;  %v2614_v9 = vld [vmem:[%s4980_s4 + $0x20] sm:$0xf] }
 0x31e   :  { %3537 = vmatprep.subr.bf16.mxu1 %v4041_v0  ;;  %v2772_v12 = vld [vmem:[%s4981_s7] sm:$0xf] }
 0x321   :  { %3538 = vmatpush3.bf16.msra.mxu1 %v3944_v14 }
 0x322   :  { %3539 = vmatprep.subr.bf16.mxu1 %v4041_v0 }
 0x325   :  { %3540 = vmatpush3.bf16.msra.mxu1 %v3945_v15 }
 0x326   :  { %3541 = vmatprep.subr.bf16.mxu1 %v4041_v0 }
 0x329   :  { %3542 = vmatpush3.bf16.msra.mxu1 %v3946_v16 }
 0x32a   :  { %3543 = vmatprep.subr.bf16.mxu1 %v4041_v0 }
 0x32d   :  { %3544 = vmatpush3.bf16.msra.mxu1 %v3947_v17 }
 0x32e   :  { %3545 = vmatprep.subr.bf16.mxu1 %v4041_v0 }
 0x331   :  { %3546 = vmatpush3.bf16.msra.mxu1 %v3948_v18 }
 0x332   :  { %3547 = vmatprep.subr.bf16.mxu1 %v4041_v0 }
 0x335   :  { %3548 = vmatpush3.bf16.msra.mxu1 %v3949_v19 }
 0x336   :  { %3549 = vmatprep.subr.bf16.mxu1 %v4041_v0 }
 0x339   :  { %3550 = vmatpush3.bf16.msra.mxu1 %v3950_v20 }
 0x33a   :  { %3555 = vmatprep.subr.bf16.mxu1 %v4041_v0 }
 0x33c   :  { %3552 = vmatmul.mubr.bf16.vlgmr.msra.gmra.mrb[40].mxu1 %v1145_v21 }
 0x33d   :  { %3556 = vmatpush3.bf16.msra.mxu1 %v4102_v1  ;;  %3559 = vmatprep.mubr.msk.bf16.mxu1 %vm4042_vm0, %v4041_v0  ;;  %v3951_v1 = vld [vmem:[%s4977_s2 + $0x200] sm:$0xff]  }
 0x33e   :  { %3557 = vmatprep.subr.bf16.mxu1 %v4041_v0 }
 0x341   :  { %3558 = vmatpush3.bf16.msra.mxu1 %v4113_v2  ;;  %v3952_v2 = vld [vmem:[%s4977_s2 + $0x208] sm:$0xff]  }
 0x342   :  { %3563 = vmatprep.subr.bf16.mxu1 %v4041_v0 }
 0x344   :  { %3560 = vmatmul.mubr.msk.bf16.vlgmr.msra.gmra.mrb[44].mxu1 %vm53_vm1, %v1251_v22  ;;  %v3967_v22 = vld [vmem:[%s4978_s5] sm:$0xff]  }
 0x345   :  { %3579 = vmatprep.mubr.msk.bf16.mxu1 %vm4042_vm0, %v4041_v0  ;;  %3564 = vmatpush3.bf16.msra.mxu1 %v3951_v1 }
 0x346   :  { %3565 = vmatprep.subr.bf16.mxu1 %v4041_v0 }
 0x349   :  { %3566 = vmatpush3.bf16.msra.mxu1 %v3952_v2 }
 0x34a   :  { %3567 = vmatprep.subr.bf16.mxu1 %v4041_v0 }
 0x34d   :  { %3568 = vmatpush3.bf16.msra.mxu1 %v3953_v23 }
 0x34e   :  { %3569 = vmatprep.subr.bf16.mxu1 %v4041_v0 }
 0x351   :  { %3570 = vmatpush3.bf16.msra.mxu1 %v3954_v24 }
 0x352   :  { %3571 = vmatprep.subr.bf16.mxu1 %v4041_v0 }
 0x355   :  { %3572 = vmatpush3.bf16.msra.mxu1 %v3955_v25 }
 0x356   :  { %3573 = vmatprep.subr.bf16.mxu1 %v4041_v0 }
 0x359   :  { %3574 = vmatpush3.bf16.msra.mxu1 %v3956_v26 }
 0x35a   :  { %3575 = vmatprep.subr.bf16.mxu1 %v4041_v0 }
 0x35d   :  { %3576 = vmatpush3.bf16.msra.mxu1 %v3957_v27 }
 0x35e   :  { %3577 = vmatprep.subr.bf16.mxu1 %v4041_v0 }
 0x361   :  { %3578 = vmatpush3.bf16.msra.mxu1 %v3958_v28 }
 0x362   :  { %3635 = vmatprep.subr.bf16.mxu1 %v4041_v0 }
 0x3ef   :  { %v1094_v29 = vpop.f32.mrb[36].mxu1 }
 0x3f0   :  { %v1100_v30 = vadd.f32 %v1094_v29, %v4437_v4  ;;  %v3525_v31 = vpop.f32.mrb[37].mxu1  ;;  %v3964_v4 = vld [vmem:[%s4978_s5 + $0x68] sm:$0xff]  }
 0x3f1   :  { %v1097_v32 = vpop.f32.mrb[38].mxu1  ;;  %v3968_v29 = vld [vmem:[%s4978_s5 + $0x8] sm:$0xff]  }
 0x3f2   :  { %v3526_v33 = vpop.f32.mrb[39].mxu1 }
 0x40f   :  { %v1244_v34 = vpop.f32.mrb[40].mxu1 }
 0x410   :  { %v1250_v35 = vadd.f32 %v1244_v34, %v1100_v30  ;;  %v3553_v36 = vpop.f32.mrb[41].mxu1  ;;  %v3969_v30 = vld [vmem:[%s4978_s5 + $0x10] sm:$0xff]  }
 0x411   :  { %v1247_v37 = vpop.f32.mrb[42].mxu1  ;;  %v3971_v36 = vld [vmem:[%s4978_s5 + $0x20] sm:$0xff]  }
 0x412   :  { %v3554_v38 = vpop.f32.mrb[43].mxu1  ;;  %v3972_v37 = vld [vmem:[%s4978_s5 + $0x28] sm:$0xff]  }
 0x413   :  { %v3973_v38 = vld [vmem:[%s4978_s5 + $0x30] sm:$0xff]  }
 0x417   :  { %v1289_v39 = vpop.f32.mrb[44].mxu1 }
 0x418   :  { %v1295_v40 = vpack.c.bf16 %v1289_v39, %v1289_v39  ;;  %v3561_v41 = vpop.f32.mrb[45].mxu1  ;;  %v3974_v39 = vld [vmem:[%s4978_s5 + $0x38] sm:$0xff]  }
 0x419   :  { %v1292_v42 = vpop.f32.mrb[46].mxu1 }
 0x41a   :  { %v3562_v43 = vpop.f32.mrb[47].mxu1  ;;  %3580 = vmatmul.mubr.bf16.vlgmr.msra.gmra.mrb[48].mxu1 %v1295_v40  ;;  %v3975_v42 = vld [vmem:[%s4978_s5 + $0x80] sm:$0xff]  }
 0x41b   :  { %3637 = vmatprep.mubr.msk.bf16.mxu1 %vm4042_vm0, %v4041_v0 }
 0x4ed   :  { %v1394_v44 = vpop.f32.mrb[48].mxu1 }
 0x4ee   :  { %v1400_v46 = vadd.f32 %v1394_v44, %v1250_v35  ;;  %v3581_v47 = vpop.f32.mrb[49].mxu1  ;;  %v3970_v35 = vld [vmem:[%s4978_s5 + $0x18] sm:$0xff]  }
 0x4ef   :  { %v1397_v48 = vpop.f32.mrb[50].mxu1  ;;  %v3977_v47 = vld [vmem:[%s4978_s5 + $0x90] sm:$0xff]  }
 0x4f0   :  { %v1408_v49 = vadd.f32 %v3019_v45, %v1400_v46  ;;  %v3582_v50 = vpop.f32.mrb[51].mxu1  ;;  %v3976_v46 = vld [vmem:[%s4978_s5 + $0x88] sm:$0xff]   ;;  %v3978_v48 = vld [vmem:[%s4978_s5 + $0x98] sm:$0xff]  }
 0x4f1   :  { %v3980_v50 = vld [vmem:[%s4978_s5 + $0xa8] sm:$0xff]  }
 0x4f2   :  { %v1409_v51 = vmax.f32 %v1408_v49, 0.0  ;;  %v3979_v49 = vld [vmem:[%s4978_s5 + $0xa0] sm:$0xff]  }
 0x4f4   :  { %v1410_v52 = vpack.c.bf16 %v1409_v51, %v1409_v51  ;;  %v3981_v51 = vld [vmem:[%s4978_s5 + $0xb0] sm:$0xff]  }
 0x4f6   :  { %v1418_v53 = vsel %vm1416_vm2, %v1410_v52, 0  ;;  %v3982_v52 = vld [vmem:[%s4978_s5 + $0xb8] sm:$0xff]  }
 0x4f7   :  { %3584 = vmatpush3.bf16.msra.mxu0 %v1418_v53  ;;  %3636 = vmatpush3.bf16.msra.mxu1 %v1418_v53 }
 0x4f8   :  { %3589 = vmatprep.subr.bf16.mxu0 %v4041_v0  ;;  %3661 = vmatprep.subr.bf16.mxu1 %v4041_v0 }
 0x4fa   :  { %3586 = vmatmul.mubr.msk.bf16.vlgmr.msra.gmra.mrb[20].mxu0 %vm1412_vm3, %v1411_v54  ;;  %3638 = vmatmul.mubr.msk.bf16.vlgmr.msra.gmra.mrb[52].mxu1 %vm1412_vm3, %v1714_v55 }
 0x4fb   :  { %3590 = vmatpush3.bf16.msra.mxu0 %v1418_v53  ;;  %3662 = vmatpush3.bf16.msra.mxu1 %v1418_v53 }
 0x4fc   :  { %3591 = vmatprep.mubr.msk.bf16.mxu0 %vm4042_vm0, %v4041_v0  ;;  %3663 = vmatprep.mubr.msk.bf16.mxu1 %vm4042_vm0, %v4041_v0 }
 0x4fd   :  { %3687 = vmatprep.subr.bf16.mxu1 %v4041_v0  ;;  %3595 = vmatprep.subr.bf16.mxu0 %v4041_v0 }
 0x502   :  { %3592 = vmatmul.mubr.msk.bf16.vlgmr.msra.gmra.mrb[24].mxu0 %vm1412_vm3, %v1477_v56  ;;  %3664 = vmatmul.mubr.msk.bf16.vlgmr.msra.gmra.mrb[56].mxu1 %vm1412_vm3, %v1864_v57  ;;  %v3983_v56 = vld [vmem:[%s4978_s5 + $0xc0] sm:$0xff]  }
 0x503   :  { %3688 = vmatpush3.bf16.msra.mxu1 %v1418_v53  ;;  %3689 = vmatprep.mubr.msk.bf16.mxu1 %vm4042_vm0, %v4041_v0 }
 0x504   :  { %3713 = vmatprep.subr.bf16.mxu1 %v4041_v0  ;;  %3596 = vmatpush3.bf16.msra.mxu0 %v3959_v58 }
 0x505   :  { %3597 = vmatprep.subr.bf16.mxu0 %v4041_v0  ;;  %3611 = vmatprep.mubr.msk.bf16.mxu0 %vm4042_vm0, %v4041_v0 }
 0x508   :  { %3598 = vmatpush3.bf16.msra.mxu0 %v3960_v59  ;;  %v3984_v59 = vld [vmem:[%s4978_s5 + $0xc8] sm:$0xff]  }
 0x509   :  { %3599 = vmatprep.subr.bf16.mxu0 %v4041_v0 }
 0x50a   :  { %3690 = vmatmul.mubr.msk.bf16.vlgmr.msra.gmra.mrb[60].mxu1 %vm1412_vm3, %v2014_v60  ;;  %v3985_v60 = vld [vmem:[%s4978_s5 + $0xd0] sm:$0xff]  }
 0x50b   :  { %3714 = vmatpush3.bf16.msra.mxu1 %v1418_v53  ;;  %3715 = vmatprep.mubr.msk.bf16.mxu1 %vm4042_vm0, %v4041_v0 }
 0x50c   :  { %3739 = vmatprep.subr.bf16.mxu1 %v4041_v0  ;;  %3600 = vmatpush3.bf16.msra.mxu0 %v3961_v61  ;;  %v3986_v61 = vld [vmem:[%s4978_s5 + $0xd8] sm:$0xff]  }
 0x50d   :  { %3601 = vmatprep.subr.bf16.mxu0 %v4041_v0 }
 0x510   :  { %3602 = vmatpush3.bf16.msra.mxu0 %v3962_v62  ;;  %v3987_v62 = vld [vmem:[%s4978_s5 + $0xe0] sm:$0xff]  }
 0x511   :  { %3603 = vmatprep.subr.bf16.mxu0 %v4041_v0 }
 0x512   :  { %3716 = vmatmul.mubr.msk.bf16.vlgmr.msra.gmra.mrb[64].mxu1 %vm1412_vm3, %v2164_v63  ;;  %v3988_v63 = vld [vmem:[%s4978_s5 + $0xe8] sm:$0xff]  }
 0x513   :  { %3740 = vmatpush3.bf16.msra.mxu1 %v1418_v53  ;;  %3741 = vmatprep.mubr.msk.bf16.mxu1 %vm4042_vm0, %v4041_v0 }
 0x514   :  { %3765 = vmatprep.subr.bf16.mxu1 %v4041_v0  ;;  %3604 = vmatpush3.bf16.msra.mxu0 %v3963_v3  ;;  %v3989_v3 = vld [vmem:[%s4978_s5 + $0xf0] sm:$0xff]  }
 0x515   :  { %3605 = vmatprep.subr.bf16.mxu0 %v4041_v0 }
 0x518   :  { %3606 = vmatpush3.bf16.msra.mxu0 %v3964_v4  ;;  %v3990_v4 = vld [vmem:[%s4978_s5 + $0xf8] sm:$0xff]  }
 0x519   :  { %3607 = vmatprep.subr.bf16.mxu0 %v4041_v0 }
 0x51a   :  { %3742 = vmatmul.mubr.msk.bf16.vlgmr.msra.gmra.mrb[68].mxu1 %vm1412_vm3, %v2314_v5 }
 0x51b   :  { %3766 = vmatpush3.bf16.msra.mxu1 %v1418_v53  ;;  %3767 = vmatprep.mubr.msk.bf16.mxu1 %vm4042_vm0, %v4041_v0 }
 0x51c   :  { %3791 = vmatprep.subr.bf16.mxu1 %v4041_v0  ;;  %3608 = vmatpush3.bf16.msra.mxu0 %v3965_v7 }
 0x51d   :  { %3609 = vmatprep.subr.bf16.mxu0 %v4041_v0 }
 0x520   :  { %3610 = vmatpush3.bf16.msra.mxu0 %v3966_v8  ;;  %v3991_v8 = vld [vmem:[%s4978_s5 + $0x100] sm:$0xff]  }
 0x521   :  { %3615 = vmatprep.subr.bf16.mxu0 %v4041_v0 }
 0x522   :  { %3768 = vmatmul.mubr.msk.bf16.vlgmr.msra.gmra.mrb[72].mxu1 %vm1412_vm3, %v2464_v6 }
 0x523   :  { %3792 = vmatpush3.bf16.msra.mxu1 %v1418_v53  ;;  %3793 = vmatprep.mubr.msk.bf16.mxu1 %vm4042_vm0, %v4041_v0 }
 0x524   :  { %3817 = vmatprep.subr.bf16.mxu1 %v4041_v0 }
 0x52a   :  { %3794 = vmatmul.mubr.msk.bf16.vlgmr.msra.gmra.mrb[76].mxu1 %vm1412_vm3, %v2614_v9 }
 0x52b   :  { %3818 = vmatpush3.bf16.msra.mxu1 %v4039_v10  ;;  %3821 = vmatprep.mubr.msk.bf16.mxu1 %vm4042_vm0, %v4041_v0 }
 0x52c   :  { %3819 = vmatprep.subr.bf16.mxu1 %v4041_v0 }
 0x52f   :  { %3820 = vmatpush3.bf16.msra.mxu1 %v4040_v11  ;;  %v3992_v11 = vld [vmem:[%s4978_s5 + $0x108] sm:$0xff]  }
 0x532   :  { %3822 = vmatmul.mubr.msk.bf16.vlgmr.msra.gmra.mrb[80].mxu1 %vm53_vm1, %v2772_v12  ;;  %v3993_v12 = vld [vmem:[%s4978_s5 + $0x110] sm:$0xff]  }
 0x5cd   :  { %v1454_v13 = vpop.f32.mrb[20].mxu0  ;;  %v4629_v14 = vpop.f32.mrb[52].mxu1 }
 0x5ce   :  { %v3587_v15 = vpop.f32.mrb[21].mxu0  ;;  %v3639_v16 = vpop.f32.mrb[53].mxu1  ;;  %v1460_v44 = vpack.c.bf16 %v1454_v13, %v1454_v13  ;;  %v1758_v54 = vpack.c.bf16 %v4629_v14, %v4629_v14  ;;  %v3994_v13 = vld [vmem:[%s4978_s5 + $0x118] sm:$0xff]   ;;  %v3995_v14 = vld [vmem:[%s4978_s5 + $0x120] sm:$0xff]  }
 0x5cf   :  { %v1457_v17 = vpop.f32.mrb[22].mxu0  ;;  %v1755_v18 = vpop.f32.mrb[54].mxu1  ;;  %v3996_v15 = vld [vmem:[%s4978_s5 + $0x128] sm:$0xff]   ;;  %v3997_v16 = vld [vmem:[%s4978_s5 + $0x130] sm:$0xff]  }
 0x5d0   :  { %v3588_v19 = vpop.f32.mrb[23].mxu0  ;;  %v3640_v20 = vpop.f32.mrb[55].mxu1  ;;  %v3998_v17 = vld [vmem:[%s4978_s5 + $0x138] sm:$0xff]  }
 0x5d5   :  { %v1515_v21 = vpop.f32.mrb[24].mxu0  ;;  %v4634_v1 = vpop.f32.mrb[56].mxu1 }
 0x5d6   :  { %v1521_v2 = vpack.c.bf16 %v1515_v21, %v1515_v21  ;;  %v3593_v23 = vpop.f32.mrb[25].mxu0  ;;  %v3665_v24 = vpop.f32.mrb[57].mxu1  ;;  %v1908_v6 = vpack.c.bf16 %v4634_v1, %v4634_v1  ;;  %v3999_v21 = vld [vmem:[%s4978_s5 + $0x140] sm:$0xff]  }
 0x5d7   :  { %v1518_v25 = vpop.f32.mrb[26].mxu0  ;;  %v1905_v26 = vpop.f32.mrb[58].mxu1  ;;  %v4001_v23 = vld [vmem:[%s4978_s5 + $0x150] sm:$0xff]   ;;  %v4002_v24 = vld [vmem:[%s4978_s5 + $0x158] sm:$0xff]  }
 0x5d8   :  { %3612 = vmatmul.mubr.bf16.vlgmr.msra.gmra.mrb[28].mxu0 %v1521_v2  ;;  %v3594_v27 = vpop.f32.mrb[27].mxu0  ;;  %v3666_v28 = vpop.f32.mrb[59].mxu1  ;;  %v4000_v2 = vld [vmem:[%s4978_s5 + $0x148] sm:$0xff]   ;;  %v4003_v25 = vld [vmem:[%s4978_s5 + $0x160] sm:$0xff]  }
 0x5d9   :  { %3616 = vmatpush3.bf16.msra.mxu0 %v3967_v22  ;;  %3631 = vmatprep.mubr.msk.bf16.mxu0 %vm4042_vm0, %v4041_v0  ;;  %v4004_v26 = vld [vmem:[%s4978_s5 + $0x168] sm:$0xff]   ;;  %v4005_v27 = vld [vmem:[%s4978_s5 + $0x170] sm:$0xff]   ;;  %v4006_v28 = vld [vmem:[%s4978_s5 + $0x178] sm:$0xff]  }
 0x5da   :  { %3617 = vmatprep.subr.bf16.mxu0 %v4041_v0 }
 0x5dd   :  { %3618 = vmatpush3.bf16.msra.mxu0 %v3968_v29  ;;  %v4645_v31 = vpop.f32.mrb[60].mxu1 }
 0x5de   :  { %3619 = vmatprep.subr.bf16.mxu0 %v4041_v0  ;;  %v3691_v32 = vpop.f32.mrb[61].mxu1  ;;  %v2058_v19 = vpack.c.bf16 %v4645_v31, %v4645_v31 }
 0x5df   :  { %v2055_v33 = vpop.f32.mrb[62].mxu1 }
 0x5e0   :  { %v3692_v34 = vpop.f32.mrb[63].mxu1  ;;  %v4007_v33 = vld [vmem:[%s4978_s5 + $0x180] sm:$0xff]  }
 0x5e1   :  { %3620 = vmatpush3.bf16.msra.mxu0 %v3969_v30 }
 0x5e2   :  { %3621 = vmatprep.subr.bf16.mxu0 %v4041_v0 }
 0x5e5   :  { %3622 = vmatpush3.bf16.msra.mxu0 %v3970_v35  ;;  %v4668_v40 = vpop.f32.mrb[64].mxu1  ;;  %v4008_v35 = vld [vmem:[%s4978_s5 + $0x188] sm:$0xff]  }
 0x5e6   :  { %3623 = vmatprep.subr.bf16.mxu0 %v4041_v0  ;;  %v3717_v41 = vpop.f32.mrb[65].mxu1  ;;  %v2208_v31 = vpack.c.bf16 %v4668_v40, %v4668_v40  ;;  %v4013_v40 = vld [vmem:[%s4978_s5 + $0x1b0] sm:$0xff]  }
 0x5e7   :  { %v2205_v43 = vpop.f32.mrb[66].mxu1  ;;  %v4014_v41 = vld [vmem:[%s4978_s5 + $0x1b8] sm:$0xff]  }
 0x5e8   :  { %v3718_v45 = vpop.f32.mrb[67].mxu1  ;;  %v4015_v43 = vld [vmem:[%s4978_s5 + $0x1c0] sm:$0xff]  }
 0x5e9   :  { %3624 = vmatpush3.bf16.msra.mxu0 %v3971_v36  ;;  %v4009_v36 = vld [vmem:[%s4978_s5 + $0x190] sm:$0xff]  }
 0x5ea   :  { %3625 = vmatprep.subr.bf16.mxu0 %v4041_v0  ;;  %v4017_v45 = vld [vmem:[%s4978_s5 + $0x1d0] sm:$0xff]  }
 0x5ed   :  { %3626 = vmatpush3.bf16.msra.mxu0 %v3972_v37  ;;  %v4704_v53 = vpop.f32.mrb[68].mxu1  ;;  %v4010_v37 = vld [vmem:[%s4978_s5 + $0x198] sm:$0xff]  }
 0x5ee   :  { %3627 = vmatprep.subr.bf16.mxu0 %v4041_v0  ;;  %v3743_v55 = vpop.f32.mrb[69].mxu1 }
 0x5ef   :  { %v2355_v57 = vpop.f32.mrb[70].mxu1  ;;  %v4026_v55 = vld [vmem:[%s4978_s5 + $0x218] sm:$0xff]  }
 0x5f0   :  { %v3744_v58 = vpop.f32.mrb[71].mxu1  ;;  %v4028_v57 = vld [vmem:[%s4978_s5 + $0x228] sm:$0xff]  }
 0x5f1   :  { %3628 = vmatpush3.bf16.msra.mxu0 %v3973_v38  ;;  %v4011_v38 = vld [vmem:[%s4978_s5 + $0x1a0] sm:$0xff]   ;;  %v4029_v58 = vld [vmem:[%s4978_s5 + $0x230] sm:$0xff]  }
 0x5f2   :  { %3629 = vmatprep.subr.bf16.mxu0 %v4041_v0 }
 0x5f5   :  { %3630 = vmatpush3.bf16.msra.mxu0 %v3974_v39  ;;  %v4742_v5 = vpop.f32.mrb[72].mxu1  ;;  %v4012_v39 = vld [vmem:[%s4978_s5 + $0x1a8] sm:$0xff]  }
 0x5f6   :  { %3641 = vmatprep.subr.bf16.mxu0 %v4041_v0  ;;  %v3769_v7 = vpop.f32.mrb[73].mxu1 }
 0x5f7   :  { %v2505_v9 = vpop.f32.mrb[74].mxu1  ;;  %v4038_v7 = vld [vmem:[%s4982_s8 + $0x38] sm:$0xff]  }
 0x5f8   :  { %3632 = vmatmul.mubr.bf16.vlgmr.msra.gmra.mrb[28].mxu0 %v1460_v44  ;;  %v3770_v10 = vpop.f32.mrb[75].mxu1  ;;  %v4016_v44 = vld [vmem:[%s4978_s5 + $0x1c8] sm:$0xff]   ;;  %v3101_v9 = vld [vmem:[%s4983_s6] ss:$0 sm:$0xff] }
 0x5f9   :  { %3642 = vmatpush3.bf16.msra.mxu0 %v3975_v42  ;;  %3657 = vmatprep.mubr.msk.bf16.mxu0 %vm4042_vm0, %v4041_v0  ;;  %v2358_v42 = vpack.c.bf16 %v4704_v53, %v4704_v53  ;;  %v4024_v53 = vld [vmem:[%s4978_s5 + $0x208] sm:$0xff]   ;;  %v3103_v10 = vld [vmem:[%s4984_s9] ss:$0 sm:$0xff] }
 0x5fa   :  { %3643 = vmatprep.subr.bf16.mxu0 %v4041_v0 }
 0x5fd   :  { %3644 = vmatpush3.bf16.msra.mxu0 %v3976_v46  ;;  %v4780_v18 = vpop.f32.mrb[76].mxu1  ;;  %v4018_v46 = vld [vmem:[%s4978_s5 + $0x1d8] sm:$0xff]  }
 0x5fe   :  { %3645 = vmatprep.subr.bf16.mxu0 %v4041_v0  ;;  %v3795_v20 = vpop.f32.mrb[77].mxu1 }
 0x5ff   :  { %v2655_v22 = vpop.f32.mrb[78].mxu1 }
 0x600   :  { %v3796_v1 = vpop.f32.mrb[79].mxu1 }
 0x601   :  { %3646 = vmatpush3.bf16.msra.mxu0 %v3977_v47  ;;  %v4019_v47 = vld [vmem:[%s4978_s5 + $0x1e0] sm:$0xff]  }
 0x602   :  { %3647 = vmatprep.subr.bf16.mxu0 %v4041_v0 }
 0x605   :  { %3648 = vmatpush3.bf16.msra.mxu0 %v3978_v48  ;;  %v4818_v29 = vpop.f32.mrb[80].mxu1  ;;  %v4020_v48 = vld [vmem:[%s4978_s5 + $0x1e8] sm:$0xff]  }
 0x606   :  { %3649 = vmatprep.subr.bf16.mxu0 %v4041_v0  ;;  %v3823_v30 = vpop.f32.mrb[81].mxu1 }
 0x607   :  { %v2813_v32 = vpop.f32.mrb[82].mxu1 }
 0x608   :  { %v3824_v34 = vpop.f32.mrb[83].mxu1 }
 0x609   :  { %3650 = vmatpush3.bf16.msra.mxu0 %v3979_v49  ;;  %v4021_v49 = vld [vmem:[%s4978_s5 + $0x1f0] sm:$0xff]  }
 0x60a   :  { %3651 = vmatprep.subr.bf16.mxu0 %v4041_v0 }
 0x60d   :  { %3652 = vmatpush3.bf16.msra.mxu0 %v3980_v50  ;;  %v4022_v50 = vld [vmem:[%s4978_s5 + $0x1f8] sm:$0xff]  }
 0x60e   :  { %3653 = vmatprep.subr.bf16.mxu0 %v4041_v0 }
 0x611   :  { %3654 = vmatpush3.bf16.msra.mxu0 %v3981_v51  ;;  %v2508_v51 = vpack.c.bf16 %v4742_v5, %v4742_v5  ;;  %v4036_v5 = vld [vmem:[%s4982_s8 + $0x28] sm:$0xff]  }
 0x612   :  { %3655 = vmatprep.subr.bf16.mxu0 %v4041_v0 }
 0x615   :  { %3656 = vmatpush3.bf16.msra.mxu0 %v3982_v52  ;;  %v4023_v52 = vld [vmem:[%s4978_s5 + $0x200] sm:$0xff]  }
 0x616   :  { %3667 = vmatprep.subr.bf16.mxu0 %v4041_v0 }
 0x618   :  { %3658 = vmatmul.mubr.bf16.vlgmr.msra.gmra.mrb[28].mxu0 %v1758_v54  ;;  %v4025_v54 = vld [vmem:[%s4978_s5 + $0x210] sm:$0xff]  }
 0x619   :  { %3668 = vmatpush3.bf16.msra.mxu0 %v3983_v56  ;;  %3683 = vmatprep.mubr.msk.bf16.mxu0 %vm4042_vm0, %v4041_v0  ;;  %v4027_v56 = vld [vmem:[%s4978_s5 + $0x220] sm:$0xff]  }
 0x61a   :  { %3669 = vmatprep.subr.bf16.mxu0 %v4041_v0 }
 0x61d   :  { %3670 = vmatpush3.bf16.msra.mxu0 %v3984_v59  ;;  %v4030_v59 = vld [vmem:[%s4978_s5 + $0x238] sm:$0xff]  }
 0x61e   :  { %3671 = vmatprep.subr.bf16.mxu0 %v4041_v0 }
 0x621   :  { %3672 = vmatpush3.bf16.msra.mxu0 %v3985_v60  ;;  %v2658_v60 = vpack.c.bf16 %v4780_v18, %v4780_v18 }
 0x622   :  { %3673 = vmatprep.subr.bf16.mxu0 %v4041_v0 }
 0x625   :  { %3674 = vmatpush3.bf16.msra.mxu0 %v3986_v61  ;;  %v4031_v61 = vld [vmem:[%s4982_s8] sm:$0xff]  }
 0x626   :  { %3675 = vmatprep.subr.bf16.mxu0 %v4041_v0 }
 0x629   :  { %3676 = vmatpush3.bf16.msra.mxu0 %v3987_v62  ;;  %v4032_v62 = vld [vmem:[%s4982_s8 + $0x8] sm:$0xff]  }
 0x62a   :  { %3677 = vmatprep.subr.bf16.mxu0 %v4041_v0 }
 0x62d   :  { %3678 = vmatpush3.bf16.msra.mxu0 %v3988_v63  ;;  %v4033_v63 = vld [vmem:[%s4982_s8 + $0x10] sm:$0xff]  }
 0x62e   :  { %3679 = vmatprep.subr.bf16.mxu0 %v4041_v0 }
 0x631   :  { %3680 = vmatpush3.bf16.msra.mxu0 %v3989_v3  ;;  %v4034_v3 = vld [vmem:[%s4982_s8 + $0x18] sm:$0xff]  }
 0x632   :  { %3681 = vmatprep.subr.bf16.mxu0 %v4041_v0 }
 0x635   :  { %3682 = vmatpush3.bf16.msra.mxu0 %v3990_v4  ;;  %v4035_v4 = vld [vmem:[%s4982_s8 + $0x20] sm:$0xff]  }
 0x636   :  { %3693 = vmatprep.subr.bf16.mxu0 %v4041_v0 }
 0x638   :  { %3684 = vmatmul.mubr.bf16.vlgmr.msra.gmra.mrb[28].mxu0 %v1908_v6  ;;  %v4037_v6 = vld [vmem:[%s4982_s8 + $0x30] sm:$0xff]  }
 0x639   :  { %3694 = vmatpush3.bf16.msra.mxu0 %v3991_v8  ;;  %3709 = vmatprep.mubr.msk.bf16.mxu0 %vm4042_vm0, %v4041_v0  ;;  %v2816_v8 = vpack.c.bf16 %v4818_v29, %v4818_v29 }
 0x63a   :  { %3695 = vmatprep.subr.bf16.mxu0 %v4041_v0 }
 0x63d   :  { %3696 = vmatpush3.bf16.msra.mxu0 %v3992_v11  ;;  %v3845_v11 = vadd.f32 %v3103_v10, %v3101_v9 }
 0x63e   :  { %3697 = vmatprep.subr.bf16.mxu0 %v4041_v0 }
 0x641   :  { %3698 = vmatpush3.bf16.msra.mxu0 %v3993_v12 }
 0x642   :  { %3699 = vmatprep.subr.bf16.mxu0 %v4041_v0 }
 0x645   :  { %3700 = vmatpush3.bf16.msra.mxu0 %v3994_v13 }
 0x646   :  { %3701 = vmatprep.subr.bf16.mxu0 %v4041_v0 }
 0x649   :  { %3702 = vmatpush3.bf16.msra.mxu0 %v3995_v14 }
 0x64a   :  { %3703 = vmatprep.subr.bf16.mxu0 %v4041_v0 }
 0x64d   :  { %3704 = vmatpush3.bf16.msra.mxu0 %v3996_v15 }
 0x64e   :  { %3705 = vmatprep.subr.bf16.mxu0 %v4041_v0 }
 0x651   :  { %3706 = vmatpush3.bf16.msra.mxu0 %v3997_v16 }
 0x652   :  { %3707 = vmatprep.subr.bf16.mxu0 %v4041_v0 }
 0x655   :  { %3708 = vmatpush3.bf16.msra.mxu0 %v3998_v17 }
 0x656   :  { %3719 = vmatprep.subr.bf16.mxu0 %v4041_v0 }
 0x658   :  { %3710 = vmatmul.mubr.bf16.vlgmr.msra.gmra.mrb[28].mxu0 %v2058_v19 }
 0x659   :  { %3720 = vmatpush3.bf16.msra.mxu0 %v3999_v21  ;;  %3735 = vmatprep.mubr.msk.bf16.mxu0 %vm4042_vm0, %v4041_v0 }
 0x65a   :  { %3721 = vmatprep.subr.bf16.mxu0 %v4041_v0 }
 0x65d   :  { %3722 = vmatpush3.bf16.msra.mxu0 %v4000_v2 }
 0x65e   :  { %3723 = vmatprep.subr.bf16.mxu0 %v4041_v0 }
 0x661   :  { %3724 = vmatpush3.bf16.msra.mxu0 %v4001_v23 }
 0x662   :  { %3725 = vmatprep.subr.bf16.mxu0 %v4041_v0 }
 0x665   :  { %3726 = vmatpush3.bf16.msra.mxu0 %v4002_v24 }
 0x666   :  { %3727 = vmatprep.subr.bf16.mxu0 %v4041_v0 }
 0x669   :  { %3728 = vmatpush3.bf16.msra.mxu0 %v4003_v25 }
 0x66a   :  { %3729 = vmatprep.subr.bf16.mxu0 %v4041_v0 }
 0x66d   :  { %3730 = vmatpush3.bf16.msra.mxu0 %v4004_v26 }
 0x66e   :  { %3731 = vmatprep.subr.bf16.mxu0 %v4041_v0 }
 0x671   :  { %3732 = vmatpush3.bf16.msra.mxu0 %v4005_v27 }
 0x672   :  { %3733 = vmatprep.subr.bf16.mxu0 %v4041_v0 }
 0x675   :  { %3734 = vmatpush3.bf16.msra.mxu0 %v4006_v28 }
 0x676   :  { %3745 = vmatprep.subr.bf16.mxu0 %v4041_v0 }
 0x678   :  { %3736 = vmatmul.mubr.bf16.vlgmr.msra.gmra.mrb[28].mxu0 %v2208_v31 }
 0x679   :  { %3746 = vmatpush3.bf16.msra.mxu0 %v4007_v33  ;;  %3761 = vmatprep.mubr.msk.bf16.mxu0 %vm4042_vm0, %v4041_v0 }
 0x67a   :  { %3747 = vmatprep.subr.bf16.mxu0 %v4041_v0 }
 0x67d   :  { %3748 = vmatpush3.bf16.msra.mxu0 %v4008_v35 }
 0x67e   :  { %3749 = vmatprep.subr.bf16.mxu0 %v4041_v0 }
 0x681   :  { %3750 = vmatpush3.bf16.msra.mxu0 %v4009_v36 }
 0x682   :  { %3751 = vmatprep.subr.bf16.mxu0 %v4041_v0 }
 0x685   :  { %3752 = vmatpush3.bf16.msra.mxu0 %v4010_v37 }
 0x686   :  { %3753 = vmatprep.subr.bf16.mxu0 %v4041_v0 }
 0x689   :  { %3754 = vmatpush3.bf16.msra.mxu0 %v4011_v38 }
 0x68a   :  { %3755 = vmatprep.subr.bf16.mxu0 %v4041_v0 }
 0x68d   :  { %3756 = vmatpush3.bf16.msra.mxu0 %v4012_v39 }
 0x68e   :  { %3757 = vmatprep.subr.bf16.mxu0 %v4041_v0 }
 0x691   :  { %3758 = vmatpush3.bf16.msra.mxu0 %v4013_v40 }
 0x692   :  { %3759 = vmatprep.subr.bf16.mxu0 %v4041_v0 }
 0x695   :  { %3760 = vmatpush3.bf16.msra.mxu0 %v4014_v41 }
 0x696   :  { %3771 = vmatprep.subr.bf16.mxu0 %v4041_v0 }
 0x698   :  { %3762 = vmatmul.mubr.bf16.vlgmr.msra.gmra.mrb[28].mxu0 %v2358_v42 }
 0x699   :  { %3772 = vmatpush3.bf16.msra.mxu0 %v4015_v43  ;;  %3787 = vmatprep.mubr.msk.bf16.mxu0 %vm4042_vm0, %v4041_v0 }
 0x69a   :  { %3773 = vmatprep.subr.bf16.mxu0 %v4041_v0 }
 0x69d   :  { %3774 = vmatpush3.bf16.msra.mxu0 %v4016_v44 }
 0x69e   :  { %3775 = vmatprep.subr.bf16.mxu0 %v4041_v0 }
 0x6a1   :  { %3776 = vmatpush3.bf16.msra.mxu0 %v4017_v45 }
 0x6a2   :  { %3777 = vmatprep.subr.bf16.mxu0 %v4041_v0 }
 0x6a5   :  { %3778 = vmatpush3.bf16.msra.mxu0 %v4018_v46 }
 0x6a6   :  { %3779 = vmatprep.subr.bf16.mxu0 %v4041_v0 }
 0x6a9   :  { %3780 = vmatpush3.bf16.msra.mxu0 %v4019_v47 }
 0x6aa   :  { %3781 = vmatprep.subr.bf16.mxu0 %v4041_v0 }
 0x6ad   :  { %3782 = vmatpush3.bf16.msra.mxu0 %v4020_v48 }
 0x6ae   :  { %3783 = vmatprep.subr.bf16.mxu0 %v4041_v0 }
 0x6b1   :  { %3784 = vmatpush3.bf16.msra.mxu0 %v4021_v49 }
 0x6b2   :  { %3785 = vmatprep.subr.bf16.mxu0 %v4041_v0 }
 0x6b5   :  { %3786 = vmatpush3.bf16.msra.mxu0 %v4022_v50 }
 0x6b6   :  { %3797 = vmatprep.subr.bf16.mxu0 %v4041_v0 }
 0x6b8   :  { %3788 = vmatmul.mubr.bf16.vlgmr.msra.gmra.mrb[28].mxu0 %v2508_v51 }
 0x6b9   :  { %3798 = vmatpush3.bf16.msra.mxu0 %v4023_v52  ;;  %3813 = vmatprep.mubr.msk.bf16.mxu0 %vm4042_vm0, %v4041_v0 }
 0x6ba   :  { %3799 = vmatprep.subr.bf16.mxu0 %v4041_v0 }
 0x6bd   :  { %3800 = vmatpush3.bf16.msra.mxu0 %v4024_v53 }
 0x6be   :  { %3801 = vmatprep.subr.bf16.mxu0 %v4041_v0 }
 0x6c1   :  { %3802 = vmatpush3.bf16.msra.mxu0 %v4025_v54 }
 0x6c2   :  { %3803 = vmatprep.subr.bf16.mxu0 %v4041_v0 }
 0x6c5   :  { %3804 = vmatpush3.bf16.msra.mxu0 %v4026_v55 }
 0x6c6   :  { %3805 = vmatprep.subr.bf16.mxu0 %v4041_v0 }
 0x6c9   :  { %3806 = vmatpush3.bf16.msra.mxu0 %v4027_v56 }
 0x6ca   :  { %3807 = vmatprep.subr.bf16.mxu0 %v4041_v0 }
 0x6cd   :  { %3808 = vmatpush3.bf16.msra.mxu0 %v4028_v57 }
 0x6ce   :  { %3809 = vmatprep.subr.bf16.mxu0 %v4041_v0 }
 0x6d1   :  { %3810 = vmatpush3.bf16.msra.mxu0 %v4029_v58 }
 0x6d2   :  { %3811 = vmatprep.subr.bf16.mxu0 %v4041_v0 }
 0x6d5   :  { %3812 = vmatpush3.bf16.msra.mxu0 %v4030_v59 }
 0x6d6   :  { %3825 = vmatprep.subr.bf16.mxu0 %v4041_v0 }
 0x6d8   :  { %3814 = vmatmul.mubr.bf16.vlgmr.msra.gmra.mrb[28].mxu0 %v2658_v60 }
 0x6d9   :  { %3826 = vmatpush3.bf16.msra.mxu0 %v4031_v61  ;;  %3841 = vmatprep.mubr.msk.bf16.mxu0 %vm4042_vm0, %v4041_v0 }
 0x6da   :  { %3827 = vmatprep.subr.bf16.mxu0 %v4041_v0 }
 0x6dd   :  { %3828 = vmatpush3.bf16.msra.mxu0 %v4032_v62 }
 0x6de   :  { %3829 = vmatprep.subr.bf16.mxu0 %v4041_v0 }
 0x6e1   :  { %3830 = vmatpush3.bf16.msra.mxu0 %v4033_v63 }
 0x6e2   :  { %3831 = vmatprep.subr.bf16.mxu0 %v4041_v0 }
 0x6e5   :  { %3832 = vmatpush3.bf16.msra.mxu0 %v4034_v3 }
 0x6e6   :  { %3833 = vmatprep.subr.bf16.mxu0 %v4041_v0 }
 0x6e9   :  { %3834 = vmatpush3.bf16.msra.mxu0 %v4035_v4 }
 0x6ea   :  { %3835 = vmatprep.subr.bf16.mxu0 %v4041_v0 }
 0x6ed   :  { %3836 = vmatpush3.bf16.msra.mxu0 %v4036_v5 }
 0x6ee   :  { %3837 = vmatprep.subr.bf16.mxu0 %v4041_v0 }
 0x6f1   :  { %3838 = vmatpush3.bf16.msra.mxu0 %v4037_v6 }
 0x6f2   :  { %3839 = vmatprep.subr.bf16.mxu0 %v4041_v0 }
 0x6f5   :  { %3840 = vmatpush3.bf16.msra.mxu0 %v4038_v7 }
 0x6f8   :  { %3842 = vmatmul.mubr.bf16.vlgmr.msra.gmra.mrb[28].mxu0 %v2816_v8 }
 0x7cb   :  { %v2922_v12 = vpop.f32.mrb[28].mxu0 }
 0x7cc   :  { %v3846_v13 = vadd.f32 %v3845_v11, %v2922_v12  ;;  %v3843_v14 = vpop.f32.mrb[29].mxu0 }
 0x7cd   :  { %v2925_v15 = vpop.f32.mrb[30].mxu0 }
 0x7ce   :  { %v2929_v16 = vmax.f32 %v3846_v13, 0.0  ;;  %v3844_v0 = vpop.f32.mrb[31].mxu0 }
 0x7d0   :  { %v2930_v17 = vpack.c.bf16 %v2929_v16, %v2929_v16 }
 0x7d2   :  { %2931 = vst [vmem:[%s4985_s10] sm:$0xf] %v2930_v17 }

// kernel: _lambda_.9
= control target key start
LH: loop header
LB: loop body
LE: loop exit
PB: predicated region body
PF: predicated region fallthrough
CT: control target
= control target key end

     0   :  { %s4904_s21 = smov 0   ;;  %s5505_s0 = inlined_call_operand.vmem [shape: bf16[32,128], index: 0, kind: input, shape index: {}]   ;;  %s5506_s1 = inlined_call_operand.vmem [shape: bf16[288,32], index: 1, kind: input, shape index: {}]   ;;  %s5507_s2 = inlined_call_operand.vmem [shape: bf16[3,1152,128], index: 2, kind: input, shape index: {}]   ;;  %s5508_s3 = inlined_call_operand.vmem [shape: f32[3,1,128], index: 3, kind: input, shape index: {}, may-alias: {3,5}]   ;;  %s5509_s4 = inlined_call_operand.vmem [shape: bf16[3,1152,128], index: 4, kind: input, shape index: {}]   ;;  %s5510_s5 = inlined_call_operand.vmem [shape: f32[3,1,128], index: 5, kind: input, shape index: {}, may-alias: {3,5}]   ;;  %s5511_s6 = inlined_call_operand.vmem [shape: bf16[32,128], index: 6, kind: output, shape index: {}]  }
   0x1 LB: > { %s3621_s22 = sadd.s32 4294967295, %s4867_s21   ;;  %p3624_p0 = scmp.ge.s32.totalorder %s4867_s21, 1  ;;  %s4867_s21 = sphi %s4904_s21, %s16_s21  }
   0x2   : > { %p233_p1 = scmp.lt.s32.totalorder %s4867_s21, 4 }
   0x4   : > { %p234_p2 = pnand %p3624_p0, %p233_p1 }
   0x5   : > { %p269_p3 = scmp.lt.s32.totalorder (!%p234_p2), %s3621_s22, 2  ;;  %p3627_p4 = scmp.ne.s32.totalorder (!%p234_p2), %s3621_s22, 0 }
   0x6   : > { %237 = sbr.rel (%p234_p2) target bundleno = 2186 (0x88a), region = 44 }
   0xd   : > { %s4912_s23 = scalar_select %p269_p3, %s3621_s22, 2 }
   0xe   : > { %289 = sbr.rel (%p3627_p4) target bundleno = 21 (0x15), region = 48  ;;  %v290_v0 = vld [vmem:[%s5505_s0] sm:$0xff] (!%p3627_p4)   ;;  %v292_v1 = vld [vmem:[%s5505_s0 + $0x8] sm:$0xff] (!%p3627_p4)  }
   0xf   : > { %s4671_s24 = smul.u32 576, %s4912_s23  ;;  %s276_s27 = scalar_lea.vmem %s5508_s3, %s4912_s23  ;;  %294 = vst [vmem:[%s5511_s6] sm:$0xff] (!%p3627_p4), %v290_v0   ;;  %296 = vst [vmem:[%s5511_s6 + $0x8] sm:$0xff] (!%p3627_p4), %v292_v1  }
  0x10   : > { %s284_s30 = scalar_lea.vmem %s5510_s5, %s4912_s23 }
  0x11   : > { %s4926_s9 = scalar_lea.vmem %s5507_s2, %s4671_s24  ;;  %s4931_s12 = scalar_lea.vmem %s5509_s4, %s4671_s24 }
  0x15 PF: > { %vm328_vm0 = vcmask 261120   ;;  %v4958_v4 = vld [vmem:[%s5506_s1] sm:$0xff]   ;;  %v4683_v6 = vld [vmem:[%s5506_s1 + $0x8] sm:$0xff]   ;;  %v4684_v7 = vld [vmem:[%s5506_s1 + $0x10] sm:$0xff]  }
  0x16   : > { %v4948_v2 = vld [vmem:[%s5511_s6] sm:$0xff]   ;;  %v4953_v3 = vld [vmem:[%s5511_s6 + $0x8] sm:$0xff]   ;;  %4107 = vmatprep.mubr.msk.bf16.mxu0 %vm328_vm0, %v4958_v4  ;;  %v4688_v9 = vld [vmem:[%s5506_s1 + $0x30] sm:$0xff]  }
  0x17   : > { %4103 = vmatprep.subr.bf16.mxu0 %v4948_v2  ;;  %4159 = vmatprep.subr.bf16.mxu1 %v4948_v2  ;;  %v4686_v5 = vld [vmem:[%s5506_s1 + $0x20] sm:$0xff]   ;;  %v4687_v8 = vld [vmem:[%s5506_s1 + $0x28] sm:$0xff]   ;;  %v4685_v11 = vld [vmem:[%s5506_s1 + $0x18] sm:$0xff]  }
  0x18   : > { %4104 = vmatpush3.bf16.msra.mxu0 %v4948_v2  ;;  %4160 = vmatpush3.bf16.msra.mxu1 %v4948_v2  ;;  %v4694_v10 = vld [vmem:[%s4926_s9 + $0x40] sm:$0xff]   ;;  %v4689_v12 = vld [vmem:[%s5506_s1 + $0x38] sm:$0xff]   ;;  %v4696_v13 = vld [vmem:[%s4926_s9 + $0x48] sm:$0xff]  }
  0x19   : > { %4105 = vmatprep.subr.bf16.mxu0 %v4953_v3  ;;  %4161 = vmatprep.subr.bf16.mxu1 %v4953_v3  ;;  %v4690_v14 = vld [vmem:[%s5506_s1 + $0x40] sm:$0xff]   ;;  %v4698_v15 = vld [vmem:[%s4926_s9 + $0x50] sm:$0xff]   ;;  %v4691_v16 = vld [vmem:[%s5506_s1 + $0x48] sm:$0xff]  }
  0x1a   : > { %4163 = vmatprep.mubr.msk.bf16.mxu1 %vm328_vm0, %v4686_v5  ;;  %v4699_v17 = vld [vmem:[%s4926_s9 + $0x58] sm:$0xff]   ;;  %v4692_v18 = vld [vmem:[%s5506_s1 + $0x50] sm:$0xff]   ;;  %v4700_v19 = vld [vmem:[%s4926_s9 + $0x60] sm:$0xff]  }
  0x1b   : > { %v4693_v20 = vld [vmem:[%s5506_s1 + $0x58] sm:$0xff]   ;;  %v4695_v21 = vld [vmem:[%s5506_s1 + $0x60] sm:$0xff]   ;;  %v4697_v22 = vld [vmem:[%s5506_s1 + $0x68] sm:$0xff]  }
  0x1c   : > { %4106 = vmatpush3.bf16.msra.mxu0 %v4953_v3  ;;  %4162 = vmatpush3.bf16.msra.mxu1 %v4953_v3  ;;  %v4701_v23 = vld [vmem:[%s4926_s9 + $0x68] sm:$0xff]   ;;  %v4702_v24 = vld [vmem:[%s4926_s9 + $0x70] sm:$0xff]   ;;  %v4703_v25 = vld [vmem:[%s4926_s9 + $0x78] sm:$0xff]  }
  0x1d   : > { %4111 = vmatprep.subr.bf16.mxu0 %v4948_v2  ;;  %4187 = vmatprep.subr.bf16.mxu1 %v4948_v2  ;;  %v4704_v26 = vld [vmem:[%s4926_s9] sm:$0xff]   ;;  %v5059_v27 = vld [vmem:[%s5506_s1 + $0x70] sm:$0xff]   ;;  %v5064_v28 = vld [vmem:[%s5506_s1 + $0x78] sm:$0xff]  }
  0x1e   : > { %v5076_v29 = vld [vmem:[%s5506_s1 + $0x80] sm:$0xff]   ;;  %v5081_v30 = vld [vmem:[%s5506_s1 + $0x88] sm:$0xff]   ;;  %v4708_v56 = vld [vmem:[%s4926_s9 + $0x10] sm:$0xff]  }
  0x1f   : > { %4108 = vmatmul.mubr.msk.bf16.vlgmr.msra.gmra.mrb[0].mxu0 %vm328_vm0, %v4683_v6  ;;  %4164 = vmatmul.mubr.msk.bf16.vlgmr.msra.gmra.mrb[0].mxu1 %vm328_vm0, %v4687_v8  ;;  %v4706_v52 = vld [vmem:[%s4926_s9 + $0x8] sm:$0xff]   ;;  %v4709_v60 = vld [vmem:[%s4926_s9 + $0x18] sm:$0xff]   ;;  %v4710_v0 = vld [vmem:[%s4926_s9 + $0x20] sm:$0xff]  }
  0x20   : > { %4112 = vmatpush3.bf16.msra.mxu0 %v4948_v2  ;;  %4115 = vmatprep.mubr.msk.bf16.mxu0 %vm328_vm0, %v4684_v7  ;;  %v4711_v1 = vld [vmem:[%s4926_s9 + $0x28] sm:$0xff]  }
  0x21   : > { %4113 = vmatprep.subr.bf16.mxu0 %v4953_v3  ;;  %4188 = vmatpush3.bf16.msra.mxu1 %v4948_v2 }
  0x22   : > { %4191 = vmatprep.mubr.msk.bf16.mxu1 %vm328_vm0, %v4688_v9  ;;  %4189 = vmatprep.subr.bf16.mxu1 %v4953_v3  ;;  %v4714_v9 = vld [vmem:[%s4926_s9 + $0x80] sm:$0xff]  }
  0x24   : > { %4114 = vmatpush3.bf16.msra.mxu0 %v4953_v3 }
  0x25   : > { %4119 = vmatprep.subr.bf16.mxu0 %v4694_v10  ;;  %4190 = vmatpush3.bf16.msra.mxu1 %v4953_v3 }
  0x26   : > { %4215 = vmatprep.subr.bf16.mxu1 %v4948_v2 }
  0x27   : > { %4116 = vmatmul.mubr.msk.bf16.vlgmr.msra.gmra.mrb[4].mxu0 %vm328_vm0, %v4685_v11  ;;  %v4717_v11 = vld [vmem:[%s4926_s9 + $0x88] sm:$0xff]  }
  0x28   : > { %4120 = vmatpush3.bf16.msra.mxu0 %v4694_v10  ;;  %4192 = vmatmul.mubr.msk.bf16.vlgmr.msra.gmra.mrb[4].mxu1 %vm328_vm0, %v4689_v12  ;;  %v4718_v12 = vld [vmem:[%s4926_s9 + $0x90] sm:$0xff]  }
  0x29   : > { %4121 = vmatprep.subr.bf16.mxu0 %v4696_v13  ;;  %4216 = vmatpush3.bf16.msra.mxu1 %v4948_v2 }
  0x2a   : > { %4219 = vmatprep.mubr.msk.bf16.mxu1 %vm328_vm0, %v4690_v14  ;;  %4217 = vmatprep.subr.bf16.mxu1 %v4953_v3  ;;  %v4720_v14 = vld [vmem:[%s4926_s9 + $0xa0] sm:$0xff]  }
  0x2c   : > { %4122 = vmatpush3.bf16.msra.mxu0 %v4696_v13  ;;  %v4719_v13 = vld [vmem:[%s4926_s9 + $0x98] sm:$0xff]  }
  0x2d   : > { %4123 = vmatprep.subr.bf16.mxu0 %v4698_v15  ;;  %4218 = vmatpush3.bf16.msra.mxu1 %v4953_v3 }
  0x2e   : > { %4243 = vmatprep.subr.bf16.mxu1 %v4948_v2 }
  0x30   : > { %4124 = vmatpush3.bf16.msra.mxu0 %v4698_v15  ;;  %4220 = vmatmul.mubr.msk.bf16.vlgmr.msra.gmra.mrb[8].mxu1 %vm328_vm0, %v4691_v16  ;;  %v4721_v15 = vld [vmem:[%s4926_s9 + $0xa8] sm:$0xff]   ;;  %v4722_v16 = vld [vmem:[%s4926_s9 + $0xb0] sm:$0xff]  }
  0x31   : > { %4125 = vmatprep.subr.bf16.mxu0 %v4699_v17  ;;  %4244 = vmatpush3.bf16.msra.mxu1 %v4948_v2 }
  0x32   : > { %4247 = vmatprep.mubr.msk.bf16.mxu1 %vm328_vm0, %v4692_v18  ;;  %4245 = vmatprep.subr.bf16.mxu1 %v4953_v3  ;;  %v4723_v18 = vld [vmem:[%s4926_s9 + $0xb8] sm:$0xff]  }
  0x34   : > { %4126 = vmatpush3.bf16.msra.mxu0 %v4699_v17 }
  0x35   : > { %4127 = vmatprep.subr.bf16.mxu0 %v4700_v19  ;;  %4246 = vmatpush3.bf16.msra.mxu1 %v4953_v3 }
  0x36   : > { %4271 = vmatprep.subr.bf16.mxu1 %v4948_v2 }
  0x38   : > { %4128 = vmatpush3.bf16.msra.mxu0 %v4700_v19  ;;  %4248 = vmatmul.mubr.msk.bf16.vlgmr.msra.gmra.mrb[12].mxu1 %vm328_vm0, %v4693_v20 }
  0x39   : > { %4272 = vmatpush3.bf16.msra.mxu1 %v4948_v2  ;;  %4275 = vmatprep.mubr.msk.bf16.mxu1 %vm328_vm0, %v4695_v21 }
  0x3a   : > { %4273 = vmatprep.subr.bf16.mxu1 %v4953_v3  ;;  %4129 = vmatprep.subr.bf16.mxu0 %v4701_v23 }
  0x3c   : > { %4130 = vmatpush3.bf16.msra.mxu0 %v4701_v23  ;;  %v4724_v23 = vld [vmem:[%s4926_s9 + $0xc0] sm:$0xff]  }
  0x3d   : > { %4274 = vmatpush3.bf16.msra.mxu1 %v4953_v3  ;;  %4131 = vmatprep.subr.bf16.mxu0 %v4702_v24 }
  0x3e   : > { %4299 = vmatprep.subr.bf16.mxu1 %v4948_v2 }
  0x40   : > { %4276 = vmatmul.mubr.msk.bf16.vlgmr.msra.gmra.mrb[16].mxu1 %vm328_vm0, %v4697_v22  ;;  %4132 = vmatpush3.bf16.msra.mxu0 %v4702_v24 }
  0x41   : > { %4300 = vmatpush3.bf16.msra.mxu1 %v4948_v2  ;;  %4133 = vmatprep.subr.bf16.mxu0 %v4703_v25 }
  0x42   : > { %4301 = vmatprep.subr.bf16.mxu1 %v4953_v3  ;;  %4303 = vmatprep.mubr.msk.bf16.mxu1 %vm328_vm0, %v5059_v27 }
  0x44   : > { %4134 = vmatpush3.bf16.msra.mxu0 %v4703_v25  ;;  %v4725_v25 = vld [vmem:[%s4926_s9 + $0xc8] sm:$0xff]  }
  0x45   : > { %4302 = vmatpush3.bf16.msra.mxu1 %v4953_v3  ;;  %4139 = vmatprep.subr.bf16.mxu0 %v4704_v26 }
  0x46   : > { %4327 = vmatprep.subr.bf16.mxu1 %v4948_v2 }
  0x48   : > { %4304 = vmatmul.mubr.msk.bf16.vlgmr.msra.gmra.mrb[20].mxu1 %vm328_vm0, %v5064_v28 }
  0x49   : > { %4328 = vmatpush3.bf16.msra.mxu1 %v4948_v2  ;;  %4331 = vmatprep.mubr.msk.bf16.mxu1 %vm328_vm0, %v5076_v29  ;;  %v4712_v2 = vld [vmem:[%s4926_s9 + $0x30] sm:$0xff]  }
  0x4a   : > { %4329 = vmatprep.subr.bf16.mxu1 %v4953_v3 }
  0x4d   : > { %4330 = vmatpush3.bf16.msra.mxu1 %v4953_v3 }
  0x50   : > { %4332 = vmatmul.mubr.msk.bf16.vlgmr.msra.gmra.mrb[24].mxu1 %vm328_vm0, %v5081_v30 }
  0x51   : > { %4359 = vmatprep.mubr.msk.bf16.mxu1 %vm328_vm0, %v4958_v4  ;;  %v4713_v4 = vld [vmem:[%s4926_s9 + $0x38] sm:$0xff]  }
  0xf2   : > { %v5089_v31 = vpop.f32.mrb[0].mxu0  ;;  %v5091_v34 = vpop.f32.mrb[0].mxu1 }
  0xf3   : > { %v369_v32 = vpop.f32.mrb[1].mxu0  ;;  %v737_v37 = vpop.f32.mrb[1].mxu1 }
  0xf4   : > { %v4110_v33 = vpop.f32.mrb[2].mxu0  ;;  %v5094_v39 = vpop.f32.mrb[2].mxu1 }
  0xf5   : > { %v385_v35 = vpack.c.bf16 %v4110_v33, %v5089_v31  ;;  %v372_v36 = vpop.f32.mrb[3].mxu0  ;;  %v753_v40 = vpack.c.bf16 %v5094_v39, %v5091_v34  ;;  %v740_v41 = vpop.f32.mrb[3].mxu1  ;;  %v4727_v31 = vld [vmem:[%s4926_s9 + $0xd8] sm:$0xff]   ;;  %v4729_v33 = vld [vmem:[%s4926_s9 + $0xe8] sm:$0xff]   ;;  %v4730_v34 = vld [vmem:[%s4926_s9 + $0xf0] sm:$0xff]  }
  0xf6   : > { %v384_v38 = vpack.c.bf16 %v372_v36, %v369_v32  ;;  %v752_v42 = vpack.c.bf16 %v740_v41, %v737_v37  ;;  %v4728_v32 = vld [vmem:[%s4926_s9 + $0xe0] sm:$0xff]  }
  0xf7   : > { %v4732_v39 = vld [vmem:[%s4926_s9 + $0x100] sm:$0xff]  }
  0xfa   : > { %v4117_v43 = vpop.f32.mrb[4].mxu0 }
  0xfb   : > { %v456_v44 = vpop.f32.mrb[5].mxu0  ;;  %v5098_v46 = vpop.f32.mrb[4].mxu1 }
  0xfc   : > { %v4118_v45 = vpop.f32.mrb[6].mxu0  ;;  %v5100_v49 = vpop.f32.mrb[5].mxu1 }
  0xfd   : > { %v472_v47 = vpack.c.bf16 %v4118_v45, %v4117_v43  ;;  %v459_v48 = vpop.f32.mrb[7].mxu0  ;;  %v5102_v51 = vpop.f32.mrb[6].mxu1  ;;  %v4733_v43 = vld [vmem:[%s4926_s9 + $0x108] sm:$0xff]   ;;  %v4735_v45 = vld [vmem:[%s4926_s9 + $0x118] sm:$0xff]  }
  0xfe   : > { %v471_v50 = vpack.c.bf16 %v459_v48, %v456_v44  ;;  %v941_v53 = vpack.c.bf16 %v5102_v51, %v5098_v46  ;;  %v5107_v54 = vpop.f32.mrb[7].mxu1  ;;  %v4734_v44 = vld [vmem:[%s4926_s9 + $0x110] sm:$0xff]   ;;  %v4737_v46 = vld [vmem:[%s4926_s9 + $0x128] sm:$0xff]  }
  0xff   : > { %v940_v55 = vpack.c.bf16 %v5107_v54, %v5100_v49  ;;  %v4738_v48 = vld [vmem:[%s4926_s9 + $0x130] sm:$0xff]   ;;  %v4739_v49 = vld [vmem:[%s4926_s9 + $0x138] sm:$0xff]  }
 0x100   : > { %4135 = vmatprep.mubr.bf16.mxu0 %v471_v50 }
 0x101   : > { %4136 = vmatmul.mubr.bf16.vlgmr.msra.gmra.mrb[8].mxu0 %v472_v47  ;;  %v4736_v47 = vld [vmem:[%s4926_s9 + $0x120] sm:$0xff]  }
 0x102   : > { %4140 = vmatpush3.bf16.msra.mxu0 %v4704_v26  ;;  %4155 = vmatprep.mubr.bf16.mxu0 %v384_v38  ;;  %v4726_v26 = vld [vmem:[%s4926_s9 + $0xd0] sm:$0xff]  }
 0x103   : > { %4141 = vmatprep.subr.bf16.mxu0 %v4706_v52  ;;  %v5112_v57 = vpop.f32.mrb[8].mxu1 }
 0x104   : > { %v5114_v58 = vpop.f32.mrb[9].mxu1 }
 0x105   : > { %v5116_v59 = vpop.f32.mrb[10].mxu1 }
 0x106   : > { %4142 = vmatpush3.bf16.msra.mxu0 %v4706_v52  ;;  %v1129_v61 = vpack.c.bf16 %v5116_v59, %v5112_v57  ;;  %v5121_v62 = vpop.f32.mrb[11].mxu1  ;;  %v4745_v57 = vld [vmem:[%s4926_s9 + $0x168] sm:$0xff]   ;;  %v4746_v59 = vld [vmem:[%s4926_s9 + $0x170] sm:$0xff]  }
 0x107   : > { %4143 = vmatprep.subr.bf16.mxu0 %v4708_v56  ;;  %v1128_v63 = vpack.c.bf16 %v5121_v62, %v5114_v58  ;;  %v4741_v58 = vld [vmem:[%s4926_s9 + $0x148] sm:$0xff]   ;;  %v4743_v62 = vld [vmem:[%s4926_s9 + $0x158] sm:$0xff]  }
 0x10a   : > { %4144 = vmatpush3.bf16.msra.mxu0 %v4708_v56 }
 0x10b   : > { %4145 = vmatprep.subr.bf16.mxu0 %v4709_v60  ;;  %v5128_v3 = vpop.f32.mrb[12].mxu1 }
 0x10c   : > { %v5131_v5 = vpop.f32.mrb[13].mxu1 }
 0x10d   : > { %v5133_v6 = vpop.f32.mrb[14].mxu1 }
 0x10e   : > { %4146 = vmatpush3.bf16.msra.mxu0 %v4709_v60  ;;  %v1317_v7 = vpack.c.bf16 %v5133_v6, %v5128_v3  ;;  %v5137_v8 = vpop.f32.mrb[15].mxu1  ;;  %v4742_v60 = vld [vmem:[%s4926_s9 + $0x150] sm:$0xff]   ;;  %v4753_v3 = vld [vmem:[%s4926_s9 + $0x1a8] sm:$0xff]  }
 0x10f   : > { %4147 = vmatprep.subr.bf16.mxu0 %v4710_v0  ;;  %v1316_v10 = vpack.c.bf16 %v5137_v8, %v5131_v5  ;;  %v4752_v5 = vld [vmem:[%s4926_s9 + $0x1a0] sm:$0xff]   ;;  %v4754_v6 = vld [vmem:[%s4926_s9 + $0x1b0] sm:$0xff]  }
 0x110   : > { %v4756_v8 = vld [vmem:[%s4926_s9 + $0x1c0] sm:$0xff]  }
 0x112   : > { %4148 = vmatpush3.bf16.msra.mxu0 %v4710_v0  ;;  %v4748_v0 = vld [vmem:[%s4926_s9 + $0x180] sm:$0xff]  }
 0x113   : > { %4149 = vmatprep.subr.bf16.mxu0 %v4711_v1  ;;  %v5148_v17 = vpop.f32.mrb[16].mxu1 }
 0x114   : > { %v5151_v19 = vpop.f32.mrb[17].mxu1 }
 0x115   : > { %v5153_v20 = vpop.f32.mrb[18].mxu1 }
 0x116   : > { %4150 = vmatpush3.bf16.msra.mxu0 %v4711_v1  ;;  %v1505_v21 = vpack.c.bf16 %v5153_v20, %v5148_v17  ;;  %v5157_v22 = vpop.f32.mrb[19].mxu1  ;;  %v4749_v1 = vld [vmem:[%s4926_s9 + $0x188] sm:$0xff]   ;;  %v4768_v20 = vld [vmem:[%s4926_s9 + $0x220] sm:$0xff]  }
 0x117   : > { %4151 = vmatprep.subr.bf16.mxu0 %v4712_v2  ;;  %v1504_v24 = vpack.c.bf16 %v5157_v22, %v5151_v19  ;;  %v4765_v17 = vld [vmem:[%s4926_s9 + $0x208] sm:$0xff]   ;;  %v4767_v19 = vld [vmem:[%s4926_s9 + $0x218] sm:$0xff]   ;;  %v4770_v22 = vld [vmem:[%s4926_s9 + $0x230] sm:$0xff]  }
 0x11a   : > { %4152 = vmatpush3.bf16.msra.mxu0 %v4712_v2  ;;  %v4750_v2 = vld [vmem:[%s4926_s9 + $0x190] sm:$0xff]  }
 0x11b   : > { %4153 = vmatprep.subr.bf16.mxu0 %v4713_v4  ;;  %v5175_v36 = vpop.f32.mrb[20].mxu1 }
 0x11c   : > { %v5177_v37 = vpop.f32.mrb[21].mxu1 }
 0x11d   : > { %v5179_v38 = vpop.f32.mrb[22].mxu1 }
 0x11e   : > { %4154 = vmatpush3.bf16.msra.mxu0 %v4713_v4  ;;  %v5184_v41 = vpop.f32.mrb[23].mxu1  ;;  %v4751_v4 = vld [vmem:[%s4926_s9 + $0x198] sm:$0xff]  }
 0x11f   : > { %4167 = vmatprep.subr.bf16.mxu0 %v4714_v9 }
 0x121   : > { %4156 = vmatmul.mubr.bf16.vlgmr.msra.gmra.mrb[8].mxu0 %v385_v35  ;;  %v4731_v35 = vld [vmem:[%s4926_s9 + $0xf8] sm:$0xff]  }
 0x122   : > { %4168 = vmatpush3.bf16.msra.mxu0 %v4714_v9  ;;  %4183 = vmatprep.mubr.bf16.mxu0 %v752_v42  ;;  %v1692_v42 = vpack.c.bf16 %v5184_v41, %v5177_v37  ;;  %v4757_v9 = vld [vmem:[%s4926_s9 + $0x1c8] sm:$0xff]  }
 0x123   : > { %4169 = vmatprep.subr.bf16.mxu0 %v4717_v11  ;;  %v5201_v50 = vpop.f32.mrb[24].mxu1 }
 0x124   : > { %v5203_v51 = vpop.f32.mrb[25].mxu1 }
 0x125   : > { %v5205_v52 = vpop.f32.mrb[26].mxu1 }
 0x126   : > { %4170 = vmatpush3.bf16.msra.mxu0 %v4717_v11  ;;  %v5209_v54 = vpop.f32.mrb[27].mxu1  ;;  %v4759_v11 = vld [vmem:[%s4926_s9 + $0x1d8] sm:$0xff]  }
 0x127   : > { %4171 = vmatprep.subr.bf16.mxu0 %v4718_v12  ;;  %v1880_v56 = vpack.c.bf16 %v5209_v54, %v5203_v51  ;;  %v4846_v51 = vld [vmem:[%s5506_s1 + $0x8] sm:$0xff]  }
 0x128   : > { %v4781_v54 = vld [vmem:[%s4931_s12 + $0x8] sm:$0xff]  }
 0x12a   : > { %4172 = vmatpush3.bf16.msra.mxu0 %v4718_v12  ;;  %v4760_v12 = vld [vmem:[%s4926_s9 + $0x1e0] sm:$0xff]  }
 0x12b   : > { %4173 = vmatprep.subr.bf16.mxu0 %v4719_v13 }
 0x12e   : > { %4174 = vmatpush3.bf16.msra.mxu0 %v4719_v13  ;;  %v4761_v13 = vld [vmem:[%s4926_s9 + $0x1e8] sm:$0xff]  }
 0x12f   : > { %4175 = vmatprep.subr.bf16.mxu0 %v4720_v14 }
 0x132   : > { %4176 = vmatpush3.bf16.msra.mxu0 %v4720_v14  ;;  %v4762_v14 = vld [vmem:[%s4926_s9 + $0x1f0] sm:$0xff]  }
 0x133   : > { %4177 = vmatprep.subr.bf16.mxu0 %v4721_v15 }
 0x136   : > { %4178 = vmatpush3.bf16.msra.mxu0 %v4721_v15  ;;  %v4763_v15 = vld [vmem:[%s4926_s9 + $0x1f8] sm:$0xff]  }
 0x137   : > { %4179 = vmatprep.subr.bf16.mxu0 %v4722_v16 }
 0x13a   : > { %4180 = vmatpush3.bf16.msra.mxu0 %v4722_v16  ;;  %v4764_v16 = vld [vmem:[%s4926_s9 + $0x200] sm:$0xff]  }
 0x13b   : > { %4181 = vmatprep.subr.bf16.mxu0 %v4723_v18 }
 0x13e   : > { %4182 = vmatpush3.bf16.msra.mxu0 %v4723_v18  ;;  %v4766_v18 = vld [vmem:[%s4926_s9 + $0x210] sm:$0xff]  }
 0x13f   : > { %4195 = vmatprep.subr.bf16.mxu0 %v4724_v23 }
 0x141   : > { %4184 = vmatmul.mubr.bf16.vlgmr.msra.gmra.mrb[8].mxu0 %v753_v40  ;;  %v1693_v40 = vpack.c.bf16 %v5179_v38, %v5175_v36  ;;  %v3738_v36 = vld [vmem:[%s276_s27] ss:$0 sm:$0xff] }
 0x142   : > { %4196 = vmatpush3.bf16.msra.mxu0 %v4724_v23  ;;  %4211 = vmatprep.mubr.bf16.mxu0 %v940_v55  ;;  %v4740_v55 = vld [vmem:[%s4926_s9 + $0x140] sm:$0xff]   ;;  %v4771_v23 = vld [vmem:[%s4926_s9 + $0x238] sm:$0xff]  }
 0x143   : > { %4197 = vmatprep.subr.bf16.mxu0 %v4725_v25 }
 0x146   : > { %4198 = vmatpush3.bf16.msra.mxu0 %v4725_v25  ;;  %v4773_v25 = vld [vmem:[%s4931_s12 + $0x48] sm:$0xff]  }
 0x147   : > { %4199 = vmatprep.subr.bf16.mxu0 %v4726_v26 }
 0x14a   : > { %4200 = vmatpush3.bf16.msra.mxu0 %v4726_v26  ;;  %v4774_v26 = vld [vmem:[%s4931_s12 + $0x50] sm:$0xff]  }
 0x14b   : > { %4201 = vmatprep.subr.bf16.mxu0 %v4727_v31 }
 0x14e   : > { %4202 = vmatpush3.bf16.msra.mxu0 %v4727_v31  ;;  %v4775_v31 = vld [vmem:[%s4931_s12 + $0x58] sm:$0xff]  }
 0x14f   : > { %4203 = vmatprep.subr.bf16.mxu0 %v4728_v32 }
 0x152   : > { %4204 = vmatpush3.bf16.msra.mxu0 %v4728_v32  ;;  %v4776_v32 = vld [vmem:[%s4931_s12 + $0x60] sm:$0xff]  }
 0x153   : > { %4205 = vmatprep.subr.bf16.mxu0 %v4729_v33 }
 0x156   : > { %4206 = vmatpush3.bf16.msra.mxu0 %v4729_v33  ;;  %v4777_v33 = vld [vmem:[%s4931_s12 + $0x68] sm:$0xff]  }
 0x157   : > { %4207 = vmatprep.subr.bf16.mxu0 %v4730_v34 }
 0x15a   : > { %4208 = vmatpush3.bf16.msra.mxu0 %v4730_v34  ;;  %v4778_v34 = vld [vmem:[%s4931_s12 + $0x70] sm:$0xff]  }
 0x15b   : > { %4209 = vmatprep.subr.bf16.mxu0 %v4731_v35 }
 0x15e   : > { %4210 = vmatpush3.bf16.msra.mxu0 %v4731_v35  ;;  %v4779_v35 = vld [vmem:[%s4931_s12 + $0x78] sm:$0xff]  }
 0x15f   : > { %4223 = vmatprep.subr.bf16.mxu0 %v4732_v39 }
 0x161   : > { %4212 = vmatmul.mubr.bf16.vlgmr.msra.gmra.mrb[8].mxu0 %v941_v53  ;;  %v1881_v53 = vpack.c.bf16 %v5205_v52, %v5201_v50  ;;  %v4847_v52 = vld [vmem:[%s5506_s1 + $0x10] sm:$0xff]  }
 0x162   : > { %4224 = vmatpush3.bf16.msra.mxu0 %v4732_v39  ;;  %4239 = vmatprep.mubr.bf16.mxu0 %v1128_v63  ;;  %v4744_v63 = vld [vmem:[%s4926_s9 + $0x160] sm:$0xff]  }
 0x163   : > { %4225 = vmatprep.subr.bf16.mxu0 %v4733_v43 }
 0x166   : > { %4226 = vmatpush3.bf16.msra.mxu0 %v4733_v43 }
 0x167   : > { %4227 = vmatprep.subr.bf16.mxu0 %v4734_v44 }
 0x16a   : > { %4228 = vmatpush3.bf16.msra.mxu0 %v4734_v44 }
 0x16b   : > { %4229 = vmatprep.subr.bf16.mxu0 %v4735_v45 }
 0x16e   : > { %4230 = vmatpush3.bf16.msra.mxu0 %v4735_v45 }
 0x16f   : > { %4231 = vmatprep.subr.bf16.mxu0 %v4736_v47 }
 0x172   : > { %4232 = vmatpush3.bf16.msra.mxu0 %v4736_v47 }
 0x173   : > { %4233 = vmatprep.subr.bf16.mxu0 %v4737_v46 }
 0x176   : > { %4234 = vmatpush3.bf16.msra.mxu0 %v4737_v46 }
 0x177   : > { %4235 = vmatprep.subr.bf16.mxu0 %v4738_v48 }
 0x17a   : > { %4236 = vmatpush3.bf16.msra.mxu0 %v4738_v48 }
 0x17b   : > { %4237 = vmatprep.subr.bf16.mxu0 %v4739_v49 }
 0x17e   : > { %4238 = vmatpush3.bf16.msra.mxu0 %v4739_v49 }
 0x17f   : > { %4251 = vmatprep.subr.bf16.mxu0 %v4740_v55 }
 0x181   : > { %4240 = vmatmul.mubr.bf16.vlgmr.msra.gmra.mrb[8].mxu0 %v1129_v61  ;;  %v4747_v61 = vld [vmem:[%s4926_s9 + $0x178] sm:$0xff]  }
 0x182   : > { %4252 = vmatpush3.bf16.msra.mxu0 %v4740_v55  ;;  %4267 = vmatprep.mubr.bf16.mxu0 %v1316_v10  ;;  %v4758_v10 = vld [vmem:[%s4926_s9 + $0x1d0] sm:$0xff]   ;;  %v4848_v55 = vld [vmem:[%s5506_s1 + $0x18] sm:$0xff]  }
 0x183   : > { %4253 = vmatprep.subr.bf16.mxu0 %v4741_v58 }
 0x186   : > { %4254 = vmatpush3.bf16.msra.mxu0 %v4741_v58  ;;  %v4783_v58 = vld [vmem:[%s4931_s12 + $0x18] sm:$0xff]  }
 0x187   : > { %4255 = vmatprep.subr.bf16.mxu0 %v4742_v60 }
 0x18a   : > { %4256 = vmatpush3.bf16.msra.mxu0 %v4742_v60  ;;  %v4784_v60 = vld [vmem:[%s4931_s12 + $0x20] sm:$0xff]  }
 0x18b   : > { %4257 = vmatprep.subr.bf16.mxu0 %v4743_v62 }
 0x18e   : > { %4258 = vmatpush3.bf16.msra.mxu0 %v4743_v62  ;;  %v4785_v62 = vld [vmem:[%s4931_s12 + $0x28] sm:$0xff]  }
 0x18f   : > { %4259 = vmatprep.subr.bf16.mxu0 %v4744_v63 }
 0x192   : > { %4260 = vmatpush3.bf16.msra.mxu0 %v4744_v63  ;;  %v4786_v63 = vld [vmem:[%s4931_s12 + $0x30] sm:$0xff]  }
 0x193   : > { %4261 = vmatprep.subr.bf16.mxu0 %v4745_v57 }
 0x196   : > { %4262 = vmatpush3.bf16.msra.mxu0 %v4745_v57  ;;  %v4787_v57 = vld [vmem:[%s4931_s12 + $0x38] sm:$0xff]  }
 0x197   : > { %4263 = vmatprep.subr.bf16.mxu0 %v4746_v59 }
 0x19a   : > { %4264 = vmatpush3.bf16.msra.mxu0 %v4746_v59 }
 0x19b   : > { %4265 = vmatprep.subr.bf16.mxu0 %v4747_v61 }
 0x19e   : > { %4266 = vmatpush3.bf16.msra.mxu0 %v4747_v61 }
 0x19f   : > { %4279 = vmatprep.subr.bf16.mxu0 %v4748_v0 }
 0x1a1   : > { %4268 = vmatmul.mubr.bf16.vlgmr.msra.gmra.mrb[8].mxu0 %v1317_v7  ;;  %v4755_v7 = vld [vmem:[%s4926_s9 + $0x1b8] sm:$0xff]  }
 0x1a2   : > { %4280 = vmatpush3.bf16.msra.mxu0 %v4748_v0  ;;  %4295 = vmatprep.mubr.bf16.mxu0 %v1504_v24  ;;  %v4772_v24 = vld [vmem:[%s4931_s12 + $0x40] sm:$0xff]  }
 0x1a3   : > { %4281 = vmatprep.subr.bf16.mxu0 %v4749_v1 }
 0x1a6   : > { %4282 = vmatpush3.bf16.msra.mxu0 %v4749_v1 }
 0x1a7   : > { %4283 = vmatprep.subr.bf16.mxu0 %v4750_v2 }
 0x1aa   : > { %4284 = vmatpush3.bf16.msra.mxu0 %v4750_v2 }
 0x1ab   : > { %4285 = vmatprep.subr.bf16.mxu0 %v4751_v4 }
 0x1ae   : > { %4286 = vmatpush3.bf16.msra.mxu0 %v4751_v4 }
 0x1af   : > { %4287 = vmatprep.subr.bf16.mxu0 %v4752_v5 }
 0x1b2   : > { %4288 = vmatpush3.bf16.msra.mxu0 %v4752_v5 }
 0x1b3   : > { %4289 = vmatprep.subr.bf16.mxu0 %v4753_v3 }
 0x1b6   : > { %4290 = vmatpush3.bf16.msra.mxu0 %v4753_v3  ;;  %v4849_v3 = vld [vmem:[%s5506_s1 + $0x20] sm:$0xff]  }
 0x1b7   : > { %4291 = vmatprep.subr.bf16.mxu0 %v4754_v6 }
 0x1ba   : > { %4292 = vmatpush3.bf16.msra.mxu0 %v4754_v6 }
 0x1bb   : > { %4293 = vmatprep.subr.bf16.mxu0 %v4755_v7 }
 0x1be   : > { %4294 = vmatpush3.bf16.msra.mxu0 %v4755_v7  ;;  %v4788_v7 = vld [vmem:[%s4931_s12 + $0x80] sm:$0xff]  }
 0x1bf   : > { %4307 = vmatprep.subr.bf16.mxu0 %v4756_v8 }
 0x1c1   : > { %4296 = vmatmul.mubr.bf16.vlgmr.msra.gmra.mrb[8].mxu0 %v1505_v21  ;;  %v4769_v21 = vld [vmem:[%s4926_s9 + $0x228] sm:$0xff]  }
 0x1c2   : > { %4308 = vmatpush3.bf16.msra.mxu0 %v4756_v8  ;;  %4323 = vmatprep.mubr.bf16.mxu0 %v1692_v42 }
 0x1c3   : > { %4309 = vmatprep.subr.bf16.mxu0 %v4757_v9 }
 0x1c6   : > { %4310 = vmatpush3.bf16.msra.mxu0 %v4757_v9 }
 0x1c7   : > { %4311 = vmatprep.subr.bf16.mxu0 %v4758_v10 }
 0x1ca   : > { %4312 = vmatpush3.bf16.msra.mxu0 %v4758_v10 }
 0x1cb   : > { %4313 = vmatprep.subr.bf16.mxu0 %v4759_v11 }
 0x1ce   : > { %4314 = vmatpush3.bf16.msra.mxu0 %v4759_v11 }
 0x1cf   : > { %4315 = vmatprep.subr.bf16.mxu0 %v4760_v12 }
 0x1d2   : > { %4316 = vmatpush3.bf16.msra.mxu0 %v4760_v12  ;;  %v4789_v12 = vld [vmem:[%s4931_s12 + $0x88] sm:$0xff]  }
 0x1d3   : > { %4317 = vmatprep.subr.bf16.mxu0 %v4761_v13 }
 0x1d6   : > { %4318 = vmatpush3.bf16.msra.mxu0 %v4761_v13  ;;  %v4850_v13 = vld [vmem:[%s5506_s1 + $0x28] sm:$0xff]  }
 0x1d7   : > { %4319 = vmatprep.subr.bf16.mxu0 %v4762_v14 }
 0x1da   : > { %4320 = vmatpush3.bf16.msra.mxu0 %v4762_v14  ;;  %v4790_v14 = vld [vmem:[%s4931_s12 + $0x90] sm:$0xff]  }
 0x1db   : > { %4321 = vmatprep.subr.bf16.mxu0 %v4763_v15 }
 0x1de   : > { %4322 = vmatpush3.bf16.msra.mxu0 %v4763_v15  ;;  %v4851_v15 = vld [vmem:[%s5506_s1 + $0x60] sm:$0xff]  }
 0x1df   : > { %4335 = vmatprep.subr.bf16.mxu0 %v4764_v16 }
 0x1e1   : > { %4324 = vmatmul.mubr.bf16.vlgmr.msra.gmra.mrb[8].mxu0 %v1693_v40 }
 0x1e2   : > { %4336 = vmatpush3.bf16.msra.mxu0 %v4764_v16  ;;  %4351 = vmatprep.mubr.bf16.mxu0 %v1880_v56  ;;  %v4782_v56 = vld [vmem:[%s4931_s12 + $0x10] sm:$0xff]   ;;  %v4791_v16 = vld [vmem:[%s4931_s12 + $0x98] sm:$0xff]  }
 0x1e3   : > { %4337 = vmatprep.subr.bf16.mxu0 %v4765_v17 }
 0x1e6   : > { %4338 = vmatpush3.bf16.msra.mxu0 %v4765_v17  ;;  %v4852_v17 = vld [vmem:[%s5506_s1 + $0x68] sm:$0xff]  }
 0x1e7   : > { %4339 = vmatprep.subr.bf16.mxu0 %v4766_v18 }
 0x1ea   : > { %4340 = vmatpush3.bf16.msra.mxu0 %v4766_v18  ;;  %v4792_v18 = vld [vmem:[%s4931_s12 + $0xa0] sm:$0xff]  }
 0x1eb   : > { %4341 = vmatprep.subr.bf16.mxu0 %v4767_v19 }
 0x1ee   : > { %4342 = vmatpush3.bf16.msra.mxu0 %v4767_v19  ;;  %v4793_v19 = vld [vmem:[%s4931_s12 + $0xa8] sm:$0xff]  }
 0x1ef   : > { %4343 = vmatprep.subr.bf16.mxu0 %v4768_v20 }
 0x1f2   : > { %4344 = vmatpush3.bf16.msra.mxu0 %v4768_v20  ;;  %v4794_v20 = vld [vmem:[%s4931_s12 + $0xb0] sm:$0xff]  }
 0x1f3   : > { %4345 = vmatprep.subr.bf16.mxu0 %v4769_v21 }
 0x1f6   : > { %4346 = vmatpush3.bf16.msra.mxu0 %v4769_v21 }
 0x1f7   : > { %4347 = vmatprep.subr.bf16.mxu0 %v4770_v22 }
 0x1fa   : > { %4348 = vmatpush3.bf16.msra.mxu0 %v4770_v22 }
 0x1fb   : > { %4349 = vmatprep.subr.bf16.mxu0 %v4771_v23 }
 0x1fe   : > { %4350 = vmatpush3.bf16.msra.mxu0 %v4771_v23 }
 0x1ff   : > { %4371 = vmatprep.subr.bf16.mxu0 %v4772_v24 }
 0x201   : > { %4352 = vmatmul.mubr.bf16.vlgmr.msra.gmra.mrb[8].mxu0 %v1881_v53  ;;  %v4780_v53 = vld [vmem:[%s4931_s12] sm:$0xff]  }
 0x202   : > { %4372 = vmatpush3.bf16.msra.mxu0 %v4772_v24 }
 0x203   : > { %4373 = vmatprep.subr.bf16.mxu0 %v4773_v25 }
 0x206   : > { %4374 = vmatpush3.bf16.msra.mxu0 %v4773_v25 }
 0x207   : > { %4375 = vmatprep.subr.bf16.mxu0 %v4774_v26 }
 0x20a   : > { %4376 = vmatpush3.bf16.msra.mxu0 %v4774_v26 }
 0x20b   : > { %4377 = vmatprep.subr.bf16.mxu0 %v4775_v31 }
 0x20e   : > { %4378 = vmatpush3.bf16.msra.mxu0 %v4775_v31 }
 0x20f   : > { %4379 = vmatprep.subr.bf16.mxu0 %v4776_v32 }
 0x212   : > { %4380 = vmatpush3.bf16.msra.mxu0 %v4776_v32  ;;  %v4853_v32 = vld [vmem:[%s5506_s1 + $0x30] sm:$0xff]  }
 0x213   : > { %4381 = vmatprep.subr.bf16.mxu0 %v4777_v33 }
 0x216   : > { %4382 = vmatpush3.bf16.msra.mxu0 %v4777_v33  ;;  %v4796_v33 = vld [vmem:[%s4931_s12 + $0xc0] sm:$0xff]  }
 0x217   : > { %4383 = vmatprep.subr.bf16.mxu0 %v4778_v34 }
 0x21a   : > { %4384 = vmatpush3.bf16.msra.mxu0 %v4778_v34  ;;  %v4797_v34 = vld [vmem:[%s4931_s12 + $0xc8] sm:$0xff]  }
 0x21b   : > { %4385 = vmatprep.subr.bf16.mxu0 %v4779_v35 }
 0x21e   : > { %4386 = vmatpush3.bf16.msra.mxu0 %v4779_v35  ;;  %v4854_v35 = vld [vmem:[%s5506_s1 + $0x38] sm:$0xff]  }
 0x2d4   : > { %v4353_v37 = vpop.f32.mrb[8].mxu0 }
 0x2d5   : > { %v2008_v38 = vadd.f32 %v4353_v37, %v3738_v36  ;;  %v1980_v39 = vpop.f32.mrb[9].mxu0  ;;  %v4799_v37 = vld [vmem:[%s4931_s12 + $0xd8] sm:$0xff]  }
 0x2d6   : > { %v2006_v40 = vadd.f32 %v3738_v36, %v1980_v39  ;;  %v4354_v41 = vpop.f32.mrb[10].mxu0  ;;  %v4801_v39 = vld [vmem:[%s4931_s12 + $0xe8] sm:$0xff]  }
 0x2d7   : > { %v2009_v42 = vadd.f32 %v4354_v41, %v3738_v36  ;;  %v1983_v43 = vpop.f32.mrb[11].mxu0  ;;  %v2012_v45 = vmax.f32 %v2008_v38, 0.0  ;;  %v4800_v38 = vld [vmem:[%s4931_s12 + $0xe0] sm:$0xff]   ;;  %v4803_v41 = vld [vmem:[%s4931_s12 + $0xf8] sm:$0xff]  }
 0x2d8   : > { %v2007_v44 = vadd.f32 %v3738_v36, %v1983_v43  ;;  %v2010_v46 = vmax.f32 %v2006_v40, 0.0  ;;  %v4798_v36 = vld [vmem:[%s4931_s12 + $0xd0] sm:$0xff]  }
 0x2d9   : > { %v2013_v47 = vmax.f32 %v2009_v42, 0.0  ;;  %v4802_v40 = vld [vmem:[%s4931_s12 + $0xf0] sm:$0xff]  }
 0x2da   : > { %v2011_v48 = vmax.f32 %v2007_v44, 0.0 }
 0x2db   : > { %v5285_v49 = vpack.c.bf16 %v2013_v47, %v2012_v45 }
 0x2dc   : > { %v5287_v50 = vpack.c.bf16 %v2011_v48, %v2010_v46  ;;  %v4855_v48 = vld [vmem:[%s5506_s1 + $0x40] sm:$0xff]  }
 0x2de   : > { %4355 = vmatprep.subr.bf16.mxu1 %v5287_v50  ;;  %4523 = vmatprep.subr.bf16.mxu0 %v5287_v50 }
 0x2df   : > { %4356 = vmatpush3.bf16.msra.mxu1 %v5287_v50 }
 0x2e0   : > { %4357 = vmatprep.subr.bf16.mxu1 %v5285_v49 }
 0x2e3   : > { %4358 = vmatpush3.bf16.msra.mxu1 %v5285_v49 }
 0x2e4   : > { %4363 = vmatprep.subr.bf16.mxu1 %v5287_v50 }
 0x2e6   : > { %4360 = vmatmul.mubr.msk.bf16.vlgmr.msra.gmra.mrb[28].mxu1 %vm328_vm0, %v4846_v51  ;;  %v4804_v51 = vld [vmem:[%s4931_s12 + $0x100] sm:$0xff]  }
 0x2e7   : > { %4364 = vmatpush3.bf16.msra.mxu1 %v5287_v50  ;;  %4367 = vmatprep.mubr.msk.bf16.mxu1 %vm328_vm0, %v4847_v52  ;;  %v4805_v52 = vld [vmem:[%s4931_s12 + $0x108] sm:$0xff]  }
 0x2e8   : > { %4365 = vmatprep.subr.bf16.mxu1 %v5285_v49 }
 0x2eb   : > { %4366 = vmatpush3.bf16.msra.mxu1 %v5285_v49 }
 0x2ec   : > { %4391 = vmatprep.subr.bf16.mxu1 %v4780_v53 }
 0x2ee   : > { %4368 = vmatmul.mubr.msk.bf16.vlgmr.msra.gmra.mrb[32].mxu1 %vm328_vm0, %v4848_v55  ;;  %v4807_v55 = vld [vmem:[%s4931_s12 + $0x118] sm:$0xff]  }
 0x2ef   : > { %4392 = vmatpush3.bf16.msra.mxu1 %v4780_v53  ;;  %v4856_v53 = vld [vmem:[%s5506_s1 + $0x48] sm:$0xff]  }
 0x2f0   : > { %4393 = vmatprep.subr.bf16.mxu1 %v4781_v54 }
 0x2f3   : > { %4394 = vmatpush3.bf16.msra.mxu1 %v4781_v54  ;;  %v4806_v54 = vld [vmem:[%s4931_s12 + $0x110] sm:$0xff]  }
 0x2f4   : > { %4395 = vmatprep.subr.bf16.mxu1 %v4782_v56 }
 0x2f7   : > { %4396 = vmatpush3.bf16.msra.mxu1 %v4782_v56  ;;  %v4808_v56 = vld [vmem:[%s4931_s12 + $0x120] sm:$0xff]  }
 0x2f8   : > { %4397 = vmatprep.subr.bf16.mxu1 %v4783_v58 }
 0x2fb   : > { %4398 = vmatpush3.bf16.msra.mxu1 %v4783_v58  ;;  %v4809_v58 = vld [vmem:[%s4931_s12 + $0x128] sm:$0xff]  }
 0x2fc   : > { %4399 = vmatprep.subr.bf16.mxu1 %v4784_v60 }
 0x2ff   : > { %4400 = vmatpush3.bf16.msra.mxu1 %v4784_v60  ;;  %v4810_v60 = vld [vmem:[%s4931_s12 + $0x130] sm:$0xff]  }
 0x300   : > { %4401 = vmatprep.subr.bf16.mxu1 %v4785_v62 }
 0x303   : > { %4402 = vmatpush3.bf16.msra.mxu1 %v4785_v62  ;;  %v4811_v62 = vld [vmem:[%s4931_s12 + $0x138] sm:$0xff]  }
 0x304   : > { %4403 = vmatprep.subr.bf16.mxu1 %v4786_v63 }
 0x307   : > { %4404 = vmatpush3.bf16.msra.mxu1 %v4786_v63 }
 0x308   : > { %4405 = vmatprep.subr.bf16.mxu1 %v4787_v57 }
 0x30b   : > { %4406 = vmatpush3.bf16.msra.mxu1 %v4787_v57 }
 0x30c   : > { %4411 = vmatprep.subr.bf16.mxu1 %v5287_v50 }
 0x3b9   : > { %v4361_v59 = vpop.f32.mrb[28].mxu1 }
 0x3ba   : > { %v2050_v61 = vpop.f32.mrb[29].mxu1 }
 0x3bb   : > { %v4362_v0 = vpop.f32.mrb[30].mxu1 }
 0x3bc   : > { %v2066_v1 = vpack.c.bf16 %v4362_v0, %v4361_v59  ;;  %v2053_v2 = vpop.f32.mrb[31].mxu1 }
 0x3bd   : > { %v2065_v4 = vpack.c.bf16 %v2053_v2, %v2050_v61  ;;  %v4857_v2 = vld [vmem:[%s5506_s1 + $0x50] sm:$0xff]  }
 0x3bf   : > { %4407 = vmatprep.mubr.bf16.mxu1 %v2065_v4  ;;  %v4812_v4 = vld [vmem:[%s4931_s12 + $0x140] sm:$0xff]  }
 0x3c0   : > { %4408 = vmatmul.mubr.bf16.vlgmr.msra.gmra.mrb[36].mxu1 %v2066_v1 }
 0x3c1   : > { %4412 = vmatpush3.bf16.msra.mxu1 %v5287_v50  ;;  %v4369_v5 = vpop.f32.mrb[32].mxu1  ;;  %4415 = vmatprep.mubr.msk.bf16.mxu1 %vm328_vm0, %v4849_v3  ;;  %v4858_v3 = vld [vmem:[%s5506_s1 + $0x58] sm:$0xff]  }
 0x3c2   : > { %4413 = vmatprep.subr.bf16.mxu1 %v5285_v49  ;;  %v2117_v6 = vpop.f32.mrb[33].mxu1 }
 0x3c3   : > { %v4370_v8 = vpop.f32.mrb[34].mxu1 }
 0x3c4   : > { %v2133_v9 = vpack.c.bf16 %v4370_v8, %v4369_v5  ;;  %v2120_v10 = vpop.f32.mrb[35].mxu1  ;;  %v4813_v5 = vld [vmem:[%s4931_s12 + $0x148] sm:$0xff]   ;;  %v4818_v8 = vld [vmem:[%s4931_s12 + $0x170] sm:$0xff]  }
 0x3c5   : > { %v2132_v11 = vpack.c.bf16 %v2120_v10, %v2117_v6  ;;  %4414 = vmatpush3.bf16.msra.mxu1 %v5285_v49  ;;  %v4815_v6 = vld [vmem:[%s4931_s12 + $0x158] sm:$0xff]   ;;  %v4820_v10 = vld [vmem:[%s4931_s12 + $0x180] sm:$0xff]  }
 0x3c6   : > { %4419 = vmatprep.subr.bf16.mxu1 %v4788_v7 }
 0x3c7   : > { %4387 = vmatprep.mubr.bf16.mxu0 %v2132_v11 }
 0x3c8   : > { %4388 = vmatmul.mubr.bf16.vlgmr.msra.gmra.mrb[12].mxu0 %v2133_v9  ;;  %4416 = vmatmul.mubr.msk.bf16.vlgmr.msra.gmra.mrb[40].mxu1 %vm328_vm0, %v4850_v13  ;;  %v4819_v9 = vld [vmem:[%s4931_s12 + $0x178] sm:$0xff]  }
 0x3c9   : > { %4420 = vmatpush3.bf16.msra.mxu1 %v4788_v7  ;;  %4524 = vmatpush3.bf16.msra.mxu0 %v5287_v50  ;;  %v4817_v7 = vld [vmem:[%s4931_s12 + $0x168] sm:$0xff]  }
 0x3ca   : > { %4525 = vmatprep.subr.bf16.mxu0 %v5285_v49  ;;  %4421 = vmatprep.subr.bf16.mxu1 %v4789_v12 }
 0x3cb   : > { %4527 = vmatprep.mubr.msk.bf16.mxu0 %vm328_vm0, %v4851_v15 }
 0x3cd   : > { %4422 = vmatpush3.bf16.msra.mxu1 %v4789_v12  ;;  %4526 = vmatpush3.bf16.msra.mxu0 %v5285_v49 }
 0x3ce   : > { %4551 = vmatprep.subr.bf16.mxu0 %v5287_v50  ;;  %4423 = vmatprep.subr.bf16.mxu1 %v4790_v14 }
 0x3d0   : > { %4528 = vmatmul.mubr.msk.bf16.vlgmr.msra.gmra.mrb[16].mxu0 %vm328_vm0, %v4852_v17 }
 0x3d1   : > { %4424 = vmatpush3.bf16.msra.mxu1 %v4790_v14  ;;  %4552 = vmatpush3.bf16.msra.mxu0 %v5287_v50 }
 0x3d2   : > { %4553 = vmatprep.subr.bf16.mxu0 %v5285_v49  ;;  %4425 = vmatprep.subr.bf16.mxu1 %v4791_v16 }
 0x3d3   : > { %4555 = vmatprep.mubr.msk.bf16.mxu0 %vm328_vm0, %v5059_v27  ;;  %v4795_v27 = vld [vmem:[%s4931_s12 + $0xb8] sm:$0xff]  }
 0x3d5   : > { %4426 = vmatpush3.bf16.msra.mxu1 %v4791_v16  ;;  %4554 = vmatpush3.bf16.msra.mxu0 %v5285_v49 }
 0x3d6   : > { %4579 = vmatprep.subr.bf16.mxu0 %v5287_v50  ;;  %4427 = vmatprep.subr.bf16.mxu1 %v4792_v18 }
 0x3d8   : > { %4556 = vmatmul.mubr.msk.bf16.vlgmr.msra.gmra.mrb[20].mxu0 %vm328_vm0, %v5064_v28 }
 0x3d9   : > { %4428 = vmatpush3.bf16.msra.mxu1 %v4792_v18  ;;  %4580 = vmatpush3.bf16.msra.mxu0 %v5287_v50 }
 0x3da   : > { %4581 = vmatprep.subr.bf16.mxu0 %v5285_v49  ;;  %4429 = vmatprep.subr.bf16.mxu1 %v4793_v19 }
 0x3db   : > { %4583 = vmatprep.mubr.msk.bf16.mxu0 %vm328_vm0, %v5076_v29 }
 0x3dd   : > { %4430 = vmatpush3.bf16.msra.mxu1 %v4793_v19  ;;  %4582 = vmatpush3.bf16.msra.mxu0 %v5285_v49 }
 0x3de   : > { %4431 = vmatprep.subr.bf16.mxu1 %v4794_v20 }
 0x3e0   : > { %4584 = vmatmul.mubr.msk.bf16.vlgmr.msra.gmra.mrb[24].mxu0 %vm328_vm0, %v5081_v30 }
 0x3e1   : > { %4432 = vmatpush3.bf16.msra.mxu1 %v4794_v20 }
 0x3e2   : > { %4433 = vmatprep.subr.bf16.mxu1 %v4795_v27 }
 0x3e5   : > { %4434 = vmatpush3.bf16.msra.mxu1 %v4795_v27 }
 0x3e6   : > { %4439 = vmatprep.subr.bf16.mxu1 %v5287_v50 }
 0x49b   : > { %v4417_v28 = vpop.f32.mrb[40].mxu1  ;;  %v5366_v21 = vpop.f32.mrb[12].mxu0 }
 0x49c   : > { %v2378_v22 = vpop.f32.mrb[41].mxu1  ;;  %v5368_v23 = vpop.f32.mrb[13].mxu0 }
 0x49d   : > { %v4418_v29 = vpop.f32.mrb[42].mxu1  ;;  %v5370_v24 = vpop.f32.mrb[14].mxu0 }
 0x49e   : > { %v2394_v25 = vpack.c.bf16 %v4418_v29, %v4417_v28  ;;  %v2381_v26 = vpop.f32.mrb[43].mxu1  ;;  %v5372_v31 = vpop.f32.mrb[15].mxu0 }
 0x49f   : > { %v2393_v30 = vpack.c.bf16 %v2381_v26, %v2378_v22 }
 0x4a1   : > { %4435 = vmatprep.mubr.bf16.mxu1 %v2393_v30 }
 0x4a2   : > { %4436 = vmatmul.mubr.bf16.vlgmr.msra.gmra.mrb[36].mxu1 %v2394_v25 }
 0x4a3   : > { %4440 = vmatpush3.bf16.msra.mxu1 %v5287_v50  ;;  %4443 = vmatprep.mubr.msk.bf16.mxu1 %vm328_vm0, %v4853_v32  ;;  %v4529_v11 = vpop.f32.mrb[16].mxu0 }
 0x4a4   : > { %4441 = vmatprep.subr.bf16.mxu1 %v5285_v49  ;;  %v3050_v12 = vpop.f32.mrb[17].mxu0 }
 0x4a5   : > { %v4530_v13 = vpop.f32.mrb[18].mxu0 }
 0x4a6   : > { %v3066_v14 = vpack.c.bf16 %v4530_v13, %v4529_v11  ;;  %v3053_v15 = vpop.f32.mrb[19].mxu0 }
 0x4a7   : > { %4442 = vmatpush3.bf16.msra.mxu1 %v5285_v49  ;;  %v3065_v16 = vpack.c.bf16 %v3053_v15, %v3050_v12 }
 0x4a8   : > { %4447 = vmatprep.subr.bf16.mxu1 %v4796_v33 }
 0x4aa   : > { %4444 = vmatmul.mubr.msk.bf16.vlgmr.msra.gmra.mrb[44].mxu1 %vm328_vm0, %v4854_v35 }
 0x4ab   : > { %4448 = vmatpush3.bf16.msra.mxu1 %v4796_v33  ;;  %v5434_v17 = vpop.f32.mrb[20].mxu0 }
 0x4ac   : > { %4449 = vmatprep.subr.bf16.mxu1 %v4797_v34  ;;  %v3218_v18 = vpop.f32.mrb[21].mxu0 }
 0x4ad   : > { %v5436_v19 = vpop.f32.mrb[22].mxu0 }
 0x4ae   : > { %v3234_v20 = vpack.c.bf16 %v5436_v19, %v5434_v17  ;;  %v3221_v27 = vpop.f32.mrb[23].mxu0 }
 0x4af   : > { %4450 = vmatpush3.bf16.msra.mxu1 %v4797_v34  ;;  %v3233_v28 = vpack.c.bf16 %v3221_v27, %v3218_v18 }
 0x4b0   : > { %4451 = vmatprep.subr.bf16.mxu1 %v4798_v36 }
 0x4b3   : > { %4452 = vmatpush3.bf16.msra.mxu1 %v4798_v36  ;;  %v5440_v22 = vpop.f32.mrb[24].mxu0 }
 0x4b4   : > { %4453 = vmatprep.subr.bf16.mxu1 %v4799_v37  ;;  %v5442_v29 = vpop.f32.mrb[25].mxu0 }
 0x4b5   : > { %v5444_v25 = vpop.f32.mrb[26].mxu0 }
 0x4b6   : > { %v3402_v26 = vpack.c.bf16 %v5444_v25, %v5440_v22  ;;  %v5448_v30 = vpop.f32.mrb[27].mxu0 }
 0x4b7   : > { %4454 = vmatpush3.bf16.msra.mxu1 %v4799_v37  ;;  %v3401_v32 = vpack.c.bf16 %v5448_v30, %v5442_v29 }
 0x4b8   : > { %4455 = vmatprep.subr.bf16.mxu1 %v4800_v38 }
 0x4bb   : > { %4456 = vmatpush3.bf16.msra.mxu1 %v4800_v38 }
 0x4bc   : > { %4457 = vmatprep.subr.bf16.mxu1 %v4801_v39 }
 0x4bf   : > { %4458 = vmatpush3.bf16.msra.mxu1 %v4801_v39  ;;  %v4821_v39 = vld [vmem:[%s4931_s12 + $0x188] sm:$0xff]  }
 0x4c0   : > { %4459 = vmatprep.subr.bf16.mxu1 %v4802_v40 }
 0x4c3   : > { %4460 = vmatpush3.bf16.msra.mxu1 %v4802_v40  ;;  %v4822_v40 = vld [vmem:[%s4931_s12 + $0x190] sm:$0xff]  }
 0x4c4   : > { %4461 = vmatprep.subr.bf16.mxu1 %v4803_v41 }
 0x4c7   : > { %4462 = vmatpush3.bf16.msra.mxu1 %v4803_v41  ;;  %v4823_v41 = vld [vmem:[%s4931_s12 + $0x198] sm:$0xff]  }
 0x4c8   : > { %4467 = vmatprep.subr.bf16.mxu1 %v5287_v50 }
 0x57d   : > { %v4445_v42 = vpop.f32.mrb[44].mxu1 }
 0x57e   : > { %v2546_v43 = vpop.f32.mrb[45].mxu1 }
 0x57f   : > { %v4446_v44 = vpop.f32.mrb[46].mxu1 }
 0x580   : > { %v2562_v45 = vpack.c.bf16 %v4446_v44, %v4445_v42  ;;  %v2549_v47 = vpop.f32.mrb[47].mxu1  ;;  %v4824_v42 = vld [vmem:[%s4931_s12 + $0x1a0] sm:$0xff]   ;;  %v4826_v44 = vld [vmem:[%s4931_s12 + $0x1b0] sm:$0xff]  }
 0x581   : > { %v2561_v46 = vpack.c.bf16 %v2549_v47, %v2546_v43  ;;  %v4825_v43 = vld [vmem:[%s4931_s12 + $0x1a8] sm:$0xff]   ;;  %v4828_v47 = vld [vmem:[%s4931_s12 + $0x1c0] sm:$0xff]  }
 0x583   : > { %4463 = vmatprep.mubr.bf16.mxu1 %v2561_v46  ;;  %v4829_v46 = vld [vmem:[%s4931_s12 + $0x1c8] sm:$0xff]  }
 0x584   : > { %4464 = vmatmul.mubr.bf16.vlgmr.msra.gmra.mrb[36].mxu1 %v2562_v45  ;;  %v4827_v45 = vld [vmem:[%s4931_s12 + $0x1b8] sm:$0xff]  }
 0x585   : > { %4468 = vmatpush3.bf16.msra.mxu1 %v5287_v50  ;;  %4471 = vmatprep.mubr.msk.bf16.mxu1 %vm328_vm0, %v4855_v48  ;;  %v4830_v48 = vld [vmem:[%s4931_s12 + $0x1d0] sm:$0xff]  }
 0x586   : > { %4469 = vmatprep.subr.bf16.mxu1 %v5285_v49 }
 0x589   : > { %4470 = vmatpush3.bf16.msra.mxu1 %v5285_v49 }
 0x58a   : > { %4475 = vmatprep.subr.bf16.mxu1 %v4804_v51 }
 0x58c   : > { %4472 = vmatmul.mubr.msk.bf16.vlgmr.msra.gmra.mrb[48].mxu1 %vm328_vm0, %v4856_v53  ;;  %v4833_v53 = vld [vmem:[%s4931_s12 + $0x1e8] sm:$0xff]  }
 0x58d   : > { %4476 = vmatpush3.bf16.msra.mxu1 %v4804_v51  ;;  %v4831_v51 = vld [vmem:[%s4931_s12 + $0x1d8] sm:$0xff]  }
 0x58e   : > { %4477 = vmatprep.subr.bf16.mxu1 %v4805_v52 }
 0x591   : > { %4478 = vmatpush3.bf16.msra.mxu1 %v4805_v52  ;;  %v4832_v52 = vld [vmem:[%s4931_s12 + $0x1e0] sm:$0xff]  }
 0x592   : > { %4479 = vmatprep.subr.bf16.mxu1 %v4806_v54 }
 0x595   : > { %4480 = vmatpush3.bf16.msra.mxu1 %v4806_v54  ;;  %v4834_v54 = vld [vmem:[%s4931_s12 + $0x1f0] sm:$0xff]  }
 0x596   : > { %4481 = vmatprep.subr.bf16.mxu1 %v4807_v55 }
 0x599   : > { %4482 = vmatpush3.bf16.msra.mxu1 %v4807_v55  ;;  %v4835_v55 = vld [vmem:[%s4931_s12 + $0x1f8] sm:$0xff]  }
 0x59a   : > { %4483 = vmatprep.subr.bf16.mxu1 %v4808_v56 }
 0x59d   : > { %4484 = vmatpush3.bf16.msra.mxu1 %v4808_v56  ;;  %v4836_v56 = vld [vmem:[%s4931_s12 + $0x200] sm:$0xff]  }
 0x59e   : > { %4485 = vmatprep.subr.bf16.mxu1 %v4809_v58 }
 0x5a1   : > { %4486 = vmatpush3.bf16.msra.mxu1 %v4809_v58  ;;  %v4837_v58 = vld [vmem:[%s4931_s12 + $0x208] sm:$0xff]  }
 0x5a2   : > { %4487 = vmatprep.subr.bf16.mxu1 %v4810_v60 }
 0x5a5   : > { %4488 = vmatpush3.bf16.msra.mxu1 %v4810_v60  ;;  %v4838_v60 = vld [vmem:[%s4931_s12 + $0x210] sm:$0xff]  }
 0x5a6   : > { %4489 = vmatprep.subr.bf16.mxu1 %v4811_v62 }
 0x5a9   : > { %4490 = vmatpush3.bf16.msra.mxu1 %v4811_v62  ;;  %v4839_v62 = vld [vmem:[%s4931_s12 + $0x218] sm:$0xff]  }
 0x5aa   : > { %4495 = vmatprep.subr.bf16.mxu1 %v5287_v50 }
 0x65f   : > { %v4473_v63 = vpop.f32.mrb[48].mxu1 }
 0x660   : > { %v2714_v57 = vpop.f32.mrb[49].mxu1 }
 0x661   : > { %v4474_v59 = vpop.f32.mrb[50].mxu1 }
 0x662   : > { %v2730_v61 = vpack.c.bf16 %v4474_v59, %v4473_v63  ;;  %v2717_v0 = vpop.f32.mrb[51].mxu1  ;;  %v4840_v63 = vld [vmem:[%s4931_s12 + $0x220] sm:$0xff]   ;;  %v4842_v59 = vld [vmem:[%s4931_s12 + $0x230] sm:$0xff]  }
 0x663   : > { %v2729_v1 = vpack.c.bf16 %v2717_v0, %v2714_v57  ;;  %v4841_v57 = vld [vmem:[%s4931_s12 + $0x228] sm:$0xff]  }
 0x665   : > { %4491 = vmatprep.mubr.bf16.mxu1 %v2729_v1  ;;  %v3829_v1 = vld [vmem:[%s284_s30] ss:$0 sm:$0xff] }
 0x666   : > { %4492 = vmatmul.mubr.bf16.vlgmr.msra.gmra.mrb[36].mxu1 %v2730_v61  ;;  %v4843_v61 = vld [vmem:[%s4931_s12 + $0x238] sm:$0xff]  }
 0x667   : > { %4496 = vmatpush3.bf16.msra.mxu1 %v5287_v50  ;;  %4499 = vmatprep.mubr.msk.bf16.mxu1 %vm328_vm0, %v4857_v2  ;;  %v4814_v50 = vld [vmem:[%s4931_s12 + $0x150] sm:$0xff]  }
 0x668   : > { %4497 = vmatprep.subr.bf16.mxu1 %v5285_v49 }
 0x66b   : > { %4498 = vmatpush3.bf16.msra.mxu1 %v5285_v49  ;;  %v4816_v49 = vld [vmem:[%s4931_s12 + $0x160] sm:$0xff]  }
 0x66c   : > { %4503 = vmatprep.subr.bf16.mxu1 %v4812_v4 }
 0x66e   : > { %4500 = vmatmul.mubr.msk.bf16.vlgmr.msra.gmra.mrb[52].mxu1 %vm328_vm0, %v4858_v3 }
 0x66f   : > { %4504 = vmatpush3.bf16.msra.mxu1 %v4812_v4  ;;  %v4859_v4 = vld [vmem:[%s5511_s6 + $0x8] sm:$0xff]  }
 0x670   : > { %4505 = vmatprep.subr.bf16.mxu1 %v4813_v5 }
 0x673   : > { %4506 = vmatpush3.bf16.msra.mxu1 %v4813_v5  ;;  %v3533_v5 = vunpack.c.l.bf16 %v4859_v4 }
 0x674   : > { %4507 = vmatprep.subr.bf16.mxu1 %v4814_v50 }
 0x677   : > { %4508 = vmatpush3.bf16.msra.mxu1 %v4814_v50 }
 0x678   : > { %4509 = vmatprep.subr.bf16.mxu1 %v4815_v6 }
 0x67b   : > { %4510 = vmatpush3.bf16.msra.mxu1 %v4815_v6  ;;  %v4860_v6 = vld [vmem:[%s5511_s6] sm:$0xff]  }
 0x67c   : > { %4511 = vmatprep.subr.bf16.mxu1 %v4816_v49  ;;  %v3532_v13 = vunpack.c.h.bf16 %v4860_v6 }
 0x67f   : > { %4512 = vmatpush3.bf16.msra.mxu1 %v4816_v49  ;;  %v3531_v49 = vunpack.c.l.bf16 %v4860_v6 }
 0x680   : > { %4513 = vmatprep.subr.bf16.mxu1 %v4817_v7 }
 0x683   : > { %4514 = vmatpush3.bf16.msra.mxu1 %v4817_v7 }
 0x684   : > { %4515 = vmatprep.subr.bf16.mxu1 %v4818_v8 }
 0x687   : > { %4516 = vmatpush3.bf16.msra.mxu1 %v4818_v8 }
 0x688   : > { %4517 = vmatprep.subr.bf16.mxu1 %v4819_v9 }
 0x68b   : > { %4518 = vmatpush3.bf16.msra.mxu1 %v4819_v9 }
 0x68c   : > { %4531 = vmatprep.subr.bf16.mxu1 %v4820_v10 }
 0x741   : > { %v4501_v33 = vpop.f32.mrb[52].mxu1 }
 0x742   : > { %v2882_v34 = vpop.f32.mrb[53].mxu1 }
 0x743   : > { %v4502_v35 = vpop.f32.mrb[54].mxu1 }
 0x744   : > { %v2898_v36 = vpack.c.bf16 %v4502_v35, %v4501_v33  ;;  %v2885_v37 = vpop.f32.mrb[55].mxu1 }
 0x745   : > { %v2897_v38 = vpack.c.bf16 %v2885_v37, %v2882_v34 }
 0x747   : > { %4519 = vmatprep.mubr.bf16.mxu1 %v2897_v38 }
 0x748   : > { %4520 = vmatmul.mubr.bf16.vlgmr.msra.gmra.mrb[36].mxu1 %v2898_v36 }
 0x749   : > { %4532 = vmatpush3.bf16.msra.mxu1 %v4820_v10  ;;  %4547 = vmatprep.mubr.bf16.mxu1 %v3065_v16  ;;  %v3534_v10 = vunpack.c.h.bf16 %v4859_v4 }
 0x74a   : > { %4533 = vmatprep.subr.bf16.mxu1 %v4821_v39 }
 0x74d   : > { %4534 = vmatpush3.bf16.msra.mxu1 %v4821_v39 }
 0x74e   : > { %4535 = vmatprep.subr.bf16.mxu1 %v4822_v40 }
 0x751   : > { %4536 = vmatpush3.bf16.msra.mxu1 %v4822_v40 }
 0x752   : > { %4537 = vmatprep.subr.bf16.mxu1 %v4823_v41 }
 0x755   : > { %4538 = vmatpush3.bf16.msra.mxu1 %v4823_v41 }
 0x756   : > { %4539 = vmatprep.subr.bf16.mxu1 %v4824_v42 }
 0x759   : > { %4540 = vmatpush3.bf16.msra.mxu1 %v4824_v42 }
 0x75a   : > { %4541 = vmatprep.subr.bf16.mxu1 %v4825_v43 }
 0x75d   : > { %4542 = vmatpush3.bf16.msra.mxu1 %v4825_v43 }
 0x75e   : > { %4543 = vmatprep.subr.bf16.mxu1 %v4826_v44 }
 0x761   : > { %4544 = vmatpush3.bf16.msra.mxu1 %v4826_v44 }
 0x762   : > { %4545 = vmatprep.subr.bf16.mxu1 %v4827_v45 }
 0x765   : > { %4546 = vmatpush3.bf16.msra.mxu1 %v4827_v45 }
 0x766   : > { %4559 = vmatprep.subr.bf16.mxu1 %v4828_v47 }
 0x768   : > { %4548 = vmatmul.mubr.bf16.vlgmr.msra.gmra.mrb[36].mxu1 %v3066_v14 }
 0x769   : > { %4560 = vmatpush3.bf16.msra.mxu1 %v4828_v47  ;;  %4575 = vmatprep.mubr.bf16.mxu1 %v3233_v28 }
 0x76a   : > { %4561 = vmatprep.subr.bf16.mxu1 %v4829_v46 }
 0x76d   : > { %4562 = vmatpush3.bf16.msra.mxu1 %v4829_v46 }
 0x76e   : > { %4563 = vmatprep.subr.bf16.mxu1 %v4830_v48 }
 0x771   : > { %4564 = vmatpush3.bf16.msra.mxu1 %v4830_v48 }
 0x772   : > { %4565 = vmatprep.subr.bf16.mxu1 %v4831_v51 }
 0x775   : > { %4566 = vmatpush3.bf16.msra.mxu1 %v4831_v51 }
 0x776   : > { %4567 = vmatprep.subr.bf16.mxu1 %v4832_v52 }
 0x779   : > { %4568 = vmatpush3.bf16.msra.mxu1 %v4832_v52 }
 0x77a   : > { %4569 = vmatprep.subr.bf16.mxu1 %v4833_v53 }
 0x77d   : > { %4570 = vmatpush3.bf16.msra.mxu1 %v4833_v53 }
 0x77e   : > { %4571 = vmatprep.subr.bf16.mxu1 %v4834_v54 }
 0x781   : > { %4572 = vmatpush3.bf16.msra.mxu1 %v4834_v54 }
 0x782   : > { %4573 = vmatprep.subr.bf16.mxu1 %v4835_v55 }
 0x785   : > { %4574 = vmatpush3.bf16.msra.mxu1 %v4835_v55 }
 0x786   : > { %4587 = vmatprep.subr.bf16.mxu1 %v4836_v56 }
 0x788   : > { %4576 = vmatmul.mubr.bf16.vlgmr.msra.gmra.mrb[36].mxu1 %v3234_v20 }
 0x789   : > { %4588 = vmatpush3.bf16.msra.mxu1 %v4836_v56  ;;  %4603 = vmatprep.mubr.bf16.mxu1 %v3401_v32 }
 0x78a   : > { %4589 = vmatprep.subr.bf16.mxu1 %v4837_v58 }
 0x78d   : > { %4590 = vmatpush3.bf16.msra.mxu1 %v4837_v58 }
 0x78e   : > { %4591 = vmatprep.subr.bf16.mxu1 %v4838_v60 }
 0x791   : > { %4592 = vmatpush3.bf16.msra.mxu1 %v4838_v60 }
 0x792   : > { %4593 = vmatprep.subr.bf16.mxu1 %v4839_v62 }
 0x795   : > { %4594 = vmatpush3.bf16.msra.mxu1 %v4839_v62 }
 0x796   : > { %4595 = vmatprep.subr.bf16.mxu1 %v4840_v63 }
 0x799   : > { %4596 = vmatpush3.bf16.msra.mxu1 %v4840_v63 }
 0x79a   : > { %4597 = vmatprep.subr.bf16.mxu1 %v4841_v57 }
 0x79d   : > { %4598 = vmatpush3.bf16.msra.mxu1 %v4841_v57 }
 0x79e   : > { %4599 = vmatprep.subr.bf16.mxu1 %v4842_v59 }
 0x7a1   : > { %4600 = vmatpush3.bf16.msra.mxu1 %v4842_v59 }
 0x7a2   : > { %4601 = vmatprep.subr.bf16.mxu1 %v4843_v61 }
 0x7a5   : > { %4602 = vmatpush3.bf16.msra.mxu1 %v4843_v61 }
 0x7a8   : > { %4604 = vmatmul.mubr.bf16.vlgmr.msra.gmra.mrb[36].mxu1 %v3402_v26 }
 0x87b   : > { %v4605_v0 = vpop.f32.mrb[36].mxu1 }
 0x87c   : > { %v4607_v2 = vadd.f32 %v4605_v0, %v5366_v21  ;;  %v3501_v3 = vpop.f32.mrb[37].mxu1 }
 0x87d   : > { %v4608_v50 = vadd.f32 %v3501_v3, %v5368_v23  ;;  %v4606_v7 = vpop.f32.mrb[38].mxu1 }
 0x87e   : > { %v3529_v8 = vadd.f32 %v4607_v2, %v3829_v1  ;;  %v4609_v9 = vadd.f32 %v4606_v7, %v5370_v24  ;;  %v3504_v11 = vpop.f32.mrb[39].mxu1 }
 0x87f   : > { %v3527_v21 = vadd.f32 %v4608_v50, %v3829_v1  ;;  %v4610_v12 = vadd.f32 %v3504_v11, %v5372_v31 }
 0x880   : > { %v3537_v14 = vadd.f32 %v3533_v5, %v3529_v8  ;;  %v3530_v15 = vadd.f32 %v4609_v9, %v3829_v1 }
 0x881   : > { %v3535_v16 = vadd.f32 %v3531_v49, %v3527_v21  ;;  %v3528_v17 = vadd.f32 %v4610_v12, %v3829_v1 }
 0x882   : > { %v3538_v23 = vadd.f32 %v3534_v10, %v3530_v15  ;;  %v3541_v19 = vmax.f32 %v3537_v14, 0.0 }
 0x883   : > { %v3536_v18 = vadd.f32 %v3532_v13, %v3528_v17  ;;  %v3539_v27 = vmax.f32 %v3535_v16, 0.0 }
 0x884   : > { %v3542_v20 = vmax.f32 %v3538_v23, 0.0 }
 0x885   : > { %v3540_v28 = vmax.f32 %v3536_v18, 0.0 }
 0x886   : > { %v3848_v22 = vpack.c.bf16 %v3542_v20, %v3541_v19 }
 0x887   : > { %v3843_v29 = vpack.c.bf16 %v3540_v28, %v3539_v27 }
 0x888   : > { %3850 = vst [vmem:[%s5511_s6 + $0x8] sm:$0xff] %v3848_v22  }
 0x889   : > { %3844 = vst [vmem:[%s5511_s6] sm:$0xff] %v3843_v29  }
 0x88a PF: > { %s16_s21 = sadd.s32 1, %s4867_s21  }
 0x88b   : > { %p13_p5 = scmp.ge.s32.totalorder %s16_s21, 5  }
 0x88d   :  { %15 = sbr.rel (!%p13_p5) target bundleno = 1 (0x1), region = 83 }

// kernel: _lambda_.11
= control target key start
LH: loop header
LB: loop body
LE: loop exit
PB: predicated region body
PF: predicated region fallthrough
CT: control target
= control target key end

     0   :  { %s4084_s21 = smov 0   ;;  %s4634_s0 = inlined_call_operand.vmem [shape: bf16[8,128], index: 0, kind: input, shape index: {}]   ;;  %s4635_s1 = inlined_call_operand.vmem [shape: bf16[72,8], index: 1, kind: input, shape index: {}]   ;;  %s4636_s2 = inlined_call_operand.vmem [shape: bf16[3,1152,128], index: 2, kind: input, shape index: {}]   ;;  %s4637_s3 = inlined_call_operand.vmem [shape: f32[3,1,128], index: 3, kind: input, shape index: {}, may-alias: {3,5}]   ;;  %s4638_s4 = inlined_call_operand.vmem [shape: bf16[3,1152,128], index: 4, kind: input, shape index: {}]   ;;  %s4639_s5 = inlined_call_operand.vmem [shape: f32[3,1,128], index: 5, kind: input, shape index: {}, may-alias: {3,5}]   ;;  %s4640_s6 = inlined_call_operand.vmem [shape: bf16[8,128], index: 6, kind: output, shape index: {}]  }
   0x1 LB: > { %s3042_s22 = sadd.s32 4294967295, %s4045_s21   ;;  %p3045_p0 = scmp.ge.s32.totalorder %s4045_s21, 1  ;;  %s4045_s21 = sphi %s4084_s21, %s16_s21  }
   0x2   : > { %p233_p1 = scmp.lt.s32.totalorder %s4045_s21, 4 }
   0x4   : > { %p234_p2 = pnand %p3045_p0, %p233_p1 }
   0x5   : > { %p269_p3 = scmp.lt.s32.totalorder (!%p234_p2), %s3042_s22, 2  ;;  %p3048_p4 = scmp.ne.s32.totalorder (!%p234_p2), %s3042_s22, 0 }
   0x6   : > { %237 = sbr.rel (%p234_p2) target bundleno = 2694 (0xa86), region = 44 }
   0xd   : > { %s4092_s23 = scalar_select %p269_p3, %s3042_s22, 2 }
   0xe   : > { %289 = sbr.rel (%p3048_p4) target bundleno = 21 (0x15), region = 48  ;;  %v290_v0 = vld [vmem:[%s4634_s0] sm:$0xf] (!%p3048_p4) }
   0xf   : > { %s3881_s24 = smul.u32 576, %s4092_s23  ;;  %s276_s27 = scalar_lea.vmem %s4637_s3, %s4092_s23  ;;  %291 = vst [vmem:[%s4640_s6] sm:$0xf] (!%p3048_p4), %v290_v0 }
  0x10   : > { %s284_s30 = scalar_lea.vmem %s4639_s5, %s4092_s23 }
  0x11   : > { %s4106_s9 = scalar_lea.vmem %s4636_s2, %s3881_s24  ;;  %s4111_s12 = scalar_lea.vmem %s4638_s4, %s3881_s24 }
  0x15 PF: > { %vm298_vm0 = vcmask 1043456   ;;  %vm294_vm1 = vcmask 64512   ;;  %v4047_v2 = vmov 0.0   ;;  %v293_v4 = vld [vmem:[%s4635_s1] sm:$0xf]  ;;  %vm4048_vm2 = vmmov 0  }
  0x16   : > { %v292_v1 = vld [vmem:[%s4640_s6] sm:$0xf]  ;;  %3413 = vmatprep.subr.bf16.mxu0 %v4047_v2  ;;  %3419 = vmatprep.subr.bf16.mxu1 %v4047_v2  ;;  %v359_v5 = vld [vmem:[%s4635_s1 + $0x4] sm:$0xf]  ;;  %v3894_v8 = vld [vmem:[%s4106_s9 + $0x48] sm:$0xff]  }
  0x17   : > { %v4125_v3 = vsel %vm298_vm0, %v292_v1, 0  ;;  %v3892_v6 = vld [vmem:[%s4106_s9 + $0x40] sm:$0xff]   ;;  %3415 = vmatprep.mubr.msk.bf16.mxu0 %vm4048_vm2, %v4047_v2  ;;  %3421 = vmatprep.mubr.msk.bf16.mxu1 %vm4048_vm2, %v4047_v2  ;;  %v3895_v9 = vld [vmem:[%s4106_s9 + $0x8] sm:$0xff]   ;;  %v3896_v10 = vld [vmem:[%s4106_s9 + $0x50] sm:$0xff]  }
  0x18   : > { %3414 = vmatpush3.bf16.msra.mxu0 %v4125_v3  ;;  %3420 = vmatpush3.bf16.msra.mxu1 %v4125_v3  ;;  %v3893_v7 = vld [vmem:[%s4106_s9] sm:$0xff]   ;;  %v3897_v11 = vld [vmem:[%s4106_s9 + $0x10] sm:$0xff]   ;;  %v3898_v12 = vld [vmem:[%s4106_s9 + $0x58] sm:$0xff]  }
  0x19   : > { %3425 = vmatprep.subr.bf16.mxu0 %v4047_v2  ;;  %3445 = vmatprep.subr.bf16.mxu1 %v4047_v2  ;;  %v3899_v13 = vld [vmem:[%s4106_s9 + $0x18] sm:$0xff]   ;;  %v3900_v14 = vld [vmem:[%s4106_s9 + $0x60] sm:$0xff]   ;;  %v3902_v16 = vld [vmem:[%s4106_s9 + $0x68] sm:$0xff]  }
  0x1a   : > { %v3901_v15 = vld [vmem:[%s4106_s9 + $0x20] sm:$0xff]   ;;  %v3903_v17 = vld [vmem:[%s4106_s9 + $0x28] sm:$0xff]   ;;  %v3904_v18 = vld [vmem:[%s4106_s9 + $0x70] sm:$0xff]  }
  0x1b   : > { %3416 = vmatmul.mubr.msk.bf16.vlgmr.msra.gmra.mrb[0].mxu0 %vm294_vm1, %v293_v4  ;;  %3422 = vmatmul.mubr.msk.bf16.vlgmr.msra.gmra.mrb[0].mxu1 %vm294_vm1, %v359_v5  ;;  %v3905_v19 = vld [vmem:[%s4106_s9 + $0x30] sm:$0xff]   ;;  %v3906_v20 = vld [vmem:[%s4106_s9 + $0x78] sm:$0xff]   ;;  %v4188_v32 = vld [vmem:[%s4635_s1 + $0x8] sm:$0xf] }
  0x1c   : > { %3426 = vmatpush3.bf16.msra.mxu0 %v3892_v6  ;;  %3446 = vmatpush3.bf16.msra.mxu1 %v3893_v7  ;;  %v3907_v21 = vld [vmem:[%s4106_s9 + $0x38] sm:$0xff]   ;;  %v3908_v33 = vld [vmem:[%s4106_s9 + $0x80] sm:$0xff]   ;;  %v3909_v34 = vld [vmem:[%s4106_s9 + $0x88] sm:$0xff]  }
  0x1d   : > { %3427 = vmatprep.subr.bf16.mxu0 %v4047_v2  ;;  %3447 = vmatprep.subr.bf16.mxu1 %v4047_v2  ;;  %v3910_v35 = vld [vmem:[%s4106_s9 + $0x90] sm:$0xff]   ;;  %v3911_v36 = vld [vmem:[%s4106_s9 + $0x98] sm:$0xff]   ;;  %v3912_v37 = vld [vmem:[%s4106_s9 + $0xa0] sm:$0xff]  }
  0x1e   : > { %3441 = vmatprep.mubr.msk.bf16.mxu0 %vm4048_vm2, %v4047_v2  ;;  %3461 = vmatprep.mubr.msk.bf16.mxu1 %vm4048_vm2, %v4047_v2  ;;  %v3913_v38 = vld [vmem:[%s4106_s9 + $0xa8] sm:$0xff]   ;;  %v3914_v39 = vld [vmem:[%s4106_s9 + $0xb0] sm:$0xff]   ;;  %v3915_v40 = vld [vmem:[%s4106_s9 + $0xb8] sm:$0xff]  }
  0x1f   : > { %v3916_v41 = vld [vmem:[%s4106_s9 + $0xc0] sm:$0xff]   ;;  %v3917_v42 = vld [vmem:[%s4106_s9 + $0xc8] sm:$0xff]   ;;  %v3918_v43 = vld [vmem:[%s4106_s9 + $0xd0] sm:$0xff]  }
  0x20   : > { %3428 = vmatpush3.bf16.msra.mxu0 %v3894_v8  ;;  %3448 = vmatpush3.bf16.msra.mxu1 %v3895_v9  ;;  %v3920_v44 = vld [vmem:[%s4106_s9 + $0xd8] sm:$0xff]   ;;  %v3922_v45 = vld [vmem:[%s4106_s9 + $0xe0] sm:$0xff]   ;;  %v4227_v60 = vld [vmem:[%s4635_s1 + $0xc] sm:$0xf] }
  0x21   : > { %3429 = vmatprep.subr.bf16.mxu0 %v4047_v2  ;;  %3449 = vmatprep.subr.bf16.mxu1 %v4047_v2  ;;  %v4238_v61 = vld [vmem:[%s4635_s1 + $0x10] sm:$0xf]  ;;  %v3919_v62 = vld [vmem:[%s4106_s9 + $0x100] sm:$0xff]   ;;  %v3921_v63 = vld [vmem:[%s4106_s9 + $0x108] sm:$0xff]  }
  0x22   : > { %v3923_v0 = vld [vmem:[%s4106_s9 + $0x110] sm:$0xff]   ;;  %v3924_v1 = vld [vmem:[%s4106_s9 + $0xe8] sm:$0xff]   ;;  %v3925_v4 = vld [vmem:[%s4106_s9 + $0x118] sm:$0xff]  }
  0x23   : > { %v3926_v5 = vld [vmem:[%s4106_s9 + $0xf0] sm:$0xff]   ;;  %v3927_v6 = vld [vmem:[%s4106_s9 + $0x120] sm:$0xff]   ;;  %v3928_v7 = vld [vmem:[%s4106_s9 + $0xf8] sm:$0xff]  }
  0x24   : > { %3430 = vmatpush3.bf16.msra.mxu0 %v3896_v10  ;;  %3450 = vmatpush3.bf16.msra.mxu1 %v3897_v11  ;;  %v3929_v8 = vld [vmem:[%s4106_s9 + $0x128] sm:$0xff]   ;;  %v3930_v9 = vld [vmem:[%s4106_s9 + $0x130] sm:$0xff]   ;;  %v3931_v10 = vld [vmem:[%s4106_s9 + $0x138] sm:$0xff]  }
  0x25   : > { %3431 = vmatprep.subr.bf16.mxu0 %v4047_v2  ;;  %3451 = vmatprep.subr.bf16.mxu1 %v4047_v2 }
  0x28   : > { %3432 = vmatpush3.bf16.msra.mxu0 %v3898_v12  ;;  %3452 = vmatpush3.bf16.msra.mxu1 %v3899_v13 }
  0x29   : > { %3433 = vmatprep.subr.bf16.mxu0 %v4047_v2  ;;  %3453 = vmatprep.subr.bf16.mxu1 %v4047_v2 }
  0x2c   : > { %3434 = vmatpush3.bf16.msra.mxu0 %v3900_v14  ;;  %3454 = vmatpush3.bf16.msra.mxu1 %v3901_v15 }
  0x2d   : > { %3435 = vmatprep.subr.bf16.mxu0 %v4047_v2  ;;  %3455 = vmatprep.subr.bf16.mxu1 %v4047_v2 }
  0x30   : > { %3436 = vmatpush3.bf16.msra.mxu0 %v3902_v16  ;;  %3456 = vmatpush3.bf16.msra.mxu1 %v3903_v17 }
  0x31   : > { %3437 = vmatprep.subr.bf16.mxu0 %v4047_v2  ;;  %3457 = vmatprep.subr.bf16.mxu1 %v4047_v2 }
  0x34   : > { %3438 = vmatpush3.bf16.msra.mxu0 %v3904_v18  ;;  %3458 = vmatpush3.bf16.msra.mxu1 %v3905_v19 }
  0x35   : > { %3439 = vmatprep.subr.bf16.mxu0 %v4047_v2  ;;  %3459 = vmatprep.subr.bf16.mxu1 %v4047_v2 }
  0x38   : > { %3440 = vmatpush3.bf16.msra.mxu0 %v3906_v20  ;;  %3460 = vmatpush3.bf16.msra.mxu1 %v3907_v21 }
  0x39   : > { %3465 = vmatprep.subr.bf16.mxu1 %v4047_v2  ;;  %3497 = vmatprep.subr.bf16.mxu0 %v4047_v2 }
  0xee   : > { %v336_v22 = vpop.f32.mrb[0].mxu0  ;;  %v397_v23 = vpop.f32.mrb[0].mxu1 }
  0xef   : > { %v342_v24 = vpack.c.bf16 %v336_v22, %v336_v22  ;;  %v403_v25 = vpack.c.bf16 %v397_v23, %v397_v23  ;;  %v3417_v26 = vpop.f32.mrb[1].mxu0  ;;  %v3423_v27 = vpop.f32.mrb[1].mxu1  ;;  %v4275_v22 = vld [vmem:[%s4635_s1 + $0x14] sm:$0xf] }
  0xf0   : > { %v339_v28 = vpop.f32.mrb[2].mxu0  ;;  %v400_v29 = vpop.f32.mrb[2].mxu1 }
  0xf1   : > { %v3418_v30 = vpop.f32.mrb[3].mxu0  ;;  %3442 = vmatmul.mubr.bf16.vlgmr.msra.gmra.mrb[4].mxu0 %v403_v25  ;;  %3462 = vmatmul.mubr.bf16.vlgmr.msra.gmra.mrb[4].mxu1 %v342_v24  ;;  %v3424_v31 = vpop.f32.mrb[3].mxu1  ;;  %v3932_v25 = vld [vmem:[%s4106_s9 + $0x140] sm:$0xff]   ;;  %v3933_v28 = vld [vmem:[%s4106_s9 + $0x148] sm:$0xff]   ;;  %v4291_v29 = vld [vmem:[%s4635_s1 + $0x18] sm:$0xf] }
  0xf2   : > { %3466 = vmatpush3.bf16.msra.mxu1 %v4125_v3  ;;  %3467 = vmatprep.mubr.msk.bf16.mxu1 %vm4048_vm2, %v4047_v2  ;;  %v3935_v30 = vld [vmem:[%s4106_s9 + $0x180] sm:$0xff]   ;;  %v3934_v31 = vld [vmem:[%s4106_s9 + $0x150] sm:$0xff]  }
  0xf3   : > { %3471 = vmatprep.subr.bf16.mxu1 %v4047_v2  ;;  %3513 = vmatprep.mubr.msk.bf16.mxu0 %vm4048_vm2, %v4047_v2 }
  0xf4   : > { %3498 = vmatpush3.bf16.msra.mxu0 %v3916_v41  ;;  %v3944_v41 = vld [vmem:[%s4106_s9 + $0x178] sm:$0xff]  }
  0xf5   : > { %3499 = vmatprep.subr.bf16.mxu0 %v4047_v2 }
  0xf8   : > { %3500 = vmatpush3.bf16.msra.mxu0 %v3917_v42  ;;  %v3945_v42 = vld [vmem:[%s4106_s9 + $0x1a8] sm:$0xff]  }
  0xf9   : > { %3468 = vmatmul.mubr.msk.bf16.vlgmr.msra.gmra.mrb[8].mxu1 %vm294_vm1, %v4188_v32  ;;  %3501 = vmatprep.subr.bf16.mxu0 %v4047_v2 }
  0xfa   : > { %3472 = vmatpush3.bf16.msra.mxu1 %v3908_v33  ;;  %3487 = vmatprep.mubr.msk.bf16.mxu1 %vm4048_vm2, %v4047_v2  ;;  %v3937_v33 = vld [vmem:[%s4106_s9 + $0x188] sm:$0xff]  }
  0xfb   : > { %3473 = vmatprep.subr.bf16.mxu1 %v4047_v2 }
  0xfc   : > { %3502 = vmatpush3.bf16.msra.mxu0 %v3918_v43  ;;  %v3946_v43 = vld [vmem:[%s4106_s9 + $0x1b0] sm:$0xff]  }
  0xfd   : > { %3503 = vmatprep.subr.bf16.mxu0 %v4047_v2 }
  0xfe   : > { %3474 = vmatpush3.bf16.msra.mxu1 %v3909_v34  ;;  %v3936_v34 = vld [vmem:[%s4106_s9 + $0x158] sm:$0xff]  }
  0xff   : > { %3475 = vmatprep.subr.bf16.mxu1 %v4047_v2 }
 0x100   : > { %3504 = vmatpush3.bf16.msra.mxu0 %v3920_v44  ;;  %v3947_v44 = vld [vmem:[%s4106_s9 + $0x1b8] sm:$0xff]  }
 0x101   : > { %3505 = vmatprep.subr.bf16.mxu0 %v4047_v2 }
 0x102   : > { %3476 = vmatpush3.bf16.msra.mxu1 %v3910_v35  ;;  %v3939_v35 = vld [vmem:[%s4106_s9 + $0x190] sm:$0xff]  }
 0x103   : > { %3477 = vmatprep.subr.bf16.mxu1 %v4047_v2 }
 0x104   : > { %3506 = vmatpush3.bf16.msra.mxu0 %v3922_v45 }
 0x105   : > { %3507 = vmatprep.subr.bf16.mxu0 %v4047_v2 }
 0x106   : > { %3478 = vmatpush3.bf16.msra.mxu1 %v3911_v36  ;;  %v3938_v36 = vld [vmem:[%s4106_s9 + $0x160] sm:$0xff]  }
 0x107   : > { %3479 = vmatprep.subr.bf16.mxu1 %v4047_v2 }
 0x108   : > { %3508 = vmatpush3.bf16.msra.mxu0 %v3924_v1 }
 0x109   : > { %3509 = vmatprep.subr.bf16.mxu0 %v4047_v2 }
 0x10a   : > { %3480 = vmatpush3.bf16.msra.mxu1 %v3912_v37  ;;  %v3940_v37 = vld [vmem:[%s4106_s9 + $0x168] sm:$0xff]  }
 0x10b   : > { %3481 = vmatprep.subr.bf16.mxu1 %v4047_v2 }
 0x10c   : > { %3510 = vmatpush3.bf16.msra.mxu0 %v3926_v5 }
 0x10d   : > { %3511 = vmatprep.subr.bf16.mxu0 %v4047_v2 }
 0x10e   : > { %3482 = vmatpush3.bf16.msra.mxu1 %v3913_v38  ;;  %v3941_v38 = vld [vmem:[%s4106_s9 + $0x198] sm:$0xff]  }
 0x10f   : > { %3483 = vmatprep.subr.bf16.mxu1 %v4047_v2 }
 0x110   : > { %3512 = vmatpush3.bf16.msra.mxu0 %v3928_v7  ;;  %v3949_v7 = vld [vmem:[%s4106_s9 + $0x1c8] sm:$0xff]  }
 0x111   : > { %3543 = vmatprep.subr.bf16.mxu0 %v4047_v2 }
 0x112   : > { %3484 = vmatpush3.bf16.msra.mxu1 %v3914_v39  ;;  %v3942_v39 = vld [vmem:[%s4106_s9 + $0x170] sm:$0xff]  }
 0x113   : > { %3485 = vmatprep.subr.bf16.mxu1 %v4047_v2 }
 0x116   : > { %3486 = vmatpush3.bf16.msra.mxu1 %v3915_v40  ;;  %v3943_v40 = vld [vmem:[%s4106_s9 + $0x1a0] sm:$0xff]  }
 0x117   : > { %3491 = vmatprep.subr.bf16.mxu1 %v4047_v2 }
 0x1c4   : > { %v502_v46 = vpop.f32.mrb[4].mxu0  ;;  %v590_v47 = vpop.f32.mrb[4].mxu1 }
 0x1c5   : > { %v591_v48 = vadd.f32 %v590_v47, %v502_v46  ;;  %v3463_v49 = vpop.f32.mrb[5].mxu1  ;;  %v3443_v50 = vpop.f32.mrb[5].mxu0 }
 0x1c6   : > { %v593_v51 = vpop.f32.mrb[6].mxu1  ;;  %v505_v52 = vpop.f32.mrb[6].mxu0 }
 0x1c7   : > { %v3464_v53 = vpop.f32.mrb[7].mxu1  ;;  %v3444_v54 = vpop.f32.mrb[7].mxu0 }
 0x1cc   : > { %v634_v55 = vpop.f32.mrb[8].mxu1 }
 0x1cd   : > { %v640_v56 = vpack.c.bf16 %v634_v55, %v634_v55  ;;  %v3469_v57 = vpop.f32.mrb[9].mxu1 }
 0x1ce   : > { %v637_v58 = vpop.f32.mrb[10].mxu1 }
 0x1cf   : > { %v3470_v59 = vpop.f32.mrb[11].mxu1  ;;  %3488 = vmatmul.mubr.bf16.vlgmr.msra.gmra.mrb[12].mxu1 %v640_v56 }
 0x1d0   : > { %3492 = vmatpush3.bf16.msra.mxu1 %v4125_v3  ;;  %3493 = vmatprep.mubr.msk.bf16.mxu1 %vm4048_vm2, %v4047_v2 }
 0x1d1   : > { %3517 = vmatprep.subr.bf16.mxu1 %v4047_v2 }
 0x1d7   : > { %3494 = vmatmul.mubr.msk.bf16.vlgmr.msra.gmra.mrb[16].mxu1 %vm294_vm1, %v4227_v60 }
 0x1d8   : > { %3518 = vmatpush3.bf16.msra.mxu1 %v4125_v3  ;;  %3519 = vmatprep.mubr.msk.bf16.mxu1 %vm4048_vm2, %v4047_v2 }
 0x1d9   : > { %3523 = vmatprep.subr.bf16.mxu1 %v4047_v2 }
 0x1df   : > { %3520 = vmatmul.mubr.msk.bf16.vlgmr.msra.gmra.mrb[20].mxu1 %vm294_vm1, %v4238_v61 }
 0x1e0   : > { %3524 = vmatpush3.bf16.msra.mxu1 %v3919_v62  ;;  %3539 = vmatprep.mubr.msk.bf16.mxu1 %vm4048_vm2, %v4047_v2 }
 0x1e1   : > { %3525 = vmatprep.subr.bf16.mxu1 %v4047_v2 }
 0x1e4   : > { %3526 = vmatpush3.bf16.msra.mxu1 %v3921_v63  ;;  %v4336_v63 = vld [vmem:[%s4635_s1 + $0x1c] sm:$0xf] }
 0x1e5   : > { %3527 = vmatprep.subr.bf16.mxu1 %v4047_v2 }
 0x1e8   : > { %3528 = vmatpush3.bf16.msra.mxu1 %v3923_v0 }
 0x1e9   : > { %3529 = vmatprep.subr.bf16.mxu1 %v4047_v2 }
 0x1ec   : > { %3530 = vmatpush3.bf16.msra.mxu1 %v3925_v4  ;;  %v3948_v4 = vld [vmem:[%s4106_s9 + $0x1c0] sm:$0xff]  }
 0x1ed   : > { %3531 = vmatprep.subr.bf16.mxu1 %v4047_v2 }
 0x1f0   : > { %3532 = vmatpush3.bf16.msra.mxu1 %v3927_v6 }
 0x1f1   : > { %3533 = vmatprep.subr.bf16.mxu1 %v4047_v2 }
 0x1f4   : > { %3534 = vmatpush3.bf16.msra.mxu1 %v3929_v8  ;;  %v4352_v8 = vld [vmem:[%s4635_s1 + $0x20] sm:$0xf] }
 0x1f5   : > { %3535 = vmatprep.subr.bf16.mxu1 %v4047_v2 }
 0x1f8   : > { %3536 = vmatpush3.bf16.msra.mxu1 %v3930_v9  ;;  %v3950_v9 = vld [vmem:[%s4106_s9 + $0x1d0] sm:$0xff]  }
 0x1f9   : > { %3537 = vmatprep.subr.bf16.mxu1 %v4047_v2 }
 0x1fc   : > { %3538 = vmatpush3.bf16.msra.mxu1 %v3931_v10  ;;  %v3953_v10 = vld [vmem:[%s4106_s9 + $0x208] sm:$0xff]  }
 0x1fd   : > { %3569 = vmatprep.subr.bf16.mxu1 %v4047_v2 }
 0x2a2   : > { %v739_v11 = vpop.f32.mrb[12].mxu1 }
 0x2a3   : > { %v4266_v12 = vadd.f32 %v739_v11, %v591_v48  ;;  %v3489_v13 = vpop.f32.mrb[13].mxu1  ;;  %v3952_v11 = vld [vmem:[%s4106_s9 + $0x1d8] sm:$0xff]  }
 0x2a4   : > { %v742_v14 = vpop.f32.mrb[14].mxu1  ;;  %v3954_v13 = vld [vmem:[%s4106_s9 + $0x1e0] sm:$0xff]  }
 0x2a5   : > { %v3490_v15 = vpop.f32.mrb[15].mxu1  ;;  %v3956_v14 = vld [vmem:[%s4106_s9 + $0x1e8] sm:$0xff]  }
 0x2a6   : > { %v3957_v15 = vld [vmem:[%s4106_s9 + $0x218] sm:$0xff]  }
 0x2aa   : > { %v784_v16 = vpop.f32.mrb[16].mxu1 }
 0x2ab   : > { %v790_v17 = vpack.c.bf16 %v784_v16, %v784_v16  ;;  %v3495_v18 = vpop.f32.mrb[17].mxu1  ;;  %v3958_v16 = vld [vmem:[%s4106_s9 + $0x1f0] sm:$0xff]  }
 0x2ac   : > { %v787_v19 = vpop.f32.mrb[18].mxu1  ;;  %v3960_v18 = vld [vmem:[%s4106_s9 + $0x1f8] sm:$0xff]  }
 0x2ad   : > { %v3496_v20 = vpop.f32.mrb[19].mxu1  ;;  %3514 = vmatmul.mubr.bf16.vlgmr.msra.gmra.mrb[8].mxu0 %v790_v17  ;;  %v3959_v17 = vld [vmem:[%s4106_s9 + $0x220] sm:$0xff]   ;;  %v3961_v19 = vld [vmem:[%s4106_s9 + $0x228] sm:$0xff]  }
 0x2ae   : > { %3544 = vmatpush3.bf16.msra.mxu0 %v4125_v3  ;;  %3545 = vmatprep.mubr.msk.bf16.mxu0 %vm4048_vm2, %v4047_v2  ;;  %v3962_v20 = vld [vmem:[%s4106_s9 + $0x230] sm:$0xff]  }
 0x2af   : > { %3549 = vmatprep.subr.bf16.mxu0 %v4047_v2 }
 0x2b2   : > { %v934_v21 = vpop.f32.mrb[20].mxu1 }
 0x2b3   : > { %v940_v23 = vpack.c.bf16 %v934_v21, %v934_v21  ;;  %v3521_v24 = vpop.f32.mrb[21].mxu1  ;;  %v3963_v21 = vld [vmem:[%s4106_s9 + $0x238] sm:$0xff]  }
 0x2b4   : > { %v937_v26 = vpop.f32.mrb[22].mxu1 }
 0x2b5   : > { %v3522_v27 = vpop.f32.mrb[23].mxu1  ;;  %3540 = vmatmul.mubr.bf16.vlgmr.msra.gmra.mrb[24].mxu1 %v940_v23  ;;  %3546 = vmatmul.mubr.msk.bf16.vlgmr.msra.gmra.mrb[12].mxu0 %vm294_vm1, %v4275_v22 }
 0x2b6   : > { %3570 = vmatpush3.bf16.msra.mxu1 %v4125_v3  ;;  %3571 = vmatprep.mubr.msk.bf16.mxu1 %vm4048_vm2, %v4047_v2 }
 0x2b7   : > { %3550 = vmatpush3.bf16.msra.mxu0 %v3932_v25  ;;  %3575 = vmatprep.subr.bf16.mxu1 %v4047_v2 }
 0x2b8   : > { %3551 = vmatprep.subr.bf16.mxu0 %v4047_v2  ;;  %3565 = vmatprep.mubr.msk.bf16.mxu0 %vm4048_vm2, %v4047_v2 }
 0x2bb   : > { %3552 = vmatpush3.bf16.msra.mxu0 %v3933_v28 }
 0x2bc   : > { %3553 = vmatprep.subr.bf16.mxu0 %v4047_v2 }
 0x2bd   : > { %3572 = vmatmul.mubr.msk.bf16.vlgmr.msra.gmra.mrb[28].mxu1 %vm294_vm1, %v4291_v29 }
 0x2be   : > { %3576 = vmatpush3.bf16.msra.mxu1 %v3935_v30  ;;  %3591 = vmatprep.mubr.msk.bf16.mxu1 %vm4048_vm2, %v4047_v2 }
 0x2bf   : > { %3554 = vmatpush3.bf16.msra.mxu0 %v3934_v31  ;;  %3577 = vmatprep.subr.bf16.mxu1 %v4047_v2 }
 0x2c0   : > { %3555 = vmatprep.subr.bf16.mxu0 %v4047_v2 }
 0x2c2   : > { %3578 = vmatpush3.bf16.msra.mxu1 %v3937_v33 }
 0x2c3   : > { %3556 = vmatpush3.bf16.msra.mxu0 %v3936_v34  ;;  %3579 = vmatprep.subr.bf16.mxu1 %v4047_v2 }
 0x2c4   : > { %3557 = vmatprep.subr.bf16.mxu0 %v4047_v2 }
 0x2c6   : > { %3580 = vmatpush3.bf16.msra.mxu1 %v3939_v35 }
 0x2c7   : > { %3558 = vmatpush3.bf16.msra.mxu0 %v3938_v36  ;;  %3581 = vmatprep.subr.bf16.mxu1 %v4047_v2 }
 0x2c8   : > { %3559 = vmatprep.subr.bf16.mxu0 %v4047_v2 }
 0x2ca   : > { %3582 = vmatpush3.bf16.msra.mxu1 %v3941_v38 }
 0x2cb   : > { %3560 = vmatpush3.bf16.msra.mxu0 %v3940_v37  ;;  %3583 = vmatprep.subr.bf16.mxu1 %v4047_v2 }
 0x2cc   : > { %3561 = vmatprep.subr.bf16.mxu0 %v4047_v2 }
 0x2ce   : > { %3584 = vmatpush3.bf16.msra.mxu1 %v3943_v40 }
 0x2cf   : > { %3562 = vmatpush3.bf16.msra.mxu0 %v3942_v39  ;;  %3585 = vmatprep.subr.bf16.mxu1 %v4047_v2 }
 0x2d0   : > { %3563 = vmatprep.subr.bf16.mxu0 %v4047_v2 }
 0x2d2   : > { %3586 = vmatpush3.bf16.msra.mxu1 %v3945_v42 }
 0x2d3   : > { %3564 = vmatpush3.bf16.msra.mxu0 %v3944_v41  ;;  %3587 = vmatprep.subr.bf16.mxu1 %v4047_v2 }
 0x2d4   : > { %3595 = vmatprep.subr.bf16.mxu0 %v4047_v2 }
 0x2d6   : > { %3588 = vmatpush3.bf16.msra.mxu1 %v3946_v43 }
 0x2d7   : > { %3589 = vmatprep.subr.bf16.mxu1 %v4047_v2 }
 0x2da   : > { %3590 = vmatpush3.bf16.msra.mxu1 %v3947_v44 }
 0x2db   : > { %3621 = vmatprep.subr.bf16.mxu1 %v4047_v2 }
 0x380   : > { %v889_v45 = vpop.f32.mrb[8].mxu0 }
 0x381   : > { %v895_v46 = vadd.f32 %v889_v45, %v4266_v12  ;;  %v3515_v47 = vpop.f32.mrb[9].mxu0  ;;  %v3955_v12 = vld [vmem:[%s4106_s9 + $0x210] sm:$0xff]   ;;  %v3964_v45 = vld [vmem:[%s4111_s12] sm:$0xff]  }
 0x382   : > { %v892_v48 = vpop.f32.mrb[10].mxu0  ;;  %v3967_v47 = vld [vmem:[%s4111_s12 + $0x10] sm:$0xff]  }
 0x383   : > { %v3516_v49 = vpop.f32.mrb[11].mxu0  ;;  %v3969_v48 = vld [vmem:[%s4111_s12 + $0x18] sm:$0xff]  }
 0x384   : > { %v3971_v49 = vld [vmem:[%s4111_s12 + $0x20] sm:$0xff]  }
 0x388   : > { %v1039_v50 = vpop.f32.mrb[24].mxu1  ;;  %v1084_v51 = vpop.f32.mrb[12].mxu0 }
 0x389   : > { %v4327_v52 = vadd.f32 %v1039_v50, %v895_v46  ;;  %v1090_v53 = vpack.c.bf16 %v1084_v51, %v1084_v51  ;;  %v3541_v54 = vpop.f32.mrb[25].mxu1  ;;  %v3547_v55 = vpop.f32.mrb[13].mxu0  ;;  %v3965_v46 = vld [vmem:[%s4111_s12 + $0x8] sm:$0xff]   ;;  %v3975_v51 = vld [vmem:[%s4111_s12 + $0x30] sm:$0xff]  }
 0x38a   : > { %v1042_v56 = vpop.f32.mrb[26].mxu1  ;;  %v1087_v57 = vpop.f32.mrb[14].mxu0  ;;  %v3973_v50 = vld [vmem:[%s4111_s12 + $0x28] sm:$0xff]  }
 0x38b   : > { %v3542_v58 = vpop.f32.mrb[27].mxu1  ;;  %3566 = vmatmul.mubr.bf16.vlgmr.msra.gmra.mrb[16].mxu0 %v1090_v53  ;;  %v3548_v59 = vpop.f32.mrb[15].mxu0 }
 0x38c   : > { %3596 = vmatpush3.bf16.msra.mxu0 %v4125_v3  ;;  %3597 = vmatprep.mubr.msk.bf16.mxu0 %vm4048_vm2, %v4047_v2  ;;  %v3130_v59 = vld [vmem:[%s276_s27] ss:$0 sm:$0xff] }
 0x38d   : > { %3601 = vmatprep.subr.bf16.mxu0 %v4047_v2 }
 0x390   : > { %v1234_v62 = vpop.f32.mrb[28].mxu1 }
 0x391   : > { %v1240_v0 = vpack.c.bf16 %v1234_v62, %v1234_v62  ;;  %v3573_v1 = vpop.f32.mrb[29].mxu1 }
 0x392   : > { %v1237_v5 = vpop.f32.mrb[30].mxu1 }
 0x393   : > { %v3574_v6 = vpop.f32.mrb[31].mxu1  ;;  %3592 = vmatmul.mubr.bf16.vlgmr.msra.gmra.mrb[32].mxu1 %v1240_v0  ;;  %3598 = vmatmul.mubr.msk.bf16.vlgmr.msra.gmra.mrb[20].mxu0 %vm294_vm1, %v4336_v63 }
 0x394   : > { %3622 = vmatpush3.bf16.msra.mxu1 %v4125_v3  ;;  %3623 = vmatprep.mubr.msk.bf16.mxu1 %vm4048_vm2, %v4047_v2  ;;  %v3951_v3 = vld [vmem:[%s4106_s9 + $0x200] sm:$0xff]  }
 0x395   : > { %3602 = vmatpush3.bf16.msra.mxu0 %v3948_v4  ;;  %3627 = vmatprep.subr.bf16.mxu1 %v4047_v2 }
 0x396   : > { %3603 = vmatprep.subr.bf16.mxu0 %v4047_v2  ;;  %3617 = vmatprep.mubr.msk.bf16.mxu0 %vm4048_vm2, %v4047_v2 }
 0x399   : > { %3604 = vmatpush3.bf16.msra.mxu0 %v3949_v7 }
 0x39a   : > { %3605 = vmatprep.subr.bf16.mxu0 %v4047_v2 }
 0x39b   : > { %3624 = vmatmul.mubr.msk.bf16.vlgmr.msra.gmra.mrb[36].mxu1 %vm294_vm1, %v4352_v8 }
 0x39c   : > { %3628 = vmatpush3.bf16.msra.mxu1 %v3951_v3  ;;  %3643 = vmatprep.mubr.msk.bf16.mxu1 %vm4048_vm2, %v4047_v2 }
 0x39d   : > { %3606 = vmatpush3.bf16.msra.mxu0 %v3950_v9  ;;  %3629 = vmatprep.subr.bf16.mxu1 %v4047_v2  ;;  %v4036_v9 = vld [vmem:[%s4635_s1] sm:$0xf] }
 0x39e   : > { %3607 = vmatprep.subr.bf16.mxu0 %v4047_v2 }
 0x3a0   : > { %3630 = vmatpush3.bf16.msra.mxu1 %v3953_v10  ;;  %v3966_v10 = vld [vmem:[%s4111_s12 + $0x40] sm:$0xff]  }
 0x3a1   : > { %3608 = vmatpush3.bf16.msra.mxu0 %v3952_v11  ;;  %3631 = vmatprep.subr.bf16.mxu1 %v4047_v2  ;;  %v4037_v11 = vld [vmem:[%s4635_s1 + $0x4] sm:$0xf] }
 0x3a2   : > { %3609 = vmatprep.subr.bf16.mxu0 %v4047_v2 }
 0x3a4   : > { %3632 = vmatpush3.bf16.msra.mxu1 %v3955_v12  ;;  %v3968_v12 = vld [vmem:[%s4111_s12 + $0x48] sm:$0xff]  }
 0x3a5   : > { %3610 = vmatpush3.bf16.msra.mxu0 %v3954_v13  ;;  %3633 = vmatprep.subr.bf16.mxu1 %v4047_v2  ;;  %v3970_v13 = vld [vmem:[%s4111_s12 + $0x50] sm:$0xff]  }
 0x3a6   : > { %3611 = vmatprep.subr.bf16.mxu0 %v4047_v2 }
 0x3a8   : > { %3634 = vmatpush3.bf16.msra.mxu1 %v3957_v15  ;;  %v3974_v15 = vld [vmem:[%s4111_s12 + $0x60] sm:$0xff]  }
 0x3a9   : > { %3612 = vmatpush3.bf16.msra.mxu0 %v3956_v14  ;;  %3635 = vmatprep.subr.bf16.mxu1 %v4047_v2  ;;  %v3972_v14 = vld [vmem:[%s4111_s12 + $0x58] sm:$0xff]  }
 0x3aa   : > { %3613 = vmatprep.subr.bf16.mxu0 %v4047_v2 }
 0x3ac   : > { %3636 = vmatpush3.bf16.msra.mxu1 %v3959_v17  ;;  %v3978_v17 = vld [vmem:[%s4111_s12 + $0x70] sm:$0xff]  }
 0x3ad   : > { %3614 = vmatpush3.bf16.msra.mxu0 %v3958_v16  ;;  %3637 = vmatprep.subr.bf16.mxu1 %v4047_v2  ;;  %v3976_v16 = vld [vmem:[%s4111_s12 + $0x68] sm:$0xff]  }
 0x3ae   : > { %3615 = vmatprep.subr.bf16.mxu0 %v4047_v2 }
 0x3b0   : > { %3638 = vmatpush3.bf16.msra.mxu1 %v3961_v19 }
 0x3b1   : > { %3616 = vmatpush3.bf16.msra.mxu0 %v3960_v18  ;;  %3639 = vmatprep.subr.bf16.mxu1 %v4047_v2  ;;  %v3979_v18 = vld [vmem:[%s4111_s12 + $0x78] sm:$0xff]  }
 0x3b2   : > { %3647 = vmatprep.subr.bf16.mxu0 %v4047_v2 }
 0x3b4   : > { %3640 = vmatpush3.bf16.msra.mxu1 %v3962_v20 }
 0x3b5   : > { %3641 = vmatprep.subr.bf16.mxu1 %v4047_v2 }
 0x3b8   : > { %3642 = vmatpush3.bf16.msra.mxu1 %v3963_v21 }
 0x3b9   : > { %3679 = vmatprep.subr.bf16.mxu1 %v4047_v2 }
 0x45e   : > { %v1189_v23 = vpop.f32.mrb[16].mxu0 }
 0x45f   : > { %v1195_v24 = vadd.f32 %v1189_v23, %v4327_v52  ;;  %v3567_v25 = vpop.f32.mrb[17].mxu0  ;;  %v3977_v52 = vld [vmem:[%s4111_s12 + $0x38] sm:$0xff]  }
 0x460   : > { %v1192_v26 = vpop.f32.mrb[18].mxu0 }
 0x461   : > { %v3568_v27 = vpop.f32.mrb[19].mxu0 }
 0x466   : > { %v1339_v28 = vpop.f32.mrb[32].mxu1  ;;  %v1384_v30 = vpop.f32.mrb[20].mxu0 }
 0x467   : > { %v1345_v31 = vadd.f32 %v1339_v28, %v1195_v24  ;;  %v1390_v33 = vpack.c.bf16 %v1384_v30, %v1384_v30  ;;  %v3593_v34 = vpop.f32.mrb[33].mxu1  ;;  %v3599_v35 = vpop.f32.mrb[21].mxu0  ;;  %v3980_v28 = vld [vmem:[%s4111_s12 + $0xc0] sm:$0xff]  }
 0x468   : > { %v1342_v36 = vpop.f32.mrb[34].mxu1  ;;  %v1387_v37 = vpop.f32.mrb[22].mxu0  ;;  %v3982_v34 = vld [vmem:[%s4111_s12 + $0x80] sm:$0xff]   ;;  %v3984_v35 = vld [vmem:[%s4111_s12 + $0x88] sm:$0xff]  }
 0x469   : > { %v3594_v38 = vpop.f32.mrb[35].mxu1  ;;  %3618 = vmatmul.mubr.bf16.vlgmr.msra.gmra.mrb[24].mxu0 %v1390_v33  ;;  %v3600_v39 = vpop.f32.mrb[23].mxu0  ;;  %v3981_v33 = vld [vmem:[%s4111_s12 + $0xc8] sm:$0xff]   ;;  %v3985_v36 = vld [vmem:[%s4111_s12 + $0xd8] sm:$0xff]   ;;  %v3986_v37 = vld [vmem:[%s4111_s12 + $0x90] sm:$0xff]  }
 0x46a   : > { %3649 = vmatprep.mubr.msk.bf16.mxu0 %vm4048_vm2, %v4047_v2  ;;  %v3988_v38 = vld [vmem:[%s4111_s12 + $0x98] sm:$0xff]   ;;  %v3989_v39 = vld [vmem:[%s4111_s12 + $0xe8] sm:$0xff]  }
 0x46e   : > { %v1534_v40 = vpop.f32.mrb[36].mxu1 }
 0x46f   : > { %v1540_v41 = vpack.c.bf16 %v1534_v40, %v1534_v40  ;;  %v3625_v42 = vpop.f32.mrb[37].mxu1  ;;  %v3990_v40 = vld [vmem:[%s4111_s12 + $0xa0] sm:$0xff]  }
 0x470   : > { %v1537_v43 = vpop.f32.mrb[38].mxu1  ;;  %v3992_v42 = vld [vmem:[%s4111_s12 + $0xa8] sm:$0xff]  }
 0x471   : > { %v3626_v44 = vpop.f32.mrb[39].mxu1  ;;  %3644 = vmatmul.mubr.bf16.vlgmr.msra.gmra.mrb[40].mxu1 %v1540_v41  ;;  %v3991_v41 = vld [vmem:[%s4111_s12 + $0xf0] sm:$0xff]   ;;  %v3993_v43 = vld [vmem:[%s4111_s12 + $0xf8] sm:$0xff]  }
 0x472   : > { %3695 = vmatprep.mubr.msk.bf16.mxu1 %vm4048_vm2, %v4047_v2  ;;  %3680 = vmatpush3.bf16.msra.mxu1 %v3964_v45  ;;  %v3994_v44 = vld [vmem:[%s4111_s12 + $0xb0] sm:$0xff]   ;;  %v3995_v45 = vld [vmem:[%s4111_s12 + $0xb8] sm:$0xff]  }
 0x473   : > { %3681 = vmatprep.subr.bf16.mxu1 %v4047_v2 }
 0x476   : > { %3682 = vmatpush3.bf16.msra.mxu1 %v3965_v46 }
 0x477   : > { %3683 = vmatprep.subr.bf16.mxu1 %v4047_v2 }
 0x47a   : > { %3684 = vmatpush3.bf16.msra.mxu1 %v3967_v47 }
 0x47b   : > { %3685 = vmatprep.subr.bf16.mxu1 %v4047_v2 }
 0x47e   : > { %3686 = vmatpush3.bf16.msra.mxu1 %v3969_v48 }
 0x47f   : > { %3687 = vmatprep.subr.bf16.mxu1 %v4047_v2 }
 0x482   : > { %3688 = vmatpush3.bf16.msra.mxu1 %v3971_v49 }
 0x483   : > { %3689 = vmatprep.subr.bf16.mxu1 %v4047_v2 }
 0x486   : > { %3690 = vmatpush3.bf16.msra.mxu1 %v3973_v50 }
 0x487   : > { %3691 = vmatprep.subr.bf16.mxu1 %v4047_v2 }
 0x48a   : > { %3692 = vmatpush3.bf16.msra.mxu1 %v3975_v51 }
 0x48b   : > { %3693 = vmatprep.subr.bf16.mxu1 %v4047_v2 }
 0x48e   : > { %3694 = vmatpush3.bf16.msra.mxu1 %v3977_v52 }
 0x48f   : > { %3725 = vmatprep.subr.bf16.mxu1 %v4047_v2 }
 0x53c   : > { %v1489_v53 = vpop.f32.mrb[24].mxu0 }
 0x53d   : > { %v1495_v54 = vadd.f32 %v1489_v53, %v1345_v31  ;;  %v3619_v55 = vpop.f32.mrb[25].mxu0 }
 0x53e   : > { %v1492_v56 = vpop.f32.mrb[26].mxu0 }
 0x53f   : > { %v3620_v57 = vpop.f32.mrb[27].mxu0 }
 0x544   : > { %v1639_v58 = vpop.f32.mrb[40].mxu1 }
 0x545   : > { %v1645_v62 = vadd.f32 %v1639_v58, %v1495_v54  ;;  %v3645_v0 = vpop.f32.mrb[41].mxu1 }
 0x546   : > { %v1642_v1 = vpop.f32.mrb[42].mxu1 }
 0x547   : > { %v1653_v4 = vadd.f32 %v3130_v59, %v1645_v62  ;;  %v3646_v5 = vpop.f32.mrb[43].mxu1 }
 0x549   : > { %v1654_v6 = vmax.f32 %v1653_v4, 0.0  ;;  %v3996_v4 = vld [vmem:[%s4111_s12 + $0x140] sm:$0xff]  }
 0x54b   : > { %v1655_v7 = vpack.c.bf16 %v1654_v6, %v1654_v6 }
 0x54d   : > { %v4414_v3 = vsel %vm298_vm0, %v1655_v7, 0  ;;  %v3997_v7 = vld [vmem:[%s4111_s12 + $0x148] sm:$0xff]  }
 0x54e   : > { %3648 = vmatpush3.bf16.msra.mxu0 %v4414_v3 }
 0x54f   : > { %3653 = vmatprep.subr.bf16.mxu0 %v4047_v2 }
 0x551   : > { %3650 = vmatmul.mubr.msk.bf16.vlgmr.msra.gmra.mrb[28].mxu0 %vm294_vm1, %v4036_v9  ;;  %v3998_v9 = vld [vmem:[%s4111_s12 + $0x100] sm:$0xff]  }
 0x552   : > { %3654 = vmatpush3.bf16.msra.mxu0 %v4414_v3  ;;  %3655 = vmatprep.mubr.msk.bf16.mxu0 %vm4048_vm2, %v4047_v2 }
 0x553   : > { %3659 = vmatprep.subr.bf16.mxu0 %v4047_v2 }
 0x559   : > { %3656 = vmatmul.mubr.msk.bf16.vlgmr.msra.gmra.mrb[32].mxu0 %vm294_vm1, %v4037_v11  ;;  %v4001_v11 = vld [vmem:[%s4111_s12 + $0x158] sm:$0xff]  }
 0x55a   : > { %3660 = vmatpush3.bf16.msra.mxu0 %v3966_v10  ;;  %3675 = vmatprep.mubr.msk.bf16.mxu0 %vm4048_vm2, %v4047_v2  ;;  %v4000_v10 = vld [vmem:[%s4111_s12 + $0x108] sm:$0xff]  }
 0x55b   : > { %3661 = vmatprep.subr.bf16.mxu0 %v4047_v2 }
 0x55e   : > { %3662 = vmatpush3.bf16.msra.mxu0 %v3968_v12  ;;  %v4002_v12 = vld [vmem:[%s4111_s12 + $0x110] sm:$0xff]  }
 0x55f   : > { %3663 = vmatprep.subr.bf16.mxu0 %v4047_v2 }
 0x562   : > { %3664 = vmatpush3.bf16.msra.mxu0 %v3970_v13  ;;  %v4004_v13 = vld [vmem:[%s4111_s12 + $0x118] sm:$0xff]  }
 0x563   : > { %3665 = vmatprep.subr.bf16.mxu0 %v4047_v2 }
 0x566   : > { %3666 = vmatpush3.bf16.msra.mxu0 %v3972_v14  ;;  %v4005_v14 = vld [vmem:[%s4111_s12 + $0x168] sm:$0xff]  }
 0x567   : > { %3667 = vmatprep.subr.bf16.mxu0 %v4047_v2 }
 0x56a   : > { %3668 = vmatpush3.bf16.msra.mxu0 %v3974_v15  ;;  %v4006_v15 = vld [vmem:[%s4111_s12 + $0x120] sm:$0xff]  }
 0x56b   : > { %3669 = vmatprep.subr.bf16.mxu0 %v4047_v2 }
 0x56e   : > { %3670 = vmatpush3.bf16.msra.mxu0 %v3976_v16  ;;  %v4007_v16 = vld [vmem:[%s4111_s12 + $0x170] sm:$0xff]  }
 0x56f   : > { %3671 = vmatprep.subr.bf16.mxu0 %v4047_v2 }
 0x572   : > { %3672 = vmatpush3.bf16.msra.mxu0 %v3978_v17  ;;  %v4008_v17 = vld [vmem:[%s4111_s12 + $0x128] sm:$0xff]  }
 0x573   : > { %3673 = vmatprep.subr.bf16.mxu0 %v4047_v2 }
 0x576   : > { %3674 = vmatpush3.bf16.msra.mxu0 %v3979_v18  ;;  %v4009_v18 = vld [vmem:[%s4111_s12 + $0x178] sm:$0xff]  }
 0x577   : > { %3699 = vmatprep.subr.bf16.mxu0 %v4047_v2 }
 0x624   : > { %v1693_v19 = vpop.f32.mrb[28].mxu0 }
 0x625   : > { %v1699_v20 = vpack.c.bf16 %v1693_v19, %v1693_v19  ;;  %v3651_v21 = vpop.f32.mrb[29].mxu0  ;;  %v4010_v19 = vld [vmem:[%s4111_s12 + $0x130] sm:$0xff]  }
 0x626   : > { %v1696_v23 = vpop.f32.mrb[30].mxu0 }
 0x627   : > { %3696 = vmatmul.mubr.bf16.vlgmr.msra.gmra.mrb[44].mxu1 %v1699_v20  ;;  %v3652_v24 = vpop.f32.mrb[31].mxu0  ;;  %v4011_v20 = vld [vmem:[%s4111_s12 + $0x138] sm:$0xff]  }
 0x628   : > { %3726 = vmatpush3.bf16.msra.mxu1 %v4414_v3  ;;  %3727 = vmatprep.mubr.msk.bf16.mxu1 %vm4048_vm2, %v4047_v2 }
 0x629   : > { %3731 = vmatprep.subr.bf16.mxu1 %v4047_v2 }
 0x62c   : > { %v1750_v25 = vpop.f32.mrb[32].mxu0 }
 0x62d   : > { %v1756_v26 = vpack.c.bf16 %v1750_v25, %v1750_v25  ;;  %v3657_v27 = vpop.f32.mrb[33].mxu0 }
 0x62e   : > { %v1753_v30 = vpop.f32.mrb[34].mxu0 }
 0x62f   : > { %3676 = vmatmul.mubr.bf16.vlgmr.msra.gmra.mrb[36].mxu0 %v1756_v26  ;;  %3728 = vmatmul.mubr.msk.bf16.vlgmr.msra.gmra.mrb[48].mxu1 %vm294_vm1, %v4227_v60  ;;  %v3658_v31 = vpop.f32.mrb[35].mxu0  ;;  %v3983_v60 = vld [vmem:[%s4111_s12 + $0xd0] sm:$0xff]  }
 0x630   : > { %3700 = vmatpush3.bf16.msra.mxu0 %v4414_v3  ;;  %3701 = vmatprep.mubr.msk.bf16.mxu0 %vm4048_vm2, %v4047_v2 }
 0x631   : > { %3732 = vmatpush3.bf16.msra.mxu1 %v3980_v28  ;;  %3705 = vmatprep.subr.bf16.mxu0 %v4047_v2 }
 0x632   : > { %3733 = vmatprep.subr.bf16.mxu1 %v4047_v2  ;;  %3747 = vmatprep.mubr.msk.bf16.mxu1 %vm4048_vm2, %v4047_v2 }
 0x635   : > { %3734 = vmatpush3.bf16.msra.mxu1 %v3981_v33 }
 0x636   : > { %3735 = vmatprep.subr.bf16.mxu1 %v4047_v2 }
 0x637   : > { %3702 = vmatmul.mubr.msk.bf16.vlgmr.msra.gmra.mrb[40].mxu0 %vm294_vm1, %v4188_v32  ;;  %v3987_v32 = vld [vmem:[%s4111_s12 + $0xe0] sm:$0xff]  }
 0x638   : > { %3706 = vmatpush3.bf16.msra.mxu0 %v3982_v34  ;;  %3721 = vmatprep.mubr.msk.bf16.mxu0 %vm4048_vm2, %v4047_v2 }
 0x639   : > { %3736 = vmatpush3.bf16.msra.mxu1 %v3983_v60  ;;  %3707 = vmatprep.subr.bf16.mxu0 %v4047_v2 }
 0x63a   : > { %3737 = vmatprep.subr.bf16.mxu1 %v4047_v2 }
 0x63c   : > { %3708 = vmatpush3.bf16.msra.mxu0 %v3984_v35 }
 0x63d   : > { %3738 = vmatpush3.bf16.msra.mxu1 %v3985_v36  ;;  %3709 = vmatprep.subr.bf16.mxu0 %v4047_v2 }
 0x63e   : > { %3739 = vmatprep.subr.bf16.mxu1 %v4047_v2 }
 0x640   : > { %3710 = vmatpush3.bf16.msra.mxu0 %v3986_v37 }
 0x641   : > { %3740 = vmatpush3.bf16.msra.mxu1 %v3987_v32  ;;  %3711 = vmatprep.subr.bf16.mxu0 %v4047_v2 }
 0x642   : > { %3741 = vmatprep.subr.bf16.mxu1 %v4047_v2 }
 0x644   : > { %3712 = vmatpush3.bf16.msra.mxu0 %v3988_v38 }
 0x645   : > { %3742 = vmatpush3.bf16.msra.mxu1 %v3989_v39  ;;  %3713 = vmatprep.subr.bf16.mxu0 %v4047_v2 }
 0x646   : > { %3743 = vmatprep.subr.bf16.mxu1 %v4047_v2 }
 0x648   : > { %3714 = vmatpush3.bf16.msra.mxu0 %v3990_v40  ;;  %v4013_v40 = vld [vmem:[%s4111_s12 + $0x1c0] sm:$0xff]  }
 0x649   : > { %3744 = vmatpush3.bf16.msra.mxu1 %v3991_v41  ;;  %3715 = vmatprep.subr.bf16.mxu0 %v4047_v2 }
 0x64a   : > { %3745 = vmatprep.subr.bf16.mxu1 %v4047_v2 }
 0x64c   : > { %3716 = vmatpush3.bf16.msra.mxu0 %v3992_v42 }
 0x64d   : > { %3746 = vmatpush3.bf16.msra.mxu1 %v3993_v43  ;;  %3717 = vmatprep.subr.bf16.mxu0 %v4047_v2  ;;  %v4015_v43 = vld [vmem:[%s4111_s12 + $0x1c8] sm:$0xff]  }
 0x64e   : > { %3777 = vmatprep.subr.bf16.mxu1 %v4047_v2 }
 0x650   : > { %3718 = vmatpush3.bf16.msra.mxu0 %v3994_v44  ;;  %v4012_v44 = vld [vmem:[%s4111_s12 + $0x180] sm:$0xff]  }
 0x651   : > { %3719 = vmatprep.subr.bf16.mxu0 %v4047_v2 }
 0x654   : > { %3720 = vmatpush3.bf16.msra.mxu0 %v3995_v45  ;;  %v4014_v45 = vld [vmem:[%s4111_s12 + $0x188] sm:$0xff]  }
 0x655   : > { %3751 = vmatprep.subr.bf16.mxu0 %v4047_v2 }
 0x6fa   : > { %v1943_v46 = vpop.f32.mrb[44].mxu1 }
 0x6fb   : > { %v3697_v47 = vpop.f32.mrb[45].mxu1 }
 0x6fc   : > { %v1946_v48 = vpop.f32.mrb[46].mxu1  ;;  %v4016_v47 = vld [vmem:[%s4111_s12 + $0x190] sm:$0xff]  }
 0x6fd   : > { %v3698_v49 = vpop.f32.mrb[47].mxu1  ;;  %v4018_v48 = vld [vmem:[%s4111_s12 + $0x198] sm:$0xff]  }
 0x6fe   : > { %v4020_v49 = vld [vmem:[%s4111_s12 + $0x1a0] sm:$0xff]  }
 0x702   : > { %v1855_v50 = vpop.f32.mrb[36].mxu0  ;;  %v2129_v51 = vpop.f32.mrb[48].mxu1 }
 0x703   : > { %v4496_v52 = vadd.f32 %v1943_v46, %v1855_v50  ;;  %v2135_v53 = vpack.c.bf16 %v2129_v51, %v2129_v51  ;;  %v3677_v54 = vpop.f32.mrb[37].mxu0  ;;  %v3729_v55 = vpop.f32.mrb[49].mxu1  ;;  %v4019_v46 = vld [vmem:[%s4111_s12 + $0x1d8] sm:$0xff]   ;;  %v4022_v50 = vld [vmem:[%s4111_s12 + $0x1a8] sm:$0xff]  }
 0x704   : > { %v1858_v56 = vpop.f32.mrb[38].mxu0  ;;  %v2132_v57 = vpop.f32.mrb[50].mxu1  ;;  %v4023_v51 = vld [vmem:[%s4111_s12 + $0x1e8] sm:$0xff]   ;;  %v4026_v54 = vld [vmem:[%s4111_s12 + $0x1b8] sm:$0xff]  }
 0x705   : > { %3748 = vmatmul.mubr.bf16.vlgmr.msra.gmra.mrb[52].mxu1 %v2135_v53  ;;  %v3678_v58 = vpop.f32.mrb[39].mxu0  ;;  %v3730_v59 = vpop.f32.mrb[51].mxu1  ;;  %v4025_v53 = vld [vmem:[%s4111_s12 + $0x1f0] sm:$0xff]   ;;  %v4027_v55 = vld [vmem:[%s4111_s12 + $0x1f8] sm:$0xff]  }
 0x706   : > { %3778 = vmatpush3.bf16.msra.mxu1 %v4414_v3  ;;  %3779 = vmatprep.mubr.msk.bf16.mxu1 %vm4048_vm2, %v4047_v2 }
 0x707   : > { %3783 = vmatprep.subr.bf16.mxu1 %v4047_v2 }
 0x70a   : > { %v1983_v62 = vpop.f32.mrb[40].mxu0 }
 0x70b   : > { %v1989_v0 = vpack.c.bf16 %v1983_v62, %v1983_v62  ;;  %v3703_v1 = vpop.f32.mrb[41].mxu0 }
 0x70c   : > { %v1986_v5 = vpop.f32.mrb[42].mxu0 }
 0x70d   : > { %3722 = vmatmul.mubr.bf16.vlgmr.msra.gmra.mrb[44].mxu0 %v1989_v0  ;;  %3780 = vmatmul.mubr.msk.bf16.vlgmr.msra.gmra.mrb[56].mxu1 %vm294_vm1, %v4275_v22  ;;  %v3704_v6 = vpop.f32.mrb[43].mxu0  ;;  %v3999_v22 = vld [vmem:[%s4111_s12 + $0x150] sm:$0xff]  }
 0x70e   : > { %3752 = vmatpush3.bf16.msra.mxu0 %v4414_v3  ;;  %3753 = vmatprep.mubr.msk.bf16.mxu0 %vm4048_vm2, %v4047_v2 }
 0x70f   : > { %3784 = vmatpush3.bf16.msra.mxu1 %v3996_v4  ;;  %3757 = vmatprep.subr.bf16.mxu0 %v4047_v2 }
 0x710   : > { %3785 = vmatprep.subr.bf16.mxu1 %v4047_v2  ;;  %3799 = vmatprep.mubr.msk.bf16.mxu1 %vm4048_vm2, %v4047_v2 }
 0x713   : > { %3786 = vmatpush3.bf16.msra.mxu1 %v3997_v7 }
 0x714   : > { %3787 = vmatprep.subr.bf16.mxu1 %v4047_v2 }
 0x715   : > { %3754 = vmatmul.mubr.msk.bf16.vlgmr.msra.gmra.mrb[48].mxu0 %vm294_vm1, %v4238_v61  ;;  %v4003_v61 = vld [vmem:[%s4111_s12 + $0x160] sm:$0xff]  }
 0x716   : > { %3758 = vmatpush3.bf16.msra.mxu0 %v3998_v9  ;;  %3773 = vmatprep.mubr.msk.bf16.mxu0 %vm4048_vm2, %v4047_v2 }
 0x717   : > { %3788 = vmatpush3.bf16.msra.mxu1 %v3999_v22  ;;  %3759 = vmatprep.subr.bf16.mxu0 %v4047_v2 }
 0x718   : > { %3789 = vmatprep.subr.bf16.mxu1 %v4047_v2 }
 0x71a   : > { %3760 = vmatpush3.bf16.msra.mxu0 %v4000_v10 }
 0x71b   : > { %3790 = vmatpush3.bf16.msra.mxu1 %v4001_v11  ;;  %3761 = vmatprep.subr.bf16.mxu0 %v4047_v2 }
 0x71c   : > { %3791 = vmatprep.subr.bf16.mxu1 %v4047_v2 }
 0x71e   : > { %3762 = vmatpush3.bf16.msra.mxu0 %v4002_v12 }
 0x71f   : > { %3792 = vmatpush3.bf16.msra.mxu1 %v4003_v61  ;;  %3763 = vmatprep.subr.bf16.mxu0 %v4047_v2 }
 0x720   : > { %3793 = vmatprep.subr.bf16.mxu1 %v4047_v2 }
 0x722   : > { %3764 = vmatpush3.bf16.msra.mxu0 %v4004_v13 }
 0x723   : > { %3794 = vmatpush3.bf16.msra.mxu1 %v4005_v14  ;;  %3765 = vmatprep.subr.bf16.mxu0 %v4047_v2 }
 0x724   : > { %3795 = vmatprep.subr.bf16.mxu1 %v4047_v2 }
 0x726   : > { %3766 = vmatpush3.bf16.msra.mxu0 %v4006_v15 }
 0x727   : > { %3796 = vmatpush3.bf16.msra.mxu1 %v4007_v16  ;;  %3767 = vmatprep.subr.bf16.mxu0 %v4047_v2  ;;  %v4028_v16 = vld [vmem:[%s4111_s12 + $0x200] sm:$0xff]  }
 0x728   : > { %3797 = vmatprep.subr.bf16.mxu1 %v4047_v2 }
 0x72a   : > { %3768 = vmatpush3.bf16.msra.mxu0 %v4008_v17  ;;  %v4029_v17 = vld [vmem:[%s4111_s12 + $0x208] sm:$0xff]  }
 0x72b   : > { %3798 = vmatpush3.bf16.msra.mxu1 %v4009_v18  ;;  %3769 = vmatprep.subr.bf16.mxu0 %v4047_v2  ;;  %v4031_v18 = vld [vmem:[%s4111_s12 + $0x218] sm:$0xff]  }
 0x72c   : > { %3829 = vmatprep.subr.bf16.mxu1 %v4047_v2 }
 0x72e   : > { %3770 = vmatpush3.bf16.msra.mxu0 %v4010_v19  ;;  %v4033_v19 = vld [vmem:[%s4111_s12 + $0x228] sm:$0xff]  }
 0x72f   : > { %3771 = vmatprep.subr.bf16.mxu0 %v4047_v2 }
 0x732   : > { %3772 = vmatpush3.bf16.msra.mxu0 %v4011_v20  ;;  %v4034_v20 = vld [vmem:[%s4111_s12 + $0x230] sm:$0xff]  }
 0x733   : > { %3803 = vmatprep.subr.bf16.mxu0 %v4047_v2 }
 0x7d8   : > { %v2234_v21 = vpop.f32.mrb[52].mxu1 }
 0x7d9   : > { %v3749_v23 = vpop.f32.mrb[53].mxu1 }
 0x7da   : > { %v2237_v24 = vpop.f32.mrb[54].mxu1 }
 0x7db   : > { %v3750_v25 = vpop.f32.mrb[55].mxu1 }
 0x7e0   : > { %v2088_v26 = vpop.f32.mrb[44].mxu0  ;;  %v2421_v27 = vpop.f32.mrb[56].mxu1 }
 0x7e1   : > { %v2094_v28 = vadd.f32 %v2088_v26, %v4496_v52  ;;  %v2427_v30 = vpack.c.bf16 %v2421_v27, %v2421_v27  ;;  %v3723_v31 = vpop.f32.mrb[45].mxu0  ;;  %v3781_v33 = vpop.f32.mrb[57].mxu1  ;;  %v4024_v52 = vld [vmem:[%s4111_s12 + $0x1b0] sm:$0xff]  }
 0x7e2   : > { %v2091_v34 = vpop.f32.mrb[46].mxu0  ;;  %v2424_v60 = vpop.f32.mrb[58].mxu1 }
 0x7e3   : > { %3800 = vmatmul.mubr.bf16.vlgmr.msra.gmra.mrb[60].mxu1 %v2427_v30  ;;  %v3724_v35 = vpop.f32.mrb[47].mxu0  ;;  %v4547_v36 = vadd.f32 %v2234_v21, %v2094_v28  ;;  %v3782_v37 = vpop.f32.mrb[59].mxu1  ;;  %v4035_v21 = vld [vmem:[%s4111_s12 + $0x238] sm:$0xff]  }
 0x7e4   : > { %3830 = vmatpush3.bf16.msra.mxu1 %v4414_v3  ;;  %3831 = vmatprep.mubr.msk.bf16.mxu1 %vm4048_vm2, %v4047_v2 }
 0x7e5   : > { %3835 = vmatprep.subr.bf16.mxu1 %v4047_v2 }
 0x7e8   : > { %v2275_v32 = vpop.f32.mrb[48].mxu0 }
 0x7e9   : > { %v2281_v38 = vpack.c.bf16 %v2275_v32, %v2275_v32  ;;  %v3755_v39 = vpop.f32.mrb[49].mxu0 }
 0x7ea   : > { %v2278_v41 = vpop.f32.mrb[50].mxu0 }
 0x7eb   : > { %3774 = vmatmul.mubr.bf16.vlgmr.msra.gmra.mrb[52].mxu0 %v2281_v38  ;;  %v3756_v42 = vpop.f32.mrb[51].mxu0  ;;  %3832 = vmatmul.mubr.msk.bf16.vlgmr.msra.gmra.mrb[64].mxu1 %vm294_vm1, %v4336_v63  ;;  %v4017_v63 = vld [vmem:[%s4111_s12 + $0x1d0] sm:$0xff]   ;;  %v3212_v38 = vld [vmem:[%s284_s30] ss:$0 sm:$0xff] }
 0x7ec   : > { %3804 = vmatpush3.bf16.msra.mxu0 %v4414_v3  ;;  %3805 = vmatprep.mubr.msk.bf16.mxu0 %vm4048_vm2, %v4047_v2 }
 0x7ed   : > { %3809 = vmatprep.subr.bf16.mxu0 %v4047_v2  ;;  %3836 = vmatpush3.bf16.msra.mxu1 %v4013_v40  ;;  %v4038_v40 = vld [vmem:[%s4640_s6] sm:$0xf] }
 0x7ee   : > { %3837 = vmatprep.subr.bf16.mxu1 %v4047_v2  ;;  %3851 = vmatprep.mubr.msk.bf16.mxu1 %vm4048_vm2, %v4047_v2  ;;  %v2979_v41 = vunpack.c.l.bf16 %v4038_v40 }
 0x7f1   : > { %3838 = vmatpush3.bf16.msra.mxu1 %v4015_v43 }
 0x7f2   : > { %3839 = vmatprep.subr.bf16.mxu1 %v4047_v2 }
 0x7f3   : > { %3806 = vmatmul.mubr.msk.bf16.vlgmr.msra.gmra.mrb[56].mxu0 %vm294_vm1, %v4291_v29  ;;  %v4021_v29 = vld [vmem:[%s4111_s12 + $0x1e0] sm:$0xff]  }
 0x7f4   : > { %3810 = vmatpush3.bf16.msra.mxu0 %v4012_v44  ;;  %3825 = vmatprep.mubr.msk.bf16.mxu0 %vm4048_vm2, %v4047_v2 }
 0x7f5   : > { %3811 = vmatprep.subr.bf16.mxu0 %v4047_v2  ;;  %3840 = vmatpush3.bf16.msra.mxu1 %v4017_v63 }
 0x7f6   : > { %3841 = vmatprep.subr.bf16.mxu1 %v4047_v2 }
 0x7f8   : > { %3812 = vmatpush3.bf16.msra.mxu0 %v4014_v45 }
 0x7f9   : > { %3813 = vmatprep.subr.bf16.mxu0 %v4047_v2  ;;  %3842 = vmatpush3.bf16.msra.mxu1 %v4019_v46 }
 0x7fa   : > { %3843 = vmatprep.subr.bf16.mxu1 %v4047_v2 }
 0x7fc   : > { %3814 = vmatpush3.bf16.msra.mxu0 %v4016_v47 }
 0x7fd   : > { %3815 = vmatprep.subr.bf16.mxu0 %v4047_v2  ;;  %3844 = vmatpush3.bf16.msra.mxu1 %v4021_v29 }
 0x7fe   : > { %3845 = vmatprep.subr.bf16.mxu1 %v4047_v2 }
 0x800   : > { %3816 = vmatpush3.bf16.msra.mxu0 %v4018_v48 }
 0x801   : > { %3817 = vmatprep.subr.bf16.mxu0 %v4047_v2  ;;  %3846 = vmatpush3.bf16.msra.mxu1 %v4023_v51 }
 0x802   : > { %3847 = vmatprep.subr.bf16.mxu1 %v4047_v2 }
 0x804   : > { %3818 = vmatpush3.bf16.msra.mxu0 %v4020_v49 }
 0x805   : > { %3819 = vmatprep.subr.bf16.mxu0 %v4047_v2  ;;  %3848 = vmatpush3.bf16.msra.mxu1 %v4025_v53 }
 0x806   : > { %3849 = vmatprep.subr.bf16.mxu1 %v4047_v2 }
 0x808   : > { %3820 = vmatpush3.bf16.msra.mxu0 %v4022_v50 }
 0x809   : > { %3821 = vmatprep.subr.bf16.mxu0 %v4047_v2  ;;  %3850 = vmatpush3.bf16.msra.mxu1 %v4027_v55 }
 0x80c   : > { %3822 = vmatpush3.bf16.msra.mxu0 %v4024_v52 }
 0x80d   : > { %3823 = vmatprep.subr.bf16.mxu0 %v4047_v2 }
 0x810   : > { %3824 = vmatpush3.bf16.msra.mxu0 %v4026_v54 }
 0x811   : > { %3855 = vmatprep.subr.bf16.mxu0 %v4047_v2 }
 0x8b6   : > { %v2526_v56 = vpop.f32.mrb[60].mxu1 }
 0x8b7   : > { %v3801_v57 = vpop.f32.mrb[61].mxu1 }
 0x8b8   : > { %v2529_v58 = vpop.f32.mrb[62].mxu1 }
 0x8b9   : > { %v3802_v59 = vpop.f32.mrb[63].mxu1 }
 0x8be   : > { %v2380_v62 = vpop.f32.mrb[52].mxu0  ;;  %v2713_v0 = vpop.f32.mrb[64].mxu1 }
 0x8bf   : > { %v2386_v1 = vadd.f32 %v2380_v62, %v4547_v36  ;;  %v3775_v4 = vpop.f32.mrb[53].mxu0  ;;  %v2719_v5 = vpack.c.bf16 %v2713_v0, %v2713_v0  ;;  %v3833_v6 = vpop.f32.mrb[65].mxu1 }
 0x8c0   : > { %v2383_v7 = vpop.f32.mrb[54].mxu0  ;;  %v2716_v9 = vpop.f32.mrb[66].mxu1 }
 0x8c1   : > { %v2532_v22 = vadd.f32 %v2526_v56, %v2386_v1  ;;  %v3776_v10 = vpop.f32.mrb[55].mxu0  ;;  %3852 = vmatmul.mubr.bf16.vlgmr.msra.gmra.mrb[68].mxu1 %v2719_v5  ;;  %v3834_v11 = vpop.f32.mrb[67].mxu1 }
 0x8c6   : > { %v2567_v12 = vpop.f32.mrb[56].mxu0 }
 0x8c7   : > { %v2573_v61 = vpack.c.bf16 %v2567_v12, %v2567_v12  ;;  %v3807_v13 = vpop.f32.mrb[57].mxu0 }
 0x8c8   : > { %v2570_v14 = vpop.f32.mrb[58].mxu0 }
 0x8c9   : > { %3826 = vmatmul.mubr.bf16.vlgmr.msra.gmra.mrb[60].mxu0 %v2573_v61  ;;  %v3808_v15 = vpop.f32.mrb[59].mxu0 }
 0x8ca   : > { %3856 = vmatpush3.bf16.msra.mxu0 %v4414_v3  ;;  %3857 = vmatprep.mubr.msk.bf16.mxu0 %vm4048_vm2, %v4047_v2  ;;  %v4030_v3 = vld [vmem:[%s4111_s12 + $0x210] sm:$0xff]  }
 0x8cb   : > { %3861 = vmatprep.subr.bf16.mxu0 %v4047_v2 }
 0x8d1   : > { %3858 = vmatmul.mubr.msk.bf16.vlgmr.msra.gmra.mrb[64].mxu0 %vm294_vm1, %v4352_v8  ;;  %v4032_v8 = vld [vmem:[%s4111_s12 + $0x220] sm:$0xff]  }
 0x8d2   : > { %3862 = vmatpush3.bf16.msra.mxu0 %v4028_v16  ;;  %3877 = vmatprep.mubr.msk.bf16.mxu0 %vm4048_vm2, %v4047_v2 }
 0x8d3   : > { %3863 = vmatprep.subr.bf16.mxu0 %v4047_v2 }
 0x8d6   : > { %3864 = vmatpush3.bf16.msra.mxu0 %v4029_v17 }
 0x8d7   : > { %3865 = vmatprep.subr.bf16.mxu0 %v4047_v2 }
 0x8da   : > { %3866 = vmatpush3.bf16.msra.mxu0 %v4030_v3 }
 0x8db   : > { %3867 = vmatprep.subr.bf16.mxu0 %v4047_v2 }
 0x8de   : > { %3868 = vmatpush3.bf16.msra.mxu0 %v4031_v18 }
 0x8df   : > { %3869 = vmatprep.subr.bf16.mxu0 %v4047_v2 }
 0x8e2   : > { %3870 = vmatpush3.bf16.msra.mxu0 %v4032_v8 }
 0x8e3   : > { %3871 = vmatprep.subr.bf16.mxu0 %v4047_v2 }
 0x8e6   : > { %3872 = vmatpush3.bf16.msra.mxu0 %v4033_v19 }
 0x8e7   : > { %3873 = vmatprep.subr.bf16.mxu0 %v4047_v2 }
 0x8ea   : > { %3874 = vmatpush3.bf16.msra.mxu0 %v4034_v20 }
 0x8eb   : > { %3875 = vmatprep.subr.bf16.mxu0 %v4047_v2 }
 0x8ee   : > { %3876 = vmatpush3.bf16.msra.mxu0 %v4035_v21 }
 0x994   : > { %v2818_v23 = vpop.f32.mrb[68].mxu1 }
 0x995   : > { %v3853_v24 = vpop.f32.mrb[69].mxu1 }
 0x996   : > { %v2821_v25 = vpop.f32.mrb[70].mxu1 }
 0x997   : > { %v3854_v26 = vpop.f32.mrb[71].mxu1 }
 0x99c   : > { %v2672_v27 = vpop.f32.mrb[60].mxu0 }
 0x99d   : > { %v2678_v28 = vadd.f32 %v2672_v27, %v2532_v22  ;;  %v3827_v30 = vpop.f32.mrb[61].mxu0 }
 0x99e   : > { %v2675_v31 = vpop.f32.mrb[62].mxu0 }
 0x99f   : > { %v2824_v33 = vadd.f32 %v2818_v23, %v2678_v28  ;;  %v3828_v34 = vpop.f32.mrb[63].mxu0 }
 0x9a4   : > { %v2859_v60 = vpop.f32.mrb[64].mxu0 }
 0x9a5   : > { %v2865_v35 = vpack.c.bf16 %v2859_v60, %v2859_v60  ;;  %v3859_v36 = vpop.f32.mrb[65].mxu0 }
 0x9a6   : > { %v2862_v37 = vpop.f32.mrb[66].mxu0 }
 0x9a7   : > { %3878 = vmatmul.mubr.bf16.vlgmr.msra.gmra.mrb[68].mxu0 %v2865_v35  ;;  %v3860_v32 = vpop.f32.mrb[67].mxu0 }
 0xa7a   : > { %v2964_v2 = vpop.f32.mrb[68].mxu0 }
 0xa7b   : > { %v2970_v39 = vadd.f32 %v2964_v2, %v2824_v33  ;;  %v3879_v42 = vpop.f32.mrb[69].mxu0 }
 0xa7c   : > { %v2967_v43 = vpop.f32.mrb[70].mxu0 }
 0xa7d   : > { %v2978_v44 = vadd.f32 %v3212_v38, %v2970_v39  ;;  %v3880_v63 = vpop.f32.mrb[71].mxu0 }
 0xa7f   : > { %v2980_v45 = vadd.f32 %v2979_v41, %v2978_v44 }
 0xa81   : > { %v2981_v46 = vmax.f32 %v2980_v45, 0.0 }
 0xa83   : > { %v2982_v47 = vpack.c.bf16 %v2981_v46, %v2981_v46 }
 0xa85   : > { %2983 = vst [vmem:[%s4640_s6] sm:$0xf] %v2982_v47 }
 0xa86 PF: > { %s16_s21 = sadd.s32 1, %s4045_s21  }
 0xa87   : > { %p13_p5 = scmp.ge.s32.totalorder %s16_s21, 5  }
 0xa89   :  { %15 = sbr.rel (!%p13_p5) target bundleno = 1 (0x1), region = 83 }

// kernel: _lambda_.12
= control target key start
LH: loop header
LB: loop body
LE: loop exit
PB: predicated region body
PF: predicated region fallthrough
CT: control target
= control target key end

     0   :  { %vm42_vm0 = vcmask 1043456   ;;  %v1631_v0 = vmov 0.0   ;;  %vm1632_vm1 = vmmov 0   ;;  %vm38_vm2 = vcmask 64512   ;;  %s2104_s0 = inlined_call_operand.vmem [shape: bf16[8,128], index: 0, kind: input, shape index: {}]   ;;  %s2105_s1 = inlined_call_operand.vmem [shape: bf16[32,8], index: 1, kind: input, shape index: {}]   ;;  %s2106_s2 = inlined_call_operand.vmem [shape: bf16[1152,256], index: 2, kind: input, shape index: {}]   ;;  %s2107_s4 = inlined_call_operand.vmem [shape: bf16[2304,256], index: 4, kind: input, shape index: {}]   ;;  %s2108_s6 = inlined_call_operand.vmem [shape: bf16[2,8], index: 6, kind: input, shape index: {}]   ;;  %s2109_s7 = inlined_call_operand.vmem [shape: bf16[128,256], index: 7, kind: input, shape index: {}]   ;;  %s2110_s3 = inlined_call_operand.vmem [shape: f32[1,256], index: 3, kind: input, shape index: {}, may-alias: {3,5,8}]   ;;  %s2111_s5 = inlined_call_operand.vmem [shape: f32[1,256], index: 5, kind: input, shape index: {}, may-alias: {3,5,8}]   ;;  %s2112_s8 = inlined_call_operand.vmem [shape: f32[1,256], index: 8, kind: input, shape index: {}, may-alias: {3,5,8}]   ;;  %s2113_s9 = inlined_call_operand.vmem [shape: bf16[2,256], index: 9, kind: output, shape index: {}]  }
   0x1   :  { %1427 = vmatprep.subr.bf16.mxu1 %v1631_v0  ;;  %v36_v1 = vld [vmem:[%s2104_s0] sm:$0xf]  ;;  %1429 = vmatprep.mubr.msk.bf16.mxu1 %vm1632_vm1, %v1631_v0  ;;  %v103_v2 = vld [vmem:[%s2105_s1 + $0x4] sm:$0x1]  ;;  %v1468_v7 = vld [vmem:[%s2106_s2 + $0x294] ss:$8 sps:$4 sm:$0xff]  }
   0x2   :  { %v37_v3 = vld [vmem:[%s2105_s1] sm:$0x1]  ;;  %v1697_v4 = vsel %vm42_vm0, %v36_v1, 0  ;;  %1421 = vmatprep.subr.bf16.mxu0 %v1631_v0  ;;  %1423 = vmatprep.mubr.msk.bf16.mxu0 %vm1632_vm1, %v1631_v0  ;;  %v1465_v6 = vld [vmem:[%s2106_s2 + $0x284] ss:$8 sps:$4 sm:$0xff]   ;;  %v1633_v22 = vmov 0  }
   0x3   :  { %v1463_v5 = vld [vmem:[%s2106_s2 + $0x280] ss:$8 sps:$4 sm:$0xff]   ;;  %1428 = vmatpush3.bf16.msra.mxu1 %v1697_v4  ;;  %1422 = vmatpush3.bf16.msra.mxu0 %v1697_v4  ;;  %v1466_v8 = vld [vmem:[%s2106_s2 + $0x290] ss:$8 sps:$4 sm:$0xff]   ;;  %v1471_v9 = vld [vmem:[%s2106_s2 + $0x2a4] ss:$8 sps:$4 sm:$0xff]  }
   0x4   :  { %244 = vmatprep.subr.bf16.mxu0 %v1465_v6  ;;  %v1469_v10 = vld [vmem:[%s2106_s2 + $0x2a0] ss:$8 sps:$4 sm:$0xff]   ;;  %v1474_v11 = vld [vmem:[%s2106_s2 + $0x2b4] ss:$8 sps:$4 sm:$0xff]   ;;  %v1472_v12 = vld [vmem:[%s2106_s2 + $0x2b0] ss:$8 sps:$4 sm:$0xff]  }
   0x5   :  { %v1477_v13 = vld [vmem:[%s2106_s2 + $0x2c4] ss:$8 sps:$4 sm:$0xff]   ;;  %v1475_v14 = vld [vmem:[%s2106_s2 + $0x2c0] ss:$8 sps:$4 sm:$0xff]   ;;  %v1480_v15 = vld [vmem:[%s2106_s2 + $0x2d4] ss:$8 sps:$4 sm:$0xff]  }
   0x6   :  { %1430 = vmatmul.mubr.msk.bf16.vlgmr.msra.gmra.mrb[0].mxu1 %vm38_vm2, %v103_v2  ;;  %1424 = vmatmul.mubr.msk.bf16.vlgmr.msra.gmra.mrb[0].mxu0 %vm38_vm2, %v37_v3  ;;  %v1478_v16 = vld [vmem:[%s2106_s2 + $0x2d0] ss:$8 sps:$4 sm:$0xff]   ;;  %v1483_v17 = vld [vmem:[%s2106_s2 + $0x2e4] ss:$8 sps:$4 sm:$0xff]   ;;  %v1481_v18 = vld [vmem:[%s2106_s2 + $0x2e0] ss:$8 sps:$4 sm:$0xff]  }
   0x7   :  { %245 = vmatpush1.bf16.msra.mxu0 %v1463_v5  ;;  %v1486_v19 = vld [vmem:[%s2106_s2 + $0x2f4] ss:$8 sps:$4 sm:$0xff]   ;;  %v1484_v20 = vld [vmem:[%s2106_s2 + $0x2f0] ss:$8 sps:$4 sm:$0xff]   ;;  %v1489_v21 = vld [vmem:[%s2106_s2 + $0x204] ss:$8 sps:$4 sm:$0xff]   ;;  %276 = vmatprep.mubr.bf16.mxu0 %v1633_v22 }
   0x8   :  { %246 = vmatprep.subr.bf16.mxu0 %v1468_v7  ;;  %579 = vmatprep.mubr.bf16.mxu1 %v1633_v22  ;;  %v1487_v24 = vld [vmem:[%s2106_s2 + $0x200] ss:$8 sps:$4 sm:$0xff]   ;;  %v1492_v28 = vld [vmem:[%s2106_s2 + $0x214] ss:$8 sps:$4 sm:$0xff]   ;;  %v1490_v34 = vld [vmem:[%s2106_s2 + $0x210] ss:$8 sps:$4 sm:$0xff]  }
   0x9   :  { %v1495_v35 = vld [vmem:[%s2106_s2 + $0x224] ss:$8 sps:$4 sm:$0xff]   ;;  %v1493_v36 = vld [vmem:[%s2106_s2 + $0x220] ss:$8 sps:$4 sm:$0xff]   ;;  %v1498_v37 = vld [vmem:[%s2106_s2 + $0x234] ss:$8 sps:$4 sm:$0xff]  }
   0xa   :  { %v1496_v38 = vld [vmem:[%s2106_s2 + $0x230] ss:$8 sps:$4 sm:$0xff]   ;;  %v1501_v39 = vld [vmem:[%s2106_s2 + $0x244] ss:$8 sps:$4 sm:$0xff]   ;;  %v1499_v40 = vld [vmem:[%s2106_s2 + $0x240] ss:$8 sps:$4 sm:$0xff]  }
   0xb   :  { %247 = vmatpush1.bf16.msra.mxu0 %v1466_v8  ;;  %v1504_v41 = vld [vmem:[%s2106_s2 + $0x254] ss:$8 sps:$4 sm:$0xff]   ;;  %v1502_v42 = vld [vmem:[%s2106_s2 + $0x250] ss:$8 sps:$4 sm:$0xff]   ;;  %v1507_v43 = vld [vmem:[%s2106_s2 + $0x264] ss:$8 sps:$4 sm:$0xff]  }
   0xc   :  { %248 = vmatprep.subr.bf16.mxu0 %v1471_v9  ;;  %v1505_v44 = vld [vmem:[%s2106_s2 + $0x260] ss:$8 sps:$4 sm:$0xff]   ;;  %v1510_v45 = vld [vmem:[%s2106_s2 + $0x274] ss:$8 sps:$4 sm:$0xff]   ;;  %v1508_v46 = vld [vmem:[%s2106_s2 + $0x270] ss:$8 sps:$4 sm:$0xff]  }
   0xd   :  { %v406_v48 = vld [vmem:[%s2105_s1 + $0x8] sm:$0x1]  ;;  %v590_v49 = vld [vmem:[%s2105_s1 + $0xc] sm:$0x1]  ;;  %v1516_v52 = vld [vmem:[%s2106_s2 + $0x394] ss:$8 sps:$4 sm:$0xff]  }
   0xe   :  { %v1511_v50 = vld [vmem:[%s2106_s2 + $0x380] ss:$8 sps:$4 sm:$0xff]   ;;  %v1513_v51 = vld [vmem:[%s2106_s2 + $0x384] ss:$8 sps:$4 sm:$0xff]   ;;  %v1514_v55 = vld [vmem:[%s2106_s2 + $0x390] ss:$8 sps:$4 sm:$0xff]  }
   0xf   :  { %249 = vmatpush1.bf16.msra.mxu0 %v1469_v10  ;;  %547 = vmatprep.subr.bf16.mxu1 %v1513_v51  ;;  %v1520_v53 = vld [vmem:[%s2106_s2 + $0x400] ss:$8 sps:$4 sm:$0xff]   ;;  %v1522_v54 = vld [vmem:[%s2106_s2 + $0x404] ss:$8 sps:$4 sm:$0xff]   ;;  %v1528_v56 = vld [vmem:[%s2106_s2 + $0x414] ss:$8 sps:$4 sm:$0xff]  }
  0x10   :  { %250 = vmatprep.subr.bf16.mxu0 %v1474_v11  ;;  %548 = vmatpush1.bf16.msra.mxu1 %v1511_v50  ;;  %v1519_v57 = vld [vmem:[%s2106_s2 + $0x3a4] ss:$8 sps:$4 sm:$0xff]   ;;  %v1526_v58 = vld [vmem:[%s2106_s2 + $0x410] ss:$8 sps:$4 sm:$0xff]   ;;  %v1517_v60 = vld [vmem:[%s2106_s2 + $0x3a0] ss:$8 sps:$4 sm:$0xff]  }
  0x11   :  { %549 = vmatprep.subr.bf16.mxu1 %v1516_v52  ;;  %v1534_v59 = vld [vmem:[%s2106_s2 + $0x424] ss:$8 sps:$4 sm:$0xff]   ;;  %v1525_v61 = vld [vmem:[%s2106_s2 + $0x3b4] ss:$8 sps:$4 sm:$0xff]   ;;  %v1532_v62 = vld [vmem:[%s2106_s2 + $0x420] ss:$8 sps:$4 sm:$0xff]  }
  0x12   :  { %v1540_v63 = vld [vmem:[%s2106_s2 + $0x434] ss:$8 sps:$4 sm:$0xff]   ;;  %v1523_v1 = vld [vmem:[%s2106_s2 + $0x3b0] ss:$8 sps:$4 sm:$0xff]   ;;  %v1531_v2 = vld [vmem:[%s2106_s2 + $0x3c4] ss:$8 sps:$4 sm:$0xff]  }
  0x13   :  { %251 = vmatpush1.bf16.msra.mxu0 %v1472_v12  ;;  %v1538_v3 = vld [vmem:[%s2106_s2 + $0x430] ss:$8 sps:$4 sm:$0xff]   ;;  %v1529_v5 = vld [vmem:[%s2106_s2 + $0x3c0] ss:$8 sps:$4 sm:$0xff]   ;;  %v1537_v6 = vld [vmem:[%s2106_s2 + $0x3d4] ss:$8 sps:$4 sm:$0xff]  }
  0x14   :  { %252 = vmatprep.subr.bf16.mxu0 %v1477_v13  ;;  %550 = vmatpush1.bf16.msra.mxu1 %v1514_v55  ;;  %v1535_v7 = vld [vmem:[%s2106_s2 + $0x3d0] ss:$8 sps:$4 sm:$0xff]   ;;  %v1543_v8 = vld [vmem:[%s2106_s2 + $0x3e4] ss:$8 sps:$4 sm:$0xff]   ;;  %v1541_v10 = vld [vmem:[%s2106_s2 + $0x3e0] ss:$8 sps:$4 sm:$0xff]  }
  0x15   :  { %551 = vmatprep.subr.bf16.mxu1 %v1519_v57  ;;  %v1546_v9 = vld [vmem:[%s2106_s2 + $0x444] ss:$8 sps:$4 sm:$0xff]   ;;  %v1544_v11 = vld [vmem:[%s2106_s2 + $0x440] ss:$8 sps:$4 sm:$0xff]   ;;  %v1549_v12 = vld [vmem:[%s2106_s2 + $0x3f4] ss:$8 sps:$4 sm:$0xff]  }
  0x16   :  { %v1547_v13 = vld [vmem:[%s2106_s2 + $0x3f0] ss:$8 sps:$4 sm:$0xff]   ;;  %v1037_v50 = vld [vmem:[%s2108_s6] sm:$0x1]  ;;  %v1579_v52 = vld [vmem:[%s2107_s4 + $0x464] ss:$8 sps:$4 sm:$0xff]  }
  0x17   :  { %253 = vmatpush1.bf16.msra.mxu0 %v1475_v14  ;;  %v1550_v14 = vld [vmem:[%s2106_s2 + $0x450] ss:$8 sps:$4 sm:$0xff]   ;;  %v1583_v57 = vld [vmem:[%s2107_s4 + $0x480] ss:$8 sps:$4 sm:$0xff]  }
  0x18   :  { %254 = vmatprep.subr.bf16.mxu0 %v1480_v15  ;;  %552 = vmatpush1.bf16.msra.mxu1 %v1517_v60  ;;  %v1552_v15 = vld [vmem:[%s2106_s2 + $0x454] ss:$8 sps:$4 sm:$0xff]   ;;  %v1574_v51 = vld [vmem:[%s2107_s4 + $0x450] ss:$8 sps:$4 sm:$0xff]   ;;  %v1591_v60 = vld [vmem:[%s2107_s4 + $0x4a4] ss:$8 sps:$4 sm:$0xff]  }
  0x19   :  { %553 = vmatprep.subr.bf16.mxu1 %v1525_v61  ;;  %v1580_v55 = vld [vmem:[%s2107_s4 + $0x470] ss:$8 sps:$4 sm:$0xff]   ;;  %v1589_v61 = vld [vmem:[%s2107_s4 + $0x4a0] ss:$8 sps:$4 sm:$0xff]  }
  0x1b   :  { %255 = vmatpush1.bf16.msra.mxu0 %v1478_v16  ;;  %v1555_v16 = vld [vmem:[%s2106_s2 + $0x464] ss:$8 sps:$4 sm:$0xff]  }
  0x1c   :  { %256 = vmatprep.subr.bf16.mxu0 %v1483_v17  ;;  %554 = vmatpush1.bf16.msra.mxu1 %v1523_v1  ;;  %v1553_v17 = vld [vmem:[%s2106_s2 + $0x460] ss:$8 sps:$4 sm:$0xff]   ;;  %v1597_v1 = vld [vmem:[%s2107_s4 + $0x4c4] ss:$8 sps:$4 sm:$0xff]  }
  0x1d   :  { %555 = vmatprep.subr.bf16.mxu1 %v1531_v2  ;;  %v1595_v2 = vld [vmem:[%s2107_s4 + $0x4c0] ss:$8 sps:$4 sm:$0xff]  }
  0x1f   :  { %257 = vmatpush1.bf16.msra.mxu0 %v1481_v18  ;;  %v1558_v18 = vld [vmem:[%s2106_s2 + $0x474] ss:$8 sps:$4 sm:$0xff]  }
  0x20   :  { %258 = vmatprep.subr.bf16.mxu0 %v1486_v19  ;;  %556 = vmatpush1.bf16.msra.mxu1 %v1529_v5  ;;  %v1556_v19 = vld [vmem:[%s2106_s2 + $0x470] ss:$8 sps:$4 sm:$0xff]   ;;  %v1600_v5 = vld [vmem:[%s2107_s4 + $0x4d4] ss:$8 sps:$4 sm:$0xff]  }
  0x21   :  { %557 = vmatprep.subr.bf16.mxu1 %v1537_v6  ;;  %v1603_v6 = vld [vmem:[%s2107_s4 + $0x4e4] ss:$8 sps:$4 sm:$0xff]  }
  0x23   :  { %259 = vmatpush1.bf16.msra.mxu0 %v1484_v20  ;;  %v1561_v20 = vld [vmem:[%s2107_s4 + $0x404] ss:$8 sps:$4 sm:$0xff]  }
  0x24   :  { %365 = vmatprep.subr.bf16.mxu0 %v1489_v21  ;;  %558 = vmatpush1.bf16.msra.mxu1 %v1535_v7  ;;  %v1601_v7 = vld [vmem:[%s2107_s4 + $0x4e0] ss:$8 sps:$4 sm:$0xff]  }
  0x25   :  { %559 = vmatprep.subr.bf16.mxu1 %v1543_v8  ;;  %v1606_v8 = vld [vmem:[%s2107_s4 + $0x4f4] ss:$8 sps:$4 sm:$0xff]  }
  0x28   :  { %560 = vmatpush1.bf16.msra.mxu1 %v1541_v10  ;;  %v1609_v10 = vld [vmem:[%s2109_s7 + $0x4] ss:$8 sps:$4 sm:$0xff]  }
  0x29   :  { %561 = vmatprep.subr.bf16.mxu1 %v1549_v12 }
  0x2c   :  { %562 = vmatpush1.bf16.msra.mxu1 %v1547_v13 }
  0x2d   :  { %996 = vmatprep.subr.bf16.mxu1 %v1561_v20  ;;  %v774_v20 = vld [vmem:[%s2110_s3] sm:$0x3] }
  0xd9   :  { %v141_v23 = vpop.f32.mrb[0].mxu1  ;;  %v80_v25 = vpop.f32.mrb[0].mxu0 }
  0xda   :  { %v147_v26 = vpack.c.bf16 %v141_v23, %v141_v23  ;;  %v1431_v27 = vpop.f32.mrb[1].mxu1  ;;  %v1425_v29 = vpop.f32.mrb[1].mxu0  ;;  %v86_v47 = vpack.c.bf16 %v80_v25, %v80_v25 }
  0xdb   :  { %v144_v30 = vpop.f32.mrb[2].mxu1  ;;  %v83_v31 = vpop.f32.mrb[2].mxu0 }
  0xdc   :  { %v1432_v32 = vpop.f32.mrb[3].mxu1  ;;  %277 = vmatmul.mubr.bf16.vlgmr.msra.gmra.mrb[4].mxu0 %v147_v26  ;;  %v1426_v33 = vpop.f32.mrb[3].mxu0 }
  0xdd   :  { %366 = vmatpush1.bf16.msra.mxu0 %v1487_v24  ;;  %397 = vmatprep.mubr.bf16.mxu0 %v1633_v22  ;;  %v1559_v33 = vld [vmem:[%s2107_s4 + $0x400] ss:$8 sps:$4 sm:$0xff]  }
  0xde   :  { %367 = vmatprep.subr.bf16.mxu0 %v1492_v28 }
  0xe1   :  { %368 = vmatpush1.bf16.msra.mxu0 %v1490_v34 }
  0xe2   :  { %369 = vmatprep.subr.bf16.mxu0 %v1495_v35 }
  0xe5   :  { %370 = vmatpush1.bf16.msra.mxu0 %v1493_v36  ;;  %v1564_v36 = vld [vmem:[%s2107_s4 + $0x414] ss:$8 sps:$4 sm:$0xff]  }
  0xe6   :  { %371 = vmatprep.subr.bf16.mxu0 %v1498_v37 }
  0xe9   :  { %372 = vmatpush1.bf16.msra.mxu0 %v1496_v38 }
  0xea   :  { %373 = vmatprep.subr.bf16.mxu0 %v1501_v39  ;;  %v1562_v39 = vld [vmem:[%s2107_s4 + $0x410] ss:$8 sps:$4 sm:$0xff]  }
  0xed   :  { %374 = vmatpush1.bf16.msra.mxu0 %v1499_v40  ;;  %v1567_v40 = vld [vmem:[%s2107_s4 + $0x424] ss:$8 sps:$4 sm:$0xff]  }
  0xee   :  { %375 = vmatprep.subr.bf16.mxu0 %v1504_v41 }
  0xf1   :  { %376 = vmatpush1.bf16.msra.mxu0 %v1502_v42 }
  0xf2   :  { %377 = vmatprep.subr.bf16.mxu0 %v1507_v43 }
  0xf5   :  { %378 = vmatpush1.bf16.msra.mxu0 %v1505_v44  ;;  %v1565_v44 = vld [vmem:[%s2107_s4 + $0x420] ss:$8 sps:$4 sm:$0xff]  }
  0xf6   :  { %379 = vmatprep.subr.bf16.mxu0 %v1510_v45 }
  0xf9   :  { %380 = vmatpush1.bf16.msra.mxu0 %v1508_v46  ;;  %v1570_v46 = vld [vmem:[%s2107_s4 + $0x434] ss:$8 sps:$4 sm:$0xff]  }
  0xfa   :  { %1433 = vmatprep.subr.bf16.mxu0 %v1631_v0 }
  0xfc   :  { %398 = vmatmul.mubr.bf16.vlgmr.msra.gmra.mrb[8].mxu0 %v86_v47 }
  0xfd   :  { %1434 = vmatpush3.bf16.msra.mxu0 %v1697_v4  ;;  %1435 = vmatprep.mubr.msk.bf16.mxu0 %vm1632_vm1, %v1631_v0 }
  0xfe   :  { %1439 = vmatprep.subr.bf16.mxu0 %v1631_v0 }
 0x104   :  { %1436 = vmatmul.mubr.msk.bf16.vlgmr.msra.gmra.mrb[12].mxu0 %vm38_vm2, %v406_v48  ;;  %v1568_v48 = vld [vmem:[%s2107_s4 + $0x430] ss:$8 sps:$4 sm:$0xff]  }
 0x105   :  { %1440 = vmatpush3.bf16.msra.mxu0 %v1697_v4  ;;  %1441 = vmatprep.mubr.msk.bf16.mxu0 %vm1632_vm1, %v1631_v0 }
 0x106   :  { %731 = vmatprep.subr.bf16.mxu0 %v1522_v54  ;;  %v1582_v54 = vld [vmem:[%s2107_s4 + $0x474] ss:$8 sps:$4 sm:$0xff]  }
 0x10c   :  { %1442 = vmatmul.mubr.msk.bf16.vlgmr.msra.gmra.mrb[16].mxu0 %vm38_vm2, %v590_v49  ;;  %v1573_v49 = vld [vmem:[%s2107_s4 + $0x444] ss:$8 sps:$4 sm:$0xff]  }
 0x10d   :  { %763 = vmatprep.mubr.bf16.mxu0 %v1633_v22  ;;  %732 = vmatpush1.bf16.msra.mxu0 %v1520_v53  ;;  %v1577_v53 = vld [vmem:[%s2107_s4 + $0x460] ss:$8 sps:$4 sm:$0xff]  }
 0x10e   :  { %733 = vmatprep.subr.bf16.mxu0 %v1528_v56  ;;  %v1585_v56 = vld [vmem:[%s2107_s4 + $0x484] ss:$8 sps:$4 sm:$0xff]  }
 0x111   :  { %734 = vmatpush1.bf16.msra.mxu0 %v1526_v58  ;;  %v1588_v58 = vld [vmem:[%s2107_s4 + $0x494] ss:$8 sps:$4 sm:$0xff]  }
 0x112   :  { %735 = vmatprep.subr.bf16.mxu0 %v1534_v59  ;;  %v1586_v59 = vld [vmem:[%s2107_s4 + $0x490] ss:$8 sps:$4 sm:$0xff]  }
 0x115   :  { %736 = vmatpush1.bf16.msra.mxu0 %v1532_v62  ;;  %v1594_v62 = vld [vmem:[%s2107_s4 + $0x4b4] ss:$8 sps:$4 sm:$0xff]  }
 0x116   :  { %737 = vmatprep.subr.bf16.mxu0 %v1540_v63  ;;  %v1592_v63 = vld [vmem:[%s2107_s4 + $0x4b0] ss:$8 sps:$4 sm:$0xff]  }
 0x119   :  { %738 = vmatpush1.bf16.msra.mxu0 %v1538_v3  ;;  %v1598_v3 = vld [vmem:[%s2107_s4 + $0x4d0] ss:$8 sps:$4 sm:$0xff]  }
 0x11a   :  { %739 = vmatprep.subr.bf16.mxu0 %v1546_v9  ;;  %v1604_v9 = vld [vmem:[%s2107_s4 + $0x4f0] ss:$8 sps:$4 sm:$0xff]  }
 0x11d   :  { %740 = vmatpush1.bf16.msra.mxu0 %v1544_v11  ;;  %v776_v11 = vlaneseq }
 0x11e   :  { %741 = vmatprep.subr.bf16.mxu0 %v1552_v15 }
 0x11f   :  { %v2029_v12 = vshrl.u32 %v776_v11, 7 }
 0x121   :  { %742 = vmatpush1.bf16.msra.mxu0 %v1550_v14 }
 0x122   :  { %743 = vmatprep.subr.bf16.mxu0 %v1555_v16 }
 0x125   :  { %744 = vmatpush1.bf16.msra.mxu0 %v1553_v17 }
 0x126   :  { %745 = vmatprep.subr.bf16.mxu0 %v1558_v18 }
 0x129   :  { %746 = vmatpush1.bf16.msra.mxu0 %v1556_v19  ;;  %v2034_v19 = vsub.s32 0, %v2029_v12 }
 0x12a   :  { %1445 = vmatprep.subr.bf16.mxu0 %v1631_v0 }
 0x1af   :  { %v278_v21 = vpop.f32.mrb[4].mxu0 }
 0x1b0   :  { %v280_v23 = vpop.f32.mrb[5].mxu0 }
 0x1b1   :  { %v282_v24 = vpop.f32.mrb[6].mxu0 }
 0x1b2   :  { %v283_v25 = vpop.f32.mrb[7].mxu0 }
 0x1cf   :  { %v399_v26 = vpop.f32.mrb[8].mxu0 }
 0x1d0   :  { %v1922_v27 = vadd.f32 %v399_v26, %v278_v21  ;;  %v401_v28 = vpop.f32.mrb[9].mxu0  ;;  %v2040_v21 = vsub.s32 1, %v2029_v12 }
 0x1d1   :  { %v1924_v29 = vadd.f32 %v401_v28, %v280_v23  ;;  %v403_v30 = vpop.f32.mrb[10].mxu0  ;;  %v779_v23 = vrot.slane %v774_v20, %v2034_v19 }
 0x1d2   :  { %v404_v31 = vpop.f32.mrb[11].mxu0  ;;  %v783_v25 = vrot.slane %v774_v20, %v2040_v21 }
 0x1d7   :  { %v444_v32 = vpop.f32.mrb[12].mxu0 }
 0x1d8   :  { %v450_v34 = vpack.c.bf16 %v444_v32, %v444_v32  ;;  %v1437_v35 = vpop.f32.mrb[13].mxu0 }
 0x1d9   :  { %v447_v37 = vpop.f32.mrb[14].mxu0 }
 0x1da   :  { %v1438_v38 = vpop.f32.mrb[15].mxu0  ;;  %580 = vmatmul.mubr.bf16.vlgmr.msra.gmra.mrb[4].mxu1 %v450_v34 }
 0x1db   :  { %997 = vmatpush1.bf16.msra.mxu1 %v1559_v33 }
 0x1dc   :  { %998 = vmatprep.subr.bf16.mxu1 %v1564_v36  ;;  %v1607_v36 = vld [vmem:[%s2109_s7] ss:$8 sps:$4 sm:$0xff]  }
 0x1df   :  { %v628_v41 = vpop.f32.mrb[16].mxu0  ;;  %999 = vmatpush1.bf16.msra.mxu1 %v1562_v39  ;;  %v1612_v39 = vld [vmem:[%s2109_s7 + $0x14] ss:$8 sps:$4 sm:$0xff]  }
 0x1e0   :  { %v634_v42 = vpack.c.bf16 %v628_v41, %v628_v41  ;;  %v1443_v43 = vpop.f32.mrb[17].mxu0  ;;  %1000 = vmatprep.subr.bf16.mxu1 %v1567_v40 }
 0x1e1   :  { %v631_v45 = vpop.f32.mrb[18].mxu0  ;;  %v1610_v43 = vld [vmem:[%s2109_s7 + $0x10] ss:$8 sps:$4 sm:$0xff]  }
 0x1e2   :  { %v1444_v47 = vpop.f32.mrb[19].mxu0  ;;  %764 = vmatmul.mubr.bf16.vlgmr.msra.gmra.mrb[20].mxu0 %v634_v42  ;;  %v1613_v45 = vld [vmem:[%s2109_s7 + $0x20] ss:$8 sps:$4 sm:$0xff]  }
 0x1e3   :  { %1446 = vmatpush3.bf16.msra.mxu0 %v1697_v4  ;;  %1447 = vmatprep.mubr.msk.bf16.mxu0 %vm1632_vm1, %v1631_v0  ;;  %v1571_v4 = vld [vmem:[%s2107_s4 + $0x440] ss:$8 sps:$4 sm:$0xff]   ;;  %v1576_v0 = vld [vmem:[%s2107_s4 + $0x454] ss:$8 sps:$4 sm:$0xff]   ;;  %v1621_v47 = vld [vmem:[%s2109_s7 + $0x44] ss:$8 sps:$4 sm:$0xff]  }
 0x1e4   :  { %1001 = vmatpush1.bf16.msra.mxu1 %v1565_v44  ;;  %v1615_v44 = vld [vmem:[%s2109_s7 + $0x24] ss:$8 sps:$4 sm:$0xff]  }
 0x1e5   :  { %1002 = vmatprep.subr.bf16.mxu1 %v1570_v46  ;;  %v1618_v46 = vld [vmem:[%s2109_s7 + $0x34] ss:$8 sps:$4 sm:$0xff]  }
 0x1e8   :  { %1003 = vmatpush1.bf16.msra.mxu1 %v1568_v48  ;;  %v1619_v48 = vld [vmem:[%s2109_s7 + $0x40] ss:$8 sps:$4 sm:$0xff]  }
 0x1e9   :  { %1004 = vmatprep.subr.bf16.mxu1 %v1573_v49  ;;  %v1624_v49 = vld [vmem:[%s2109_s7 + $0x54] ss:$8 sps:$4 sm:$0xff]  }
 0x1ea   :  { %1448 = vmatmul.mubr.msk.bf16.vlgmr.msra.gmra.mrb[24].mxu0 %vm38_vm2, %v1037_v50  ;;  %v1622_v50 = vld [vmem:[%s2109_s7 + $0x50] ss:$8 sps:$4 sm:$0xff]  }
 0x1ec   :  { %1005 = vmatpush1.bf16.msra.mxu1 %v1571_v4  ;;  %v1627_v4 = vld [vmem:[%s2109_s7 + $0x64] ss:$8 sps:$4 sm:$0xff]  }
 0x1ed   :  { %1006 = vmatprep.subr.bf16.mxu1 %v1576_v0  ;;  %v1625_v0 = vld [vmem:[%s2109_s7 + $0x60] ss:$8 sps:$4 sm:$0xff]  }
 0x1f0   :  { %1007 = vmatpush1.bf16.msra.mxu1 %v1574_v51  ;;  %v1630_v51 = vld [vmem:[%s2109_s7 + $0x74] ss:$8 sps:$4 sm:$0xff]  }
 0x1f1   :  { %1008 = vmatprep.subr.bf16.mxu1 %v1579_v52  ;;  %v1628_v52 = vld [vmem:[%s2109_s7 + $0x70] ss:$8 sps:$4 sm:$0xff]  }
 0x1f4   :  { %1009 = vmatpush1.bf16.msra.mxu1 %v1577_v53 }
 0x1f5   :  { %1010 = vmatprep.subr.bf16.mxu1 %v1582_v54  ;;  %v824_v54 = vld [vmem:[%s2111_s5] sm:$0x3] }
 0x1f8   :  { %1011 = vmatpush1.bf16.msra.mxu1 %v1580_v55  ;;  %v1098_v55 = vld [vmem:[%s2112_s8] sm:$0x3] }
 0x1f9   :  { %1012 = vmatprep.subr.bf16.mxu1 %v1585_v56  ;;  %v829_v56 = vrot.slane %v824_v54, %v2034_v19 }
 0x1fc   :  { %1013 = vmatpush1.bf16.msra.mxu1 %v1583_v57  ;;  %v1103_v57 = vrot.slane %v1098_v55, %v2034_v19 }
 0x1fd   :  { %1014 = vmatprep.subr.bf16.mxu1 %v1588_v58  ;;  %v833_v58 = vrot.slane %v824_v54, %v2040_v21 }
 0x200   :  { %1015 = vmatpush1.bf16.msra.mxu1 %v1586_v59  ;;  %v1107_v59 = vrot.slane %v1098_v55, %v2040_v21 }
 0x201   :  { %1016 = vmatprep.subr.bf16.mxu1 %v1591_v60  ;;  %v1634_v60 = vmov 1966171168  }
 0x204   :  { %1017 = vmatpush1.bf16.msra.mxu1 %v1589_v61  ;;  %v1241_v61 = vunpack.c.l.s4 %v1634_v60 }
 0x205   :  { %1018 = vmatprep.subr.bf16.mxu1 %v1594_v62  ;;  %v1451_v62 = vadd.f32 %v1103_v57, %v829_v56 }
 0x208   :  { %1019 = vmatpush1.bf16.msra.mxu1 %v1592_v63  ;;  %v1453_v63 = vadd.f32 %v1107_v59, %v833_v58 }
 0x209   :  { %1020 = vmatprep.subr.bf16.mxu1 %v1597_v1 }
 0x20c   :  { %1021 = vmatpush1.bf16.msra.mxu1 %v1595_v2  ;;  %v1242_v2 = vunpack.c.0.s8 %v1241_v61 }
 0x20d   :  { %1022 = vmatprep.subr.bf16.mxu1 %v1600_v5 }
 0x20e   :  { %v1245_v11 = vsub.s32 %v1242_v2, %v2029_v12 }
 0x210   :  { %1023 = vmatpush1.bf16.msra.mxu1 %v1598_v3 }
 0x211   :  { %1024 = vmatprep.subr.bf16.mxu1 %v1603_v6 }
 0x214   :  { %1025 = vmatpush1.bf16.msra.mxu1 %v1601_v7 }
 0x215   :  { %1026 = vmatprep.subr.bf16.mxu1 %v1606_v8 }
 0x218   :  { %1027 = vmatpush1.bf16.msra.mxu1 %v1604_v9 }
 0x219   :  { %1190 = vmatprep.subr.bf16.mxu1 %v1609_v10 }
 0x2ad   :  { %v581_v13 = vpop.f32.mrb[4].mxu1 }
 0x2ae   :  { %v588_v14 = vadd.f32 %v581_v13, %v1922_v27  ;;  %v583_v15 = vpop.f32.mrb[5].mxu1 }
 0x2af   :  { %v589_v16 = vadd.f32 %v583_v15, %v1924_v29  ;;  %v585_v17 = vpop.f32.mrb[6].mxu1 }
 0x2b0   :  { %v586_v18 = vpop.f32.mrb[7].mxu1 }
 0x2b5   :  { %v765_v24 = vpop.f32.mrb[20].mxu0 }
 0x2b6   :  { %v772_v26 = vadd.f32 %v765_v24, %v588_v14  ;;  %v767_v27 = vpop.f32.mrb[21].mxu0 }
 0x2b7   :  { %v773_v28 = vadd.f32 %v767_v27, %v589_v16  ;;  %v769_v29 = vpop.f32.mrb[22].mxu0 }
 0x2b8   :  { %v786_v30 = vadd.f32 %v779_v23, %v772_v26  ;;  %v770_v31 = vpop.f32.mrb[23].mxu0 }
 0x2b9   :  { %v787_v32 = vadd.f32 %v783_v25, %v773_v28 }
 0x2ba   :  { %v788_v33 = vmax.f32 %v786_v30, 0.0 }
 0x2bb   :  { %v789_v34 = vmax.f32 %v787_v32, 0.0 }
 0x2bc   :  { %v790_v38 = vpack.c.bf16 %v788_v33, %v788_v33 }
 0x2bd   :  { %v791_v35 = vpack.c.bf16 %v789_v34, %v789_v34  ;;  %v1075_v37 = vpop.f32.mrb[24].mxu0 }
 0x2be   :  { %v1449_v40 = vpop.f32.mrb[25].mxu0  ;;  %v1081_v53 = vpack.c.bf16 %v1075_v37, %v1075_v37 }
 0x2bf   :  { %1028 = vmatprep.mubr.bf16.mxu1 %v791_v35  ;;  %v1078_v41 = vpop.f32.mrb[26].mxu0 }
 0x2c0   :  { %1029 = vmatmul.mubr.bf16.vlgmr.msra.gmra.mrb[8].mxu1 %v790_v38  ;;  %v1450_v42 = vpop.f32.mrb[27].mxu0 }
 0x2c1   :  { %1191 = vmatpush1.bf16.msra.mxu1 %v1607_v36  ;;  %1222 = vmatprep.mubr.bf16.mxu1 %v1633_v22  ;;  %v1616_v22 = vld [vmem:[%s2109_s7 + $0x30] ss:$8 sps:$4 sm:$0xff]  }
 0x2c2   :  { %1192 = vmatprep.subr.bf16.mxu1 %v1612_v39 }
 0x2c5   :  { %1193 = vmatpush1.bf16.msra.mxu1 %v1610_v43 }
 0x2c6   :  { %1194 = vmatprep.subr.bf16.mxu1 %v1615_v44 }
 0x2c9   :  { %1195 = vmatpush1.bf16.msra.mxu1 %v1613_v45 }
 0x2ca   :  { %1196 = vmatprep.subr.bf16.mxu1 %v1618_v46 }
 0x2cd   :  { %1197 = vmatpush1.bf16.msra.mxu1 %v1616_v22 }
 0x2ce   :  { %1198 = vmatprep.subr.bf16.mxu1 %v1621_v47 }
 0x2d1   :  { %1199 = vmatpush1.bf16.msra.mxu1 %v1619_v48 }
 0x2d2   :  { %1200 = vmatprep.subr.bf16.mxu1 %v1624_v49 }
 0x2d5   :  { %1201 = vmatpush1.bf16.msra.mxu1 %v1622_v50 }
 0x2d6   :  { %1202 = vmatprep.subr.bf16.mxu1 %v1627_v4 }
 0x2d9   :  { %1203 = vmatpush1.bf16.msra.mxu1 %v1625_v0 }
 0x2da   :  { %1204 = vmatprep.subr.bf16.mxu1 %v1630_v51 }
 0x2dd   :  { %1205 = vmatpush1.bf16.msra.mxu1 %v1628_v52 }
 0x2e0   :  { %1223 = vmatmul.mubr.bf16.vlgmr.msra.gmra.mrb[8].mxu1 %v1081_v53 }
 0x3b3   :  { %v1224_v1 = vpop.f32.mrb[8].mxu1 }
 0x3b4   :  { %v1452_v3 = vadd.f32 %v1451_v62, %v1224_v1  ;;  %v1226_v5 = vpop.f32.mrb[9].mxu1 }
 0x3b5   :  { %v1454_v6 = vadd.f32 %v1453_v63, %v1226_v5  ;;  %v1228_v7 = vpop.f32.mrb[10].mxu1 }
 0x3b6   :  { %v1233_v8 = vmax.f32 %v1452_v3, 0.0  ;;  %v1229_v9 = vpop.f32.mrb[11].mxu1 }
 0x3b7   :  { %v1234_v10 = vmax.f32 %v1454_v6, 0.0 }
 0x3b9   :  { %v1409_v13 = vpack.c.bf16 %v1234_v10, %v1233_v8 }
 0x3bb   :  { %v1246_v14 = vrot.slane %v1409_v13, %v1245_v11 }
 0x3bd   :  { %1410 = vst.sshfl [vmem:[%s2113_s9] sm:$0x5 pattern:$0x73625140] %v1246_v14 }

// kernel: _lambda_.13
= control target key start
LH: loop header
LB: loop body
LE: loop exit
PB: predicated region body
PF: predicated region fallthrough
CT: control target
= control target key end

     0   :  { %s1196_s18 = smov 0   ;;  %s1326_s0 = inlined_call_operand.vmem [shape: bf16[2,256], index: 0, kind: input, shape index: {}]   ;;  %s1327_s1 = inlined_call_operand.vmem [shape: bf16[5,2304,256], index: 1, kind: input, shape index: {}]   ;;  %s1328_s2 = inlined_call_operand.vmem [shape: f32[5,1,256], index: 2, kind: input, shape index: {}, may-alias: {2,4}]   ;;  %s1329_s3 = inlined_call_operand.vmem [shape: bf16[5,2304,256], index: 3, kind: input, shape index: {}]   ;;  %s1330_s4 = inlined_call_operand.vmem [shape: f32[5,1,256], index: 4, kind: input, shape index: {}, may-alias: {2,4}]   ;;  %s1331_s5 = inlined_call_operand.vmem [shape: bf16[2,256], index: 5, kind: output, shape index: {}]  }
   0x1 LB: > { %s909_s19 = sadd.s32 4294967295, %s1162_s18   ;;  %p912_p0 = scmp.ge.s32.totalorder %s1162_s18, 1  ;;  %s1162_s18 = sphi %s1196_s18, %s15_s18  }
   0x2   : > { %p212_p1 = scmp.lt.s32.totalorder %s1162_s18, 6 }
   0x4   : > { %p213_p2 = pnand %p912_p0, %p212_p1 }
   0x5   : > { %p250_p3 = scmp.lt.s32.totalorder (!%p213_p2), %s909_s19, 4  ;;  %p917_p4 = scmp.ne.s32.totalorder (!%p213_p2), %s909_s19, 0 }
   0x6   : > { %216 = sbr.rel (%p213_p2) target bundleno = 530 (0x212), region = 40 }
   0xd   : > { %s251_s20 = scalar_select %p250_p3, %s909_s19, 4 }
   0xe   : > { %273 = sbr.rel (%p917_p4) target bundleno = 21 (0x15), region = 44  ;;  %v274_v0 = vld [vmem:[%s1326_s0] sm:$0x3] (!%p917_p4) }
   0xf   : > { %s913_s21 = smul.u32 2304, %s251_s20  ;;  %s914_s22 = sshll.u32 %s251_s20, 1  ;;  %275 = vst [vmem:[%s1331_s5] sm:$0x3] (!%p917_p4), %v274_v0 }
  0x10   : > { %s1207_s25 = scalar_lea.vmem %s1328_s2, %s914_s22  ;;  %s1212_s28 = scalar_lea.vmem %s1330_s4, %s914_s22 }
  0x11   : > { %s1217_s6 = scalar_lea.vmem %s1327_s1, %s913_s21  ;;  %s1222_s9 = scalar_lea.vmem %s1329_s3, %s913_s21 }
  0x15 PF: > { %v1060_v1 = vld [vmem:[%s1217_s6 + $0x404] ss:$8 sps:$4 sm:$0xff]   ;;  %v1062_v2 = vld [vmem:[%s1217_s6 + $0x400] ss:$8 sps:$4 sm:$0xff]   ;;  %v1063_v3 = vld [vmem:[%s1217_s6 + $0x414] ss:$8 sps:$4 sm:$0xff]   ;;  %v311_v8 = vlaneseq }
  0x16   : > { %506 = vmatprep.subr.bf16.mxu0 %v1060_v1  ;;  %v1065_v4 = vld [vmem:[%s1217_s6 + $0x410] ss:$8 sps:$4 sm:$0xff]   ;;  %v1066_v5 = vld [vmem:[%s1217_s6 + $0x424] ss:$8 sps:$4 sm:$0xff]   ;;  %v1068_v6 = vld [vmem:[%s1217_s6 + $0x420] ss:$8 sps:$4 sm:$0xff]  }
  0x17   : > { %507 = vmatpush1.bf16.msra.mxu0 %v1062_v2  ;;  %v1069_v7 = vld [vmem:[%s1217_s6 + $0x434] ss:$8 sps:$4 sm:$0xff]   ;;  %v1164_v9 = vmov 1966171168   ;;  %v1071_v11 = vld [vmem:[%s1217_s6 + $0x430] ss:$8 sps:$4 sm:$0xff]  }
  0x18   : > { %508 = vmatprep.subr.bf16.mxu0 %v1063_v3  ;;  %v323_v10 = vunpack.c.l.s4 %v1164_v9  ;;  %v1072_v12 = vld [vmem:[%s1217_s6 + $0x444] ss:$8 sps:$4 sm:$0xff]   ;;  %v1239_v13 = vshrl.u32 %v311_v8, 7  ;;  %v1074_v15 = vld [vmem:[%s1217_s6 + $0x440] ss:$8 sps:$4 sm:$0xff]  }
  0x19   : > { %v1075_v16 = vld [vmem:[%s1217_s6 + $0x454] ss:$8 sps:$4 sm:$0xff]   ;;  %v1077_v18 = vld [vmem:[%s1217_s6 + $0x450] ss:$8 sps:$4 sm:$0xff]   ;;  %v1078_v19 = vld [vmem:[%s1217_s6 + $0x464] ss:$8 sps:$4 sm:$0xff]  }
  0x1a   : > { %v324_v14 = vunpack.c.0.s8 %v323_v10  ;;  %v1080_v20 = vld [vmem:[%s1217_s6 + $0x460] ss:$8 sps:$4 sm:$0xff]   ;;  %v1108_v23 = vld [vmem:[%s1222_s9 + $0x404] ss:$8 sps:$4 sm:$0xff]   ;;  %v1111_v25 = vld [vmem:[%s1222_s9 + $0x414] ss:$8 sps:$4 sm:$0xff]  }
  0x1b   : > { %509 = vmatpush1.bf16.msra.mxu0 %v1065_v4  ;;  %v1252_v21 = vld [vmem:[%s1331_s5] sm:$0x3]  ;;  %v1081_v26 = vld [vmem:[%s1217_s6 + $0x474] ss:$8 sps:$4 sm:$0xff]   ;;  %755 = vmatprep.subr.bf16.mxu1 %v1108_v23  ;;  %v1113_v28 = vld [vmem:[%s1222_s9 + $0x410] ss:$8 sps:$4 sm:$0xff]  }
  0x1c   : > { %510 = vmatprep.subr.bf16.mxu0 %v1066_v5  ;;  %v1244_v17 = vsub.s32 %v324_v14, %v1239_v13  ;;  %v1110_v24 = vld [vmem:[%s1222_s9 + $0x400] ss:$8 sps:$4 sm:$0xff]   ;;  %v1114_v30 = vld [vmem:[%s1222_s9 + $0x424] ss:$8 sps:$4 sm:$0xff]   ;;  %v1083_v31 = vld [vmem:[%s1217_s6 + $0x470] ss:$8 sps:$4 sm:$0xff]  }
  0x1d   : > { %756 = vmatpush1.bf16.msra.mxu1 %v1110_v24  ;;  %v1084_v32 = vld [vmem:[%s1217_s6 + $0x484] ss:$8 sps:$4 sm:$0xff]   ;;  %v1116_v33 = vld [vmem:[%s1222_s9 + $0x420] ss:$8 sps:$4 sm:$0xff]   ;;  %v1117_v34 = vld [vmem:[%s1222_s9 + $0x434] ss:$8 sps:$4 sm:$0xff]  }
  0x1e   : > { %v1256_v22 = vrot.slane %v1252_v21, %v1244_v17  ;;  %757 = vmatprep.subr.bf16.mxu1 %v1111_v25  ;;  %v1086_v35 = vld [vmem:[%s1217_s6 + $0x480] ss:$8 sps:$4 sm:$0xff]   ;;  %v1087_v36 = vld [vmem:[%s1217_s6 + $0x494] ss:$8 sps:$4 sm:$0xff]   ;;  %v1119_v37 = vld [vmem:[%s1222_s9 + $0x430] ss:$8 sps:$4 sm:$0xff]  }
  0x1f   : > { %511 = vmatpush1.bf16.msra.mxu0 %v1068_v6  ;;  %v1120_v38 = vld [vmem:[%s1222_s9 + $0x444] ss:$8 sps:$4 sm:$0xff]   ;;  %v1089_v39 = vld [vmem:[%s1217_s6 + $0x490] ss:$8 sps:$4 sm:$0xff]   ;;  %v1122_v41 = vld [vmem:[%s1222_s9 + $0x440] ss:$8 sps:$4 sm:$0xff]  }
  0x20   : > { %512 = vmatprep.subr.bf16.mxu0 %v1069_v7  ;;  %v329_v27 = vcombine.high %v1256_v22, %v1256_v22  ;;  %v1090_v40 = vld [vmem:[%s1217_s6 + $0x4a4] ss:$8 sps:$4 sm:$0xff]   ;;  %v1123_v42 = vld [vmem:[%s1222_s9 + $0x454] ss:$8 sps:$4 sm:$0xff]   ;;  %v1092_v43 = vld [vmem:[%s1217_s6 + $0x4a0] ss:$8 sps:$4 sm:$0xff]   ;;  %v336_v1 = vrot.slane %v1256_v22, %v1244_v17 }
  0x21   : > { %758 = vmatpush1.bf16.msra.mxu1 %v1113_v28  ;;  %v1093_v44 = vld [vmem:[%s1217_s6 + $0x4b4] ss:$8 sps:$4 sm:$0xff]   ;;  %v1125_v45 = vld [vmem:[%s1222_s9 + $0x450] ss:$8 sps:$4 sm:$0xff]   ;;  %v1126_v46 = vld [vmem:[%s1222_s9 + $0x464] ss:$8 sps:$4 sm:$0xff]  }
  0x22   : > { %v343_v29 = vrot.slane %v329_v27, %v1244_v17  ;;  %759 = vmatprep.subr.bf16.mxu1 %v1114_v30  ;;  %v1095_v47 = vld [vmem:[%s1217_s6 + $0x4b0] ss:$8 sps:$4 sm:$0xff]   ;;  %v1096_v48 = vld [vmem:[%s1217_s6 + $0x4c4] ss:$8 sps:$4 sm:$0xff]   ;;  %v1128_v49 = vld [vmem:[%s1222_s9 + $0x460] ss:$8 sps:$4 sm:$0xff]  }
  0x23   : > { %513 = vmatpush1.bf16.msra.mxu0 %v1071_v11  ;;  %v1129_v50 = vld [vmem:[%s1222_s9 + $0x474] ss:$8 sps:$4 sm:$0xff]   ;;  %v1098_v51 = vld [vmem:[%s1217_s6 + $0x4c0] ss:$8 sps:$4 sm:$0xff]   ;;  %v1131_v53 = vld [vmem:[%s1222_s9 + $0x470] ss:$8 sps:$4 sm:$0xff]  }
  0x24   : > { %514 = vmatprep.subr.bf16.mxu0 %v1072_v12  ;;  %538 = vmatprep.mubr.bf16.mxu0 %v343_v29  ;;  %v1099_v52 = vld [vmem:[%s1217_s6 + $0x4d4] ss:$8 sps:$4 sm:$0xff]   ;;  %v1132_v54 = vld [vmem:[%s1222_s9 + $0x484] ss:$8 sps:$4 sm:$0xff]   ;;  %v1101_v55 = vld [vmem:[%s1217_s6 + $0x4d0] ss:$8 sps:$4 sm:$0xff]  }
  0x25   : > { %760 = vmatpush1.bf16.msra.mxu1 %v1116_v33  ;;  %v1102_v56 = vld [vmem:[%s1217_s6 + $0x4e4] ss:$8 sps:$4 sm:$0xff]   ;;  %v1134_v57 = vld [vmem:[%s1222_s9 + $0x480] ss:$8 sps:$4 sm:$0xff]   ;;  %v1135_v58 = vld [vmem:[%s1222_s9 + $0x494] ss:$8 sps:$4 sm:$0xff]   ;;  %v796_v33 = vunpack.c.l.bf16 %v1252_v21 }
  0x26   : > { %761 = vmatprep.subr.bf16.mxu1 %v1117_v34  ;;  %v1104_v59 = vld [vmem:[%s1217_s6 + $0x4e0] ss:$8 sps:$4 sm:$0xff]   ;;  %v1105_v60 = vld [vmem:[%s1217_s6 + $0x4f4] ss:$8 sps:$4 sm:$0xff]   ;;  %v1137_v61 = vld [vmem:[%s1222_s9 + $0x490] ss:$8 sps:$4 sm:$0xff]  }
  0x27   : > { %515 = vmatpush1.bf16.msra.mxu0 %v1074_v15  ;;  %v1138_v62 = vld [vmem:[%s1222_s9 + $0x4a4] ss:$8 sps:$4 sm:$0xff]   ;;  %v1107_v63 = vld [vmem:[%s1217_s6 + $0x4f0] ss:$8 sps:$4 sm:$0xff]   ;;  %v1140_v0 = vld [vmem:[%s1222_s9 + $0x4a0] ss:$8 sps:$4 sm:$0xff]  }
  0x28   : > { %516 = vmatprep.subr.bf16.mxu0 %v1075_v16  ;;  %v1141_v2 = vld [vmem:[%s1222_s9 + $0x4b4] ss:$8 sps:$4 sm:$0xff]   ;;  %v1143_v3 = vld [vmem:[%s1222_s9 + $0x4b0] ss:$8 sps:$4 sm:$0xff]   ;;  %v1144_v4 = vld [vmem:[%s1222_s9 + $0x4c4] ss:$8 sps:$4 sm:$0xff]  }
  0x29   : > { %762 = vmatpush1.bf16.msra.mxu1 %v1119_v37  ;;  %v1146_v5 = vld [vmem:[%s1222_s9 + $0x4c0] ss:$8 sps:$4 sm:$0xff]   ;;  %v1147_v6 = vld [vmem:[%s1222_s9 + $0x4d4] ss:$8 sps:$4 sm:$0xff]   ;;  %v1149_v7 = vld [vmem:[%s1222_s9 + $0x4d0] ss:$8 sps:$4 sm:$0xff]  }
  0x2a   : > { %763 = vmatprep.subr.bf16.mxu1 %v1120_v38  ;;  %v1150_v8 = vld [vmem:[%s1222_s9 + $0x4e4] ss:$8 sps:$4 sm:$0xff]   ;;  %v1152_v9 = vld [vmem:[%s1222_s9 + $0x4e0] ss:$8 sps:$4 sm:$0xff]   ;;  %v1153_v10 = vld [vmem:[%s1222_s9 + $0x4f4] ss:$8 sps:$4 sm:$0xff]  }
  0x2b   : > { %517 = vmatpush1.bf16.msra.mxu0 %v1077_v18  ;;  %v1155_v11 = vld [vmem:[%s1222_s9 + $0x4f0] ss:$8 sps:$4 sm:$0xff]   ;;  %v313_v12 = vsub.s32 0, %v1239_v13  ;;  %v309_v14 = vld [vmem:[%s1207_s25] sm:$0x3]  ;;  %v317_v15 = vsub.s32 1, %v1239_v13 }
  0x2c   : > { %518 = vmatprep.subr.bf16.mxu0 %v1078_v19  ;;  %v1165_v30 = vmov 1983009808  }
  0x2d   : > { %764 = vmatpush1.bf16.msra.mxu1 %v1122_v41  ;;  %v314_v16 = vrot.slane %v309_v14, %v313_v12  ;;  %v318_v18 = vrot.slane %v309_v14, %v317_v15 }
  0x2e   : > { %765 = vmatprep.subr.bf16.mxu1 %v1123_v42 }
  0x2f   : > { %519 = vmatpush1.bf16.msra.mxu0 %v1080_v20 }
  0x30   : > { %520 = vmatprep.subr.bf16.mxu0 %v1081_v26 }
  0x31   : > { %766 = vmatpush1.bf16.msra.mxu1 %v1125_v45 }
  0x32   : > { %767 = vmatprep.subr.bf16.mxu1 %v1126_v46 }
  0x33   : > { %521 = vmatpush1.bf16.msra.mxu0 %v1083_v31  ;;  %v799_v31 = vunpack.c.l.s4 %v1165_v30 }
  0x34   : > { %522 = vmatprep.subr.bf16.mxu0 %v1084_v32 }
  0x35   : > { %768 = vmatpush1.bf16.msra.mxu1 %v1128_v49  ;;  %v800_v32 = vunpack.c.0.s8 %v799_v31 }
  0x36   : > { %769 = vmatprep.subr.bf16.mxu1 %v1129_v50 }
  0x37   : > { %523 = vmatpush1.bf16.msra.mxu0 %v1086_v35  ;;  %v803_v34 = vsub.s32 %v800_v32, %v1239_v13  ;;  %v583_v35 = vld [vmem:[%s1212_s28] sm:$0x3] }
  0x38   : > { %524 = vmatprep.subr.bf16.mxu0 %v1087_v36  ;;  %v588_v37 = vrot.slane %v583_v35, %v313_v12  ;;  %v592_v38 = vrot.slane %v583_v35, %v317_v15 }
  0x39   : > { %770 = vmatpush1.bf16.msra.mxu1 %v1131_v53  ;;  %v804_v36 = vrot.slane %v796_v33, %v803_v34 }
  0x3a   : > { %771 = vmatprep.subr.bf16.mxu1 %v1132_v54 }
  0x3b   : > { %525 = vmatpush1.bf16.msra.mxu0 %v1089_v39 }
  0x3c   : > { %526 = vmatprep.subr.bf16.mxu0 %v1090_v40  ;;  %v805_v40 = vcombine.high %v804_v36, %v804_v36 }
  0x3d   : > { %772 = vmatpush1.bf16.msra.mxu1 %v1134_v57 }
  0x3e   : > { %773 = vmatprep.subr.bf16.mxu1 %v1135_v58 }
  0x3f   : > { %527 = vmatpush1.bf16.msra.mxu0 %v1092_v43 }
  0x40   : > { %528 = vmatprep.subr.bf16.mxu0 %v1093_v44 }
  0x41   : > { %774 = vmatpush1.bf16.msra.mxu1 %v1137_v61 }
  0x42   : > { %775 = vmatprep.subr.bf16.mxu1 %v1138_v62 }
  0x43   : > { %529 = vmatpush1.bf16.msra.mxu0 %v1095_v47 }
  0x44   : > { %530 = vmatprep.subr.bf16.mxu0 %v1096_v48 }
  0x45   : > { %776 = vmatpush1.bf16.msra.mxu1 %v1140_v0 }
  0x46   : > { %777 = vmatprep.subr.bf16.mxu1 %v1141_v2 }
  0x47   : > { %531 = vmatpush1.bf16.msra.mxu0 %v1098_v51 }
  0x48   : > { %532 = vmatprep.subr.bf16.mxu0 %v1099_v52 }
  0x49   : > { %778 = vmatpush1.bf16.msra.mxu1 %v1143_v3 }
  0x4a   : > { %779 = vmatprep.subr.bf16.mxu1 %v1144_v4 }
  0x4b   : > { %533 = vmatpush1.bf16.msra.mxu0 %v1101_v55 }
  0x4c   : > { %534 = vmatprep.subr.bf16.mxu0 %v1102_v56 }
  0x4d   : > { %780 = vmatpush1.bf16.msra.mxu1 %v1146_v5 }
  0x4e   : > { %781 = vmatprep.subr.bf16.mxu1 %v1147_v6 }
  0x4f   : > { %535 = vmatpush1.bf16.msra.mxu0 %v1104_v59 }
  0x50   : > { %536 = vmatprep.subr.bf16.mxu0 %v1105_v60 }
  0x51   : > { %782 = vmatpush1.bf16.msra.mxu1 %v1149_v7 }
  0x52   : > { %783 = vmatprep.subr.bf16.mxu1 %v1150_v8 }
  0x53   : > { %537 = vmatpush1.bf16.msra.mxu0 %v1107_v63 }
  0x55   : > { %784 = vmatpush1.bf16.msra.mxu1 %v1152_v9 }
  0x56   : > { %539 = vmatmul.mubr.bf16.vlgmr.msra.gmra.mrb[0].mxu0 %v336_v1  ;;  %785 = vmatprep.subr.bf16.mxu1 %v1153_v10 }
  0x59   : > { %786 = vmatpush1.bf16.msra.mxu1 %v1155_v11 }
 0x129   : > { %v540_v19 = vpop.f32.mrb[0].mxu0 }
 0x12a   : > { %v541_v20 = vadd.f32 %v540_v19, %v314_v16  ;;  %v542_v22 = vpop.f32.mrb[1].mxu0 }
 0x12b   : > { %v543_v23 = vadd.f32 %v542_v22, %v318_v18  ;;  %v544_v24 = vpop.f32.mrb[2].mxu0 }
 0x12c   : > { %v547_v25 = vmax.f32 %v541_v20, 0.0  ;;  %v545_v26 = vpop.f32.mrb[3].mxu0 }
 0x12d   : > { %v548_v27 = vmax.f32 %v543_v23, 0.0 }
 0x12e   : > { %v549_v29 = vpack.c.bf16 %v547_v25, %v547_v25 }
 0x12f   : > { %v550_v28 = vpack.c.bf16 %v548_v27, %v548_v27 }
 0x131   : > { %787 = vmatprep.mubr.bf16.mxu1 %v550_v28 }
 0x132   : > { %788 = vmatmul.mubr.bf16.vlgmr.msra.gmra.mrb[0].mxu1 %v549_v29 }
 0x205   : > { %v789_v39 = vpop.f32.mrb[0].mxu1 }
 0x206   : > { %v790_v41 = vadd.f32 %v789_v39, %v588_v37  ;;  %v791_v42 = vpop.f32.mrb[1].mxu1 }
 0x207   : > { %v792_v43 = vadd.f32 %v791_v42, %v592_v38  ;;  %v793_v44 = vpop.f32.mrb[2].mxu1 }
 0x208   : > { %v808_v45 = vadd.f32 %v804_v36, %v790_v41  ;;  %v794_v46 = vpop.f32.mrb[3].mxu1 }
 0x209   : > { %v809_v47 = vadd.f32 %v805_v40, %v792_v43 }
 0x20a   : > { %v810_v48 = vmax.f32 %v808_v45, 0.0 }
 0x20b   : > { %v811_v49 = vmax.f32 %v809_v47, 0.0 }
 0x20d   : > { %v1046_v50 = vpack.c.bf16 %v811_v49, %v810_v48 }
 0x20f   : > { %v823_v21 = vrot.slane %v1046_v50, %v1244_v17 }
 0x211   : > { %1047 = vst.sshfl [vmem:[%s1331_s5] sm:$0x5 pattern:$0x73625140] %v823_v21 }
 0x212 PF: > { %s15_s18 = sadd.s32 1, %s1162_s18  }
 0x213   : > { %p12_p5 = scmp.ge.s32.totalorder %s15_s18, 7  }
 0x215   :  { %14 = sbr.rel (!%p12_p5) target bundleno = 1 (0x1), region = 79 }

// kernel: _lambda_.14
= control target key start
LH: loop header
LB: loop body
LE: loop exit
PB: predicated region body
PF: predicated region fallthrough
CT: control target
= control target key end

     0   :  { %v99_v9 = vlaneseq  ;;  %v2903_v10 = vmov 1966171168   ;;  %s3786_s1 = inlined_call_operand.vmem [shape: bf16[2304,512], index: 1, kind: input, shape index: {}]   ;;  %s3787_s0 = inlined_call_operand.vmem [shape: bf16[2,256], index: 0, kind: input, shape index: {}]   ;;  %s3788_s3 = inlined_call_operand.vmem [shape: bf16[4608,512], index: 3, kind: input, shape index: {}]   ;;  %s3789_s5 = inlined_call_operand.vmem [shape: bf16[256,512], index: 5, kind: input, shape index: {}]   ;;  %s3790_s2 = inlined_call_operand.vmem [shape: f32[1,512], index: 2, kind: input, shape index: {}, may-alias: {2,4,6}]   ;;  %s3791_s4 = inlined_call_operand.vmem [shape: f32[1,512], index: 4, kind: input, shape index: {}, may-alias: {2,4,6}]   ;;  %s3792_s6 = inlined_call_operand.vmem [shape: f32[1,512], index: 6, kind: input, shape index: {}, may-alias: {2,4,6}]   ;;  %s3793_s7 = inlined_call_operand.vmem [shape: bf16[2,512], index: 7, kind: output, shape index: {}]  }
   0x1   :  { %v2519_v0 = vld [vmem:[%s3786_s1 + $0x804] ss:$16 sps:$4 sm:$0xff]   ;;  %v2521_v1 = vld [vmem:[%s3786_s1 + $0x800] ss:$16 sps:$4 sm:$0xff]   ;;  %v129_v11 = vunpack.c.l.s4 %v2903_v10  ;;  %v2567_v19 = vld [vmem:[%s3786_s1 + $0x80c] ss:$16 sps:$4 sm:$0xff]  }
   0x2   :  { %464 = vmatprep.subr.bf16.mxu0 %v2519_v0  ;;  %v2522_v2 = vld [vmem:[%s3786_s1 + $0x824] ss:$16 sps:$4 sm:$0xff]   ;;  %v2524_v3 = vld [vmem:[%s3786_s1 + $0x820] ss:$16 sps:$4 sm:$0xff]   ;;  %v2977_v14 = vshrl.u32 %v99_v9, 7  ;;  %505 = vmatprep.subr.bf16.mxu1 %v2567_v19 }
   0x3   :  { %465 = vmatpush1.bf16.msra.mxu0 %v2521_v1  ;;  %v2525_v4 = vld [vmem:[%s3786_s1 + $0x844] ss:$16 sps:$4 sm:$0xff]   ;;  %v2527_v5 = vld [vmem:[%s3786_s1 + $0x840] ss:$16 sps:$4 sm:$0xff]   ;;  %v130_v15 = vunpack.c.0.s8 %v129_v11  ;;  %v2569_v20 = vld [vmem:[%s3786_s1 + $0x808] ss:$16 sps:$4 sm:$0xff]  }
   0x4   :  { %466 = vmatprep.subr.bf16.mxu0 %v2522_v2  ;;  %v2528_v6 = vld [vmem:[%s3786_s1 + $0x864] ss:$16 sps:$4 sm:$0xff]   ;;  %v2530_v7 = vld [vmem:[%s3786_s1 + $0x860] ss:$16 sps:$4 sm:$0xff]   ;;  %v2570_v25 = vld [vmem:[%s3786_s1 + $0x82c] ss:$16 sps:$4 sm:$0xff]   ;;  %506 = vmatpush1.bf16.msra.mxu1 %v2569_v20 }
   0x5   :  { %v2531_v8 = vld [vmem:[%s3786_s1 + $0x884] ss:$16 sps:$4 sm:$0xff]   ;;  %v2533_v12 = vld [vmem:[%s3786_s1 + $0x880] ss:$16 sps:$4 sm:$0xff]   ;;  %v2995_v21 = vsub.s32 %v130_v15, %v2977_v14  ;;  %v2572_v26 = vld [vmem:[%s3786_s1 + $0x828] ss:$16 sps:$4 sm:$0xff]   ;;  %507 = vmatprep.subr.bf16.mxu1 %v2570_v25 }
   0x6   :  { %v2534_v13 = vld [vmem:[%s3786_s1 + $0x8a4] ss:$16 sps:$4 sm:$0xff]   ;;  %v2536_v16 = vld [vmem:[%s3786_s1 + $0x8a0] ss:$16 sps:$4 sm:$0xff]   ;;  %v2573_v28 = vld [vmem:[%s3786_s1 + $0x84c] ss:$16 sps:$4 sm:$0xff]  }
   0x7   :  { %467 = vmatpush1.bf16.msra.mxu0 %v2524_v3  ;;  %v2537_v17 = vld [vmem:[%s3786_s1 + $0x8c4] ss:$16 sps:$4 sm:$0xff]   ;;  %v2539_v18 = vld [vmem:[%s3786_s1 + $0x8c0] ss:$16 sps:$4 sm:$0xff]   ;;  %v2575_v31 = vld [vmem:[%s3786_s1 + $0x848] ss:$16 sps:$4 sm:$0xff]  }
   0x8   :  { %468 = vmatprep.subr.bf16.mxu0 %v2525_v4  ;;  %v3000_v22 = vld.sshfl [vmem:[%s3787_s0] sm:$0x11 pattern:$0x75316420]  ;;  %v2540_v23 = vld [vmem:[%s3786_s1 + $0x8e4] ss:$16 sps:$4 sm:$0xff]   ;;  %508 = vmatpush1.bf16.msra.mxu1 %v2572_v26 }
   0x9   :  { %v127_v24 = vcombine.high %v3000_v22, %v3000_v22  ;;  %v2542_v29 = vld [vmem:[%s3786_s1 + $0x8e0] ss:$16 sps:$4 sm:$0xff]   ;;  %v2543_v30 = vld [vmem:[%s3786_s1 + $0x904] ss:$16 sps:$4 sm:$0xff]   ;;  %509 = vmatprep.subr.bf16.mxu1 %v2573_v28  ;;  %v2576_v32 = vld [vmem:[%s3786_s1 + $0x86c] ss:$16 sps:$4 sm:$0xff]   ;;  %v3128_v0 = vrot.slane %v3000_v22, %v2995_v21 }
   0xa   :  { %v2545_v33 = vld [vmem:[%s3786_s1 + $0x900] ss:$16 sps:$4 sm:$0xff]   ;;  %v2546_v34 = vld [vmem:[%s3786_s1 + $0x924] ss:$16 sps:$4 sm:$0xff]   ;;  %v2578_v35 = vld [vmem:[%s3786_s1 + $0x868] ss:$16 sps:$4 sm:$0xff]  }
   0xb   :  { %469 = vmatpush1.bf16.msra.mxu0 %v2527_v5  ;;  %v3014_v27 = vrot.slane %v127_v24, %v2995_v21  ;;  %v2579_v36 = vld [vmem:[%s3786_s1 + $0x88c] ss:$16 sps:$4 sm:$0xff]   ;;  %v2548_v37 = vld [vmem:[%s3786_s1 + $0x920] ss:$16 sps:$4 sm:$0xff]   ;;  %v2549_v38 = vld [vmem:[%s3786_s1 + $0x944] ss:$16 sps:$4 sm:$0xff]  }
   0xc   :  { %470 = vmatprep.subr.bf16.mxu0 %v2528_v6  ;;  %510 = vmatpush1.bf16.msra.mxu1 %v2575_v31  ;;  %v2581_v39 = vld [vmem:[%s3786_s1 + $0x888] ss:$16 sps:$4 sm:$0xff]   ;;  %v2582_v40 = vld [vmem:[%s3786_s1 + $0x8ac] ss:$16 sps:$4 sm:$0xff]   ;;  %v2551_v41 = vld [vmem:[%s3786_s1 + $0x940] ss:$16 sps:$4 sm:$0xff]  }
   0xd   :  { %496 = vmatprep.mubr.bf16.mxu0 %v3014_v27  ;;  %537 = vmatprep.mubr.bf16.mxu1 %v3014_v27  ;;  %v2552_v42 = vld [vmem:[%s3786_s1 + $0x964] ss:$16 sps:$4 sm:$0xff]   ;;  %v2584_v43 = vld [vmem:[%s3786_s1 + $0x8a8] ss:$16 sps:$4 sm:$0xff]   ;;  %v2585_v44 = vld [vmem:[%s3786_s1 + $0x8cc] ss:$16 sps:$4 sm:$0xff]  }
   0xe   :  { %511 = vmatprep.subr.bf16.mxu1 %v2576_v32  ;;  %v2554_v45 = vld [vmem:[%s3786_s1 + $0x960] ss:$16 sps:$4 sm:$0xff]   ;;  %v2555_v46 = vld [vmem:[%s3786_s1 + $0x984] ss:$16 sps:$4 sm:$0xff]   ;;  %v2587_v47 = vld [vmem:[%s3786_s1 + $0x8c8] ss:$16 sps:$4 sm:$0xff]  }
   0xf   :  { %471 = vmatpush1.bf16.msra.mxu0 %v2530_v7  ;;  %v2588_v48 = vld [vmem:[%s3786_s1 + $0x8ec] ss:$16 sps:$4 sm:$0xff]   ;;  %v2557_v49 = vld [vmem:[%s3786_s1 + $0x980] ss:$16 sps:$4 sm:$0xff]   ;;  %v2558_v50 = vld [vmem:[%s3786_s1 + $0x9a4] ss:$16 sps:$4 sm:$0xff]  }
  0x10   :  { %472 = vmatprep.subr.bf16.mxu0 %v2531_v8  ;;  %512 = vmatpush1.bf16.msra.mxu1 %v2578_v35  ;;  %v2590_v51 = vld [vmem:[%s3786_s1 + $0x8e8] ss:$16 sps:$4 sm:$0xff]   ;;  %v2591_v52 = vld [vmem:[%s3786_s1 + $0x90c] ss:$16 sps:$4 sm:$0xff]   ;;  %v2560_v53 = vld [vmem:[%s3786_s1 + $0x9a0] ss:$16 sps:$4 sm:$0xff]  }
  0x11   :  { %513 = vmatprep.subr.bf16.mxu1 %v2579_v36  ;;  %v2561_v54 = vld [vmem:[%s3786_s1 + $0x9c4] ss:$16 sps:$4 sm:$0xff]   ;;  %v2593_v55 = vld [vmem:[%s3786_s1 + $0x908] ss:$16 sps:$4 sm:$0xff]   ;;  %v2594_v56 = vld [vmem:[%s3786_s1 + $0x92c] ss:$16 sps:$4 sm:$0xff]  }
  0x12   :  { %v2563_v57 = vld [vmem:[%s3786_s1 + $0x9c0] ss:$16 sps:$4 sm:$0xff]   ;;  %v2564_v58 = vld [vmem:[%s3786_s1 + $0x9e4] ss:$16 sps:$4 sm:$0xff]   ;;  %v2596_v59 = vld [vmem:[%s3786_s1 + $0x928] ss:$16 sps:$4 sm:$0xff]  }
  0x13   :  { %473 = vmatpush1.bf16.msra.mxu0 %v2533_v12  ;;  %v2597_v60 = vld [vmem:[%s3786_s1 + $0x94c] ss:$16 sps:$4 sm:$0xff]   ;;  %v2566_v61 = vld [vmem:[%s3786_s1 + $0x9e0] ss:$16 sps:$4 sm:$0xff]   ;;  %v2617_v62 = vld [vmem:[%s3788_s3 + $0x1004] ss:$16 sps:$4 sm:$0xff]  }
  0x14   :  { %474 = vmatprep.subr.bf16.mxu0 %v2534_v13  ;;  %514 = vmatpush1.bf16.msra.mxu1 %v2581_v39  ;;  %v2599_v63 = vld [vmem:[%s3786_s1 + $0x948] ss:$16 sps:$4 sm:$0xff]   ;;  %v2600_v1 = vld [vmem:[%s3786_s1 + $0x96c] ss:$16 sps:$4 sm:$0xff]   ;;  %v2615_v2 = vld [vmem:[%s3788_s3 + $0x1000] ss:$16 sps:$4 sm:$0xff]  }
  0x15   :  { %515 = vmatprep.subr.bf16.mxu1 %v2582_v40  ;;  %v2623_v3 = vld [vmem:[%s3788_s3 + $0x1024] ss:$16 sps:$4 sm:$0xff]   ;;  %v2602_v4 = vld [vmem:[%s3786_s1 + $0x968] ss:$16 sps:$4 sm:$0xff]   ;;  %v2603_v5 = vld [vmem:[%s3786_s1 + $0x98c] ss:$16 sps:$4 sm:$0xff]  }
  0x16   :  { %v2621_v6 = vld [vmem:[%s3788_s3 + $0x1020] ss:$16 sps:$4 sm:$0xff]   ;;  %v2629_v7 = vld [vmem:[%s3788_s3 + $0x1044] ss:$16 sps:$4 sm:$0xff]   ;;  %v2605_v8 = vld [vmem:[%s3786_s1 + $0x988] ss:$16 sps:$4 sm:$0xff]  }
  0x17   :  { %475 = vmatpush1.bf16.msra.mxu0 %v2536_v16  ;;  %v2606_v9 = vld [vmem:[%s3786_s1 + $0x9ac] ss:$16 sps:$4 sm:$0xff]   ;;  %v2627_v10 = vld [vmem:[%s3788_s3 + $0x1040] ss:$16 sps:$4 sm:$0xff]   ;;  %v2635_v11 = vld [vmem:[%s3788_s3 + $0x1064] ss:$16 sps:$4 sm:$0xff]  }
  0x18   :  { %476 = vmatprep.subr.bf16.mxu0 %v2537_v17  ;;  %516 = vmatpush1.bf16.msra.mxu1 %v2584_v43  ;;  %v2608_v12 = vld [vmem:[%s3786_s1 + $0x9a8] ss:$16 sps:$4 sm:$0xff]   ;;  %v2609_v13 = vld [vmem:[%s3786_s1 + $0x9cc] ss:$16 sps:$4 sm:$0xff]   ;;  %v2633_v15 = vld [vmem:[%s3788_s3 + $0x1060] ss:$16 sps:$4 sm:$0xff]  }
  0x19   :  { %517 = vmatprep.subr.bf16.mxu1 %v2585_v44  ;;  %v2641_v16 = vld [vmem:[%s3788_s3 + $0x1084] ss:$16 sps:$4 sm:$0xff]   ;;  %v2611_v17 = vld [vmem:[%s3786_s1 + $0x9c8] ss:$16 sps:$4 sm:$0xff]   ;;  %v2639_v20 = vld [vmem:[%s3788_s3 + $0x1080] ss:$16 sps:$4 sm:$0xff]  }
  0x1a   :  { %v2614_v19 = vld [vmem:[%s3786_s1 + $0x9e8] ss:$16 sps:$4 sm:$0xff]   ;;  %v2620_v22 = vld [vmem:[%s3788_s3 + $0x100c] ss:$16 sps:$4 sm:$0xff]   ;;  %v2645_v24 = vld [vmem:[%s3788_s3 + $0x10a0] ss:$16 sps:$4 sm:$0xff]  }
  0x1b   :  { %477 = vmatpush1.bf16.msra.mxu0 %v2539_v18  ;;  %v2612_v18 = vld [vmem:[%s3786_s1 + $0x9ec] ss:$16 sps:$4 sm:$0xff]   ;;  %v2653_v25 = vld [vmem:[%s3788_s3 + $0x10c4] ss:$16 sps:$4 sm:$0xff]   ;;  %v2618_v26 = vld [vmem:[%s3788_s3 + $0x1008] ss:$16 sps:$4 sm:$0xff]  }
  0x1c   :  { %478 = vmatprep.subr.bf16.mxu0 %v2540_v23  ;;  %518 = vmatpush1.bf16.msra.mxu1 %v2587_v47  ;;  %v2647_v23 = vld [vmem:[%s3788_s3 + $0x10a4] ss:$16 sps:$4 sm:$0xff]   ;;  %v2626_v28 = vld [vmem:[%s3788_s3 + $0x102c] ss:$16 sps:$4 sm:$0xff]   ;;  %v2624_v31 = vld [vmem:[%s3788_s3 + $0x1028] ss:$16 sps:$4 sm:$0xff]  }
  0x1d   :  { %519 = vmatprep.subr.bf16.mxu1 %v2588_v48  ;;  %v2632_v32 = vld [vmem:[%s3788_s3 + $0x104c] ss:$16 sps:$4 sm:$0xff]   ;;  %v2630_v35 = vld [vmem:[%s3788_s3 + $0x1048] ss:$16 sps:$4 sm:$0xff]  }
  0x1e   :  { %v2638_v36 = vld [vmem:[%s3788_s3 + $0x106c] ss:$16 sps:$4 sm:$0xff]   ;;  %v2636_v39 = vld [vmem:[%s3788_s3 + $0x1068] ss:$16 sps:$4 sm:$0xff]  }
  0x1f   :  { %479 = vmatpush1.bf16.msra.mxu0 %v2542_v29  ;;  %v2651_v29 = vld [vmem:[%s3788_s3 + $0x10c0] ss:$16 sps:$4 sm:$0xff]   ;;  %v2644_v40 = vld [vmem:[%s3788_s3 + $0x108c] ss:$16 sps:$4 sm:$0xff]   ;;  %v2642_v43 = vld [vmem:[%s3788_s3 + $0x1088] ss:$16 sps:$4 sm:$0xff]  }
  0x20   :  { %480 = vmatprep.subr.bf16.mxu0 %v2543_v30  ;;  %520 = vmatpush1.bf16.msra.mxu1 %v2590_v51  ;;  %v2659_v30 = vld [vmem:[%s3788_s3 + $0x10e4] ss:$16 sps:$4 sm:$0xff]   ;;  %v2650_v44 = vld [vmem:[%s3788_s3 + $0x10ac] ss:$16 sps:$4 sm:$0xff]   ;;  %v2648_v47 = vld [vmem:[%s3788_s3 + $0x10a8] ss:$16 sps:$4 sm:$0xff]  }
  0x21   :  { %521 = vmatprep.subr.bf16.mxu1 %v2591_v52  ;;  %v2656_v48 = vld [vmem:[%s3788_s3 + $0x10cc] ss:$16 sps:$4 sm:$0xff]   ;;  %v2654_v51 = vld [vmem:[%s3788_s3 + $0x10c8] ss:$16 sps:$4 sm:$0xff]  }
  0x22   :  { %v2662_v52 = vld [vmem:[%s3788_s3 + $0x10ec] ss:$16 sps:$4 sm:$0xff]  }
  0x23   :  { %481 = vmatpush1.bf16.msra.mxu0 %v2545_v33  ;;  %v2657_v33 = vld [vmem:[%s3788_s3 + $0x10e0] ss:$16 sps:$4 sm:$0xff]  }
  0x24   :  { %482 = vmatprep.subr.bf16.mxu0 %v2546_v34  ;;  %522 = vmatpush1.bf16.msra.mxu1 %v2593_v55  ;;  %v2665_v34 = vld [vmem:[%s3788_s3 + $0x1104] ss:$16 sps:$4 sm:$0xff]   ;;  %v2660_v55 = vld [vmem:[%s3788_s3 + $0x10e8] ss:$16 sps:$4 sm:$0xff]  }
  0x25   :  { %523 = vmatprep.subr.bf16.mxu1 %v2594_v56  ;;  %v2668_v56 = vld [vmem:[%s3788_s3 + $0x110c] ss:$16 sps:$4 sm:$0xff]  }
  0x27   :  { %483 = vmatpush1.bf16.msra.mxu0 %v2548_v37  ;;  %v2663_v37 = vld [vmem:[%s3788_s3 + $0x1100] ss:$16 sps:$4 sm:$0xff]  }
  0x28   :  { %484 = vmatprep.subr.bf16.mxu0 %v2549_v38  ;;  %524 = vmatpush1.bf16.msra.mxu1 %v2596_v59  ;;  %v2671_v38 = vld [vmem:[%s3788_s3 + $0x1124] ss:$16 sps:$4 sm:$0xff]   ;;  %v2674_v59 = vld [vmem:[%s3788_s3 + $0x112c] ss:$16 sps:$4 sm:$0xff]  }
  0x29   :  { %525 = vmatprep.subr.bf16.mxu1 %v2597_v60  ;;  %v2672_v60 = vld [vmem:[%s3788_s3 + $0x1128] ss:$16 sps:$4 sm:$0xff]  }
  0x2b   :  { %485 = vmatpush1.bf16.msra.mxu0 %v2551_v41  ;;  %v2669_v41 = vld [vmem:[%s3788_s3 + $0x1120] ss:$16 sps:$4 sm:$0xff]  }
  0x2c   :  { %486 = vmatprep.subr.bf16.mxu0 %v2552_v42  ;;  %526 = vmatpush1.bf16.msra.mxu1 %v2599_v63  ;;  %v2677_v42 = vld [vmem:[%s3788_s3 + $0x1144] ss:$16 sps:$4 sm:$0xff]   ;;  %v2686_v63 = vld [vmem:[%s3788_s3 + $0x116c] ss:$16 sps:$4 sm:$0xff]  }
  0x2d   :  { %527 = vmatprep.subr.bf16.mxu1 %v2600_v1  ;;  %v2684_v1 = vld [vmem:[%s3788_s3 + $0x1168] ss:$16 sps:$4 sm:$0xff]  }
  0x2f   :  { %487 = vmatpush1.bf16.msra.mxu0 %v2554_v45  ;;  %v2675_v45 = vld [vmem:[%s3788_s3 + $0x1140] ss:$16 sps:$4 sm:$0xff]  }
  0x30   :  { %488 = vmatprep.subr.bf16.mxu0 %v2555_v46  ;;  %528 = vmatpush1.bf16.msra.mxu1 %v2602_v4  ;;  %v2683_v46 = vld [vmem:[%s3788_s3 + $0x1164] ss:$16 sps:$4 sm:$0xff]   ;;  %v2698_v4 = vld [vmem:[%s3788_s3 + $0x11ac] ss:$16 sps:$4 sm:$0xff]  }
  0x31   :  { %529 = vmatprep.subr.bf16.mxu1 %v2603_v5  ;;  %v2696_v5 = vld [vmem:[%s3788_s3 + $0x11a8] ss:$16 sps:$4 sm:$0xff]  }
  0x33   :  { %489 = vmatpush1.bf16.msra.mxu0 %v2557_v49  ;;  %v2681_v49 = vld [vmem:[%s3788_s3 + $0x1160] ss:$16 sps:$4 sm:$0xff]  }
  0x34   :  { %490 = vmatprep.subr.bf16.mxu0 %v2558_v50  ;;  %530 = vmatpush1.bf16.msra.mxu1 %v2605_v8  ;;  %v2689_v50 = vld [vmem:[%s3788_s3 + $0x1184] ss:$16 sps:$4 sm:$0xff]   ;;  %v2699_v8 = vld [vmem:[%s3788_s3 + $0x11c0] ss:$16 sps:$4 sm:$0xff]  }
  0x35   :  { %531 = vmatprep.subr.bf16.mxu1 %v2606_v9  ;;  %v2702_v9 = vld [vmem:[%s3788_s3 + $0x11c8] ss:$16 sps:$4 sm:$0xff]  }
  0x37   :  { %491 = vmatpush1.bf16.msra.mxu0 %v2560_v53  ;;  %v2687_v53 = vld [vmem:[%s3788_s3 + $0x1180] ss:$16 sps:$4 sm:$0xff]  }
  0x38   :  { %492 = vmatprep.subr.bf16.mxu0 %v2561_v54  ;;  %532 = vmatpush1.bf16.msra.mxu1 %v2608_v12  ;;  %v2695_v54 = vld [vmem:[%s3788_s3 + $0x11a4] ss:$16 sps:$4 sm:$0xff]   ;;  %v2705_v12 = vld [vmem:[%s3788_s3 + $0x11e0] ss:$16 sps:$4 sm:$0xff]  }
  0x39   :  { %533 = vmatprep.subr.bf16.mxu1 %v2609_v13  ;;  %v2708_v13 = vld [vmem:[%s3788_s3 + $0x11e8] ss:$16 sps:$4 sm:$0xff]  }
  0x3b   :  { %493 = vmatpush1.bf16.msra.mxu0 %v2563_v57  ;;  %v2693_v57 = vld [vmem:[%s3788_s3 + $0x11a0] ss:$16 sps:$4 sm:$0xff]  }
  0x3c   :  { %494 = vmatprep.subr.bf16.mxu0 %v2564_v58  ;;  %534 = vmatpush1.bf16.msra.mxu1 %v2611_v17  ;;  %v2666_v58 = vld [vmem:[%s3788_s3 + $0x1108] ss:$16 sps:$4 sm:$0xff]   ;;  %v3358_v17 = vsub.s32 0, %v2977_v14 }
  0x3d   :  { %535 = vmatprep.subr.bf16.mxu1 %v2612_v18  ;;  %v3363_v18 = vld [vmem:[%s3790_s2] sm:$0xf] }
  0x3f   :  { %495 = vmatpush1.bf16.msra.mxu0 %v2566_v61  ;;  %v2680_v61 = vld [vmem:[%s3788_s3 + $0x114c] ss:$16 sps:$4 sm:$0xff]  }
  0x40   :  { %1344 = vmatprep.subr.bf16.mxu0 %v2617_v62  ;;  %536 = vmatpush1.bf16.msra.mxu1 %v2614_v19  ;;  %v2678_v62 = vld [vmem:[%s3788_s3 + $0x1148] ss:$16 sps:$4 sm:$0xff]   ;;  %v3366_v19 = vsub.s32 1, %v2977_v14 }
  0x41   :  { %1426 = vmatprep.subr.bf16.mxu1 %v2620_v22 }
  0x42   :  { %497 = vmatmul.mubr.bf16.vlgmr.msra.gmra.mrb[0].mxu0 %v3128_v0  ;;  %v106_v22 = vrot.slane %v3363_v18, %v3366_v19 }
  0x43   :  { %1345 = vmatpush1.bf16.msra.mxu0 %v2615_v2  ;;  %538 = vmatmul.mubr.bf16.vlgmr.msra.gmra.mrb[0].mxu1 %v3128_v0  ;;  %v2692_v2 = vld [vmem:[%s3788_s3 + $0x118c] ss:$16 sps:$4 sm:$0xff]  }
  0x44   :  { %1346 = vmatprep.subr.bf16.mxu0 %v2623_v3  ;;  %1427 = vmatpush1.bf16.msra.mxu1 %v2618_v26  ;;  %v2690_v3 = vld [vmem:[%s3788_s3 + $0x1188] ss:$16 sps:$4 sm:$0xff]  }
  0x45   :  { %1428 = vmatprep.subr.bf16.mxu1 %v2626_v28 }
  0x47   :  { %1347 = vmatpush1.bf16.msra.mxu0 %v2621_v6  ;;  %v2701_v6 = vld [vmem:[%s3788_s3 + $0x11c4] ss:$16 sps:$4 sm:$0xff]  }
  0x48   :  { %1348 = vmatprep.subr.bf16.mxu0 %v2629_v7  ;;  %1429 = vmatpush1.bf16.msra.mxu1 %v2624_v31  ;;  %v2704_v7 = vld [vmem:[%s3788_s3 + $0x11cc] ss:$16 sps:$4 sm:$0xff]  }
  0x49   :  { %1430 = vmatprep.subr.bf16.mxu1 %v2632_v32 }
  0x4b   :  { %1349 = vmatpush1.bf16.msra.mxu0 %v2627_v10  ;;  %v2707_v10 = vld [vmem:[%s3788_s3 + $0x11e4] ss:$16 sps:$4 sm:$0xff]  }
  0x4c   :  { %1350 = vmatprep.subr.bf16.mxu0 %v2635_v11  ;;  %1431 = vmatpush1.bf16.msra.mxu1 %v2630_v35  ;;  %v2710_v11 = vld [vmem:[%s3788_s3 + $0x11ec] ss:$16 sps:$4 sm:$0xff]  }
  0x4d   :  { %1432 = vmatprep.subr.bf16.mxu1 %v2638_v36  ;;  %v2719_v36 = vld [vmem:[%s3788_s3 + $0x1224] ss:$16 sps:$4 sm:$0xff]  }
  0x4f   :  { %1351 = vmatpush1.bf16.msra.mxu0 %v2633_v15  ;;  %v2713_v15 = vld [vmem:[%s3788_s3 + $0x1204] ss:$16 sps:$4 sm:$0xff]  }
  0x50   :  { %1352 = vmatprep.subr.bf16.mxu0 %v2641_v16  ;;  %1433 = vmatpush1.bf16.msra.mxu1 %v2636_v39  ;;  %v2716_v16 = vld [vmem:[%s3788_s3 + $0x120c] ss:$16 sps:$4 sm:$0xff]   ;;  %v2720_v39 = vld [vmem:[%s3788_s3 + $0x1228] ss:$16 sps:$4 sm:$0xff]  }
  0x51   :  { %1434 = vmatprep.subr.bf16.mxu1 %v2644_v40  ;;  %v2725_v40 = vld [vmem:[%s3788_s3 + $0x1244] ss:$16 sps:$4 sm:$0xff]  }
  0x53   :  { %1353 = vmatpush1.bf16.msra.mxu0 %v2639_v20  ;;  %v102_v20 = vrot.slane %v3363_v18, %v3358_v17 }
  0x54   :  { %1354 = vmatprep.subr.bf16.mxu0 %v2647_v23  ;;  %1435 = vmatpush1.bf16.msra.mxu1 %v2642_v43  ;;  %v2726_v43 = vld [vmem:[%s3788_s3 + $0x1248] ss:$16 sps:$4 sm:$0xff]  }
  0x55   :  { %1436 = vmatprep.subr.bf16.mxu1 %v2650_v44  ;;  %v2731_v44 = vld [vmem:[%s3788_s3 + $0x1264] ss:$16 sps:$4 sm:$0xff]  }
  0x57   :  { %1355 = vmatpush1.bf16.msra.mxu0 %v2645_v24 }
  0x58   :  { %1356 = vmatprep.subr.bf16.mxu0 %v2653_v25  ;;  %1437 = vmatpush1.bf16.msra.mxu1 %v2648_v47  ;;  %v2729_v47 = vld [vmem:[%s3788_s3 + $0x1260] ss:$16 sps:$4 sm:$0xff]  }
  0x59   :  { %1438 = vmatprep.subr.bf16.mxu1 %v2656_v48  ;;  %v2732_v48 = vld [vmem:[%s3788_s3 + $0x1268] ss:$16 sps:$4 sm:$0xff]  }
  0x5b   :  { %1357 = vmatpush1.bf16.msra.mxu0 %v2651_v29 }
  0x5c   :  { %1358 = vmatprep.subr.bf16.mxu0 %v2659_v30  ;;  %1439 = vmatpush1.bf16.msra.mxu1 %v2654_v51 }
  0x5d   :  { %1440 = vmatprep.subr.bf16.mxu1 %v2662_v52  ;;  %v2735_v52 = vld [vmem:[%s3788_s3 + $0x1280] ss:$16 sps:$4 sm:$0xff]  }
  0x5f   :  { %1359 = vmatpush1.bf16.msra.mxu0 %v2657_v33  ;;  %v2711_v33 = vld [vmem:[%s3788_s3 + $0x1200] ss:$16 sps:$4 sm:$0xff]  }
  0x60   :  { %1360 = vmatprep.subr.bf16.mxu0 %v2665_v34  ;;  %1441 = vmatpush1.bf16.msra.mxu1 %v2660_v55  ;;  %v2714_v34 = vld [vmem:[%s3788_s3 + $0x1208] ss:$16 sps:$4 sm:$0xff]   ;;  %v2743_v55 = vld [vmem:[%s3788_s3 + $0x12a4] ss:$16 sps:$4 sm:$0xff]  }
  0x61   :  { %1442 = vmatprep.subr.bf16.mxu1 %v2668_v56  ;;  %v2746_v56 = vld [vmem:[%s3788_s3 + $0x12ac] ss:$16 sps:$4 sm:$0xff]  }
  0x63   :  { %1361 = vmatpush1.bf16.msra.mxu0 %v2663_v37  ;;  %v2722_v37 = vld [vmem:[%s3788_s3 + $0x122c] ss:$16 sps:$4 sm:$0xff]  }
  0x64   :  { %1362 = vmatprep.subr.bf16.mxu0 %v2671_v38  ;;  %1443 = vmatpush1.bf16.msra.mxu1 %v2666_v58  ;;  %v2717_v38 = vld [vmem:[%s3788_s3 + $0x1220] ss:$16 sps:$4 sm:$0xff]  }
  0x65   :  { %1444 = vmatprep.subr.bf16.mxu1 %v2674_v59 }
  0x67   :  { %1363 = vmatpush1.bf16.msra.mxu0 %v2669_v41  ;;  %v2728_v41 = vld [vmem:[%s3788_s3 + $0x124c] ss:$16 sps:$4 sm:$0xff]  }
  0x68   :  { %1364 = vmatprep.subr.bf16.mxu0 %v2677_v42  ;;  %1445 = vmatpush1.bf16.msra.mxu1 %v2672_v60  ;;  %v2723_v42 = vld [vmem:[%s3788_s3 + $0x1240] ss:$16 sps:$4 sm:$0xff]  }
  0x69   :  { %1446 = vmatprep.subr.bf16.mxu1 %v2680_v61  ;;  %v2741_v61 = vld [vmem:[%s3788_s3 + $0x12a0] ss:$16 sps:$4 sm:$0xff]  }
  0x6b   :  { %1365 = vmatpush1.bf16.msra.mxu0 %v2675_v45  ;;  %v2734_v45 = vld [vmem:[%s3788_s3 + $0x126c] ss:$16 sps:$4 sm:$0xff]  }
  0x6c   :  { %1366 = vmatprep.subr.bf16.mxu0 %v2683_v46  ;;  %1447 = vmatpush1.bf16.msra.mxu1 %v2678_v62  ;;  %v3409_v46 = vsub.s32 3, %v2977_v14  ;;  %v2744_v62 = vld [vmem:[%s3788_s3 + $0x12a8] ss:$16 sps:$4 sm:$0xff]  }
  0x6d   :  { %1448 = vmatprep.subr.bf16.mxu1 %v2686_v63 }
  0x6e   :  { %v114_v51 = vrot.slane %v3363_v18, %v3409_v46 }
  0x6f   :  { %1367 = vmatpush1.bf16.msra.mxu0 %v2681_v49  ;;  %v2737_v49 = vld [vmem:[%s3788_s3 + $0x1284] ss:$16 sps:$4 sm:$0xff]  }
  0x70   :  { %1368 = vmatprep.subr.bf16.mxu0 %v2689_v50  ;;  %1449 = vmatpush1.bf16.msra.mxu1 %v2684_v1  ;;  %v2740_v50 = vld [vmem:[%s3788_s3 + $0x128c] ss:$16 sps:$4 sm:$0xff]   ;;  %v2749_v1 = vld [vmem:[%s3788_s3 + $0x12c4] ss:$16 sps:$4 sm:$0xff]  }
  0x71   :  { %1450 = vmatprep.subr.bf16.mxu1 %v2692_v2  ;;  %v2752_v2 = vld [vmem:[%s3788_s3 + $0x12cc] ss:$16 sps:$4 sm:$0xff]  }
  0x73   :  { %1369 = vmatpush1.bf16.msra.mxu0 %v2687_v53  ;;  %v2738_v53 = vld [vmem:[%s3788_s3 + $0x1288] ss:$16 sps:$4 sm:$0xff]  }
  0x74   :  { %1370 = vmatprep.subr.bf16.mxu0 %v2695_v54  ;;  %1451 = vmatpush1.bf16.msra.mxu1 %v2690_v3 }
  0x75   :  { %1452 = vmatprep.subr.bf16.mxu1 %v2698_v4  ;;  %v2747_v4 = vld [vmem:[%s3788_s3 + $0x12c0] ss:$16 sps:$4 sm:$0xff]  }
  0x77   :  { %1371 = vmatpush1.bf16.msra.mxu0 %v2693_v57 }
  0x78   :  { %1453 = vmatpush1.bf16.msra.mxu1 %v2696_v5  ;;  %1372 = vmatprep.subr.bf16.mxu0 %v2701_v6  ;;  %v2750_v5 = vld [vmem:[%s3788_s3 + $0x12c8] ss:$16 sps:$4 sm:$0xff]   ;;  %v2755_v6 = vld [vmem:[%s3788_s3 + $0x12e4] ss:$16 sps:$4 sm:$0xff]  }
  0x79   :  { %1454 = vmatprep.subr.bf16.mxu1 %v2704_v7  ;;  %v2758_v7 = vld [vmem:[%s3788_s3 + $0x12ec] ss:$16 sps:$4 sm:$0xff]  }
  0x7b   :  { %1373 = vmatpush1.bf16.msra.mxu0 %v2699_v8  ;;  %v2753_v8 = vld [vmem:[%s3788_s3 + $0x12e0] ss:$16 sps:$4 sm:$0xff]  }
  0x7c   :  { %1455 = vmatpush1.bf16.msra.mxu1 %v2702_v9  ;;  %1374 = vmatprep.subr.bf16.mxu0 %v2707_v10  ;;  %v2756_v9 = vld [vmem:[%s3788_s3 + $0x12e8] ss:$16 sps:$4 sm:$0xff]   ;;  %v2761_v10 = vld [vmem:[%s3788_s3 + $0x1304] ss:$16 sps:$4 sm:$0xff]  }
  0x7d   :  { %1456 = vmatprep.subr.bf16.mxu1 %v2710_v11  ;;  %v2764_v11 = vld [vmem:[%s3788_s3 + $0x130c] ss:$16 sps:$4 sm:$0xff]  }
  0x7f   :  { %1375 = vmatpush1.bf16.msra.mxu0 %v2705_v12  ;;  %v2759_v12 = vld [vmem:[%s3788_s3 + $0x1300] ss:$16 sps:$4 sm:$0xff]  }
  0x80   :  { %1457 = vmatpush1.bf16.msra.mxu1 %v2708_v13  ;;  %1385 = vmatprep.subr.bf16.mxu0 %v2713_v15  ;;  %v2762_v13 = vld [vmem:[%s3788_s3 + $0x1308] ss:$16 sps:$4 sm:$0xff]   ;;  %v2767_v15 = vld [vmem:[%s3788_s3 + $0x1324] ss:$16 sps:$4 sm:$0xff]  }
  0x81   :  { %1467 = vmatprep.subr.bf16.mxu1 %v2716_v16  ;;  %v2770_v16 = vld [vmem:[%s3788_s3 + $0x132c] ss:$16 sps:$4 sm:$0xff]  }
 0x115   :  { %v498_v23 = vpop.f32.mrb[0].mxu0 }
 0x116   :  { %v499_v24 = vadd.f32 %v498_v23, %v102_v20  ;;  %v500_v25 = vpop.f32.mrb[1].mxu0  ;;  %v3431_v54 = vpop.f32.mrb[0].mxu1  ;;  %v2765_v20 = vld [vmem:[%s3788_s3 + $0x1320] ss:$16 sps:$4 sm:$0xff]   ;;  %v2773_v23 = vld [vmem:[%s3788_s3 + $0x1344] ss:$16 sps:$4 sm:$0xff]  }
 0x117   :  { %v501_v26 = vadd.f32 %v500_v25, %v106_v22  ;;  %v502_v28 = vpop.f32.mrb[2].mxu0  ;;  %v541_v57 = vpop.f32.mrb[1].mxu1  ;;  %v2768_v22 = vld [vmem:[%s3788_s3 + $0x1328] ss:$16 sps:$4 sm:$0xff]   ;;  %v2771_v25 = vld [vmem:[%s3788_s3 + $0x1340] ss:$16 sps:$4 sm:$0xff]  }
 0x118   :  { %v546_v29 = vmax.f32 %v499_v24, 0.0  ;;  %v503_v30 = vpop.f32.mrb[3].mxu0  ;;  %v542_v58 = vadd.f32 %v541_v57, %v114_v51  ;;  %v543_v59 = vpop.f32.mrb[2].mxu1  ;;  %v2776_v24 = vld [vmem:[%s3788_s3 + $0x134c] ss:$16 sps:$4 sm:$0xff]  }
 0x119   :  { %v547_v31 = vmax.f32 %v501_v26, 0.0  ;;  %v544_v60 = vpop.f32.mrb[3].mxu1  ;;  %v2774_v26 = vld [vmem:[%s3788_s3 + $0x1348] ss:$16 sps:$4 sm:$0xff]   ;;  %v2779_v28 = vld [vmem:[%s3788_s3 + $0x1364] ss:$16 sps:$4 sm:$0xff]  }
 0x11a   :  { %v550_v35 = vpack.c.bf16 %v546_v29, %v546_v29  ;;  %v549_v63 = vmax.f32 %v542_v58, 0.0  ;;  %v2782_v29 = vld [vmem:[%s3788_s3 + $0x136c] ss:$16 sps:$4 sm:$0xff]   ;;  %v2777_v30 = vld [vmem:[%s3788_s3 + $0x1360] ss:$16 sps:$4 sm:$0xff]  }
 0x11b   :  { %v551_v32 = vpack.c.bf16 %v547_v31, %v547_v31  ;;  %v2780_v31 = vld [vmem:[%s3788_s3 + $0x1368] ss:$16 sps:$4 sm:$0xff]   ;;  %v2809_v51 = vld [vmem:[%s3789_s5 + $0x4] ss:$16 sps:$4 sm:$0xff]   ;;  %v2818_v57 = vld [vmem:[%s3789_s5 + $0x2c] ss:$16 sps:$4 sm:$0xff]  }
 0x11c   :  { %v553_v3 = vpack.c.bf16 %v549_v63, %v549_v63  ;;  %v2813_v58 = vld [vmem:[%s3789_s5 + $0x20] ss:$16 sps:$4 sm:$0xff]   ;;  %v2816_v59 = vld [vmem:[%s3789_s5 + $0x28] ss:$16 sps:$4 sm:$0xff]   ;;  %v2821_v60 = vld [vmem:[%s3789_s5 + $0x44] ss:$16 sps:$4 sm:$0xff]  }
 0x11d   :  { %1376 = vmatprep.mubr.bf16.mxu0 %v551_v32  ;;  %1458 = vmatprep.mubr.bf16.mxu1 %v551_v32  ;;  %v2785_v32 = vld [vmem:[%s3788_s3 + $0x1384] ss:$16 sps:$4 sm:$0xff]   ;;  %v2822_v63 = vld [vmem:[%s3789_s5 + $0x48] ss:$16 sps:$4 sm:$0xff]  }
 0x11e   :  { %1377 = vmatmul.mubr.bf16.vlgmr.msra.gmra.mrb[4].mxu0 %v550_v35  ;;  %1459 = vmatmul.mubr.bf16.vlgmr.msra.gmra.mrb[4].mxu1 %v550_v35  ;;  %v2783_v35 = vld [vmem:[%s3788_s3 + $0x1380] ss:$16 sps:$4 sm:$0xff]  }
 0x11f   :  { %1386 = vmatpush1.bf16.msra.mxu0 %v2711_v33  ;;  %1468 = vmatpush1.bf16.msra.mxu1 %v2714_v34  ;;  %v2788_v33 = vld [vmem:[%s3788_s3 + $0x138c] ss:$16 sps:$4 sm:$0xff]   ;;  %v3524_v34 = vsub.s32 2, %v2977_v14 }
 0x120   :  { %1387 = vmatprep.subr.bf16.mxu0 %v2719_v36  ;;  %1469 = vmatprep.subr.bf16.mxu1 %v2722_v37  ;;  %v2786_v36 = vld [vmem:[%s3788_s3 + $0x1388] ss:$16 sps:$4 sm:$0xff]   ;;  %v2791_v37 = vld [vmem:[%s3788_s3 + $0x13a4] ss:$16 sps:$4 sm:$0xff]   ;;  %v2794_v14 = vld [vmem:[%s3788_s3 + $0x13ac] ss:$16 sps:$4 sm:$0xff]  }
 0x121   :  { %1417 = vmatprep.mubr.bf16.mxu0 %v553_v3  ;;  %1499 = vmatprep.mubr.bf16.mxu1 %v553_v3  ;;  %v2828_v3 = vld [vmem:[%s3789_s5 + $0x68] ss:$16 sps:$4 sm:$0xff]  }
 0x123   :  { %1388 = vmatpush1.bf16.msra.mxu0 %v2717_v38  ;;  %1470 = vmatpush1.bf16.msra.mxu1 %v2720_v39  ;;  %v110_v38 = vrot.slane %v3363_v18, %v3524_v34  ;;  %v2789_v39 = vld [vmem:[%s3788_s3 + $0x13a0] ss:$16 sps:$4 sm:$0xff]   ;;  %v2800_v18 = vld [vmem:[%s3788_s3 + $0x13cc] ss:$16 sps:$4 sm:$0xff]  }
 0x124   :  { %1389 = vmatprep.subr.bf16.mxu0 %v2725_v40  ;;  %1471 = vmatprep.subr.bf16.mxu1 %v2728_v41  ;;  %v2792_v40 = vld [vmem:[%s3788_s3 + $0x13a8] ss:$16 sps:$4 sm:$0xff]   ;;  %v2797_v41 = vld [vmem:[%s3788_s3 + $0x13c4] ss:$16 sps:$4 sm:$0xff]  }
 0x127   :  { %1390 = vmatpush1.bf16.msra.mxu0 %v2723_v42  ;;  %1472 = vmatpush1.bf16.msra.mxu1 %v2726_v43  ;;  %v540_v42 = vadd.f32 %v3431_v54, %v110_v38  ;;  %v2795_v43 = vld [vmem:[%s3788_s3 + $0x13c0] ss:$16 sps:$4 sm:$0xff]   ;;  %v2875_v38 = vld [vmem:[%s3789_s5 + $0x164] ss:$16 sps:$4 sm:$0xff]  }
 0x128   :  { %1391 = vmatprep.subr.bf16.mxu0 %v2731_v44  ;;  %1473 = vmatprep.subr.bf16.mxu1 %v2734_v45  ;;  %v2798_v44 = vld [vmem:[%s3788_s3 + $0x13c8] ss:$16 sps:$4 sm:$0xff]   ;;  %v2803_v45 = vld [vmem:[%s3788_s3 + $0x13e4] ss:$16 sps:$4 sm:$0xff]   ;;  %v2807_v54 = vld [vmem:[%s3789_s5] ss:$16 sps:$4 sm:$0xff]  }
 0x12b   :  { %1392 = vmatpush1.bf16.msra.mxu0 %v2729_v47  ;;  %1474 = vmatpush1.bf16.msra.mxu1 %v2732_v48  ;;  %v2806_v47 = vld [vmem:[%s3788_s3 + $0x13ec] ss:$16 sps:$4 sm:$0xff]   ;;  %v548_v48 = vmax.f32 %v540_v42, 0.0 }
 0x12c   :  { %1393 = vmatprep.subr.bf16.mxu0 %v2737_v49  ;;  %1475 = vmatprep.subr.bf16.mxu1 %v2740_v50  ;;  %v2801_v49 = vld [vmem:[%s3788_s3 + $0x13e0] ss:$16 sps:$4 sm:$0xff]   ;;  %v2804_v50 = vld [vmem:[%s3788_s3 + $0x13e8] ss:$16 sps:$4 sm:$0xff]   ;;  %v2884_v42 = vld [vmem:[%s3789_s5 + $0x18c] ss:$16 sps:$4 sm:$0xff]  }
 0x12f   :  { %1394 = vmatpush1.bf16.msra.mxu0 %v2735_v52  ;;  %1476 = vmatpush1.bf16.msra.mxu1 %v2738_v53  ;;  %v2812_v52 = vld [vmem:[%s3789_s5 + $0xc] ss:$16 sps:$4 sm:$0xff]   ;;  %v552_v53 = vpack.c.bf16 %v548_v48, %v548_v48  ;;  %v2885_v48 = vld [vmem:[%s3789_s5 + $0x1a0] ss:$16 sps:$4 sm:$0xff]  }
 0x130   :  { %1395 = vmatprep.subr.bf16.mxu0 %v2743_v55  ;;  %1477 = vmatprep.subr.bf16.mxu1 %v2746_v56  ;;  %v2810_v55 = vld [vmem:[%s3789_s5 + $0x8] ss:$16 sps:$4 sm:$0xff]   ;;  %v2815_v56 = vld [vmem:[%s3789_s5 + $0x24] ss:$16 sps:$4 sm:$0xff]  }
 0x133   :  { %1396 = vmatpush1.bf16.msra.mxu0 %v2741_v61  ;;  %1478 = vmatpush1.bf16.msra.mxu1 %v2744_v62  ;;  %v2824_v61 = vld [vmem:[%s3789_s5 + $0x4c] ss:$16 sps:$4 sm:$0xff]   ;;  %v2819_v62 = vld [vmem:[%s3789_s5 + $0x40] ss:$16 sps:$4 sm:$0xff]  }
 0x134   :  { %1397 = vmatprep.subr.bf16.mxu0 %v2749_v1  ;;  %1479 = vmatprep.subr.bf16.mxu1 %v2752_v2  ;;  %v2827_v1 = vld [vmem:[%s3789_s5 + $0x64] ss:$16 sps:$4 sm:$0xff]   ;;  %v2825_v2 = vld [vmem:[%s3789_s5 + $0x60] ss:$16 sps:$4 sm:$0xff]  }
 0x137   :  { %1398 = vmatpush1.bf16.msra.mxu0 %v2747_v4  ;;  %1480 = vmatpush1.bf16.msra.mxu1 %v2750_v5  ;;  %v2833_v4 = vld [vmem:[%s3789_s5 + $0x84] ss:$16 sps:$4 sm:$0xff]   ;;  %v2836_v5 = vld [vmem:[%s3789_s5 + $0x8c] ss:$16 sps:$4 sm:$0xff]  }
 0x138   :  { %1399 = vmatprep.subr.bf16.mxu0 %v2755_v6  ;;  %1481 = vmatprep.subr.bf16.mxu1 %v2758_v7  ;;  %v2831_v6 = vld [vmem:[%s3789_s5 + $0x80] ss:$16 sps:$4 sm:$0xff]   ;;  %v2834_v7 = vld [vmem:[%s3789_s5 + $0x88] ss:$16 sps:$4 sm:$0xff]  }
 0x13b   :  { %1400 = vmatpush1.bf16.msra.mxu0 %v2753_v8  ;;  %1482 = vmatpush1.bf16.msra.mxu1 %v2756_v9  ;;  %v2839_v8 = vld [vmem:[%s3789_s5 + $0xa4] ss:$16 sps:$4 sm:$0xff]   ;;  %v2842_v9 = vld [vmem:[%s3789_s5 + $0xac] ss:$16 sps:$4 sm:$0xff]  }
 0x13c   :  { %1401 = vmatprep.subr.bf16.mxu0 %v2761_v10  ;;  %1483 = vmatprep.subr.bf16.mxu1 %v2764_v11  ;;  %v2837_v10 = vld [vmem:[%s3789_s5 + $0xa0] ss:$16 sps:$4 sm:$0xff]   ;;  %v2840_v11 = vld [vmem:[%s3789_s5 + $0xa8] ss:$16 sps:$4 sm:$0xff]  }
 0x13f   :  { %1402 = vmatpush1.bf16.msra.mxu0 %v2759_v12  ;;  %1484 = vmatpush1.bf16.msra.mxu1 %v2762_v13  ;;  %v2845_v12 = vld [vmem:[%s3789_s5 + $0xc4] ss:$16 sps:$4 sm:$0xff]   ;;  %v2848_v13 = vld [vmem:[%s3789_s5 + $0xcc] ss:$16 sps:$4 sm:$0xff]  }
 0x140   :  { %1403 = vmatprep.subr.bf16.mxu0 %v2767_v15  ;;  %1485 = vmatprep.subr.bf16.mxu1 %v2770_v16  ;;  %v2843_v15 = vld [vmem:[%s3789_s5 + $0xc0] ss:$16 sps:$4 sm:$0xff]   ;;  %v2846_v16 = vld [vmem:[%s3789_s5 + $0xc8] ss:$16 sps:$4 sm:$0xff]  }
 0x143   :  { %1404 = vmatpush1.bf16.msra.mxu0 %v2765_v20  ;;  %1486 = vmatpush1.bf16.msra.mxu1 %v2768_v22  ;;  %v2851_v20 = vld [vmem:[%s3789_s5 + $0xe4] ss:$16 sps:$4 sm:$0xff]   ;;  %v2854_v22 = vld [vmem:[%s3789_s5 + $0xec] ss:$16 sps:$4 sm:$0xff]  }
 0x144   :  { %1405 = vmatprep.subr.bf16.mxu0 %v2773_v23  ;;  %1487 = vmatprep.subr.bf16.mxu1 %v2776_v24  ;;  %v2849_v23 = vld [vmem:[%s3789_s5 + $0xe0] ss:$16 sps:$4 sm:$0xff]   ;;  %v2852_v24 = vld [vmem:[%s3789_s5 + $0xe8] ss:$16 sps:$4 sm:$0xff]  }
 0x147   :  { %1406 = vmatpush1.bf16.msra.mxu0 %v2771_v25  ;;  %1488 = vmatpush1.bf16.msra.mxu1 %v2774_v26  ;;  %v2857_v25 = vld [vmem:[%s3789_s5 + $0x104] ss:$16 sps:$4 sm:$0xff]   ;;  %v2860_v26 = vld [vmem:[%s3789_s5 + $0x10c] ss:$16 sps:$4 sm:$0xff]  }
 0x148   :  { %1407 = vmatprep.subr.bf16.mxu0 %v2779_v28  ;;  %1489 = vmatprep.subr.bf16.mxu1 %v2782_v29  ;;  %v2855_v28 = vld [vmem:[%s3789_s5 + $0x100] ss:$16 sps:$4 sm:$0xff]   ;;  %v2858_v29 = vld [vmem:[%s3789_s5 + $0x108] ss:$16 sps:$4 sm:$0xff]  }
 0x14b   :  { %1408 = vmatpush1.bf16.msra.mxu0 %v2777_v30  ;;  %1490 = vmatpush1.bf16.msra.mxu1 %v2780_v31  ;;  %v2863_v30 = vld [vmem:[%s3789_s5 + $0x124] ss:$16 sps:$4 sm:$0xff]   ;;  %v2866_v31 = vld [vmem:[%s3789_s5 + $0x12c] ss:$16 sps:$4 sm:$0xff]  }
 0x14c   :  { %1409 = vmatprep.subr.bf16.mxu0 %v2785_v32  ;;  %1491 = vmatprep.subr.bf16.mxu1 %v2788_v33  ;;  %v2861_v32 = vld [vmem:[%s3789_s5 + $0x120] ss:$16 sps:$4 sm:$0xff]   ;;  %v2864_v33 = vld [vmem:[%s3789_s5 + $0x128] ss:$16 sps:$4 sm:$0xff]  }
 0x14f   :  { %1410 = vmatpush1.bf16.msra.mxu0 %v2783_v35  ;;  %1492 = vmatpush1.bf16.msra.mxu1 %v2786_v36  ;;  %v2869_v35 = vld [vmem:[%s3789_s5 + $0x144] ss:$16 sps:$4 sm:$0xff]   ;;  %v2872_v36 = vld [vmem:[%s3789_s5 + $0x14c] ss:$16 sps:$4 sm:$0xff]  }
 0x150   :  { %1411 = vmatprep.subr.bf16.mxu0 %v2791_v37  ;;  %1493 = vmatprep.subr.bf16.mxu1 %v2794_v14  ;;  %v2867_v37 = vld [vmem:[%s3789_s5 + $0x140] ss:$16 sps:$4 sm:$0xff]   ;;  %v2870_v14 = vld [vmem:[%s3789_s5 + $0x148] ss:$16 sps:$4 sm:$0xff]  }
 0x153   :  { %1412 = vmatpush1.bf16.msra.mxu0 %v2789_v39  ;;  %1494 = vmatpush1.bf16.msra.mxu1 %v2792_v40  ;;  %v2878_v39 = vld [vmem:[%s3789_s5 + $0x16c] ss:$16 sps:$4 sm:$0xff]   ;;  %v2873_v40 = vld [vmem:[%s3789_s5 + $0x160] ss:$16 sps:$4 sm:$0xff]  }
 0x154   :  { %1413 = vmatprep.subr.bf16.mxu0 %v2797_v41  ;;  %1495 = vmatprep.subr.bf16.mxu1 %v2800_v18  ;;  %v2876_v41 = vld [vmem:[%s3789_s5 + $0x168] ss:$16 sps:$4 sm:$0xff]   ;;  %v2881_v18 = vld [vmem:[%s3789_s5 + $0x184] ss:$16 sps:$4 sm:$0xff]  }
 0x157   :  { %1414 = vmatpush1.bf16.msra.mxu0 %v2795_v43  ;;  %1496 = vmatpush1.bf16.msra.mxu1 %v2798_v44  ;;  %v2879_v43 = vld [vmem:[%s3789_s5 + $0x180] ss:$16 sps:$4 sm:$0xff]   ;;  %v2882_v44 = vld [vmem:[%s3789_s5 + $0x188] ss:$16 sps:$4 sm:$0xff]  }
 0x158   :  { %1415 = vmatprep.subr.bf16.mxu0 %v2803_v45  ;;  %1497 = vmatprep.subr.bf16.mxu1 %v2806_v47  ;;  %v2887_v45 = vld [vmem:[%s3789_s5 + $0x1a4] ss:$16 sps:$4 sm:$0xff]   ;;  %v2890_v47 = vld [vmem:[%s3789_s5 + $0x1ac] ss:$16 sps:$4 sm:$0xff]  }
 0x15b   :  { %1416 = vmatpush1.bf16.msra.mxu0 %v2801_v49  ;;  %1498 = vmatpush1.bf16.msra.mxu1 %v2804_v50  ;;  %v2888_v49 = vld [vmem:[%s3789_s5 + $0x1a8] ss:$16 sps:$4 sm:$0xff]   ;;  %v2893_v50 = vld [vmem:[%s3789_s5 + $0x1c4] ss:$16 sps:$4 sm:$0xff]  }
 0x15c   :  { %1914 = vmatprep.subr.bf16.mxu0 %v2809_v51  ;;  %1955 = vmatprep.subr.bf16.mxu1 %v2812_v52  ;;  %v2896_v51 = vld [vmem:[%s3789_s5 + $0x1cc] ss:$16 sps:$4 sm:$0xff]   ;;  %v2891_v52 = vld [vmem:[%s3789_s5 + $0x1c0] ss:$16 sps:$4 sm:$0xff]  }
 0x15e   :  { %1418 = vmatmul.mubr.bf16.vlgmr.msra.gmra.mrb[4].mxu0 %v552_v53  ;;  %1500 = vmatmul.mubr.bf16.vlgmr.msra.gmra.mrb[4].mxu1 %v552_v53  ;;  %v2894_v53 = vld [vmem:[%s3789_s5 + $0x1c8] ss:$16 sps:$4 sm:$0xff]  }
 0x15f   :  { %1915 = vmatpush1.bf16.msra.mxu0 %v2807_v54  ;;  %1956 = vmatpush1.bf16.msra.mxu1 %v2810_v55  ;;  %v2899_v54 = vld [vmem:[%s3789_s5 + $0x1e4] ss:$16 sps:$4 sm:$0xff]   ;;  %v2902_v55 = vld [vmem:[%s3789_s5 + $0x1ec] ss:$16 sps:$4 sm:$0xff]  }
 0x160   :  { %1916 = vmatprep.subr.bf16.mxu0 %v2815_v56  ;;  %1957 = vmatprep.subr.bf16.mxu1 %v2818_v57  ;;  %v2897_v56 = vld [vmem:[%s3789_s5 + $0x1e0] ss:$16 sps:$4 sm:$0xff]   ;;  %v2900_v57 = vld [vmem:[%s3789_s5 + $0x1e8] ss:$16 sps:$4 sm:$0xff]  }
 0x161   :  { %1946 = vmatprep.mubr.bf16.mxu0 %v3014_v27  ;;  %1987 = vmatprep.mubr.bf16.mxu1 %v3014_v27  ;;  %v2830_v27 = vld [vmem:[%s3789_s5 + $0x6c] ss:$16 sps:$4 sm:$0xff]  }
 0x163   :  { %1917 = vmatpush1.bf16.msra.mxu0 %v2813_v58  ;;  %1958 = vmatpush1.bf16.msra.mxu1 %v2816_v59  ;;  %v682_v58 = vld [vmem:[%s3791_s4] sm:$0xf] }
 0x164   :  { %1918 = vmatprep.subr.bf16.mxu0 %v2821_v60  ;;  %1959 = vmatprep.subr.bf16.mxu1 %v2824_v61  ;;  %v1572_v59 = vld [vmem:[%s3792_s6] sm:$0xf]  ;;  %v687_v60 = vrot.slane %v682_v58, %v3358_v17 }
 0x165   :  { %v1577_v61 = vrot.slane %v1572_v59, %v3358_v17 }
 0x167   :  { %1919 = vmatpush1.bf16.msra.mxu0 %v2819_v62  ;;  %1960 = vmatpush1.bf16.msra.mxu1 %v2822_v63  ;;  %v695_v62 = vrot.slane %v682_v58, %v3524_v34  ;;  %v1585_v63 = vrot.slane %v1572_v59, %v3524_v34 }
 0x168   :  { %1920 = vmatprep.subr.bf16.mxu0 %v2827_v1  ;;  %1961 = vmatprep.subr.bf16.mxu1 %v2830_v27  ;;  %v691_v1 = vrot.slane %v682_v58, %v3366_v19  ;;  %v699_v27 = vrot.slane %v682_v58, %v3409_v46 }
 0x16b   :  { %1921 = vmatpush1.bf16.msra.mxu0 %v2825_v2  ;;  %1962 = vmatpush1.bf16.msra.mxu1 %v2828_v3  ;;  %v1589_v2 = vrot.slane %v1572_v59, %v3409_v46  ;;  %v2494_v3 = vadd.f32 %v1577_v61, %v687_v60 }
 0x16c   :  { %1922 = vmatprep.subr.bf16.mxu0 %v2833_v4  ;;  %1963 = vmatprep.subr.bf16.mxu1 %v2836_v5  ;;  %v2498_v4 = vadd.f32 %v1585_v63, %v695_v62 }
 0x16f   :  { %1923 = vmatpush1.bf16.msra.mxu0 %v2831_v6  ;;  %1964 = vmatpush1.bf16.msra.mxu1 %v2834_v7  ;;  %v2500_v6 = vadd.f32 %v1589_v2, %v699_v27 }
 0x170   :  { %1924 = vmatprep.subr.bf16.mxu0 %v2839_v8  ;;  %1965 = vmatprep.subr.bf16.mxu1 %v2842_v9 }
 0x173   :  { %1925 = vmatpush1.bf16.msra.mxu0 %v2837_v10  ;;  %1966 = vmatpush1.bf16.msra.mxu1 %v2840_v11 }
 0x174   :  { %1926 = vmatprep.subr.bf16.mxu0 %v2845_v12  ;;  %1967 = vmatprep.subr.bf16.mxu1 %v2848_v13 }
 0x177   :  { %1927 = vmatpush1.bf16.msra.mxu0 %v2843_v15  ;;  %1968 = vmatpush1.bf16.msra.mxu1 %v2846_v16 }
 0x178   :  { %1928 = vmatprep.subr.bf16.mxu0 %v2851_v20  ;;  %1969 = vmatprep.subr.bf16.mxu1 %v2854_v22 }
 0x17b   :  { %1929 = vmatpush1.bf16.msra.mxu0 %v2849_v23  ;;  %1970 = vmatpush1.bf16.msra.mxu1 %v2852_v24 }
 0x17c   :  { %1930 = vmatprep.subr.bf16.mxu0 %v2857_v25  ;;  %1971 = vmatprep.subr.bf16.mxu1 %v2860_v26 }
 0x17f   :  { %1931 = vmatpush1.bf16.msra.mxu0 %v2855_v28  ;;  %1972 = vmatpush1.bf16.msra.mxu1 %v2858_v29 }
 0x180   :  { %1932 = vmatprep.subr.bf16.mxu0 %v2863_v30  ;;  %1973 = vmatprep.subr.bf16.mxu1 %v2866_v31 }
 0x183   :  { %1933 = vmatpush1.bf16.msra.mxu0 %v2861_v32  ;;  %1974 = vmatpush1.bf16.msra.mxu1 %v2864_v33 }
 0x184   :  { %1934 = vmatprep.subr.bf16.mxu0 %v2869_v35  ;;  %1975 = vmatprep.subr.bf16.mxu1 %v2872_v36 }
 0x187   :  { %1935 = vmatpush1.bf16.msra.mxu0 %v2867_v37  ;;  %1976 = vmatpush1.bf16.msra.mxu1 %v2870_v14 }
 0x188   :  { %1936 = vmatprep.subr.bf16.mxu0 %v2875_v38  ;;  %1977 = vmatprep.subr.bf16.mxu1 %v2878_v39 }
 0x18b   :  { %1937 = vmatpush1.bf16.msra.mxu0 %v2873_v40  ;;  %1978 = vmatpush1.bf16.msra.mxu1 %v2876_v41 }
 0x18c   :  { %1938 = vmatprep.subr.bf16.mxu0 %v2881_v18  ;;  %1979 = vmatprep.subr.bf16.mxu1 %v2884_v42 }
 0x18f   :  { %1939 = vmatpush1.bf16.msra.mxu0 %v2879_v43  ;;  %1980 = vmatpush1.bf16.msra.mxu1 %v2882_v44 }
 0x190   :  { %1940 = vmatprep.subr.bf16.mxu0 %v2887_v45  ;;  %1981 = vmatprep.subr.bf16.mxu1 %v2890_v47 }
 0x193   :  { %1941 = vmatpush1.bf16.msra.mxu0 %v2885_v48  ;;  %1982 = vmatpush1.bf16.msra.mxu1 %v2888_v49 }
 0x194   :  { %1942 = vmatprep.subr.bf16.mxu0 %v2893_v50  ;;  %1983 = vmatprep.subr.bf16.mxu1 %v2896_v51 }
 0x197   :  { %1943 = vmatpush1.bf16.msra.mxu0 %v2891_v52  ;;  %1984 = vmatpush1.bf16.msra.mxu1 %v2894_v53 }
 0x198   :  { %1944 = vmatprep.subr.bf16.mxu0 %v2899_v54  ;;  %1985 = vmatprep.subr.bf16.mxu1 %v2902_v55 }
 0x19b   :  { %1945 = vmatpush1.bf16.msra.mxu0 %v2897_v56  ;;  %1986 = vmatpush1.bf16.msra.mxu1 %v2900_v57 }
 0x19e   :  { %1947 = vmatmul.mubr.bf16.vlgmr.msra.gmra.mrb[4].mxu0 %v3128_v0  ;;  %1988 = vmatmul.mubr.bf16.vlgmr.msra.gmra.mrb[4].mxu1 %v3128_v0  ;;  %v1581_v0 = vrot.slane %v1572_v59, %v3366_v19 }
 0x1a0   :  { %v2496_v5 = vadd.f32 %v1581_v0, %v691_v1 }
 0x271   :  { %v1948_v7 = vpop.f32.mrb[4].mxu0  ;;  %v1989_v8 = vpop.f32.mrb[4].mxu1 }
 0x272   :  { %v2495_v9 = vadd.f32 %v2494_v3, %v1948_v7  ;;  %v2499_v17 = vadd.f32 %v2498_v4, %v1989_v8  ;;  %v1950_v10 = vpop.f32.mrb[5].mxu0  ;;  %v1991_v11 = vpop.f32.mrb[5].mxu1 }
 0x273   :  { %v2497_v12 = vadd.f32 %v2496_v5, %v1950_v10  ;;  %v2501_v34 = vadd.f32 %v2500_v6, %v1991_v11  ;;  %v1952_v13 = vpop.f32.mrb[6].mxu0  ;;  %v1993_v15 = vpop.f32.mrb[6].mxu1 }
 0x274   :  { %v2000_v16 = vmax.f32 %v2495_v9, 0.0  ;;  %v2002_v19 = vmax.f32 %v2499_v17, 0.0  ;;  %v1953_v20 = vpop.f32.mrb[7].mxu0  ;;  %v1994_v22 = vpop.f32.mrb[7].mxu1 }
 0x275   :  { %v2001_v23 = vmax.f32 %v2497_v12, 0.0  ;;  %v2003_v46 = vmax.f32 %v2501_v34, 0.0 }
 0x277   :  { %v2491_v24 = vpack.c.bf16 %v2001_v23, %v2000_v16  ;;  %v2492_v25 = vpack.c.bf16 %v2003_v46, %v2002_v19 }
 0x279   :  { %v2020_v26 = vrot.slane %v2491_v24, %v2995_v21  ;;  %v2027_v28 = vrot.slane %v2492_v25, %v2995_v21 }
 0x27b   :  { %v2028_v29 = vcombine.low %v2020_v26, %v2027_v28 }
 0x27d   :  { %2493 = vst.sshfl [vmem:[%s3793_s7] sm:$0x55 pattern:$0x73625140] %v2028_v29 }

// kernel: _lambda_.15
= control target key start
LH: loop header
LB: loop body
LE: loop exit
PB: predicated region body
PF: predicated region fallthrough
CT: control target
= control target key end

     0   :  { %s3337_s18 = smov 0   ;;  %s3685_s0 = inlined_call_operand.vmem [shape: bf16[2,512], index: 0, kind: input, shape index: {}]   ;;  %s3686_s1 = inlined_call_operand.vmem [shape: bf16[2,4608,512], index: 1, kind: input, shape index: {}]   ;;  %s3687_s2 = inlined_call_operand.vmem [shape: f32[2,1,512], index: 2, kind: input, shape index: {}, may-alias: {2,4}]   ;;  %s3688_s3 = inlined_call_operand.vmem [shape: bf16[2,4608,512], index: 3, kind: input, shape index: {}]   ;;  %s3689_s4 = inlined_call_operand.vmem [shape: f32[2,1,512], index: 4, kind: input, shape index: {}, may-alias: {2,4}]   ;;  %s3690_s5 = inlined_call_operand.vmem [shape: bf16[2,512], index: 5, kind: output, shape index: {}]  }
   0x1 LB: > { %s2363_s19 = sadd.s32 4294967295, %s3303_s18   ;;  %p2366_p0 = scmp.ge.s32.totalorder %s3303_s18, 1  ;;  %s3303_s18 = sphi %s3337_s18, %s15_s18  }
   0x2   : > { %p212_p1 = scmp.lt.s32.totalorder %s3303_s18, 3 }
   0x4   : > { %p213_p2 = pnand %p2366_p0, %p212_p1 }
   0x5   : > { %p250_p3 = scmp.lt.s32.totalorder (!%p213_p2), %s2363_s19, 1  ;;  %p2371_p4 = scmp.ne.s32.totalorder (!%p213_p2), %s2363_s19, 0 }
   0x6   : > { %216 = sbr.rel (%p213_p2) target bundleno = 662 (0x296), region = 40 }
   0xd   : > { %s251_s20 = scalar_select %p250_p3, %s2363_s19, 1 }
   0xe   : > { %273 = sbr.rel (%p2371_p4) target bundleno = 21 (0x15), region = 44  ;;  %v274_v0 = vld [vmem:[%s3685_s0] sm:$0xf] (!%p2371_p4) }
   0xf   : > { %s2367_s21 = smul.u32 9216, %s251_s20  ;;  %s2368_s22 = sshll.u32 %s251_s20, 2  ;;  %275 = vst [vmem:[%s3690_s5] sm:$0xf] (!%p2371_p4), %v274_v0 }
  0x10   : > { %s3348_s25 = scalar_lea.vmem %s3687_s2, %s2368_s22  ;;  %s3353_s28 = scalar_lea.vmem %s3689_s4, %s2368_s22 }
  0x11   : > { %s3358_s6 = scalar_lea.vmem %s3686_s1, %s2367_s21  ;;  %s3363_s9 = scalar_lea.vmem %s3688_s3, %s2367_s21 }
  0x15 PF: > { %v2911_v1 = vld [vmem:[%s3358_s6 + $0x1004] ss:$16 sps:$4 sm:$0xff]   ;;  %v2913_v2 = vld [vmem:[%s3358_s6 + $0x100c] ss:$16 sps:$4 sm:$0xff]   ;;  %v2915_v3 = vld [vmem:[%s3358_s6 + $0x1000] ss:$16 sps:$4 sm:$0xff]   ;;  %v407_v37 = vlaneseq }
  0x16   : > { %1096 = vmatprep.subr.bf16.mxu0 %v2911_v1  ;;  %v2916_v4 = vld [vmem:[%s3358_s6 + $0x1008] ss:$16 sps:$4 sm:$0xff]   ;;  %1178 = vmatprep.subr.bf16.mxu1 %v2913_v2  ;;  %v2917_v5 = vld [vmem:[%s3358_s6 + $0x1024] ss:$16 sps:$4 sm:$0xff]   ;;  %v2919_v6 = vld [vmem:[%s3358_s6 + $0x102c] ss:$16 sps:$4 sm:$0xff]  }
  0x17   : > { %1097 = vmatpush1.bf16.msra.mxu0 %v2915_v3  ;;  %1179 = vmatpush1.bf16.msra.mxu1 %v2916_v4  ;;  %v2921_v7 = vld [vmem:[%s3358_s6 + $0x1020] ss:$16 sps:$4 sm:$0xff]   ;;  %v2922_v8 = vld [vmem:[%s3358_s6 + $0x1028] ss:$16 sps:$4 sm:$0xff]   ;;  %v2923_v9 = vld [vmem:[%s3358_s6 + $0x1044] ss:$16 sps:$4 sm:$0xff]  }
  0x18   : > { %1098 = vmatprep.subr.bf16.mxu0 %v2917_v5  ;;  %1180 = vmatprep.subr.bf16.mxu1 %v2919_v6  ;;  %v2925_v10 = vld [vmem:[%s3358_s6 + $0x104c] ss:$16 sps:$4 sm:$0xff]   ;;  %v2927_v11 = vld [vmem:[%s3358_s6 + $0x1040] ss:$16 sps:$4 sm:$0xff]   ;;  %v2928_v12 = vld [vmem:[%s3358_s6 + $0x1048] ss:$16 sps:$4 sm:$0xff]  }
  0x19   : > { %v2929_v13 = vld [vmem:[%s3358_s6 + $0x1064] ss:$16 sps:$4 sm:$0xff]   ;;  %v2931_v14 = vld [vmem:[%s3358_s6 + $0x106c] ss:$16 sps:$4 sm:$0xff]   ;;  %v2933_v15 = vld [vmem:[%s3358_s6 + $0x1060] ss:$16 sps:$4 sm:$0xff]  }
  0x1a   : > { %v2934_v16 = vld [vmem:[%s3358_s6 + $0x1068] ss:$16 sps:$4 sm:$0xff]   ;;  %v2935_v17 = vld [vmem:[%s3358_s6 + $0x1084] ss:$16 sps:$4 sm:$0xff]   ;;  %v2937_v18 = vld [vmem:[%s3358_s6 + $0x108c] ss:$16 sps:$4 sm:$0xff]  }
  0x1b   : > { %1099 = vmatpush1.bf16.msra.mxu0 %v2921_v7  ;;  %1181 = vmatpush1.bf16.msra.mxu1 %v2922_v8  ;;  %v2939_v19 = vld [vmem:[%s3358_s6 + $0x1080] ss:$16 sps:$4 sm:$0xff]   ;;  %v2940_v20 = vld [vmem:[%s3358_s6 + $0x1088] ss:$16 sps:$4 sm:$0xff]   ;;  %v2941_v21 = vld [vmem:[%s3358_s6 + $0x10a4] ss:$16 sps:$4 sm:$0xff]  }
  0x1c   : > { %1100 = vmatprep.subr.bf16.mxu0 %v2923_v9  ;;  %1182 = vmatprep.subr.bf16.mxu1 %v2925_v10  ;;  %v2943_v22 = vld [vmem:[%s3358_s6 + $0x10ac] ss:$16 sps:$4 sm:$0xff]   ;;  %v2945_v23 = vld [vmem:[%s3358_s6 + $0x10a0] ss:$16 sps:$4 sm:$0xff]   ;;  %v2946_v24 = vld [vmem:[%s3358_s6 + $0x10a8] ss:$16 sps:$4 sm:$0xff]  }
  0x1d   : > { %v2947_v25 = vld [vmem:[%s3358_s6 + $0x10c4] ss:$16 sps:$4 sm:$0xff]   ;;  %v2949_v26 = vld [vmem:[%s3358_s6 + $0x10cc] ss:$16 sps:$4 sm:$0xff]   ;;  %v2951_v27 = vld [vmem:[%s3358_s6 + $0x10c0] ss:$16 sps:$4 sm:$0xff]  }
  0x1e   : > { %v2952_v28 = vld [vmem:[%s3358_s6 + $0x10c8] ss:$16 sps:$4 sm:$0xff]   ;;  %v2953_v29 = vld [vmem:[%s3358_s6 + $0x10e4] ss:$16 sps:$4 sm:$0xff]   ;;  %v2955_v30 = vld [vmem:[%s3358_s6 + $0x10ec] ss:$16 sps:$4 sm:$0xff]  }
  0x1f   : > { %1101 = vmatpush1.bf16.msra.mxu0 %v2927_v11  ;;  %1183 = vmatpush1.bf16.msra.mxu1 %v2928_v12  ;;  %v2957_v31 = vld [vmem:[%s3358_s6 + $0x10e0] ss:$16 sps:$4 sm:$0xff]   ;;  %v2958_v32 = vld [vmem:[%s3358_s6 + $0x10e8] ss:$16 sps:$4 sm:$0xff]   ;;  %v2959_v33 = vld [vmem:[%s3358_s6 + $0x1104] ss:$16 sps:$4 sm:$0xff]  }
  0x20   : > { %1102 = vmatprep.subr.bf16.mxu0 %v2929_v13  ;;  %1184 = vmatprep.subr.bf16.mxu1 %v2931_v14  ;;  %v2961_v34 = vld [vmem:[%s3358_s6 + $0x110c] ss:$16 sps:$4 sm:$0xff]   ;;  %v2963_v35 = vld [vmem:[%s3358_s6 + $0x1100] ss:$16 sps:$4 sm:$0xff]   ;;  %v2964_v36 = vld [vmem:[%s3358_s6 + $0x1108] ss:$16 sps:$4 sm:$0xff]  }
  0x21   : > { %v3305_v38 = vmov 1966171168   ;;  %v2965_v40 = vld [vmem:[%s3358_s6 + $0x1124] ss:$16 sps:$4 sm:$0xff]   ;;  %v2967_v41 = vld [vmem:[%s3358_s6 + $0x112c] ss:$16 sps:$4 sm:$0xff]  }
  0x22   : > { %v429_v39 = vunpack.c.l.s4 %v3305_v38  ;;  %v2969_v42 = vld [vmem:[%s3358_s6 + $0x1120] ss:$16 sps:$4 sm:$0xff]   ;;  %v3410_v43 = vshrl.u32 %v407_v37, 7  ;;  %v2970_v45 = vld [vmem:[%s3358_s6 + $0x1128] ss:$16 sps:$4 sm:$0xff]  }
  0x23   : > { %1103 = vmatpush1.bf16.msra.mxu0 %v2933_v15  ;;  %1185 = vmatpush1.bf16.msra.mxu1 %v2934_v16  ;;  %v2971_v46 = vld [vmem:[%s3358_s6 + $0x1144] ss:$16 sps:$4 sm:$0xff]   ;;  %v2973_v47 = vld [vmem:[%s3358_s6 + $0x114c] ss:$16 sps:$4 sm:$0xff]   ;;  %v2975_v48 = vld [vmem:[%s3358_s6 + $0x1140] ss:$16 sps:$4 sm:$0xff]  }
  0x24   : > { %1104 = vmatprep.subr.bf16.mxu0 %v2935_v17  ;;  %1186 = vmatprep.subr.bf16.mxu1 %v2937_v18  ;;  %v430_v44 = vunpack.c.0.s8 %v429_v39  ;;  %v2976_v49 = vld [vmem:[%s3358_s6 + $0x1148] ss:$16 sps:$4 sm:$0xff]   ;;  %v2977_v51 = vld [vmem:[%s3358_s6 + $0x1164] ss:$16 sps:$4 sm:$0xff]   ;;  %v2979_v52 = vld [vmem:[%s3358_s6 + $0x116c] ss:$16 sps:$4 sm:$0xff]  }
  0x25   : > { %v3296_v53 = vld.sshfl [vmem:[%s3690_s5] sm:$0x33 pattern:$0x75316420]  ;;  %v2982_v55 = vld [vmem:[%s3358_s6 + $0x1168] ss:$16 sps:$4 sm:$0xff]  }
  0x26   : > { %v3418_v50 = vsub.s32 %v430_v44, %v3410_v43  ;;  %v2981_v54 = vld [vmem:[%s3358_s6 + $0x1160] ss:$16 sps:$4 sm:$0xff]   ;;  %v2983_v56 = vld [vmem:[%s3358_s6 + $0x1184] ss:$16 sps:$4 sm:$0xff]   ;;  %v2985_v57 = vld [vmem:[%s3358_s6 + $0x118c] ss:$16 sps:$4 sm:$0xff]   ;;  %v435_v58 = vcombine.high %v3296_v53, %v3296_v53 }
  0x27   : > { %1105 = vmatpush1.bf16.msra.mxu0 %v2939_v19  ;;  %1187 = vmatpush1.bf16.msra.mxu1 %v2940_v20  ;;  %v2987_v59 = vld [vmem:[%s3358_s6 + $0x1180] ss:$16 sps:$4 sm:$0xff]   ;;  %v2988_v61 = vld [vmem:[%s3358_s6 + $0x1188] ss:$16 sps:$4 sm:$0xff]   ;;  %v2989_v62 = vld [vmem:[%s3358_s6 + $0x11a4] ss:$16 sps:$4 sm:$0xff]  }
  0x28   : > { %1106 = vmatprep.subr.bf16.mxu0 %v2941_v21  ;;  %1188 = vmatprep.subr.bf16.mxu1 %v2943_v22  ;;  %v449_v60 = vrot.slane %v435_v58, %v3418_v50  ;;  %v2991_v63 = vld [vmem:[%s3358_s6 + $0x11ac] ss:$16 sps:$4 sm:$0xff]   ;;  %v2993_v0 = vld [vmem:[%s3358_s6 + $0x11a0] ss:$16 sps:$4 sm:$0xff]   ;;  %v2994_v1 = vld [vmem:[%s3358_s6 + $0x11a8] ss:$16 sps:$4 sm:$0xff]   ;;  %v3448_v13 = vrot.slane %v3296_v53, %v3418_v50 }
  0x29   : > { %v2995_v2 = vld [vmem:[%s3358_s6 + $0x11c4] ss:$16 sps:$4 sm:$0xff]   ;;  %v2997_v3 = vld [vmem:[%s3358_s6 + $0x11cc] ss:$16 sps:$4 sm:$0xff]   ;;  %v2999_v4 = vld [vmem:[%s3358_s6 + $0x11c0] ss:$16 sps:$4 sm:$0xff]  }
  0x2a   : > { %1128 = vmatprep.mubr.bf16.mxu0 %v449_v60  ;;  %1210 = vmatprep.mubr.bf16.mxu1 %v449_v60  ;;  %v3000_v5 = vld [vmem:[%s3358_s6 + $0x11c8] ss:$16 sps:$4 sm:$0xff]   ;;  %v3001_v6 = vld [vmem:[%s3358_s6 + $0x11e4] ss:$16 sps:$4 sm:$0xff]   ;;  %v3003_v7 = vld [vmem:[%s3358_s6 + $0x11ec] ss:$16 sps:$4 sm:$0xff]   ;;  %v451_v17 = vcombine.high %v449_v60, %v449_v60 }
  0x2b   : > { %1107 = vmatpush1.bf16.msra.mxu0 %v2945_v23  ;;  %1189 = vmatpush1.bf16.msra.mxu1 %v2946_v24  ;;  %v3005_v8 = vld [vmem:[%s3358_s6 + $0x11e0] ss:$16 sps:$4 sm:$0xff]   ;;  %v3006_v9 = vld [vmem:[%s3358_s6 + $0x11e8] ss:$16 sps:$4 sm:$0xff]   ;;  %v3009_v10 = vld [vmem:[%s3358_s6 + $0x1204] ss:$16 sps:$4 sm:$0xff]  }
  0x2c   : > { %1108 = vmatprep.subr.bf16.mxu0 %v2947_v25  ;;  %1190 = vmatprep.subr.bf16.mxu1 %v2949_v26  ;;  %v3012_v11 = vld [vmem:[%s3358_s6 + $0x120c] ss:$16 sps:$4 sm:$0xff]   ;;  %v3007_v12 = vld [vmem:[%s3358_s6 + $0x1200] ss:$16 sps:$4 sm:$0xff]   ;;  %v3010_v14 = vld [vmem:[%s3358_s6 + $0x1208] ss:$16 sps:$4 sm:$0xff]  }
  0x2d   : > { %v3015_v15 = vld [vmem:[%s3358_s6 + $0x1224] ss:$16 sps:$4 sm:$0xff]   ;;  %v3018_v16 = vld [vmem:[%s3358_s6 + $0x122c] ss:$16 sps:$4 sm:$0xff]   ;;  %v3013_v18 = vld [vmem:[%s3358_s6 + $0x1220] ss:$16 sps:$4 sm:$0xff]  }
  0x2e   : > { %v3016_v19 = vld [vmem:[%s3358_s6 + $0x1228] ss:$16 sps:$4 sm:$0xff]   ;;  %v3021_v20 = vld [vmem:[%s3358_s6 + $0x1244] ss:$16 sps:$4 sm:$0xff]   ;;  %v3024_v21 = vld [vmem:[%s3358_s6 + $0x124c] ss:$16 sps:$4 sm:$0xff]  }
  0x2f   : > { %1109 = vmatpush1.bf16.msra.mxu0 %v2951_v27  ;;  %1191 = vmatpush1.bf16.msra.mxu1 %v2952_v28  ;;  %v3019_v22 = vld [vmem:[%s3358_s6 + $0x1240] ss:$16 sps:$4 sm:$0xff]   ;;  %v3022_v23 = vld [vmem:[%s3358_s6 + $0x1248] ss:$16 sps:$4 sm:$0xff]   ;;  %v3027_v24 = vld [vmem:[%s3358_s6 + $0x1264] ss:$16 sps:$4 sm:$0xff]  }
  0x30   : > { %1110 = vmatprep.subr.bf16.mxu0 %v2953_v29  ;;  %1192 = vmatprep.subr.bf16.mxu1 %v2955_v30  ;;  %v3030_v25 = vld [vmem:[%s3358_s6 + $0x126c] ss:$16 sps:$4 sm:$0xff]   ;;  %v3025_v26 = vld [vmem:[%s3358_s6 + $0x1260] ss:$16 sps:$4 sm:$0xff]   ;;  %v3028_v27 = vld [vmem:[%s3358_s6 + $0x1268] ss:$16 sps:$4 sm:$0xff]  }
  0x31   : > { %v3033_v28 = vld [vmem:[%s3358_s6 + $0x1284] ss:$16 sps:$4 sm:$0xff]   ;;  %v3036_v29 = vld [vmem:[%s3358_s6 + $0x128c] ss:$16 sps:$4 sm:$0xff]   ;;  %v3031_v30 = vld [vmem:[%s3358_s6 + $0x1280] ss:$16 sps:$4 sm:$0xff]  }
  0x32   : > { %v3048_v37 = vld [vmem:[%s3358_s6 + $0x12cc] ss:$16 sps:$4 sm:$0xff]   ;;  %v3043_v38 = vld [vmem:[%s3358_s6 + $0x12c0] ss:$16 sps:$4 sm:$0xff]   ;;  %v3046_v39 = vld [vmem:[%s3358_s6 + $0x12c8] ss:$16 sps:$4 sm:$0xff]  }
  0x33   : > { %1111 = vmatpush1.bf16.msra.mxu0 %v2957_v31  ;;  %1193 = vmatpush1.bf16.msra.mxu1 %v2958_v32  ;;  %v3034_v31 = vld [vmem:[%s3358_s6 + $0x1288] ss:$16 sps:$4 sm:$0xff]   ;;  %v3039_v32 = vld [vmem:[%s3358_s6 + $0x12a4] ss:$16 sps:$4 sm:$0xff]   ;;  %v3073_v60 = vld [vmem:[%s3358_s6 + $0x1360] ss:$16 sps:$4 sm:$0xff]  }
  0x34   : > { %1112 = vmatprep.subr.bf16.mxu0 %v2959_v33  ;;  %1194 = vmatprep.subr.bf16.mxu1 %v2961_v34  ;;  %v3042_v33 = vld [vmem:[%s3358_s6 + $0x12ac] ss:$16 sps:$4 sm:$0xff]   ;;  %v3037_v34 = vld [vmem:[%s3358_s6 + $0x12a0] ss:$16 sps:$4 sm:$0xff]   ;;  %v3052_v44 = vld [vmem:[%s3358_s6 + $0x12e8] ss:$16 sps:$4 sm:$0xff]  }
  0x35   : > { %v3064_v53 = vld [vmem:[%s3358_s6 + $0x1328] ss:$16 sps:$4 sm:$0xff]   ;;  %v3075_v58 = vld [vmem:[%s3358_s6 + $0x1364] ss:$16 sps:$4 sm:$0xff]  }
  0x37   : > { %1113 = vmatpush1.bf16.msra.mxu0 %v2963_v35  ;;  %1195 = vmatpush1.bf16.msra.mxu1 %v2964_v36  ;;  %v3040_v35 = vld [vmem:[%s3358_s6 + $0x12a8] ss:$16 sps:$4 sm:$0xff]   ;;  %v3045_v36 = vld [vmem:[%s3358_s6 + $0x12c4] ss:$16 sps:$4 sm:$0xff]  }
  0x38   : > { %1114 = vmatprep.subr.bf16.mxu0 %v2965_v40  ;;  %1196 = vmatprep.subr.bf16.mxu1 %v2967_v41  ;;  %v3051_v40 = vld [vmem:[%s3358_s6 + $0x12e4] ss:$16 sps:$4 sm:$0xff]   ;;  %v3054_v41 = vld [vmem:[%s3358_s6 + $0x12ec] ss:$16 sps:$4 sm:$0xff]  }
  0x3b   : > { %1115 = vmatpush1.bf16.msra.mxu0 %v2969_v42  ;;  %1197 = vmatpush1.bf16.msra.mxu1 %v2970_v45  ;;  %v3049_v42 = vld [vmem:[%s3358_s6 + $0x12e0] ss:$16 sps:$4 sm:$0xff]   ;;  %v3057_v45 = vld [vmem:[%s3358_s6 + $0x1304] ss:$16 sps:$4 sm:$0xff]  }
  0x3c   : > { %1116 = vmatprep.subr.bf16.mxu0 %v2971_v46  ;;  %1198 = vmatprep.subr.bf16.mxu1 %v2973_v47  ;;  %v3060_v46 = vld [vmem:[%s3358_s6 + $0x130c] ss:$16 sps:$4 sm:$0xff]   ;;  %v3055_v47 = vld [vmem:[%s3358_s6 + $0x1300] ss:$16 sps:$4 sm:$0xff]  }
  0x3f   : > { %1117 = vmatpush1.bf16.msra.mxu0 %v2975_v48  ;;  %1199 = vmatpush1.bf16.msra.mxu1 %v2976_v49  ;;  %v3058_v48 = vld [vmem:[%s3358_s6 + $0x1308] ss:$16 sps:$4 sm:$0xff]   ;;  %v3063_v49 = vld [vmem:[%s3358_s6 + $0x1324] ss:$16 sps:$4 sm:$0xff]  }
  0x40   : > { %1118 = vmatprep.subr.bf16.mxu0 %v2977_v51  ;;  %1200 = vmatprep.subr.bf16.mxu1 %v2979_v52  ;;  %v3066_v51 = vld [vmem:[%s3358_s6 + $0x132c] ss:$16 sps:$4 sm:$0xff]   ;;  %v3061_v52 = vld [vmem:[%s3358_s6 + $0x1320] ss:$16 sps:$4 sm:$0xff]  }
  0x43   : > { %1119 = vmatpush1.bf16.msra.mxu0 %v2981_v54  ;;  %1201 = vmatpush1.bf16.msra.mxu1 %v2982_v55  ;;  %v3069_v54 = vld [vmem:[%s3358_s6 + $0x1344] ss:$16 sps:$4 sm:$0xff]   ;;  %v3072_v55 = vld [vmem:[%s3358_s6 + $0x134c] ss:$16 sps:$4 sm:$0xff]  }
  0x44   : > { %1120 = vmatprep.subr.bf16.mxu0 %v2983_v56  ;;  %1202 = vmatprep.subr.bf16.mxu1 %v2985_v57  ;;  %v3067_v56 = vld [vmem:[%s3358_s6 + $0x1340] ss:$16 sps:$4 sm:$0xff]   ;;  %v3070_v57 = vld [vmem:[%s3358_s6 + $0x1348] ss:$16 sps:$4 sm:$0xff]  }
  0x47   : > { %1121 = vmatpush1.bf16.msra.mxu0 %v2987_v59  ;;  %1203 = vmatpush1.bf16.msra.mxu1 %v2988_v61  ;;  %v3078_v59 = vld [vmem:[%s3358_s6 + $0x136c] ss:$16 sps:$4 sm:$0xff]   ;;  %v3076_v61 = vld [vmem:[%s3358_s6 + $0x1368] ss:$16 sps:$4 sm:$0xff]  }
  0x48   : > { %1122 = vmatprep.subr.bf16.mxu0 %v2989_v62  ;;  %1204 = vmatprep.subr.bf16.mxu1 %v2991_v63  ;;  %v3081_v62 = vld [vmem:[%s3358_s6 + $0x1384] ss:$16 sps:$4 sm:$0xff]   ;;  %v3084_v63 = vld [vmem:[%s3358_s6 + $0x138c] ss:$16 sps:$4 sm:$0xff]  }
  0x4b   : > { %1123 = vmatpush1.bf16.msra.mxu0 %v2993_v0  ;;  %1205 = vmatpush1.bf16.msra.mxu1 %v2994_v1  ;;  %v3079_v0 = vld [vmem:[%s3358_s6 + $0x1380] ss:$16 sps:$4 sm:$0xff]   ;;  %v3082_v1 = vld [vmem:[%s3358_s6 + $0x1388] ss:$16 sps:$4 sm:$0xff]  }
  0x4c   : > { %1124 = vmatprep.subr.bf16.mxu0 %v2995_v2  ;;  %1206 = vmatprep.subr.bf16.mxu1 %v2997_v3  ;;  %v3087_v2 = vld [vmem:[%s3358_s6 + $0x13a4] ss:$16 sps:$4 sm:$0xff]   ;;  %v3090_v3 = vld [vmem:[%s3358_s6 + $0x13ac] ss:$16 sps:$4 sm:$0xff]  }
  0x4f   : > { %1125 = vmatpush1.bf16.msra.mxu0 %v2999_v4  ;;  %1207 = vmatpush1.bf16.msra.mxu1 %v3000_v5  ;;  %v3085_v4 = vld [vmem:[%s3358_s6 + $0x13a0] ss:$16 sps:$4 sm:$0xff]   ;;  %v3088_v5 = vld [vmem:[%s3358_s6 + $0x13a8] ss:$16 sps:$4 sm:$0xff]  }
  0x50   : > { %1126 = vmatprep.subr.bf16.mxu0 %v3001_v6  ;;  %1208 = vmatprep.subr.bf16.mxu1 %v3003_v7  ;;  %v3093_v6 = vld [vmem:[%s3358_s6 + $0x13c4] ss:$16 sps:$4 sm:$0xff]   ;;  %v3096_v7 = vld [vmem:[%s3358_s6 + $0x13cc] ss:$16 sps:$4 sm:$0xff]  }
  0x53   : > { %1127 = vmatpush1.bf16.msra.mxu0 %v3005_v8  ;;  %1209 = vmatpush1.bf16.msra.mxu1 %v3006_v9  ;;  %v3091_v8 = vld [vmem:[%s3358_s6 + $0x13c0] ss:$16 sps:$4 sm:$0xff]   ;;  %v3094_v9 = vld [vmem:[%s3358_s6 + $0x13c8] ss:$16 sps:$4 sm:$0xff]  }
  0x54   : > { %1137 = vmatprep.subr.bf16.mxu0 %v3009_v10  ;;  %1219 = vmatprep.subr.bf16.mxu1 %v3012_v11  ;;  %v3099_v10 = vld [vmem:[%s3358_s6 + $0x13e4] ss:$16 sps:$4 sm:$0xff]   ;;  %v3102_v11 = vld [vmem:[%s3358_s6 + $0x13ec] ss:$16 sps:$4 sm:$0xff]  }
  0x56   : > { %1129 = vmatmul.mubr.bf16.vlgmr.msra.gmra.mrb[0].mxu0 %v3448_v13  ;;  %1211 = vmatmul.mubr.bf16.vlgmr.msra.gmra.mrb[0].mxu1 %v3448_v13 }
  0x57   : > { %1138 = vmatpush1.bf16.msra.mxu0 %v3007_v12  ;;  %1220 = vmatpush1.bf16.msra.mxu1 %v3010_v14  ;;  %v3097_v12 = vld [vmem:[%s3358_s6 + $0x13e0] ss:$16 sps:$4 sm:$0xff]   ;;  %v3100_v14 = vld [vmem:[%s3358_s6 + $0x13e8] ss:$16 sps:$4 sm:$0xff]  }
  0x58   : > { %1139 = vmatprep.subr.bf16.mxu0 %v3015_v15  ;;  %1221 = vmatprep.subr.bf16.mxu1 %v3018_v16  ;;  %v3105_v15 = vld [vmem:[%s3363_s9 + $0x1004] ss:$16 sps:$4 sm:$0xff]  }
  0x59   : > { %1169 = vmatprep.mubr.bf16.mxu0 %v451_v17  ;;  %1251 = vmatprep.mubr.bf16.mxu1 %v451_v17  ;;  %v3108_v16 = vld [vmem:[%s3363_s9 + $0x1204] ss:$16 sps:$4 sm:$0xff]   ;;  %v3103_v17 = vld [vmem:[%s3363_s9 + $0x1000] ss:$16 sps:$4 sm:$0xff]  }
  0x5b   : > { %1140 = vmatpush1.bf16.msra.mxu0 %v3013_v18  ;;  %1222 = vmatpush1.bf16.msra.mxu1 %v3016_v19  ;;  %v3106_v18 = vld [vmem:[%s3363_s9 + $0x1200] ss:$16 sps:$4 sm:$0xff]   ;;  %v450_v19 = vcombine.high %v3448_v13, %v3448_v13 }
  0x5c   : > { %1141 = vmatprep.subr.bf16.mxu0 %v3021_v20  ;;  %1223 = vmatprep.subr.bf16.mxu1 %v3024_v21  ;;  %v3111_v20 = vld [vmem:[%s3363_s9 + $0x1024] ss:$16 sps:$4 sm:$0xff]   ;;  %v3115_v13 = vld [vmem:[%s3363_s9 + $0x1040] ss:$16 sps:$4 sm:$0xff]  }
  0x5d   : > { %v3114_v21 = vld [vmem:[%s3363_s9 + $0x1224] ss:$16 sps:$4 sm:$0xff]  }
  0x5f   : > { %1142 = vmatpush1.bf16.msra.mxu0 %v3019_v22  ;;  %1224 = vmatpush1.bf16.msra.mxu1 %v3022_v23  ;;  %v3109_v22 = vld [vmem:[%s3363_s9 + $0x1020] ss:$16 sps:$4 sm:$0xff]  }
  0x60   : > { %1143 = vmatprep.subr.bf16.mxu0 %v3027_v24  ;;  %1225 = vmatprep.subr.bf16.mxu1 %v3030_v25  ;;  %v3112_v23 = vld [vmem:[%s3363_s9 + $0x1220] ss:$16 sps:$4 sm:$0xff]   ;;  %v3117_v24 = vld [vmem:[%s3363_s9 + $0x1044] ss:$16 sps:$4 sm:$0xff]  }
  0x61   : > { %v3120_v25 = vld [vmem:[%s3363_s9 + $0x1244] ss:$16 sps:$4 sm:$0xff]  }
  0x63   : > { %1144 = vmatpush1.bf16.msra.mxu0 %v3025_v26  ;;  %1226 = vmatpush1.bf16.msra.mxu1 %v3028_v27  ;;  %v3118_v26 = vld [vmem:[%s3363_s9 + $0x1240] ss:$16 sps:$4 sm:$0xff]   ;;  %v3123_v27 = vld [vmem:[%s3363_s9 + $0x1064] ss:$16 sps:$4 sm:$0xff]  }
  0x64   : > { %1145 = vmatprep.subr.bf16.mxu0 %v3033_v28  ;;  %1227 = vmatprep.subr.bf16.mxu1 %v3036_v29  ;;  %v3126_v28 = vld [vmem:[%s3363_s9 + $0x1264] ss:$16 sps:$4 sm:$0xff]   ;;  %v3121_v29 = vld [vmem:[%s3363_s9 + $0x1060] ss:$16 sps:$4 sm:$0xff]  }
  0x67   : > { %1146 = vmatpush1.bf16.msra.mxu0 %v3031_v30  ;;  %1228 = vmatpush1.bf16.msra.mxu1 %v3034_v31  ;;  %v3124_v30 = vld [vmem:[%s3363_s9 + $0x1260] ss:$16 sps:$4 sm:$0xff]   ;;  %v3129_v31 = vld [vmem:[%s3363_s9 + $0x1084] ss:$16 sps:$4 sm:$0xff]  }
  0x68   : > { %1147 = vmatprep.subr.bf16.mxu0 %v3039_v32  ;;  %1229 = vmatprep.subr.bf16.mxu1 %v3042_v33  ;;  %v3132_v32 = vld [vmem:[%s3363_s9 + $0x1284] ss:$16 sps:$4 sm:$0xff]   ;;  %v3127_v33 = vld [vmem:[%s3363_s9 + $0x1080] ss:$16 sps:$4 sm:$0xff]  }
  0x6b   : > { %1148 = vmatpush1.bf16.msra.mxu0 %v3037_v34  ;;  %1230 = vmatpush1.bf16.msra.mxu1 %v3040_v35  ;;  %v3130_v34 = vld [vmem:[%s3363_s9 + $0x1280] ss:$16 sps:$4 sm:$0xff]   ;;  %v3135_v35 = vld [vmem:[%s3363_s9 + $0x10a4] ss:$16 sps:$4 sm:$0xff]  }
  0x6c   : > { %1149 = vmatprep.subr.bf16.mxu0 %v3045_v36  ;;  %1231 = vmatprep.subr.bf16.mxu1 %v3048_v37  ;;  %v3138_v36 = vld [vmem:[%s3363_s9 + $0x12a4] ss:$16 sps:$4 sm:$0xff]   ;;  %v3133_v37 = vld [vmem:[%s3363_s9 + $0x10a0] ss:$16 sps:$4 sm:$0xff]  }
  0x6f   : > { %1150 = vmatpush1.bf16.msra.mxu0 %v3043_v38  ;;  %1232 = vmatpush1.bf16.msra.mxu1 %v3046_v39  ;;  %v3136_v38 = vld [vmem:[%s3363_s9 + $0x12a0] ss:$16 sps:$4 sm:$0xff]   ;;  %v3141_v39 = vld [vmem:[%s3363_s9 + $0x10c4] ss:$16 sps:$4 sm:$0xff]  }
  0x70   : > { %1151 = vmatprep.subr.bf16.mxu0 %v3051_v40  ;;  %1233 = vmatprep.subr.bf16.mxu1 %v3054_v41  ;;  %v3144_v40 = vld [vmem:[%s3363_s9 + $0x12c4] ss:$16 sps:$4 sm:$0xff]   ;;  %v3139_v41 = vld [vmem:[%s3363_s9 + $0x10c0] ss:$16 sps:$4 sm:$0xff]  }
  0x73   : > { %1152 = vmatpush1.bf16.msra.mxu0 %v3049_v42  ;;  %1234 = vmatpush1.bf16.msra.mxu1 %v3052_v44  ;;  %v3142_v42 = vld [vmem:[%s3363_s9 + $0x12c0] ss:$16 sps:$4 sm:$0xff]   ;;  %v3147_v44 = vld [vmem:[%s3363_s9 + $0x10e4] ss:$16 sps:$4 sm:$0xff]  }
  0x74   : > { %1153 = vmatprep.subr.bf16.mxu0 %v3057_v45  ;;  %1235 = vmatprep.subr.bf16.mxu1 %v3060_v46  ;;  %v3150_v45 = vld [vmem:[%s3363_s9 + $0x12e4] ss:$16 sps:$4 sm:$0xff]   ;;  %v3145_v46 = vld [vmem:[%s3363_s9 + $0x10e0] ss:$16 sps:$4 sm:$0xff]  }
  0x77   : > { %1154 = vmatpush1.bf16.msra.mxu0 %v3055_v47  ;;  %1236 = vmatpush1.bf16.msra.mxu1 %v3058_v48  ;;  %v3148_v47 = vld [vmem:[%s3363_s9 + $0x12e0] ss:$16 sps:$4 sm:$0xff]   ;;  %v3153_v48 = vld [vmem:[%s3363_s9 + $0x1104] ss:$16 sps:$4 sm:$0xff]  }
  0x78   : > { %1155 = vmatprep.subr.bf16.mxu0 %v3063_v49  ;;  %1237 = vmatprep.subr.bf16.mxu1 %v3066_v51  ;;  %v3156_v49 = vld [vmem:[%s3363_s9 + $0x1304] ss:$16 sps:$4 sm:$0xff]   ;;  %v3151_v51 = vld [vmem:[%s3363_s9 + $0x1100] ss:$16 sps:$4 sm:$0xff]  }
  0x7b   : > { %1156 = vmatpush1.bf16.msra.mxu0 %v3061_v52  ;;  %1238 = vmatpush1.bf16.msra.mxu1 %v3064_v53  ;;  %v3154_v52 = vld [vmem:[%s3363_s9 + $0x1300] ss:$16 sps:$4 sm:$0xff]   ;;  %v3159_v53 = vld [vmem:[%s3363_s9 + $0x1124] ss:$16 sps:$4 sm:$0xff]  }
  0x7c   : > { %1157 = vmatprep.subr.bf16.mxu0 %v3069_v54  ;;  %1239 = vmatprep.subr.bf16.mxu1 %v3072_v55  ;;  %v3162_v54 = vld [vmem:[%s3363_s9 + $0x1324] ss:$16 sps:$4 sm:$0xff]   ;;  %v3157_v55 = vld [vmem:[%s3363_s9 + $0x1120] ss:$16 sps:$4 sm:$0xff]  }
  0x7f   : > { %1158 = vmatpush1.bf16.msra.mxu0 %v3067_v56  ;;  %1240 = vmatpush1.bf16.msra.mxu1 %v3070_v57  ;;  %v3160_v56 = vld [vmem:[%s3363_s9 + $0x1320] ss:$16 sps:$4 sm:$0xff]   ;;  %v3165_v57 = vld [vmem:[%s3363_s9 + $0x1144] ss:$16 sps:$4 sm:$0xff]  }
  0x80   : > { %1159 = vmatprep.subr.bf16.mxu0 %v3075_v58  ;;  %1241 = vmatprep.subr.bf16.mxu1 %v3078_v59  ;;  %v3168_v58 = vld [vmem:[%s3363_s9 + $0x1344] ss:$16 sps:$4 sm:$0xff]   ;;  %v3163_v59 = vld [vmem:[%s3363_s9 + $0x1140] ss:$16 sps:$4 sm:$0xff]  }
  0x83   : > { %1160 = vmatpush1.bf16.msra.mxu0 %v3073_v60  ;;  %1242 = vmatpush1.bf16.msra.mxu1 %v3076_v61  ;;  %v3166_v60 = vld [vmem:[%s3363_s9 + $0x1340] ss:$16 sps:$4 sm:$0xff]   ;;  %v3171_v61 = vld [vmem:[%s3363_s9 + $0x1164] ss:$16 sps:$4 sm:$0xff]  }
  0x84   : > { %1161 = vmatprep.subr.bf16.mxu0 %v3081_v62  ;;  %1243 = vmatprep.subr.bf16.mxu1 %v3084_v63  ;;  %v3174_v62 = vld [vmem:[%s3363_s9 + $0x1364] ss:$16 sps:$4 sm:$0xff]   ;;  %v3169_v63 = vld [vmem:[%s3363_s9 + $0x1160] ss:$16 sps:$4 sm:$0xff]  }
  0x87   : > { %1162 = vmatpush1.bf16.msra.mxu0 %v3079_v0  ;;  %1244 = vmatpush1.bf16.msra.mxu1 %v3082_v1  ;;  %v3172_v0 = vld [vmem:[%s3363_s9 + $0x1360] ss:$16 sps:$4 sm:$0xff]   ;;  %v3177_v1 = vld [vmem:[%s3363_s9 + $0x1184] ss:$16 sps:$4 sm:$0xff]  }
  0x88   : > { %1163 = vmatprep.subr.bf16.mxu0 %v3087_v2  ;;  %1245 = vmatprep.subr.bf16.mxu1 %v3090_v3  ;;  %v3180_v2 = vld [vmem:[%s3363_s9 + $0x1384] ss:$16 sps:$4 sm:$0xff]   ;;  %v3175_v3 = vld [vmem:[%s3363_s9 + $0x1180] ss:$16 sps:$4 sm:$0xff]  }
  0x8b   : > { %1164 = vmatpush1.bf16.msra.mxu0 %v3085_v4  ;;  %1246 = vmatpush1.bf16.msra.mxu1 %v3088_v5  ;;  %v3178_v4 = vld [vmem:[%s3363_s9 + $0x1380] ss:$16 sps:$4 sm:$0xff]   ;;  %v3183_v5 = vld [vmem:[%s3363_s9 + $0x11a4] ss:$16 sps:$4 sm:$0xff]  }
  0x8c   : > { %1165 = vmatprep.subr.bf16.mxu0 %v3093_v6  ;;  %1247 = vmatprep.subr.bf16.mxu1 %v3096_v7  ;;  %v3186_v6 = vld [vmem:[%s3363_s9 + $0x13a4] ss:$16 sps:$4 sm:$0xff]   ;;  %v3181_v7 = vld [vmem:[%s3363_s9 + $0x11a0] ss:$16 sps:$4 sm:$0xff]  }
  0x8f   : > { %1166 = vmatpush1.bf16.msra.mxu0 %v3091_v8  ;;  %1248 = vmatpush1.bf16.msra.mxu1 %v3094_v9  ;;  %v3184_v8 = vld [vmem:[%s3363_s9 + $0x13a0] ss:$16 sps:$4 sm:$0xff]   ;;  %v3189_v9 = vld [vmem:[%s3363_s9 + $0x11c4] ss:$16 sps:$4 sm:$0xff]  }
  0x90   : > { %1167 = vmatprep.subr.bf16.mxu0 %v3099_v10  ;;  %1249 = vmatprep.subr.bf16.mxu1 %v3102_v11  ;;  %v3192_v10 = vld [vmem:[%s3363_s9 + $0x13c4] ss:$16 sps:$4 sm:$0xff]   ;;  %v3187_v11 = vld [vmem:[%s3363_s9 + $0x11c0] ss:$16 sps:$4 sm:$0xff]  }
  0x93   : > { %1168 = vmatpush1.bf16.msra.mxu0 %v3097_v12  ;;  %1250 = vmatpush1.bf16.msra.mxu1 %v3100_v14  ;;  %v3190_v12 = vld [vmem:[%s3363_s9 + $0x13c0] ss:$16 sps:$4 sm:$0xff]   ;;  %v3195_v14 = vld [vmem:[%s3363_s9 + $0x11e4] ss:$16 sps:$4 sm:$0xff]  }
  0x94   : > { %2058 = vmatprep.subr.bf16.mxu0 %v3105_v15  ;;  %2099 = vmatprep.subr.bf16.mxu1 %v3108_v16  ;;  %v3198_v15 = vld [vmem:[%s3363_s9 + $0x13e4] ss:$16 sps:$4 sm:$0xff]   ;;  %v3193_v16 = vld [vmem:[%s3363_s9 + $0x11e0] ss:$16 sps:$4 sm:$0xff]  }
  0x96   : > { %1170 = vmatmul.mubr.bf16.vlgmr.msra.gmra.mrb[0].mxu0 %v450_v19  ;;  %1252 = vmatmul.mubr.bf16.vlgmr.msra.gmra.mrb[0].mxu1 %v450_v19  ;;  %v3204_v19 = vld [vmem:[%s3363_s9 + $0x120c] ss:$16 sps:$4 sm:$0xff]  }
  0x97   : > { %2059 = vmatpush1.bf16.msra.mxu0 %v3103_v17  ;;  %2100 = vmatpush1.bf16.msra.mxu1 %v3106_v18  ;;  %v3196_v17 = vld [vmem:[%s3363_s9 + $0x13e0] ss:$16 sps:$4 sm:$0xff]   ;;  %v3201_v18 = vld [vmem:[%s3363_s9 + $0x100c] ss:$16 sps:$4 sm:$0xff]  }
  0x98   : > { %2060 = vmatprep.subr.bf16.mxu0 %v3111_v20  ;;  %2101 = vmatprep.subr.bf16.mxu1 %v3114_v21  ;;  %v409_v20 = vsub.s32 0, %v3410_v43  ;;  %v417_v21 = vsub.s32 2, %v3410_v43 }
  0x9b   : > { %2061 = vmatpush1.bf16.msra.mxu0 %v3109_v22  ;;  %2102 = vmatpush1.bf16.msra.mxu1 %v3112_v23  ;;  %v405_v22 = vld [vmem:[%s3348_s25] sm:$0xf]  ;;  %v413_v23 = vsub.s32 1, %v3410_v43 }
  0x9c   : > { %2062 = vmatprep.subr.bf16.mxu0 %v3117_v24  ;;  %2103 = vmatprep.subr.bf16.mxu1 %v3120_v25  ;;  %v421_v24 = vsub.s32 3, %v3410_v43  ;;  %v410_v25 = vrot.slane %v405_v22, %v409_v20 }
  0x9f   : > { %2063 = vmatpush1.bf16.msra.mxu0 %v3115_v13  ;;  %2104 = vmatpush1.bf16.msra.mxu1 %v3118_v26  ;;  %v418_v13 = vrot.slane %v405_v22, %v417_v21  ;;  %v414_v26 = vrot.slane %v405_v22, %v413_v23 }
  0xa0   : > { %2064 = vmatprep.subr.bf16.mxu0 %v3123_v27  ;;  %2105 = vmatprep.subr.bf16.mxu1 %v3126_v28  ;;  %v422_v27 = vrot.slane %v405_v22, %v421_v24  ;;  %v3250_v22 = vld [vmem:[%s3363_s9 + $0x1308] ss:$16 sps:$4 sm:$0xff]  }
  0xa3   : > { %2065 = vmatpush1.bf16.msra.mxu0 %v3121_v29  ;;  %2106 = vmatpush1.bf16.msra.mxu1 %v3124_v30 }
  0xa4   : > { %2066 = vmatprep.subr.bf16.mxu0 %v3129_v31  ;;  %2107 = vmatprep.subr.bf16.mxu1 %v3132_v32 }
  0xa7   : > { %2067 = vmatpush1.bf16.msra.mxu0 %v3127_v33  ;;  %2108 = vmatpush1.bf16.msra.mxu1 %v3130_v34 }
  0xa8   : > { %2068 = vmatprep.subr.bf16.mxu0 %v3135_v35  ;;  %2109 = vmatprep.subr.bf16.mxu1 %v3138_v36 }
  0xab   : > { %2069 = vmatpush1.bf16.msra.mxu0 %v3133_v37  ;;  %2110 = vmatpush1.bf16.msra.mxu1 %v3136_v38 }
  0xac   : > { %2070 = vmatprep.subr.bf16.mxu0 %v3141_v39  ;;  %2111 = vmatprep.subr.bf16.mxu1 %v3144_v40 }
  0xaf   : > { %2071 = vmatpush1.bf16.msra.mxu0 %v3139_v41  ;;  %2112 = vmatpush1.bf16.msra.mxu1 %v3142_v42 }
  0xb0   : > { %2072 = vmatprep.subr.bf16.mxu0 %v3147_v44  ;;  %2113 = vmatprep.subr.bf16.mxu1 %v3150_v45 }
  0xb3   : > { %2073 = vmatpush1.bf16.msra.mxu0 %v3145_v46  ;;  %2114 = vmatpush1.bf16.msra.mxu1 %v3148_v47  ;;  %v3199_v47 = vld [vmem:[%s3363_s9 + $0x1008] ss:$16 sps:$4 sm:$0xff]  }
  0xb4   : > { %2074 = vmatprep.subr.bf16.mxu0 %v3153_v48  ;;  %2115 = vmatprep.subr.bf16.mxu1 %v3156_v49  ;;  %v3202_v48 = vld [vmem:[%s3363_s9 + $0x1208] ss:$16 sps:$4 sm:$0xff]  }
  0xb7   : > { %2075 = vmatpush1.bf16.msra.mxu0 %v3151_v51  ;;  %2116 = vmatpush1.bf16.msra.mxu1 %v3154_v52  ;;  %v3207_v52 = vld [vmem:[%s3363_s9 + $0x102c] ss:$16 sps:$4 sm:$0xff]  }
  0xb8   : > { %2076 = vmatprep.subr.bf16.mxu0 %v3159_v53  ;;  %2117 = vmatprep.subr.bf16.mxu1 %v3162_v54  ;;  %v3210_v53 = vld [vmem:[%s3363_s9 + $0x122c] ss:$16 sps:$4 sm:$0xff]   ;;  %v3205_v54 = vld [vmem:[%s3363_s9 + $0x1028] ss:$16 sps:$4 sm:$0xff]  }
  0xbb   : > { %2077 = vmatpush1.bf16.msra.mxu0 %v3157_v55  ;;  %2118 = vmatpush1.bf16.msra.mxu1 %v3160_v56  ;;  %v3208_v55 = vld [vmem:[%s3363_s9 + $0x1228] ss:$16 sps:$4 sm:$0xff]   ;;  %v3213_v56 = vld [vmem:[%s3363_s9 + $0x104c] ss:$16 sps:$4 sm:$0xff]  }
  0xbc   : > { %2078 = vmatprep.subr.bf16.mxu0 %v3165_v57  ;;  %2119 = vmatprep.subr.bf16.mxu1 %v3168_v58  ;;  %v3216_v57 = vld [vmem:[%s3363_s9 + $0x124c] ss:$16 sps:$4 sm:$0xff]   ;;  %v3211_v58 = vld [vmem:[%s3363_s9 + $0x1048] ss:$16 sps:$4 sm:$0xff]  }
  0xbf   : > { %2079 = vmatpush1.bf16.msra.mxu0 %v3163_v59  ;;  %2120 = vmatpush1.bf16.msra.mxu1 %v3166_v60  ;;  %v3214_v59 = vld [vmem:[%s3363_s9 + $0x1248] ss:$16 sps:$4 sm:$0xff]   ;;  %v3219_v60 = vld [vmem:[%s3363_s9 + $0x106c] ss:$16 sps:$4 sm:$0xff]  }
  0xc0   : > { %2080 = vmatprep.subr.bf16.mxu0 %v3171_v61  ;;  %2121 = vmatprep.subr.bf16.mxu1 %v3174_v62  ;;  %v3222_v61 = vld [vmem:[%s3363_s9 + $0x126c] ss:$16 sps:$4 sm:$0xff]   ;;  %v3217_v62 = vld [vmem:[%s3363_s9 + $0x1068] ss:$16 sps:$4 sm:$0xff]  }
  0xc3   : > { %2081 = vmatpush1.bf16.msra.mxu0 %v3169_v63  ;;  %2122 = vmatpush1.bf16.msra.mxu1 %v3172_v0  ;;  %v3220_v63 = vld [vmem:[%s3363_s9 + $0x1268] ss:$16 sps:$4 sm:$0xff]   ;;  %v3225_v0 = vld [vmem:[%s3363_s9 + $0x108c] ss:$16 sps:$4 sm:$0xff]  }
  0xc4   : > { %2082 = vmatprep.subr.bf16.mxu0 %v3177_v1  ;;  %2123 = vmatprep.subr.bf16.mxu1 %v3180_v2  ;;  %v3228_v1 = vld [vmem:[%s3363_s9 + $0x128c] ss:$16 sps:$4 sm:$0xff]   ;;  %v3223_v2 = vld [vmem:[%s3363_s9 + $0x1088] ss:$16 sps:$4 sm:$0xff]  }
  0xc7   : > { %2083 = vmatpush1.bf16.msra.mxu0 %v3175_v3  ;;  %2124 = vmatpush1.bf16.msra.mxu1 %v3178_v4  ;;  %v3226_v3 = vld [vmem:[%s3363_s9 + $0x1288] ss:$16 sps:$4 sm:$0xff]   ;;  %v3231_v4 = vld [vmem:[%s3363_s9 + $0x10ac] ss:$16 sps:$4 sm:$0xff]  }
  0xc8   : > { %2084 = vmatprep.subr.bf16.mxu0 %v3183_v5  ;;  %2125 = vmatprep.subr.bf16.mxu1 %v3186_v6  ;;  %v3234_v5 = vld [vmem:[%s3363_s9 + $0x12ac] ss:$16 sps:$4 sm:$0xff]   ;;  %v3229_v6 = vld [vmem:[%s3363_s9 + $0x10a8] ss:$16 sps:$4 sm:$0xff]  }
  0xcb   : > { %2085 = vmatpush1.bf16.msra.mxu0 %v3181_v7  ;;  %2126 = vmatpush1.bf16.msra.mxu1 %v3184_v8  ;;  %v3232_v7 = vld [vmem:[%s3363_s9 + $0x12a8] ss:$16 sps:$4 sm:$0xff]   ;;  %v3237_v8 = vld [vmem:[%s3363_s9 + $0x10cc] ss:$16 sps:$4 sm:$0xff]  }
  0xcc   : > { %2086 = vmatprep.subr.bf16.mxu0 %v3189_v9  ;;  %2127 = vmatprep.subr.bf16.mxu1 %v3192_v10  ;;  %v3240_v9 = vld [vmem:[%s3363_s9 + $0x12cc] ss:$16 sps:$4 sm:$0xff]   ;;  %v3235_v10 = vld [vmem:[%s3363_s9 + $0x10c8] ss:$16 sps:$4 sm:$0xff]  }
  0xcf   : > { %2087 = vmatpush1.bf16.msra.mxu0 %v3187_v11  ;;  %2128 = vmatpush1.bf16.msra.mxu1 %v3190_v12  ;;  %v3238_v11 = vld [vmem:[%s3363_s9 + $0x12c8] ss:$16 sps:$4 sm:$0xff]   ;;  %v3243_v12 = vld [vmem:[%s3363_s9 + $0x10ec] ss:$16 sps:$4 sm:$0xff]  }
  0xd0   : > { %2088 = vmatprep.subr.bf16.mxu0 %v3195_v14  ;;  %2129 = vmatprep.subr.bf16.mxu1 %v3198_v15  ;;  %v3246_v14 = vld [vmem:[%s3363_s9 + $0x12ec] ss:$16 sps:$4 sm:$0xff]   ;;  %v3241_v15 = vld [vmem:[%s3363_s9 + $0x10e8] ss:$16 sps:$4 sm:$0xff]  }
  0xd3   : > { %2089 = vmatpush1.bf16.msra.mxu0 %v3193_v16  ;;  %2130 = vmatpush1.bf16.msra.mxu1 %v3196_v17  ;;  %v3244_v16 = vld [vmem:[%s3363_s9 + $0x12e8] ss:$16 sps:$4 sm:$0xff]   ;;  %v3249_v17 = vld [vmem:[%s3363_s9 + $0x110c] ss:$16 sps:$4 sm:$0xff]  }
  0xd4   : > { %2140 = vmatprep.subr.bf16.mxu0 %v3201_v18  ;;  %2181 = vmatprep.subr.bf16.mxu1 %v3204_v19  ;;  %v3252_v18 = vld [vmem:[%s3363_s9 + $0x130c] ss:$16 sps:$4 sm:$0xff]   ;;  %v3247_v19 = vld [vmem:[%s3363_s9 + $0x1108] ss:$16 sps:$4 sm:$0xff]  }
 0x169   : > { %v1171_v28 = vpop.f32.mrb[0].mxu0  ;;  %v1253_v29 = vpop.f32.mrb[0].mxu1 }
 0x16a   : > { %v2889_v30 = vadd.f32 %v1171_v28, %v410_v25  ;;  %v2891_v31 = vadd.f32 %v1253_v29, %v418_v13  ;;  %v1173_v32 = vpop.f32.mrb[1].mxu0  ;;  %v1255_v33 = vpop.f32.mrb[1].mxu1  ;;  %v3255_v25 = vld [vmem:[%s3363_s9 + $0x112c] ss:$16 sps:$4 sm:$0xff]  }
 0x16b   : > { %v2890_v34 = vadd.f32 %v1173_v32, %v414_v26  ;;  %v2892_v35 = vadd.f32 %v1255_v33, %v422_v27  ;;  %v1175_v36 = vpop.f32.mrb[2].mxu0  ;;  %v1257_v37 = vpop.f32.mrb[2].mxu1  ;;  %v3258_v13 = vld [vmem:[%s3363_s9 + $0x132c] ss:$16 sps:$4 sm:$0xff]   ;;  %v3253_v26 = vld [vmem:[%s3363_s9 + $0x1128] ss:$16 sps:$4 sm:$0xff]  }
 0x16c   : > { %v1260_v38 = vmax.f32 %v2889_v30, 0.0  ;;  %v1262_v39 = vmax.f32 %v2891_v31, 0.0  ;;  %v1176_v40 = vpop.f32.mrb[3].mxu0  ;;  %v1258_v41 = vpop.f32.mrb[3].mxu1  ;;  %v3256_v27 = vld [vmem:[%s3363_s9 + $0x1328] ss:$16 sps:$4 sm:$0xff]  }
 0x16d   : > { %v1261_v42 = vmax.f32 %v2890_v34, 0.0  ;;  %v1263_v44 = vmax.f32 %v2892_v35, 0.0  ;;  %v3261_v28 = vld [vmem:[%s3363_s9 + $0x114c] ss:$16 sps:$4 sm:$0xff]   ;;  %v3259_v30 = vld [vmem:[%s3363_s9 + $0x1148] ss:$16 sps:$4 sm:$0xff]  }
 0x16e   : > { %v3596_v49 = vpack.c.bf16 %v1260_v38, %v1260_v38  ;;  %v3598_v51 = vpack.c.bf16 %v1262_v39, %v1262_v39  ;;  %v3264_v29 = vld [vmem:[%s3363_s9 + $0x134c] ss:$16 sps:$4 sm:$0xff]   ;;  %v3262_v31 = vld [vmem:[%s3363_s9 + $0x1348] ss:$16 sps:$4 sm:$0xff]  }
 0x16f   : > { %v1265_v45 = vpack.c.bf16 %v1261_v42, %v1261_v42  ;;  %v1267_v46 = vpack.c.bf16 %v1263_v44, %v1263_v44  ;;  %v3267_v32 = vld [vmem:[%s3363_s9 + $0x116c] ss:$16 sps:$4 sm:$0xff]   ;;  %v3265_v34 = vld [vmem:[%s3363_s9 + $0x1168] ss:$16 sps:$4 sm:$0xff]  }
 0x170   : > { %v3270_v33 = vld [vmem:[%s3363_s9 + $0x136c] ss:$16 sps:$4 sm:$0xff]   ;;  %v3268_v35 = vld [vmem:[%s3363_s9 + $0x1368] ss:$16 sps:$4 sm:$0xff]  }
 0x171   : > { %2090 = vmatprep.mubr.bf16.mxu0 %v1265_v45  ;;  %2131 = vmatprep.mubr.bf16.mxu1 %v1267_v46  ;;  %v3273_v36 = vld [vmem:[%s3363_s9 + $0x118c] ss:$16 sps:$4 sm:$0xff]   ;;  %v3271_v38 = vld [vmem:[%s3363_s9 + $0x1188] ss:$16 sps:$4 sm:$0xff]  }
 0x172   : > { %2091 = vmatmul.mubr.bf16.vlgmr.msra.gmra.mrb[4].mxu0 %v3596_v49  ;;  %2132 = vmatmul.mubr.bf16.vlgmr.msra.gmra.mrb[4].mxu1 %v3598_v51  ;;  %v3276_v37 = vld [vmem:[%s3363_s9 + $0x138c] ss:$16 sps:$4 sm:$0xff]   ;;  %v3274_v39 = vld [vmem:[%s3363_s9 + $0x1388] ss:$16 sps:$4 sm:$0xff]  }
 0x173   : > { %2141 = vmatpush1.bf16.msra.mxu0 %v3199_v47  ;;  %2182 = vmatpush1.bf16.msra.mxu1 %v3202_v48  ;;  %v3279_v40 = vld [vmem:[%s3363_s9 + $0x11ac] ss:$16 sps:$4 sm:$0xff]   ;;  %v3277_v42 = vld [vmem:[%s3363_s9 + $0x11a8] ss:$16 sps:$4 sm:$0xff]  }
 0x174   : > { %2172 = vmatprep.mubr.bf16.mxu0 %v1265_v45  ;;  %2213 = vmatprep.mubr.bf16.mxu1 %v1267_v46  ;;  %v3282_v41 = vld [vmem:[%s3363_s9 + $0x13ac] ss:$16 sps:$4 sm:$0xff]   ;;  %v3280_v44 = vld [vmem:[%s3363_s9 + $0x13a8] ss:$16 sps:$4 sm:$0xff]  }
 0x175   : > { %2142 = vmatprep.subr.bf16.mxu0 %v3207_v52  ;;  %2183 = vmatprep.subr.bf16.mxu1 %v3210_v53  ;;  %v3285_v45 = vld [vmem:[%s3363_s9 + $0x11cc] ss:$16 sps:$4 sm:$0xff]   ;;  %v3283_v47 = vld [vmem:[%s3363_s9 + $0x11c8] ss:$16 sps:$4 sm:$0xff]  }
 0x176   : > { %v3288_v46 = vld [vmem:[%s3363_s9 + $0x13cc] ss:$16 sps:$4 sm:$0xff]   ;;  %v3286_v48 = vld [vmem:[%s3363_s9 + $0x13c8] ss:$16 sps:$4 sm:$0xff]  }
 0x177   : > { %2143 = vmatpush1.bf16.msra.mxu0 %v3205_v54  ;;  %2184 = vmatpush1.bf16.msra.mxu1 %v3208_v55  ;;  %v3291_v52 = vld [vmem:[%s3363_s9 + $0x11ec] ss:$16 sps:$4 sm:$0xff]   ;;  %v3289_v54 = vld [vmem:[%s3363_s9 + $0x11e8] ss:$16 sps:$4 sm:$0xff]  }
 0x178   : > { %2144 = vmatprep.subr.bf16.mxu0 %v3213_v56  ;;  %2185 = vmatprep.subr.bf16.mxu1 %v3216_v57  ;;  %v3294_v53 = vld [vmem:[%s3363_s9 + $0x13ec] ss:$16 sps:$4 sm:$0xff]   ;;  %v3292_v55 = vld [vmem:[%s3363_s9 + $0x13e8] ss:$16 sps:$4 sm:$0xff]   ;;  %v3306_v56 = vmov 1983009808  }
 0x179   : > { %v2226_v57 = vunpack.c.l.s4 %v3306_v56 }
 0x17b   : > { %2145 = vmatpush1.bf16.msra.mxu0 %v3211_v58  ;;  %2186 = vmatpush1.bf16.msra.mxu1 %v3214_v59  ;;  %v2227_v58 = vunpack.c.0.s8 %v2226_v57  ;;  %v1396_v59 = vld [vmem:[%s3353_s28] sm:$0xf] }
 0x17c   : > { %2146 = vmatprep.subr.bf16.mxu0 %v3219_v60  ;;  %2187 = vmatprep.subr.bf16.mxu1 %v3222_v61  ;;  %v3295_v60 = vld [vmem:[%s3690_s5] sm:$0xf] }
 0x17d   : > { %v2222_v61 = vunpack.c.l.bf16 %v3295_v60 }
 0x17f   : > { %2147 = vmatpush1.bf16.msra.mxu0 %v3217_v62  ;;  %2188 = vmatpush1.bf16.msra.mxu1 %v3220_v63  ;;  %v2230_v62 = vsub.s32 %v2227_v58, %v3410_v43  ;;  %v1401_v63 = vrot.slane %v1396_v59, %v409_v20 }
 0x180   : > { %2148 = vmatprep.subr.bf16.mxu0 %v3225_v0  ;;  %2189 = vmatprep.subr.bf16.mxu1 %v3228_v1 }
 0x181   : > { %v2231_v0 = vrot.slane %v2222_v61, %v2230_v62 }
 0x183   : > { %2149 = vmatpush1.bf16.msra.mxu0 %v3223_v2  ;;  %2190 = vmatpush1.bf16.msra.mxu1 %v3226_v3 }
 0x184   : > { %2150 = vmatprep.subr.bf16.mxu0 %v3231_v4  ;;  %2191 = vmatprep.subr.bf16.mxu1 %v3234_v5 }
 0x187   : > { %2151 = vmatpush1.bf16.msra.mxu0 %v3229_v6  ;;  %2192 = vmatpush1.bf16.msra.mxu1 %v3232_v7  ;;  %v2239_v6 = vcombine.high %v2231_v0, %v2231_v0 }
 0x188   : > { %2152 = vmatprep.subr.bf16.mxu0 %v3237_v8  ;;  %2193 = vmatprep.subr.bf16.mxu1 %v3240_v9 }
 0x18b   : > { %2153 = vmatpush1.bf16.msra.mxu0 %v3235_v10  ;;  %2194 = vmatpush1.bf16.msra.mxu1 %v3238_v11 }
 0x18c   : > { %2154 = vmatprep.subr.bf16.mxu0 %v3243_v12  ;;  %2195 = vmatprep.subr.bf16.mxu1 %v3246_v14 }
 0x18f   : > { %2155 = vmatpush1.bf16.msra.mxu0 %v3241_v15  ;;  %2196 = vmatpush1.bf16.msra.mxu1 %v3244_v16 }
 0x190   : > { %2156 = vmatprep.subr.bf16.mxu0 %v3249_v17  ;;  %2197 = vmatprep.subr.bf16.mxu1 %v3252_v18  ;;  %v2224_v18 = vcombine.high %v2222_v61, %v2222_v61 }
 0x193   : > { %2157 = vmatpush1.bf16.msra.mxu0 %v3247_v19  ;;  %2198 = vmatpush1.bf16.msra.mxu1 %v3250_v22  ;;  %v2238_v19 = vrot.slane %v2224_v18, %v2230_v62  ;;  %v1413_v22 = vrot.slane %v1396_v59, %v421_v24 }
 0x194   : > { %2158 = vmatprep.subr.bf16.mxu0 %v3255_v25  ;;  %2199 = vmatprep.subr.bf16.mxu1 %v3258_v13 }
 0x197   : > { %2159 = vmatpush1.bf16.msra.mxu0 %v3253_v26  ;;  %2200 = vmatpush1.bf16.msra.mxu1 %v3256_v27 }
 0x198   : > { %2160 = vmatprep.subr.bf16.mxu0 %v3261_v28  ;;  %2201 = vmatprep.subr.bf16.mxu1 %v3264_v29 }
 0x19b   : > { %2161 = vmatpush1.bf16.msra.mxu0 %v3259_v30  ;;  %2202 = vmatpush1.bf16.msra.mxu1 %v3262_v31  ;;  %v2240_v30 = vcombine.high %v2238_v19, %v2238_v19 }
 0x19c   : > { %2162 = vmatprep.subr.bf16.mxu0 %v3267_v32  ;;  %2203 = vmatprep.subr.bf16.mxu1 %v3270_v33 }
 0x19f   : > { %2163 = vmatpush1.bf16.msra.mxu0 %v3265_v34  ;;  %2204 = vmatpush1.bf16.msra.mxu1 %v3268_v35 }
 0x1a0   : > { %2164 = vmatprep.subr.bf16.mxu0 %v3273_v36  ;;  %2205 = vmatprep.subr.bf16.mxu1 %v3276_v37 }
 0x1a3   : > { %2165 = vmatpush1.bf16.msra.mxu0 %v3271_v38  ;;  %2206 = vmatpush1.bf16.msra.mxu1 %v3274_v39 }
 0x1a4   : > { %2166 = vmatprep.subr.bf16.mxu0 %v3279_v40  ;;  %2207 = vmatprep.subr.bf16.mxu1 %v3282_v41 }
 0x1a7   : > { %2167 = vmatpush1.bf16.msra.mxu0 %v3277_v42  ;;  %2208 = vmatpush1.bf16.msra.mxu1 %v3280_v44 }
 0x1a8   : > { %2168 = vmatprep.subr.bf16.mxu0 %v3285_v45  ;;  %2209 = vmatprep.subr.bf16.mxu1 %v3288_v46 }
 0x1ab   : > { %2169 = vmatpush1.bf16.msra.mxu0 %v3283_v47  ;;  %2210 = vmatpush1.bf16.msra.mxu1 %v3286_v48 }
 0x1ac   : > { %2170 = vmatprep.subr.bf16.mxu0 %v3291_v52  ;;  %2211 = vmatprep.subr.bf16.mxu1 %v3294_v53 }
 0x1af   : > { %2171 = vmatpush1.bf16.msra.mxu0 %v3289_v54  ;;  %2212 = vmatpush1.bf16.msra.mxu1 %v3292_v55 }
 0x1b2   : > { %2173 = vmatmul.mubr.bf16.vlgmr.msra.gmra.mrb[8].mxu0 %v3596_v49  ;;  %2214 = vmatmul.mubr.bf16.vlgmr.msra.gmra.mrb[8].mxu1 %v3598_v51  ;;  %v1405_v49 = vrot.slane %v1396_v59, %v413_v23  ;;  %v1409_v23 = vrot.slane %v1396_v59, %v417_v21 }
 0x245   : > { %v2092_v1 = vpop.f32.mrb[4].mxu0  ;;  %v2133_v51 = vpop.f32.mrb[4].mxu1 }
 0x246   : > { %v2093_v2 = vadd.f32 %v2092_v1, %v1401_v63  ;;  %v2094_v3 = vpop.f32.mrb[5].mxu0  ;;  %v2135_v4 = vpop.f32.mrb[5].mxu1 }
 0x247   : > { %v2095_v5 = vadd.f32 %v2094_v3, %v1405_v49  ;;  %v2096_v7 = vpop.f32.mrb[6].mxu0  ;;  %v2137_v8 = vpop.f32.mrb[6].mxu1 }
 0x248   : > { %v2134_v9 = vadd.f32 %v2133_v51, %v2093_v2  ;;  %v2097_v10 = vpop.f32.mrb[7].mxu0  ;;  %v2138_v11 = vpop.f32.mrb[7].mxu1 }
 0x249   : > { %v2136_v12 = vadd.f32 %v2135_v4, %v2095_v5 }
 0x24a   : > { %v2245_v14 = vadd.f32 %v2231_v0, %v2134_v9 }
 0x24b   : > { %v2246_v15 = vadd.f32 %v2239_v6, %v2136_v12 }
 0x24c   : > { %v2249_v20 = vmax.f32 %v2245_v14, 0.0 }
 0x24d   : > { %v2250_v16 = vmax.f32 %v2246_v15, 0.0 }
 0x24f   : > { %v2884_v17 = vpack.c.bf16 %v2250_v16, %v2249_v20 }
 0x251   : > { %v2269_v43 = vrot.slane %v2884_v17, %v3418_v50 }
 0x285   : > { %v2174_v25 = vpop.f32.mrb[8].mxu0  ;;  %v2215_v13 = vpop.f32.mrb[8].mxu1 }
 0x286   : > { %v2175_v26 = vadd.f32 %v2174_v25, %v1409_v23  ;;  %v2176_v27 = vpop.f32.mrb[9].mxu0  ;;  %v2217_v28 = vpop.f32.mrb[9].mxu1 }
 0x287   : > { %v2177_v29 = vadd.f32 %v2176_v27, %v1413_v22  ;;  %v2178_v31 = vpop.f32.mrb[10].mxu0  ;;  %v2219_v32 = vpop.f32.mrb[10].mxu1 }
 0x288   : > { %v2216_v33 = vadd.f32 %v2215_v13, %v2175_v26  ;;  %v2179_v34 = vpop.f32.mrb[11].mxu0  ;;  %v2220_v35 = vpop.f32.mrb[11].mxu1 }
 0x289   : > { %v2218_v36 = vadd.f32 %v2217_v28, %v2177_v29 }
 0x28a   : > { %v2247_v37 = vadd.f32 %v2238_v19, %v2216_v33 }
 0x28b   : > { %v2248_v38 = vadd.f32 %v2240_v30, %v2218_v36 }
 0x28c   : > { %v2251_v21 = vmax.f32 %v2247_v37, 0.0 }
 0x28d   : > { %v2252_v39 = vmax.f32 %v2248_v38, 0.0 }
 0x28f   : > { %v2885_v40 = vpack.c.bf16 %v2252_v39, %v2251_v21 }
 0x291   : > { %v2276_v24 = vrot.slane %v2885_v40, %v3418_v50 }
 0x293   : > { %v2277_v41 = vcombine.low %v2269_v43, %v2276_v24 }
 0x295   : > { %2886 = vst.sshfl [vmem:[%s3690_s5] sm:$0x55 pattern:$0x73625140] %v2277_v41 }
 0x296 PF: > { %s15_s18 = sadd.s32 1, %s3303_s18  }
 0x297   : > { %p12_p5 = scmp.ge.s32.totalorder %s15_s18, 4  }
 0x299   :  { %14 = sbr.rel (!%p12_p5) target bundleno = 1 (0x1), region = 79 }

</bundles_post_ra>
